<compile_context>
chip_gen: v5e
topology: v5e:2x2
jax: 0.10.0
libtpu: 0.0.40
codegen_flags: <defaults>
</compile_context>

<pallas_src>
import numpy as np
import jax
import jax.numpy as jnp
from jax import lax
from jax.experimental import pallas as pl
from jax.experimental.pallas import tpu as pltpu


# ----------------------------- model geometry ------------------------------

NB_FILTER = (4, 8, 16, 32, 64)
IN_CHANNELS = 3
NUM_CLASSES = 1
H0 = W0 = 16
N_LEVELS = 5


def _round_up(v, m):
    return (v + m - 1) // m * m


LEVEL_HW = [(H0 >> l, W0 >> l) for l in range(N_LEVELS)]        # (16,16) .. (1,1)
LEVEL_P = [(h + 2) * (w + 2) for (h, w) in LEVEL_HW]            # real padded columns
LEVEL_Q = [_round_up(p, 128) for p in LEVEL_P]                  # lane-aligned columns


# -------------------------- host-side constant builders ---------------------

def _interior_cols(h, w):
    """Padded-grid column index of every real pixel, (h, w) row-major."""
    hh, ww = np.meshgrid(np.arange(h), np.arange(w), indexing="ij")
    return ((hh + 1) * (w + 2) + (ww + 1)).reshape(-1)


def _interp_matrix(n_in, n_out):
    """1-D bilinear interpolation matrix, align_corners=True (PyTorch)."""
    m = np.zeros((n_out, n_in), np.float32)
    if n_in == 1:
        m[:, 0] = 1.0
        return m
    scale = (n_in - 1) / (n_out - 1)
    for i in range(n_out):
        src = i * scale
        i0 = min(int(np.floor(src)), n_in - 1)
        i1 = min(i0 + 1, n_in - 1)
        frac = src - i0
        m[i, i0] += 1.0 - frac
        m[i, i1] += frac
    return m


def build_constants():
    """Interior masks + maxpool-selection + bilinear-upsample matrices."""
    consts = []
    for l in range(N_LEVELS):                                    # interior masks
        h, w = LEVEL_HW[l]
        m = np.zeros((1, LEVEL_Q[l]), np.float32)
        m[0, _interior_cols(h, w)] = 1.0
        consts.append(m)
    for l in range(N_LEVELS - 1):                                # maxpool select l -> l+1
        h, w = LEVEL_HW[l]
        hc, wc = LEVEL_HW[l + 1]
        s = np.zeros((LEVEL_Q[l], LEVEL_Q[l + 1]), np.float32)
        anchors = _interior_cols(h, w).reshape(h, w)[0::2, 0::2].reshape(-1)
        s[anchors, _interior_cols(hc, wc)] = 1.0
        consts.append(s)
    for l in (4, 3, 2, 1):                                       # bilinear up l -> l-1
        hc, wc = LEVEL_HW[l]
        k = np.kron(_interp_matrix(hc, 2 * hc), _interp_matrix(wc, 2 * wc))
        u = np.zeros((LEVEL_Q[l], LEVEL_Q[l - 1]), np.float32)
        u[np.ix_(_interior_cols(hc, wc), _interior_cols(2 * hc, 2 * wc))] = k.T
        consts.append(u)
    return [jnp.asarray(c) for c in consts]


# ------------------------------ Pallas kernel -------------------------------

def _shift_cols(y, off):
    """z[:, p] = y[:, p + off], zero filled outside the slab (static offset)."""
    if off == 0:
        return y
    c, q = y.shape
    if off > 0:
        return jnp.concatenate([y[:, off:], jnp.zeros((c, off), y.dtype)], axis=1)
    k = -off
    return jnp.concatenate([jnp.zeros((c, k), y.dtype), y[:, : q - k]], axis=1)


def _conv3x3_relu(inputs, b_ref, mask_ref, level):
    """RepVGG deploy block: ReLU(conv3x3(pad=1) + bias), border re-zeroed.

    inputs: list of (activation (Cin_i, Q), weight ref (9, Cout, Cin_i)); the
    list form implements the decoder channel-concat as split-K accumulation.
    """
    h, w = LEVEL_HW[level]
    wp = w + 2
    cout = b_ref.shape[0]
    acc = jnp.zeros((cout, LEVEL_Q[level]), jnp.float32)
    for x_val, w_ref in inputs:
        for kh in range(3):
            if h == 1 and kh != 1:          # 1x1 spatial: only centre tap hits data
                continue
            for kw in range(3):
                if w == 1 and kw != 1:
                    continue
                tap = jnp.dot(w_ref[kh * 3 + kw], x_val,
                              preferred_element_type=jnp.float32)
                acc = acc + _shift_cols(tap, (kh - 1) * wp + (kw - 1))
    out = jnp.maximum(acc + b_ref[...], 0.0)
    return out * mask_ref[...]              # keep the zero padding ring exact


def _maxpool2x2(x_val, sel_ref, level):
    """2x2/2 max pool: two shifted VPU maxima + one 0/1 selection matmul."""
    wp = LEVEL_HW[level][1] + 2
    m = jnp.maximum(x_val, _shift_cols(x_val, 1))
    m = jnp.maximum(m, _shift_cols(m, wp))
    return jnp.dot(m, sel_ref[...], preferred_element_type=jnp.float32)


def _upsample2x(x_val, up_ref):
    """Bilinear x2 (align_corners=True) as a single interpolation matmul."""
    return jnp.dot(x_val, up_ref[...], preferred_element_type=jnp.float32)


def _unet_kernel(*refs):
    x_ref, out_ref = refs[0], refs[-1]
    it = iter(refs[1:-1])
    enc = [(next(it), next(it)) for _ in range(9)]               # (w, b) x 9
    dec = [(next(it), next(it), next(it)) for _ in range(4)]     # (w_skip, w_up, b) x 4
    wf_ref, bf_ref = next(it), next(it)
    masks = [next(it) for _ in range(N_LEVELS)]
    pools = [next(it) for _ in range(N_LEVELS - 1)]
    ups = [next(it) for _ in range(4)]                           # 4->3, 3->2, 2->1, 1->0

    x = x_ref[...]                                               # (Cin, Q0)

    # ----- encoder -----
    x0_0 = _conv3x3_relu([(x, enc[0][0])], enc[0][1], masks[0], 0)
    t = _maxpool2x2(x0_0, pools[0], 0)
    t = _conv3x3_relu([(t, enc[1][0])], enc[1][1], masks[1], 1)
    x1_0 = _conv3x3_relu([(t, enc[2][0])], enc[2][1], masks[1], 1)
    t = _maxpool2x2(x1_0, pools[1], 1)
    t = _conv3x3_relu([(t, enc[3][0])], enc[3][1], masks[2], 2)
    x2_0 = _conv3x3_relu([(t, enc[4][0])], enc[4][1], masks[2], 2)
    t = _maxpool2x2(x2_0, pools[2], 2)
    t = _conv3x3_relu([(t, enc[5][0])], enc[5][1], masks[3], 3)
    x3_0 = _conv3x3_relu([(t, enc[6][0])], enc[6][1], masks[3], 3)
    t = _maxpool2x2(x3_0, pools[3], 3)
    t = _conv3x3_relu([(t, enc[7][0])], enc[7][1], masks[4], 4)
    x4_0 = _conv3x3_relu([(t, enc[8][0])], enc[8][1], masks[4], 4)

    # ----- decoder (channel concat expressed as split-K accumulation) -----
    ws, wu, b = dec[0]
    x3_1 = _conv3x3_relu([(x3_0, ws), (_upsample2x(x4_0, ups[0]), wu)], b, masks[3], 3)
    ws, wu, b = dec[1]
    x2_2 = _conv3x3_relu([(x2_0, ws), (_upsample2x(x3_1, ups[1]), wu)], b, masks[2], 2)
    ws, wu, b = dec[2]
    x1_3 = _conv3x3_relu([(x1_0, ws), (_upsample2x(x2_2, ups[2]), wu)], b, masks[1], 1)
    ws, wu, b = dec[3]
    x0_4 = _conv3x3_relu([(x0_0, ws), (_upsample2x(x1_3, ups[3]), wu)], b, masks[0], 0)

    # ----- final 1x1 conv (num_classes=1): scale + cross-sublane sum -----
    out = jnp.sum(wf_ref[...] * x0_4, axis=0, keepdims=True) + bf_ref[...]
    out_ref[...] = out


# --------------------------------- params -----------------------------------

def init_params(key):
    nb = NB_FILTER

    def conv_wb(k, cin, cout):
        kw, kb = jax.random.split(k)
        w = jax.random.normal(kw, (3, 3, cin, cout), jnp.float32) / np.sqrt(9 * cin)
        b = 0.01 * jax.random.normal(kb, (cout,), jnp.float32)
        return w, b

    def seq(cin, cout, n):
        return [(cin, cout)] + [(cout, cout)] * (n - 1)

    layer_defs = {
        "conv0_0": seq(IN_CHANNELS, nb[0], 1),
        "conv1_0": seq(nb[0], nb[1], 2),
        "conv2_0": seq(nb[1], nb[2], 2),
        "conv3_0": seq(nb[2], nb[3], 2),
        "conv4_0": seq(nb[3], nb[4], 2),
        "conv3_1": seq(nb[3] + nb[4], nb[3], 1),
        "conv2_2": seq(nb[2] + nb[3], nb[2], 1),
        "conv1_3": seq(nb[1] + nb[2], nb[1], 1),
        "conv0_4": seq(nb[0] + nb[1], nb[0], 1),
    }
    params = {}
    for name, chans in layer_defs.items():
        blocks = []
        for cin, cout in chans:
            key, sub = jax.random.split(key)
            blocks.append(conv_wb(sub, cin, cout))
        params[name] = blocks
    key, kw, kb = jax.random.split(key, 3)
    params["final"] = (
        jax.random.normal(kw, (nb[0], NUM_CLASSES), jnp.float32) / np.sqrt(nb[0]),
        0.01 * jax.random.normal(kb, (NUM_CLASSES,), jnp.float32),
    )
    return params


def _tap_major(w_hwio):
    """(3,3,Cin,Cout) HWIO -> (9, Cout, Cin), tap index = kh*3 + kw."""
    cout, cin = w_hwio.shape[3], w_hwio.shape[2]
    return jnp.transpose(w_hwio, (0, 1, 3, 2)).reshape(9, cout, cin)


def flatten_params(params):
    """Kernel-ready operand list (order must match _unet_kernel unpacking)."""
    flat = []
    for name in ("conv0_0", "conv1_0", "conv2_0", "conv3_0", "conv4_0"):
        for w, b in params[name]:
            flat += [_tap_major(w), b.reshape(-1, 1)]
    skip_ch = {"conv3_1": NB_FILTER[3], "conv2_2": NB_FILTER[2],
               "conv1_3": NB_FILTER[1], "conv0_4": NB_FILTER[0]}
    for name in ("conv3_1", "conv2_2", "conv1_3", "conv0_4"):
        w, b = params[name][0]
        cs = skip_ch[name]
        flat += [_tap_major(w[:, :, :cs, :]), _tap_major(w[:, :, cs:, :]),
                 b.reshape(-1, 1)]
    wf, bf = params["final"]
    flat += [wf.reshape(NB_FILTER[0], NUM_CLASSES), bf.reshape(1, 1)]
    return flat


# --------------------------------- wrapper ----------------------------------

def _const_spec(arr):
    zeros = (0,) * arr.ndim
    return pl.BlockSpec(arr.shape, lambda b, _z=zeros: _z)


def build_forward(params, batch):
    operands = flatten_params(params) + build_constants()
    q0, p0 = LEVEL_Q[0], LEVEL_P[0]

    in_specs = [pl.BlockSpec((None, IN_CHANNELS, q0), lambda b: (b, 0, 0))]
    in_specs += [_const_spec(a) for a in operands]

    call = pl.pallas_call(
        _unet_kernel,
        out_shape=jax.ShapeDtypeStruct((batch, NUM_CLASSES, q0), jnp.float32),
        grid=(batch,),
        in_specs=in_specs,
        out_specs=pl.BlockSpec((None, NUM_CLASSES, q0), lambda b: (b, 0, 0)),
        compiler_params=pltpu.CompilerParams(
            dimension_semantics=("parallel",)),   # v7x: one image per TensorCore
    )

    def forward(x_nchw):
        n = x_nchw.shape[0]
        # NCHW -> per-image zero-padded, flattened, lane-aligned column slabs.
        xp = jnp.zeros((n, IN_CHANNELS, H0 + 2, W0 + 2), jnp.float32)
        xp = xp.at[:, :, 1:H0 + 1, 1:W0 + 1].set(x_nchw.astype(jnp.float32))
        xcols = xp.reshape(n, IN_CHANNELS, p0)
        xcols = jnp.pad(xcols, ((0, 0), (0, 0), (0, q0 - p0)))
        out = call(xcols, *operands)                              # (n, classes, Q0)
        out = out[:, :, :p0].reshape(n, NUM_CLASSES, H0 + 2, W0 + 2)
        return out[:, :, 1:H0 + 1, 1:W0 + 1]

    return forward


# ---------------------- pure-JAX reference (correctness) --------------------

def _ref_block(x, w, b):
    w_oihw = jnp.transpose(w, (3, 2, 0, 1))
    y = lax.conv_general_dilated(x, w_oihw, (1, 1), ((1, 1), (1, 1)),
                                 precision=lax.Precision.HIGHEST)
    return jnp.maximum(y + b.reshape(1, -1, 1, 1), 0.0)


def _ref_up(x):
    _, _, h, w = x.shape
    r = jnp.asarray(_interp_matrix(h, 2 * h))
    s = jnp.asarray(_interp_matrix(w, 2 * w))
    return jnp.einsum("oi,pj,ncij->ncop", r, s, x,
                      precision=lax.Precision.HIGHEST)


def _ref_pool(x):
    n, c, h, w = x.shape
    return x.reshape(n, c, h // 2, 2, w // 2, 2).max(axis=(3, 5))


def reference_forward(params, x):
    def seq(name, t):
        for w, b in params[name]:
            t = _ref_block(t, w, b)
        return t

    x0_0 = seq("conv0_0", x)
    x1_0 = seq("conv1_0", _ref_pool(x0_0))
    x2_0 = seq("conv2_0", _ref_pool(x1_0))
    x3_0 = seq("conv3_0", _ref_pool(x2_0))
    x4_0 = seq("conv4_0", _ref_pool(x3_0))
    x3_1 = seq("conv3_1", jnp.concatenate([x3_0, _ref_up(x4_0)], axis=1))
    x2_2 = seq("conv2_2", jnp.concatenate([x2_0, _ref_up(x3_1)], axis=1))
    x1_3 = seq("conv1_3", jnp.concatenate([x1_0, _ref_up(x2_2)], axis=1))
    x0_4 = seq("conv0_4", jnp.concatenate([x0_0, _ref_up(x1_3)], axis=1))
    wf, bf = params["final"]
    return jnp.einsum("nchw,ck->nkhw", x0_4, wf,
                      precision=lax.Precision.HIGHEST) + bf.reshape(1, -1, 1, 1)


# ---------------------------------- main -------------------------------------

if __name__ == "__main__":
    key = jax.random.PRNGKey(0)
    key, pk, xk = jax.random.split(key, 3)
    params = init_params(pk)

    # NCHW input matching the PyTorch module (input_channels=3).
    x = jax.random.normal(xk, (2, IN_CHANNELS, H0, W0), jnp.float32)

    fwd = jax.jit(build_forward(params, batch=x.shape[0]))
    out = jax.block_until_ready(fwd(x))

    assert out.shape == (2, NUM_CLASSES, H0, W0), out.shape
    assert out.dtype == jnp.float32
    assert bool(jnp.all(jnp.isfinite(out)))

    ref = jax.block_until_ready(jax.jit(lambda t: reference_forward(params, t))(x))
    max_err = float(jnp.max(jnp.abs(out - ref)))
    assert max_err < 5e-2, max_err

    print("KERNEL_OK")
</pallas_src>

<mosaic_0001>
module attributes {stable_mosaic.version = 11 : i64} {
  func.func @_unet_kernel(%arg0: i32, %arg1: memref<1x3x384xf32, #tpu.memory_space<vmem>>, %arg2: memref<9x4x3xf32, #tpu.memory_space<vmem>>, %arg3: memref<4x1xf32, #tpu.memory_space<vmem>>, %arg4: memref<9x8x4xf32, #tpu.memory_space<vmem>>, %arg5: memref<8x1xf32, #tpu.memory_space<vmem>>, %arg6: memref<9x8x8xf32, #tpu.memory_space<vmem>>, %arg7: memref<8x1xf32, #tpu.memory_space<vmem>>, %arg8: memref<9x16x8xf32, #tpu.memory_space<vmem>>, %arg9: memref<16x1xf32, #tpu.memory_space<vmem>>, %arg10: memref<9x16x16xf32, #tpu.memory_space<vmem>>, %arg11: memref<16x1xf32, #tpu.memory_space<vmem>>, %arg12: memref<9x32x16xf32, #tpu.memory_space<vmem>>, %arg13: memref<32x1xf32, #tpu.memory_space<vmem>>, %arg14: memref<9x32x32xf32, #tpu.memory_space<vmem>>, %arg15: memref<32x1xf32, #tpu.memory_space<vmem>>, %arg16: memref<9x64x32xf32, #tpu.memory_space<vmem>>, %arg17: memref<64x1xf32, #tpu.memory_space<vmem>>, %arg18: memref<9x64x64xf32, #tpu.memory_space<vmem>>, %arg19: memref<64x1xf32, #tpu.memory_space<vmem>>, %arg20: memref<9x32x32xf32, #tpu.memory_space<vmem>>, %arg21: memref<9x32x64xf32, #tpu.memory_space<vmem>>, %arg22: memref<32x1xf32, #tpu.memory_space<vmem>>, %arg23: memref<9x16x16xf32, #tpu.memory_space<vmem>>, %arg24: memref<9x16x32xf32, #tpu.memory_space<vmem>>, %arg25: memref<16x1xf32, #tpu.memory_space<vmem>>, %arg26: memref<9x8x8xf32, #tpu.memory_space<vmem>>, %arg27: memref<9x8x16xf32, #tpu.memory_space<vmem>>, %arg28: memref<8x1xf32, #tpu.memory_space<vmem>>, %arg29: memref<9x4x4xf32, #tpu.memory_space<vmem>>, %arg30: memref<9x4x8xf32, #tpu.memory_space<vmem>>, %arg31: memref<4x1xf32, #tpu.memory_space<vmem>>, %arg32: memref<4x1xf32, #tpu.memory_space<vmem>>, %arg33: memref<1x1xf32, #tpu.memory_space<vmem>>, %arg34: memref<1x384xf32, #tpu.memory_space<vmem>>, %arg35: memref<1x128xf32, #tpu.memory_space<vmem>>, %arg36: memref<1x128xf32, #tpu.memory_space<vmem>>, %arg37: memref<1x128xf32, #tpu.memory_space<vmem>>, %arg38: memref<1x128xf32, #tpu.memory_space<vmem>>, %arg39: memref<384x128xf32, #tpu.memory_space<vmem>>, %arg40: memref<128x128xf32, #tpu.memory_space<vmem>>, %arg41: memref<128x128xf32, #tpu.memory_space<vmem>>, %arg42: memref<128x128xf32, #tpu.memory_space<vmem>>, %arg43: memref<128x128xf32, #tpu.memory_space<vmem>>, %arg44: memref<128x128xf32, #tpu.memory_space<vmem>>, %arg45: memref<128x128xf32, #tpu.memory_space<vmem>>, %arg46: memref<128x384xf32, #tpu.memory_space<vmem>>, %arg47: memref<1x1x384xf32, #tpu.memory_space<vmem>>) attributes {dimension_semantics = [#tpu.dimension_semantics<parallel>], iteration_bounds = array<i64: 2>, scalar_prefetch = 0 : i64, scratch_operands = 0 : i64, tpu.core_type = #tpu.core_type<tc>, window_params = [{transform_indices = @transform_0, window_bounds = array<i64: 1, 3, 384>}, {pipeline_mode = #tpu.pipeline_mode<synchronous>, transform_indices = @transform_1, window_bounds = array<i64: 9, 4, 3>}, {pipeline_mode = #tpu.pipeline_mode<synchronous>, transform_indices = @transform_2, window_bounds = array<i64: 4, 1>}, {pipeline_mode = #tpu.pipeline_mode<synchronous>, transform_indices = @transform_3, window_bounds = array<i64: 9, 8, 4>}, {pipeline_mode = #tpu.pipeline_mode<synchronous>, transform_indices = @transform_4, window_bounds = array<i64: 8, 1>}, {pipeline_mode = #tpu.pipeline_mode<synchronous>, transform_indices = @transform_5, window_bounds = array<i64: 9, 8, 8>}, {pipeline_mode = #tpu.pipeline_mode<synchronous>, transform_indices = @transform_6, window_bounds = array<i64: 8, 1>}, {pipeline_mode = #tpu.pipeline_mode<synchronous>, transform_indices = @transform_7, window_bounds = array<i64: 9, 16, 8>}, {pipeline_mode = #tpu.pipeline_mode<synchronous>, transform_indices = @transform_8, window_bounds = array<i64: 16, 1>}, {pipeline_mode = #tpu.pipeline_mode<synchronous>, transform_indices = @transform_9, window_bounds = array<i64: 9, 16, 16>}, {pipeline_mode = #tpu.pipeline_mode<synchronous>, transform_indices = @transform_10, window_bounds = array<i64: 16, 1>}, {pipeline_mode = #tpu.pipeline_mode<synchronous>, transform_indices = @transform_11, window_bounds = array<i64: 9, 32, 16>}, {pipeline_mode = #tpu.pipeline_mode<synchronous>, transform_indices = @transform_12, window_bounds = array<i64: 32, 1>}, {pipeline_mode = #tpu.pipeline_mode<synchronous>, transform_indices = @transform_13, window_bounds = array<i64: 9, 32, 32>}, {pipeline_mode = #tpu.pipeline_mode<synchronous>, transform_indices = @transform_14, window_bounds = array<i64: 32, 1>}, {pipeline_mode = #tpu.pipeline_mode<synchronous>, transform_indices = @transform_15, window_bounds = array<i64: 9, 64, 32>}, {pipeline_mode = #tpu.pipeline_mode<synchronous>, transform_indices = @transform_16, window_bounds = array<i64: 64, 1>}, {pipeline_mode = #tpu.pipeline_mode<synchronous>, transform_indices = @transform_17, window_bounds = array<i64: 9, 64, 64>}, {pipeline_mode = #tpu.pipeline_mode<synchronous>, transform_indices = @transform_18, window_bounds = array<i64: 64, 1>}, {pipeline_mode = #tpu.pipeline_mode<synchronous>, transform_indices = @transform_19, window_bounds = array<i64: 9, 32, 32>}, {pipeline_mode = #tpu.pipeline_mode<synchronous>, transform_indices = @transform_20, window_bounds = array<i64: 9, 32, 64>}, {pipeline_mode = #tpu.pipeline_mode<synchronous>, transform_indices = @transform_21, window_bounds = array<i64: 32, 1>}, {pipeline_mode = #tpu.pipeline_mode<synchronous>, transform_indices = @transform_22, window_bounds = array<i64: 9, 16, 16>}, {pipeline_mode = #tpu.pipeline_mode<synchronous>, transform_indices = @transform_23, window_bounds = array<i64: 9, 16, 32>}, {pipeline_mode = #tpu.pipeline_mode<synchronous>, transform_indices = @transform_24, window_bounds = array<i64: 16, 1>}, {pipeline_mode = #tpu.pipeline_mode<synchronous>, transform_indices = @transform_25, window_bounds = array<i64: 9, 8, 8>}, {pipeline_mode = #tpu.pipeline_mode<synchronous>, transform_indices = @transform_26, window_bounds = array<i64: 9, 8, 16>}, {pipeline_mode = #tpu.pipeline_mode<synchronous>, transform_indices = @transform_27, window_bounds = array<i64: 8, 1>}, {pipeline_mode = #tpu.pipeline_mode<synchronous>, transform_indices = @transform_28, window_bounds = array<i64: 9, 4, 4>}, {pipeline_mode = #tpu.pipeline_mode<synchronous>, transform_indices = @transform_29, window_bounds = array<i64: 9, 4, 8>}, {pipeline_mode = #tpu.pipeline_mode<synchronous>, transform_indices = @transform_30, window_bounds = array<i64: 4, 1>}, {pipeline_mode = #tpu.pipeline_mode<synchronous>, transform_indices = @transform_31, window_bounds = array<i64: 4, 1>}, {pipeline_mode = #tpu.pipeline_mode<synchronous>, transform_indices = @transform_32, window_bounds = array<i64: 1, 1>}, {pipeline_mode = #tpu.pipeline_mode<synchronous>, transform_indices = @transform_33, window_bounds = array<i64: 1, 384>}, {pipeline_mode = #tpu.pipeline_mode<synchronous>, transform_indices = @transform_34, window_bounds = array<i64: 1, 128>}, {pipeline_mode = #tpu.pipeline_mode<synchronous>, transform_indices = @transform_35, window_bounds = array<i64: 1, 128>}, {pipeline_mode = #tpu.pipeline_mode<synchronous>, transform_indices = @transform_36, window_bounds = array<i64: 1, 128>}, {pipeline_mode = #tpu.pipeline_mode<synchronous>, transform_indices = @transform_37, window_bounds = array<i64: 1, 128>}, {pipeline_mode = #tpu.pipeline_mode<synchronous>, transform_indices = @transform_38, window_bounds = array<i64: 384, 128>}, {pipeline_mode = #tpu.pipeline_mode<synchronous>, transform_indices = @transform_39, window_bounds = array<i64: 128, 128>}, {pipeline_mode = #tpu.pipeline_mode<synchronous>, transform_indices = @transform_40, window_bounds = array<i64: 128, 128>}, {pipeline_mode = #tpu.pipeline_mode<synchronous>, transform_indices = @transform_41, window_bounds = array<i64: 128, 128>}, {pipeline_mode = #tpu.pipeline_mode<synchronous>, transform_indices = @transform_42, window_bounds = array<i64: 128, 128>}, {pipeline_mode = #tpu.pipeline_mode<synchronous>, transform_indices = @transform_43, window_bounds = array<i64: 128, 128>}, {pipeline_mode = #tpu.pipeline_mode<synchronous>, transform_indices = @transform_44, window_bounds = array<i64: 128, 128>}, {pipeline_mode = #tpu.pipeline_mode<synchronous>, transform_indices = @transform_45, window_bounds = array<i64: 128, 384>}, {transform_indices = @transform_46, window_bounds = array<i64: 1, 1, 384>}]} {
    %c0 = arith.constant 0 : index
    %c0_0 = arith.constant 0 : index
    %c0_1 = arith.constant 0 : index
    %0 = vector.load %arg1[%c0, %c0_0, %c0_1] : memref<1x3x384xf32, #tpu.memory_space<vmem>>, vector<1x3x384xf32>
    %1 = vector.shape_cast %0 : vector<1x3x384xf32> to vector<3x384xf32>
    %cst = arith.constant 0.000000e+00 : f32
    %2 = vector.broadcast %cst : f32 to vector<4x384xf32>
    %c0_2 = arith.constant 0 : index
    %c0_3 = arith.constant 0 : index
    %c0_4 = arith.constant 0 : index
    %3 = vector.load %arg2[%c0_2, %c0_3, %c0_4] : memref<9x4x3xf32, #tpu.memory_space<vmem>>, vector<1x4x3xf32>
    %4 = vector.shape_cast %3 : vector<1x4x3xf32> to vector<4x3xf32>
    %cst_5 = arith.constant dense<0.000000e+00> : vector<4x384xf32>
    %5 = tpu.matmul %4, %1, %cst_5 {dimension_numbers = #tpu.dot_dimension_numbers<[1], [0], [0], [1], [0, 0, 1, 1], [], []>} : vector<4x3xf32>, vector<3x384xf32>, vector<4x384xf32> -> vector<4x384xf32>
    %cst_6 = arith.constant 0.000000e+00 : f32
    %6 = vector.broadcast %cst_6 : f32 to vector<4x19xf32>
    %7 = vector.extract_strided_slice %5 {offsets = [0, 0], sizes = [4, 365], strides = [1, 1]} : vector<4x384xf32> to vector<4x365xf32>
    %8 = tpu.concatenate %6, %7 in 1 : vector<4x19xf32>, vector<4x365xf32> -> vector<4x384xf32>
    %9 = arith.addf %2, %8 : vector<4x384xf32>
    %c1 = arith.constant 1 : index
    %c0_7 = arith.constant 0 : index
    %c0_8 = arith.constant 0 : index
    %10 = vector.load %arg2[%c1, %c0_7, %c0_8] : memref<9x4x3xf32, #tpu.memory_space<vmem>>, vector<1x4x3xf32>
    %11 = vector.shape_cast %10 : vector<1x4x3xf32> to vector<4x3xf32>
    %cst_9 = arith.constant dense<0.000000e+00> : vector<4x384xf32>
    %12 = tpu.matmul %11, %1, %cst_9 {dimension_numbers = #tpu.dot_dimension_numbers<[1], [0], [0], [1], [0, 0, 1, 1], [], []>} : vector<4x3xf32>, vector<3x384xf32>, vector<4x384xf32> -> vector<4x384xf32>
    %cst_10 = arith.constant 0.000000e+00 : f32
    %13 = vector.broadcast %cst_10 : f32 to vector<4x18xf32>
    %14 = vector.extract_strided_slice %12 {offsets = [0, 0], sizes = [4, 366], strides = [1, 1]} : vector<4x384xf32> to vector<4x366xf32>
    %15 = tpu.concatenate %13, %14 in 1 : vector<4x18xf32>, vector<4x366xf32> -> vector<4x384xf32>
    %16 = arith.addf %9, %15 : vector<4x384xf32>
    %c2 = arith.constant 2 : index
    %c0_11 = arith.constant 0 : index
    %c0_12 = arith.constant 0 : index
    %17 = vector.load %arg2[%c2, %c0_11, %c0_12] : memref<9x4x3xf32, #tpu.memory_space<vmem>>, vector<1x4x3xf32>
    %18 = vector.shape_cast %17 : vector<1x4x3xf32> to vector<4x3xf32>
    %cst_13 = arith.constant dense<0.000000e+00> : vector<4x384xf32>
    %19 = tpu.matmul %18, %1, %cst_13 {dimension_numbers = #tpu.dot_dimension_numbers<[1], [0], [0], [1], [0, 0, 1, 1], [], []>} : vector<4x3xf32>, vector<3x384xf32>, vector<4x384xf32> -> vector<4x384xf32>
    %cst_14 = arith.constant 0.000000e+00 : f32
    %20 = vector.broadcast %cst_14 : f32 to vector<4x17xf32>
    %21 = vector.extract_strided_slice %19 {offsets = [0, 0], sizes = [4, 367], strides = [1, 1]} : vector<4x384xf32> to vector<4x367xf32>
    %22 = tpu.concatenate %20, %21 in 1 : vector<4x17xf32>, vector<4x367xf32> -> vector<4x384xf32>
    %23 = arith.addf %16, %22 : vector<4x384xf32>
    %c3 = arith.constant 3 : index
    %c0_15 = arith.constant 0 : index
    %c0_16 = arith.constant 0 : index
    %24 = vector.load %arg2[%c3, %c0_15, %c0_16] : memref<9x4x3xf32, #tpu.memory_space<vmem>>, vector<1x4x3xf32>
    %25 = vector.shape_cast %24 : vector<1x4x3xf32> to vector<4x3xf32>
    %cst_17 = arith.constant dense<0.000000e+00> : vector<4x384xf32>
    %26 = tpu.matmul %25, %1, %cst_17 {dimension_numbers = #tpu.dot_dimension_numbers<[1], [0], [0], [1], [0, 0, 1, 1], [], []>} : vector<4x3xf32>, vector<3x384xf32>, vector<4x384xf32> -> vector<4x384xf32>
    %cst_18 = arith.constant 0.000000e+00 : f32
    %27 = vector.broadcast %cst_18 : f32 to vector<4x1xf32>
    %28 = vector.extract_strided_slice %26 {offsets = [0, 0], sizes = [4, 383], strides = [1, 1]} : vector<4x384xf32> to vector<4x383xf32>
    %29 = tpu.concatenate %27, %28 in 1 : vector<4x1xf32>, vector<4x383xf32> -> vector<4x384xf32>
    %30 = arith.addf %23, %29 : vector<4x384xf32>
    %c4 = arith.constant 4 : index
    %c0_19 = arith.constant 0 : index
    %c0_20 = arith.constant 0 : index
    %31 = vector.load %arg2[%c4, %c0_19, %c0_20] : memref<9x4x3xf32, #tpu.memory_space<vmem>>, vector<1x4x3xf32>
    %32 = vector.shape_cast %31 : vector<1x4x3xf32> to vector<4x3xf32>
    %cst_21 = arith.constant dense<0.000000e+00> : vector<4x384xf32>
    %33 = tpu.matmul %32, %1, %cst_21 {dimension_numbers = #tpu.dot_dimension_numbers<[1], [0], [0], [1], [0, 0, 1, 1], [], []>} : vector<4x3xf32>, vector<3x384xf32>, vector<4x384xf32> -> vector<4x384xf32>
    %34 = arith.addf %30, %33 : vector<4x384xf32>
    %c5 = arith.constant 5 : index
    %c0_22 = arith.constant 0 : index
    %c0_23 = arith.constant 0 : index
    %35 = vector.load %arg2[%c5, %c0_22, %c0_23] : memref<9x4x3xf32, #tpu.memory_space<vmem>>, vector<1x4x3xf32>
    %36 = vector.shape_cast %35 : vector<1x4x3xf32> to vector<4x3xf32>
    %cst_24 = arith.constant dense<0.000000e+00> : vector<4x384xf32>
    %37 = tpu.matmul %36, %1, %cst_24 {dimension_numbers = #tpu.dot_dimension_numbers<[1], [0], [0], [1], [0, 0, 1, 1], [], []>} : vector<4x3xf32>, vector<3x384xf32>, vector<4x384xf32> -> vector<4x384xf32>
    %38 = vector.extract_strided_slice %37 {offsets = [0, 1], sizes = [4, 383], strides = [1, 1]} : vector<4x384xf32> to vector<4x383xf32>
    %cst_25 = arith.constant 0.000000e+00 : f32
    %39 = vector.broadcast %cst_25 : f32 to vector<4x1xf32>
    %40 = tpu.concatenate %38, %39 in 1 : vector<4x383xf32>, vector<4x1xf32> -> vector<4x384xf32>
    %41 = arith.addf %34, %40 : vector<4x384xf32>
    %c6 = arith.constant 6 : index
    %c0_26 = arith.constant 0 : index
    %c0_27 = arith.constant 0 : index
    %42 = vector.load %arg2[%c6, %c0_26, %c0_27] : memref<9x4x3xf32, #tpu.memory_space<vmem>>, vector<1x4x3xf32>
    %43 = vector.shape_cast %42 : vector<1x4x3xf32> to vector<4x3xf32>
    %cst_28 = arith.constant dense<0.000000e+00> : vector<4x384xf32>
    %44 = tpu.matmul %43, %1, %cst_28 {dimension_numbers = #tpu.dot_dimension_numbers<[1], [0], [0], [1], [0, 0, 1, 1], [], []>} : vector<4x3xf32>, vector<3x384xf32>, vector<4x384xf32> -> vector<4x384xf32>
    %45 = vector.extract_strided_slice %44 {offsets = [0, 17], sizes = [4, 367], strides = [1, 1]} : vector<4x384xf32> to vector<4x367xf32>
    %cst_29 = arith.constant 0.000000e+00 : f32
    %46 = vector.broadcast %cst_29 : f32 to vector<4x17xf32>
    %47 = tpu.concatenate %45, %46 in 1 : vector<4x367xf32>, vector<4x17xf32> -> vector<4x384xf32>
    %48 = arith.addf %41, %47 : vector<4x384xf32>
    %c7 = arith.constant 7 : index
    %c0_30 = arith.constant 0 : index
    %c0_31 = arith.constant 0 : index
    %49 = vector.load %arg2[%c7, %c0_30, %c0_31] : memref<9x4x3xf32, #tpu.memory_space<vmem>>, vector<1x4x3xf32>
    %50 = vector.shape_cast %49 : vector<1x4x3xf32> to vector<4x3xf32>
    %cst_32 = arith.constant dense<0.000000e+00> : vector<4x384xf32>
    %51 = tpu.matmul %50, %1, %cst_32 {dimension_numbers = #tpu.dot_dimension_numbers<[1], [0], [0], [1], [0, 0, 1, 1], [], []>} : vector<4x3xf32>, vector<3x384xf32>, vector<4x384xf32> -> vector<4x384xf32>
    %52 = vector.extract_strided_slice %51 {offsets = [0, 18], sizes = [4, 366], strides = [1, 1]} : vector<4x384xf32> to vector<4x366xf32>
    %cst_33 = arith.constant 0.000000e+00 : f32
    %53 = vector.broadcast %cst_33 : f32 to vector<4x18xf32>
    %54 = tpu.concatenate %52, %53 in 1 : vector<4x366xf32>, vector<4x18xf32> -> vector<4x384xf32>
    %55 = arith.addf %48, %54 : vector<4x384xf32>
    %c8 = arith.constant 8 : index
    %c0_34 = arith.constant 0 : index
    %c0_35 = arith.constant 0 : index
    %56 = vector.load %arg2[%c8, %c0_34, %c0_35] : memref<9x4x3xf32, #tpu.memory_space<vmem>>, vector<1x4x3xf32>
    %57 = vector.shape_cast %56 : vector<1x4x3xf32> to vector<4x3xf32>
    %cst_36 = arith.constant dense<0.000000e+00> : vector<4x384xf32>
    %58 = tpu.matmul %57, %1, %cst_36 {dimension_numbers = #tpu.dot_dimension_numbers<[1], [0], [0], [1], [0, 0, 1, 1], [], []>} : vector<4x3xf32>, vector<3x384xf32>, vector<4x384xf32> -> vector<4x384xf32>
    %59 = vector.extract_strided_slice %58 {offsets = [0, 19], sizes = [4, 365], strides = [1, 1]} : vector<4x384xf32> to vector<4x365xf32>
    %cst_37 = arith.constant 0.000000e+00 : f32
    %60 = vector.broadcast %cst_37 : f32 to vector<4x19xf32>
    %61 = tpu.concatenate %59, %60 in 1 : vector<4x365xf32>, vector<4x19xf32> -> vector<4x384xf32>
    %62 = arith.addf %55, %61 : vector<4x384xf32>
    %c0_38 = arith.constant 0 : index
    %c0_39 = arith.constant 0 : index
    %63 = vector.load %arg3[%c0_38, %c0_39] : memref<4x1xf32, #tpu.memory_space<vmem>>, vector<4x1xf32>
    %64 = vector.broadcast %63 : vector<4x1xf32> to vector<4x384xf32>
    %65 = arith.addf %62, %64 : vector<4x384xf32>
    %cst_40 = arith.constant 0.000000e+00 : f32
    %66 = vector.broadcast %cst_40 : f32 to vector<4x384xf32>
    %67 = arith.maximumf %65, %66 : vector<4x384xf32>
    %c0_41 = arith.constant 0 : index
    %c0_42 = arith.constant 0 : index
    %68 = vector.load %arg34[%c0_41, %c0_42] : memref<1x384xf32, #tpu.memory_space<vmem>>, vector<1x384xf32>
    %69 = vector.broadcast %68 : vector<1x384xf32> to vector<4x384xf32>
    %70 = arith.mulf %67, %69 : vector<4x384xf32>
    %71 = vector.extract_strided_slice %70 {offsets = [0, 1], sizes = [4, 383], strides = [1, 1]} : vector<4x384xf32> to vector<4x383xf32>
    %cst_43 = arith.constant 0.000000e+00 : f32
    %72 = vector.broadcast %cst_43 : f32 to vector<4x1xf32>
    %73 = tpu.concatenate %71, %72 in 1 : vector<4x383xf32>, vector<4x1xf32> -> vector<4x384xf32>
    %74 = arith.maximumf %70, %73 : vector<4x384xf32>
    %75 = vector.extract_strided_slice %74 {offsets = [0, 18], sizes = [4, 366], strides = [1, 1]} : vector<4x384xf32> to vector<4x366xf32>
    %cst_44 = arith.constant 0.000000e+00 : f32
    %76 = vector.broadcast %cst_44 : f32 to vector<4x18xf32>
    %77 = tpu.concatenate %75, %76 in 1 : vector<4x366xf32>, vector<4x18xf32> -> vector<4x384xf32>
    %78 = arith.maximumf %74, %77 : vector<4x384xf32>
    %c0_45 = arith.constant 0 : index
    %c0_46 = arith.constant 0 : index
    %79 = vector.load %arg39[%c0_45, %c0_46] : memref<384x128xf32, #tpu.memory_space<vmem>>, vector<384x128xf32>
    %cst_47 = arith.constant dense<0.000000e+00> : vector<4x128xf32>
    %80 = tpu.matmul %78, %79, %cst_47 {dimension_numbers = #tpu.dot_dimension_numbers<[1], [0], [0], [1], [0, 0, 1, 1], [], []>} : vector<4x384xf32>, vector<384x128xf32>, vector<4x128xf32> -> vector<4x128xf32>
    %cst_48 = arith.constant 0.000000e+00 : f32
    %81 = vector.broadcast %cst_48 : f32 to vector<8x128xf32>
    %c0_49 = arith.constant 0 : index
    %c0_50 = arith.constant 0 : index
    %c0_51 = arith.constant 0 : index
    %82 = vector.load %arg4[%c0_49, %c0_50, %c0_51] : memref<9x8x4xf32, #tpu.memory_space<vmem>>, vector<1x8x4xf32>
    %83 = vector.shape_cast %82 : vector<1x8x4xf32> to vector<8x4xf32>
    %cst_52 = arith.constant dense<0.000000e+00> : vector<8x128xf32>
    %84 = tpu.matmul %83, %80, %cst_52 {dimension_numbers = #tpu.dot_dimension_numbers<[1], [0], [0], [1], [0, 0, 1, 1], [], []>} : vector<8x4xf32>, vector<4x128xf32>, vector<8x128xf32> -> vector<8x128xf32>
    %cst_53 = arith.constant 0.000000e+00 : f32
    %85 = vector.broadcast %cst_53 : f32 to vector<8x11xf32>
    %86 = vector.extract_strided_slice %84 {offsets = [0, 0], sizes = [8, 117], strides = [1, 1]} : vector<8x128xf32> to vector<8x117xf32>
    %87 = tpu.concatenate %85, %86 in 1 : vector<8x11xf32>, vector<8x117xf32> -> vector<8x128xf32>
    %88 = arith.addf %81, %87 : vector<8x128xf32>
    %c1_54 = arith.constant 1 : index
    %c0_55 = arith.constant 0 : index
    %c0_56 = arith.constant 0 : index
    %89 = vector.load %arg4[%c1_54, %c0_55, %c0_56] : memref<9x8x4xf32, #tpu.memory_space<vmem>>, vector<1x8x4xf32>
    %90 = vector.shape_cast %89 : vector<1x8x4xf32> to vector<8x4xf32>
    %cst_57 = arith.constant dense<0.000000e+00> : vector<8x128xf32>
    %91 = tpu.matmul %90, %80, %cst_57 {dimension_numbers = #tpu.dot_dimension_numbers<[1], [0], [0], [1], [0, 0, 1, 1], [], []>} : vector<8x4xf32>, vector<4x128xf32>, vector<8x128xf32> -> vector<8x128xf32>
    %cst_58 = arith.constant 0.000000e+00 : f32
    %92 = vector.broadcast %cst_58 : f32 to vector<8x10xf32>
    %93 = vector.extract_strided_slice %91 {offsets = [0, 0], sizes = [8, 118], strides = [1, 1]} : vector<8x128xf32> to vector<8x118xf32>
    %94 = tpu.concatenate %92, %93 in 1 : vector<8x10xf32>, vector<8x118xf32> -> vector<8x128xf32>
    %95 = arith.addf %88, %94 : vector<8x128xf32>
    %c2_59 = arith.constant 2 : index
    %c0_60 = arith.constant 0 : index
    %c0_61 = arith.constant 0 : index
    %96 = vector.load %arg4[%c2_59, %c0_60, %c0_61] : memref<9x8x4xf32, #tpu.memory_space<vmem>>, vector<1x8x4xf32>
    %97 = vector.shape_cast %96 : vector<1x8x4xf32> to vector<8x4xf32>
    %cst_62 = arith.constant dense<0.000000e+00> : vector<8x128xf32>
    %98 = tpu.matmul %97, %80, %cst_62 {dimension_numbers = #tpu.dot_dimension_numbers<[1], [0], [0], [1], [0, 0, 1, 1], [], []>} : vector<8x4xf32>, vector<4x128xf32>, vector<8x128xf32> -> vector<8x128xf32>
    %cst_63 = arith.constant 0.000000e+00 : f32
    %99 = vector.broadcast %cst_63 : f32 to vector<8x9xf32>
    %100 = vector.extract_strided_slice %98 {offsets = [0, 0], sizes = [8, 119], strides = [1, 1]} : vector<8x128xf32> to vector<8x119xf32>
    %101 = tpu.concatenate %99, %100 in 1 : vector<8x9xf32>, vector<8x119xf32> -> vector<8x128xf32>
    %102 = arith.addf %95, %101 : vector<8x128xf32>
    %c3_64 = arith.constant 3 : index
    %c0_65 = arith.constant 0 : index
    %c0_66 = arith.constant 0 : index
    %103 = vector.load %arg4[%c3_64, %c0_65, %c0_66] : memref<9x8x4xf32, #tpu.memory_space<vmem>>, vector<1x8x4xf32>
    %104 = vector.shape_cast %103 : vector<1x8x4xf32> to vector<8x4xf32>
    %cst_67 = arith.constant dense<0.000000e+00> : vector<8x128xf32>
    %105 = tpu.matmul %104, %80, %cst_67 {dimension_numbers = #tpu.dot_dimension_numbers<[1], [0], [0], [1], [0, 0, 1, 1], [], []>} : vector<8x4xf32>, vector<4x128xf32>, vector<8x128xf32> -> vector<8x128xf32>
    %cst_68 = arith.constant 0.000000e+00 : f32
    %106 = vector.broadcast %cst_68 : f32 to vector<8x1xf32>
    %107 = vector.extract_strided_slice %105 {offsets = [0, 0], sizes = [8, 127], strides = [1, 1]} : vector<8x128xf32> to vector<8x127xf32>
    %108 = tpu.concatenate %106, %107 in 1 : vector<8x1xf32>, vector<8x127xf32> -> vector<8x128xf32>
    %109 = arith.addf %102, %108 : vector<8x128xf32>
    %c4_69 = arith.constant 4 : index
    %c0_70 = arith.constant 0 : index
    %c0_71 = arith.constant 0 : index
    %110 = vector.load %arg4[%c4_69, %c0_70, %c0_71] : memref<9x8x4xf32, #tpu.memory_space<vmem>>, vector<1x8x4xf32>
    %111 = vector.shape_cast %110 : vector<1x8x4xf32> to vector<8x4xf32>
    %cst_72 = arith.constant dense<0.000000e+00> : vector<8x128xf32>
    %112 = tpu.matmul %111, %80, %cst_72 {dimension_numbers = #tpu.dot_dimension_numbers<[1], [0], [0], [1], [0, 0, 1, 1], [], []>} : vector<8x4xf32>, vector<4x128xf32>, vector<8x128xf32> -> vector<8x128xf32>
    %113 = arith.addf %109, %112 : vector<8x128xf32>
    %c5_73 = arith.constant 5 : index
    %c0_74 = arith.constant 0 : index
    %c0_75 = arith.constant 0 : index
    %114 = vector.load %arg4[%c5_73, %c0_74, %c0_75] : memref<9x8x4xf32, #tpu.memory_space<vmem>>, vector<1x8x4xf32>
    %115 = vector.shape_cast %114 : vector<1x8x4xf32> to vector<8x4xf32>
    %cst_76 = arith.constant dense<0.000000e+00> : vector<8x128xf32>
    %116 = tpu.matmul %115, %80, %cst_76 {dimension_numbers = #tpu.dot_dimension_numbers<[1], [0], [0], [1], [0, 0, 1, 1], [], []>} : vector<8x4xf32>, vector<4x128xf32>, vector<8x128xf32> -> vector<8x128xf32>
    %117 = vector.extract_strided_slice %116 {offsets = [0, 1], sizes = [8, 127], strides = [1, 1]} : vector<8x128xf32> to vector<8x127xf32>
    %cst_77 = arith.constant 0.000000e+00 : f32
    %118 = vector.broadcast %cst_77 : f32 to vector<8x1xf32>
    %119 = tpu.concatenate %117, %118 in 1 : vector<8x127xf32>, vector<8x1xf32> -> vector<8x128xf32>
    %120 = arith.addf %113, %119 : vector<8x128xf32>
    %c6_78 = arith.constant 6 : index
    %c0_79 = arith.constant 0 : index
    %c0_80 = arith.constant 0 : index
    %121 = vector.load %arg4[%c6_78, %c0_79, %c0_80] : memref<9x8x4xf32, #tpu.memory_space<vmem>>, vector<1x8x4xf32>
    %122 = vector.shape_cast %121 : vector<1x8x4xf32> to vector<8x4xf32>
    %cst_81 = arith.constant dense<0.000000e+00> : vector<8x128xf32>
    %123 = tpu.matmul %122, %80, %cst_81 {dimension_numbers = #tpu.dot_dimension_numbers<[1], [0], [0], [1], [0, 0, 1, 1], [], []>} : vector<8x4xf32>, vector<4x128xf32>, vector<8x128xf32> -> vector<8x128xf32>
    %124 = vector.extract_strided_slice %123 {offsets = [0, 9], sizes = [8, 119], strides = [1, 1]} : vector<8x128xf32> to vector<8x119xf32>
    %cst_82 = arith.constant 0.000000e+00 : f32
    %125 = vector.broadcast %cst_82 : f32 to vector<8x9xf32>
    %126 = tpu.concatenate %124, %125 in 1 : vector<8x119xf32>, vector<8x9xf32> -> vector<8x128xf32>
    %127 = arith.addf %120, %126 : vector<8x128xf32>
    %c7_83 = arith.constant 7 : index
    %c0_84 = arith.constant 0 : index
    %c0_85 = arith.constant 0 : index
    %128 = vector.load %arg4[%c7_83, %c0_84, %c0_85] : memref<9x8x4xf32, #tpu.memory_space<vmem>>, vector<1x8x4xf32>
    %129 = vector.shape_cast %128 : vector<1x8x4xf32> to vector<8x4xf32>
    %cst_86 = arith.constant dense<0.000000e+00> : vector<8x128xf32>
    %130 = tpu.matmul %129, %80, %cst_86 {dimension_numbers = #tpu.dot_dimension_numbers<[1], [0], [0], [1], [0, 0, 1, 1], [], []>} : vector<8x4xf32>, vector<4x128xf32>, vector<8x128xf32> -> vector<8x128xf32>
    %131 = vector.extract_strided_slice %130 {offsets = [0, 10], sizes = [8, 118], strides = [1, 1]} : vector<8x128xf32> to vector<8x118xf32>
    %cst_87 = arith.constant 0.000000e+00 : f32
    %132 = vector.broadcast %cst_87 : f32 to vector<8x10xf32>
    %133 = tpu.concatenate %131, %132 in 1 : vector<8x118xf32>, vector<8x10xf32> -> vector<8x128xf32>
    %134 = arith.addf %127, %133 : vector<8x128xf32>
    %c8_88 = arith.constant 8 : index
    %c0_89 = arith.constant 0 : index
    %c0_90 = arith.constant 0 : index
    %135 = vector.load %arg4[%c8_88, %c0_89, %c0_90] : memref<9x8x4xf32, #tpu.memory_space<vmem>>, vector<1x8x4xf32>
    %136 = vector.shape_cast %135 : vector<1x8x4xf32> to vector<8x4xf32>
    %cst_91 = arith.constant dense<0.000000e+00> : vector<8x128xf32>
    %137 = tpu.matmul %136, %80, %cst_91 {dimension_numbers = #tpu.dot_dimension_numbers<[1], [0], [0], [1], [0, 0, 1, 1], [], []>} : vector<8x4xf32>, vector<4x128xf32>, vector<8x128xf32> -> vector<8x128xf32>
    %138 = vector.extract_strided_slice %137 {offsets = [0, 11], sizes = [8, 117], strides = [1, 1]} : vector<8x128xf32> to vector<8x117xf32>
    %cst_92 = arith.constant 0.000000e+00 : f32
    %139 = vector.broadcast %cst_92 : f32 to vector<8x11xf32>
    %140 = tpu.concatenate %138, %139 in 1 : vector<8x117xf32>, vector<8x11xf32> -> vector<8x128xf32>
    %141 = arith.addf %134, %140 : vector<8x128xf32>
    %c0_93 = arith.constant 0 : index
    %c0_94 = arith.constant 0 : index
    %142 = vector.load %arg5[%c0_93, %c0_94] : memref<8x1xf32, #tpu.memory_space<vmem>>, vector<8x1xf32>
    %143 = vector.broadcast %142 : vector<8x1xf32> to vector<8x128xf32>
    %144 = arith.addf %141, %143 : vector<8x128xf32>
    %cst_95 = arith.constant 0.000000e+00 : f32
    %145 = vector.broadcast %cst_95 : f32 to vector<8x128xf32>
    %146 = arith.maximumf %144, %145 : vector<8x128xf32>
    %c0_96 = arith.constant 0 : index
    %c0_97 = arith.constant 0 : index
    %147 = vector.load %arg35[%c0_96, %c0_97] : memref<1x128xf32, #tpu.memory_space<vmem>>, vector<1x128xf32>
    %148 = vector.broadcast %147 : vector<1x128xf32> to vector<8x128xf32>
    %149 = arith.mulf %146, %148 : vector<8x128xf32>
    %cst_98 = arith.constant 0.000000e+00 : f32
    %150 = vector.broadcast %cst_98 : f32 to vector<8x128xf32>
    %c0_99 = arith.constant 0 : index
    %c0_100 = arith.constant 0 : index
    %c0_101 = arith.constant 0 : index
    %151 = vector.load %arg6[%c0_99, %c0_100, %c0_101] : memref<9x8x8xf32, #tpu.memory_space<vmem>>, vector<1x8x8xf32>
    %152 = vector.shape_cast %151 : vector<1x8x8xf32> to vector<8x8xf32>
    %cst_102 = arith.constant dense<0.000000e+00> : vector<8x128xf32>
    %153 = tpu.matmul %152, %149, %cst_102 {dimension_numbers = #tpu.dot_dimension_numbers<[1], [0], [0], [1], [0, 0, 1, 1], [], []>} : vector<8x8xf32>, vector<8x128xf32>, vector<8x128xf32> -> vector<8x128xf32>
    %cst_103 = arith.constant 0.000000e+00 : f32
    %154 = vector.broadcast %cst_103 : f32 to vector<8x11xf32>
    %155 = vector.extract_strided_slice %153 {offsets = [0, 0], sizes = [8, 117], strides = [1, 1]} : vector<8x128xf32> to vector<8x117xf32>
    %156 = tpu.concatenate %154, %155 in 1 : vector<8x11xf32>, vector<8x117xf32> -> vector<8x128xf32>
    %157 = arith.addf %150, %156 : vector<8x128xf32>
    %c1_104 = arith.constant 1 : index
    %c0_105 = arith.constant 0 : index
    %c0_106 = arith.constant 0 : index
    %158 = vector.load %arg6[%c1_104, %c0_105, %c0_106] : memref<9x8x8xf32, #tpu.memory_space<vmem>>, vector<1x8x8xf32>
    %159 = vector.shape_cast %158 : vector<1x8x8xf32> to vector<8x8xf32>
    %cst_107 = arith.constant dense<0.000000e+00> : vector<8x128xf32>
    %160 = tpu.matmul %159, %149, %cst_107 {dimension_numbers = #tpu.dot_dimension_numbers<[1], [0], [0], [1], [0, 0, 1, 1], [], []>} : vector<8x8xf32>, vector<8x128xf32>, vector<8x128xf32> -> vector<8x128xf32>
    %cst_108 = arith.constant 0.000000e+00 : f32
    %161 = vector.broadcast %cst_108 : f32 to vector<8x10xf32>
    %162 = vector.extract_strided_slice %160 {offsets = [0, 0], sizes = [8, 118], strides = [1, 1]} : vector<8x128xf32> to vector<8x118xf32>
    %163 = tpu.concatenate %161, %162 in 1 : vector<8x10xf32>, vector<8x118xf32> -> vector<8x128xf32>
    %164 = arith.addf %157, %163 : vector<8x128xf32>
    %c2_109 = arith.constant 2 : index
    %c0_110 = arith.constant 0 : index
    %c0_111 = arith.constant 0 : index
    %165 = vector.load %arg6[%c2_109, %c0_110, %c0_111] : memref<9x8x8xf32, #tpu.memory_space<vmem>>, vector<1x8x8xf32>
    %166 = vector.shape_cast %165 : vector<1x8x8xf32> to vector<8x8xf32>
    %cst_112 = arith.constant dense<0.000000e+00> : vector<8x128xf32>
    %167 = tpu.matmul %166, %149, %cst_112 {dimension_numbers = #tpu.dot_dimension_numbers<[1], [0], [0], [1], [0, 0, 1, 1], [], []>} : vector<8x8xf32>, vector<8x128xf32>, vector<8x128xf32> -> vector<8x128xf32>
    %cst_113 = arith.constant 0.000000e+00 : f32
    %168 = vector.broadcast %cst_113 : f32 to vector<8x9xf32>
    %169 = vector.extract_strided_slice %167 {offsets = [0, 0], sizes = [8, 119], strides = [1, 1]} : vector<8x128xf32> to vector<8x119xf32>
    %170 = tpu.concatenate %168, %169 in 1 : vector<8x9xf32>, vector<8x119xf32> -> vector<8x128xf32>
    %171 = arith.addf %164, %170 : vector<8x128xf32>
    %c3_114 = arith.constant 3 : index
    %c0_115 = arith.constant 0 : index
    %c0_116 = arith.constant 0 : index
    %172 = vector.load %arg6[%c3_114, %c0_115, %c0_116] : memref<9x8x8xf32, #tpu.memory_space<vmem>>, vector<1x8x8xf32>
    %173 = vector.shape_cast %172 : vector<1x8x8xf32> to vector<8x8xf32>
    %cst_117 = arith.constant dense<0.000000e+00> : vector<8x128xf32>
    %174 = tpu.matmul %173, %149, %cst_117 {dimension_numbers = #tpu.dot_dimension_numbers<[1], [0], [0], [1], [0, 0, 1, 1], [], []>} : vector<8x8xf32>, vector<8x128xf32>, vector<8x128xf32> -> vector<8x128xf32>
    %cst_118 = arith.constant 0.000000e+00 : f32
    %175 = vector.broadcast %cst_118 : f32 to vector<8x1xf32>
    %176 = vector.extract_strided_slice %174 {offsets = [0, 0], sizes = [8, 127], strides = [1, 1]} : vector<8x128xf32> to vector<8x127xf32>
    %177 = tpu.concatenate %175, %176 in 1 : vector<8x1xf32>, vector<8x127xf32> -> vector<8x128xf32>
    %178 = arith.addf %171, %177 : vector<8x128xf32>
    %c4_119 = arith.constant 4 : index
    %c0_120 = arith.constant 0 : index
    %c0_121 = arith.constant 0 : index
    %179 = vector.load %arg6[%c4_119, %c0_120, %c0_121] : memref<9x8x8xf32, #tpu.memory_space<vmem>>, vector<1x8x8xf32>
    %180 = vector.shape_cast %179 : vector<1x8x8xf32> to vector<8x8xf32>
    %cst_122 = arith.constant dense<0.000000e+00> : vector<8x128xf32>
    %181 = tpu.matmul %180, %149, %cst_122 {dimension_numbers = #tpu.dot_dimension_numbers<[1], [0], [0], [1], [0, 0, 1, 1], [], []>} : vector<8x8xf32>, vector<8x128xf32>, vector<8x128xf32> -> vector<8x128xf32>
    %182 = arith.addf %178, %181 : vector<8x128xf32>
    %c5_123 = arith.constant 5 : index
    %c0_124 = arith.constant 0 : index
    %c0_125 = arith.constant 0 : index
    %183 = vector.load %arg6[%c5_123, %c0_124, %c0_125] : memref<9x8x8xf32, #tpu.memory_space<vmem>>, vector<1x8x8xf32>
    %184 = vector.shape_cast %183 : vector<1x8x8xf32> to vector<8x8xf32>
    %cst_126 = arith.constant dense<0.000000e+00> : vector<8x128xf32>
    %185 = tpu.matmul %184, %149, %cst_126 {dimension_numbers = #tpu.dot_dimension_numbers<[1], [0], [0], [1], [0, 0, 1, 1], [], []>} : vector<8x8xf32>, vector<8x128xf32>, vector<8x128xf32> -> vector<8x128xf32>
    %186 = vector.extract_strided_slice %185 {offsets = [0, 1], sizes = [8, 127], strides = [1, 1]} : vector<8x128xf32> to vector<8x127xf32>
    %cst_127 = arith.constant 0.000000e+00 : f32
    %187 = vector.broadcast %cst_127 : f32 to vector<8x1xf32>
    %188 = tpu.concatenate %186, %187 in 1 : vector<8x127xf32>, vector<8x1xf32> -> vector<8x128xf32>
    %189 = arith.addf %182, %188 : vector<8x128xf32>
    %c6_128 = arith.constant 6 : index
    %c0_129 = arith.constant 0 : index
    %c0_130 = arith.constant 0 : index
    %190 = vector.load %arg6[%c6_128, %c0_129, %c0_130] : memref<9x8x8xf32, #tpu.memory_space<vmem>>, vector<1x8x8xf32>
    %191 = vector.shape_cast %190 : vector<1x8x8xf32> to vector<8x8xf32>
    %cst_131 = arith.constant dense<0.000000e+00> : vector<8x128xf32>
    %192 = tpu.matmul %191, %149, %cst_131 {dimension_numbers = #tpu.dot_dimension_numbers<[1], [0], [0], [1], [0, 0, 1, 1], [], []>} : vector<8x8xf32>, vector<8x128xf32>, vector<8x128xf32> -> vector<8x128xf32>
    %193 = vector.extract_strided_slice %192 {offsets = [0, 9], sizes = [8, 119], strides = [1, 1]} : vector<8x128xf32> to vector<8x119xf32>
    %cst_132 = arith.constant 0.000000e+00 : f32
    %194 = vector.broadcast %cst_132 : f32 to vector<8x9xf32>
    %195 = tpu.concatenate %193, %194 in 1 : vector<8x119xf32>, vector<8x9xf32> -> vector<8x128xf32>
    %196 = arith.addf %189, %195 : vector<8x128xf32>
    %c7_133 = arith.constant 7 : index
    %c0_134 = arith.constant 0 : index
    %c0_135 = arith.constant 0 : index
    %197 = vector.load %arg6[%c7_133, %c0_134, %c0_135] : memref<9x8x8xf32, #tpu.memory_space<vmem>>, vector<1x8x8xf32>
    %198 = vector.shape_cast %197 : vector<1x8x8xf32> to vector<8x8xf32>
    %cst_136 = arith.constant dense<0.000000e+00> : vector<8x128xf32>
    %199 = tpu.matmul %198, %149, %cst_136 {dimension_numbers = #tpu.dot_dimension_numbers<[1], [0], [0], [1], [0, 0, 1, 1], [], []>} : vector<8x8xf32>, vector<8x128xf32>, vector<8x128xf32> -> vector<8x128xf32>
    %200 = vector.extract_strided_slice %199 {offsets = [0, 10], sizes = [8, 118], strides = [1, 1]} : vector<8x128xf32> to vector<8x118xf32>
    %cst_137 = arith.constant 0.000000e+00 : f32
    %201 = vector.broadcast %cst_137 : f32 to vector<8x10xf32>
    %202 = tpu.concatenate %200, %201 in 1 : vector<8x118xf32>, vector<8x10xf32> -> vector<8x128xf32>
    %203 = arith.addf %196, %202 : vector<8x128xf32>
    %c8_138 = arith.constant 8 : index
    %c0_139 = arith.constant 0 : index
    %c0_140 = arith.constant 0 : index
    %204 = vector.load %arg6[%c8_138, %c0_139, %c0_140] : memref<9x8x8xf32, #tpu.memory_space<vmem>>, vector<1x8x8xf32>
    %205 = vector.shape_cast %204 : vector<1x8x8xf32> to vector<8x8xf32>
    %cst_141 = arith.constant dense<0.000000e+00> : vector<8x128xf32>
    %206 = tpu.matmul %205, %149, %cst_141 {dimension_numbers = #tpu.dot_dimension_numbers<[1], [0], [0], [1], [0, 0, 1, 1], [], []>} : vector<8x8xf32>, vector<8x128xf32>, vector<8x128xf32> -> vector<8x128xf32>
    %207 = vector.extract_strided_slice %206 {offsets = [0, 11], sizes = [8, 117], strides = [1, 1]} : vector<8x128xf32> to vector<8x117xf32>
    %cst_142 = arith.constant 0.000000e+00 : f32
    %208 = vector.broadcast %cst_142 : f32 to vector<8x11xf32>
    %209 = tpu.concatenate %207, %208 in 1 : vector<8x117xf32>, vector<8x11xf32> -> vector<8x128xf32>
    %210 = arith.addf %203, %209 : vector<8x128xf32>
    %c0_143 = arith.constant 0 : index
    %c0_144 = arith.constant 0 : index
    %211 = vector.load %arg7[%c0_143, %c0_144] : memref<8x1xf32, #tpu.memory_space<vmem>>, vector<8x1xf32>
    %212 = vector.broadcast %211 : vector<8x1xf32> to vector<8x128xf32>
    %213 = arith.addf %210, %212 : vector<8x128xf32>
    %cst_145 = arith.constant 0.000000e+00 : f32
    %214 = vector.broadcast %cst_145 : f32 to vector<8x128xf32>
    %215 = arith.maximumf %213, %214 : vector<8x128xf32>
    %c0_146 = arith.constant 0 : index
    %c0_147 = arith.constant 0 : index
    %216 = vector.load %arg35[%c0_146, %c0_147] : memref<1x128xf32, #tpu.memory_space<vmem>>, vector<1x128xf32>
    %217 = vector.broadcast %216 : vector<1x128xf32> to vector<8x128xf32>
    %218 = arith.mulf %215, %217 : vector<8x128xf32>
    %219 = vector.extract_strided_slice %218 {offsets = [0, 1], sizes = [8, 127], strides = [1, 1]} : vector<8x128xf32> to vector<8x127xf32>
    %cst_148 = arith.constant 0.000000e+00 : f32
    %220 = vector.broadcast %cst_148 : f32 to vector<8x1xf32>
    %221 = tpu.concatenate %219, %220 in 1 : vector<8x127xf32>, vector<8x1xf32> -> vector<8x128xf32>
    %222 = arith.maximumf %218, %221 : vector<8x128xf32>
    %223 = vector.extract_strided_slice %222 {offsets = [0, 10], sizes = [8, 118], strides = [1, 1]} : vector<8x128xf32> to vector<8x118xf32>
    %cst_149 = arith.constant 0.000000e+00 : f32
    %224 = vector.broadcast %cst_149 : f32 to vector<8x10xf32>
    %225 = tpu.concatenate %223, %224 in 1 : vector<8x118xf32>, vector<8x10xf32> -> vector<8x128xf32>
    %226 = arith.maximumf %222, %225 : vector<8x128xf32>
    %c0_150 = arith.constant 0 : index
    %c0_151 = arith.constant 0 : index
    %227 = vector.load %arg40[%c0_150, %c0_151] : memref<128x128xf32, #tpu.memory_space<vmem>>, vector<128x128xf32>
    %cst_152 = arith.constant dense<0.000000e+00> : vector<8x128xf32>
    %228 = tpu.matmul %226, %227, %cst_152 {dimension_numbers = #tpu.dot_dimension_numbers<[1], [0], [0], [1], [0, 0, 1, 1], [], []>} : vector<8x128xf32>, vector<128x128xf32>, vector<8x128xf32> -> vector<8x128xf32>
    %cst_153 = arith.constant 0.000000e+00 : f32
    %229 = vector.broadcast %cst_153 : f32 to vector<16x128xf32>
    %c0_154 = arith.constant 0 : index
    %c0_155 = arith.constant 0 : index
    %c0_156 = arith.constant 0 : index
    %230 = vector.load %arg8[%c0_154, %c0_155, %c0_156] : memref<9x16x8xf32, #tpu.memory_space<vmem>>, vector<1x16x8xf32>
    %231 = vector.shape_cast %230 : vector<1x16x8xf32> to vector<16x8xf32>
    %cst_157 = arith.constant dense<0.000000e+00> : vector<16x128xf32>
    %232 = tpu.matmul %231, %228, %cst_157 {dimension_numbers = #tpu.dot_dimension_numbers<[1], [0], [0], [1], [0, 0, 1, 1], [], []>} : vector<16x8xf32>, vector<8x128xf32>, vector<16x128xf32> -> vector<16x128xf32>
    %cst_158 = arith.constant 0.000000e+00 : f32
    %233 = vector.broadcast %cst_158 : f32 to vector<16x7xf32>
    %234 = vector.extract_strided_slice %232 {offsets = [0, 0], sizes = [16, 121], strides = [1, 1]} : vector<16x128xf32> to vector<16x121xf32>
    %235 = tpu.concatenate %233, %234 in 1 : vector<16x7xf32>, vector<16x121xf32> -> vector<16x128xf32>
    %236 = arith.addf %229, %235 : vector<16x128xf32>
    %c1_159 = arith.constant 1 : index
    %c0_160 = arith.constant 0 : index
    %c0_161 = arith.constant 0 : index
    %237 = vector.load %arg8[%c1_159, %c0_160, %c0_161] : memref<9x16x8xf32, #tpu.memory_space<vmem>>, vector<1x16x8xf32>
    %238 = vector.shape_cast %237 : vector<1x16x8xf32> to vector<16x8xf32>
    %cst_162 = arith.constant dense<0.000000e+00> : vector<16x128xf32>
    %239 = tpu.matmul %238, %228, %cst_162 {dimension_numbers = #tpu.dot_dimension_numbers<[1], [0], [0], [1], [0, 0, 1, 1], [], []>} : vector<16x8xf32>, vector<8x128xf32>, vector<16x128xf32> -> vector<16x128xf32>
    %cst_163 = arith.constant 0.000000e+00 : f32
    %240 = vector.broadcast %cst_163 : f32 to vector<16x6xf32>
    %241 = vector.extract_strided_slice %239 {offsets = [0, 0], sizes = [16, 122], strides = [1, 1]} : vector<16x128xf32> to vector<16x122xf32>
    %242 = tpu.concatenate %240, %241 in 1 : vector<16x6xf32>, vector<16x122xf32> -> vector<16x128xf32>
    %243 = arith.addf %236, %242 : vector<16x128xf32>
    %c2_164 = arith.constant 2 : index
    %c0_165 = arith.constant 0 : index
    %c0_166 = arith.constant 0 : index
    %244 = vector.load %arg8[%c2_164, %c0_165, %c0_166] : memref<9x16x8xf32, #tpu.memory_space<vmem>>, vector<1x16x8xf32>
    %245 = vector.shape_cast %244 : vector<1x16x8xf32> to vector<16x8xf32>
    %cst_167 = arith.constant dense<0.000000e+00> : vector<16x128xf32>
    %246 = tpu.matmul %245, %228, %cst_167 {dimension_numbers = #tpu.dot_dimension_numbers<[1], [0], [0], [1], [0, 0, 1, 1], [], []>} : vector<16x8xf32>, vector<8x128xf32>, vector<16x128xf32> -> vector<16x128xf32>
    %cst_168 = arith.constant 0.000000e+00 : f32
    %247 = vector.broadcast %cst_168 : f32 to vector<16x5xf32>
    %248 = vector.extract_strided_slice %246 {offsets = [0, 0], sizes = [16, 123], strides = [1, 1]} : vector<16x128xf32> to vector<16x123xf32>
    %249 = tpu.concatenate %247, %248 in 1 : vector<16x5xf32>, vector<16x123xf32> -> vector<16x128xf32>
    %250 = arith.addf %243, %249 : vector<16x128xf32>
    %c3_169 = arith.constant 3 : index
    %c0_170 = arith.constant 0 : index
    %c0_171 = arith.constant 0 : index
    %251 = vector.load %arg8[%c3_169, %c0_170, %c0_171] : memref<9x16x8xf32, #tpu.memory_space<vmem>>, vector<1x16x8xf32>
    %252 = vector.shape_cast %251 : vector<1x16x8xf32> to vector<16x8xf32>
    %cst_172 = arith.constant dense<0.000000e+00> : vector<16x128xf32>
    %253 = tpu.matmul %252, %228, %cst_172 {dimension_numbers = #tpu.dot_dimension_numbers<[1], [0], [0], [1], [0, 0, 1, 1], [], []>} : vector<16x8xf32>, vector<8x128xf32>, vector<16x128xf32> -> vector<16x128xf32>
    %cst_173 = arith.constant 0.000000e+00 : f32
    %254 = vector.broadcast %cst_173 : f32 to vector<16x1xf32>
    %255 = vector.extract_strided_slice %253 {offsets = [0, 0], sizes = [16, 127], strides = [1, 1]} : vector<16x128xf32> to vector<16x127xf32>
    %256 = tpu.concatenate %254, %255 in 1 : vector<16x1xf32>, vector<16x127xf32> -> vector<16x128xf32>
    %257 = arith.addf %250, %256 : vector<16x128xf32>
    %c4_174 = arith.constant 4 : index
    %c0_175 = arith.constant 0 : index
    %c0_176 = arith.constant 0 : index
    %258 = vector.load %arg8[%c4_174, %c0_175, %c0_176] : memref<9x16x8xf32, #tpu.memory_space<vmem>>, vector<1x16x8xf32>
    %259 = vector.shape_cast %258 : vector<1x16x8xf32> to vector<16x8xf32>
    %cst_177 = arith.constant dense<0.000000e+00> : vector<16x128xf32>
    %260 = tpu.matmul %259, %228, %cst_177 {dimension_numbers = #tpu.dot_dimension_numbers<[1], [0], [0], [1], [0, 0, 1, 1], [], []>} : vector<16x8xf32>, vector<8x128xf32>, vector<16x128xf32> -> vector<16x128xf32>
    %261 = arith.addf %257, %260 : vector<16x128xf32>
    %c5_178 = arith.constant 5 : index
    %c0_179 = arith.constant 0 : index
    %c0_180 = arith.constant 0 : index
    %262 = vector.load %arg8[%c5_178, %c0_179, %c0_180] : memref<9x16x8xf32, #tpu.memory_space<vmem>>, vector<1x16x8xf32>
    %263 = vector.shape_cast %262 : vector<1x16x8xf32> to vector<16x8xf32>
    %cst_181 = arith.constant dense<0.000000e+00> : vector<16x128xf32>
    %264 = tpu.matmul %263, %228, %cst_181 {dimension_numbers = #tpu.dot_dimension_numbers<[1], [0], [0], [1], [0, 0, 1, 1], [], []>} : vector<16x8xf32>, vector<8x128xf32>, vector<16x128xf32> -> vector<16x128xf32>
    %265 = vector.extract_strided_slice %264 {offsets = [0, 1], sizes = [16, 127], strides = [1, 1]} : vector<16x128xf32> to vector<16x127xf32>
    %cst_182 = arith.constant 0.000000e+00 : f32
    %266 = vector.broadcast %cst_182 : f32 to vector<16x1xf32>
    %267 = tpu.concatenate %265, %266 in 1 : vector<16x127xf32>, vector<16x1xf32> -> vector<16x128xf32>
    %268 = arith.addf %261, %267 : vector<16x128xf32>
    %c6_183 = arith.constant 6 : index
    %c0_184 = arith.constant 0 : index
    %c0_185 = arith.constant 0 : index
    %269 = vector.load %arg8[%c6_183, %c0_184, %c0_185] : memref<9x16x8xf32, #tpu.memory_space<vmem>>, vector<1x16x8xf32>
    %270 = vector.shape_cast %269 : vector<1x16x8xf32> to vector<16x8xf32>
    %cst_186 = arith.constant dense<0.000000e+00> : vector<16x128xf32>
    %271 = tpu.matmul %270, %228, %cst_186 {dimension_numbers = #tpu.dot_dimension_numbers<[1], [0], [0], [1], [0, 0, 1, 1], [], []>} : vector<16x8xf32>, vector<8x128xf32>, vector<16x128xf32> -> vector<16x128xf32>
    %272 = vector.extract_strided_slice %271 {offsets = [0, 5], sizes = [16, 123], strides = [1, 1]} : vector<16x128xf32> to vector<16x123xf32>
    %cst_187 = arith.constant 0.000000e+00 : f32
    %273 = vector.broadcast %cst_187 : f32 to vector<16x5xf32>
    %274 = tpu.concatenate %272, %273 in 1 : vector<16x123xf32>, vector<16x5xf32> -> vector<16x128xf32>
    %275 = arith.addf %268, %274 : vector<16x128xf32>
    %c7_188 = arith.constant 7 : index
    %c0_189 = arith.constant 0 : index
    %c0_190 = arith.constant 0 : index
    %276 = vector.load %arg8[%c7_188, %c0_189, %c0_190] : memref<9x16x8xf32, #tpu.memory_space<vmem>>, vector<1x16x8xf32>
    %277 = vector.shape_cast %276 : vector<1x16x8xf32> to vector<16x8xf32>
    %cst_191 = arith.constant dense<0.000000e+00> : vector<16x128xf32>
    %278 = tpu.matmul %277, %228, %cst_191 {dimension_numbers = #tpu.dot_dimension_numbers<[1], [0], [0], [1], [0, 0, 1, 1], [], []>} : vector<16x8xf32>, vector<8x128xf32>, vector<16x128xf32> -> vector<16x128xf32>
    %279 = vector.extract_strided_slice %278 {offsets = [0, 6], sizes = [16, 122], strides = [1, 1]} : vector<16x128xf32> to vector<16x122xf32>
    %cst_192 = arith.constant 0.000000e+00 : f32
    %280 = vector.broadcast %cst_192 : f32 to vector<16x6xf32>
    %281 = tpu.concatenate %279, %280 in 1 : vector<16x122xf32>, vector<16x6xf32> -> vector<16x128xf32>
    %282 = arith.addf %275, %281 : vector<16x128xf32>
    %c8_193 = arith.constant 8 : index
    %c0_194 = arith.constant 0 : index
    %c0_195 = arith.constant 0 : index
    %283 = vector.load %arg8[%c8_193, %c0_194, %c0_195] : memref<9x16x8xf32, #tpu.memory_space<vmem>>, vector<1x16x8xf32>
    %284 = vector.shape_cast %283 : vector<1x16x8xf32> to vector<16x8xf32>
    %cst_196 = arith.constant dense<0.000000e+00> : vector<16x128xf32>
    %285 = tpu.matmul %284, %228, %cst_196 {dimension_numbers = #tpu.dot_dimension_numbers<[1], [0], [0], [1], [0, 0, 1, 1], [], []>} : vector<16x8xf32>, vector<8x128xf32>, vector<16x128xf32> -> vector<16x128xf32>
    %286 = vector.extract_strided_slice %285 {offsets = [0, 7], sizes = [16, 121], strides = [1, 1]} : vector<16x128xf32> to vector<16x121xf32>
    %cst_197 = arith.constant 0.000000e+00 : f32
    %287 = vector.broadcast %cst_197 : f32 to vector<16x7xf32>
    %288 = tpu.concatenate %286, %287 in 1 : vector<16x121xf32>, vector<16x7xf32> -> vector<16x128xf32>
    %289 = arith.addf %282, %288 : vector<16x128xf32>
    %c0_198 = arith.constant 0 : index
    %c0_199 = arith.constant 0 : index
    %290 = vector.load %arg9[%c0_198, %c0_199] : memref<16x1xf32, #tpu.memory_space<vmem>>, vector<16x1xf32>
    %291 = vector.broadcast %290 : vector<16x1xf32> to vector<16x128xf32>
    %292 = arith.addf %289, %291 : vector<16x128xf32>
    %cst_200 = arith.constant 0.000000e+00 : f32
    %293 = vector.broadcast %cst_200 : f32 to vector<16x128xf32>
    %294 = arith.maximumf %292, %293 : vector<16x128xf32>
    %c0_201 = arith.constant 0 : index
    %c0_202 = arith.constant 0 : index
    %295 = vector.load %arg36[%c0_201, %c0_202] : memref<1x128xf32, #tpu.memory_space<vmem>>, vector<1x128xf32>
    %296 = vector.broadcast %295 : vector<1x128xf32> to vector<16x128xf32>
    %297 = arith.mulf %294, %296 : vector<16x128xf32>
    %cst_203 = arith.constant 0.000000e+00 : f32
    %298 = vector.broadcast %cst_203 : f32 to vector<16x128xf32>
    %c0_204 = arith.constant 0 : index
    %c0_205 = arith.constant 0 : index
    %c0_206 = arith.constant 0 : index
    %299 = vector.load %arg10[%c0_204, %c0_205, %c0_206] : memref<9x16x16xf32, #tpu.memory_space<vmem>>, vector<1x16x16xf32>
    %300 = vector.shape_cast %299 : vector<1x16x16xf32> to vector<16x16xf32>
    %cst_207 = arith.constant dense<0.000000e+00> : vector<16x128xf32>
    %301 = tpu.matmul %300, %297, %cst_207 {dimension_numbers = #tpu.dot_dimension_numbers<[1], [0], [0], [1], [0, 0, 1, 1], [], []>} : vector<16x16xf32>, vector<16x128xf32>, vector<16x128xf32> -> vector<16x128xf32>
    %cst_208 = arith.constant 0.000000e+00 : f32
    %302 = vector.broadcast %cst_208 : f32 to vector<16x7xf32>
    %303 = vector.extract_strided_slice %301 {offsets = [0, 0], sizes = [16, 121], strides = [1, 1]} : vector<16x128xf32> to vector<16x121xf32>
    %304 = tpu.concatenate %302, %303 in 1 : vector<16x7xf32>, vector<16x121xf32> -> vector<16x128xf32>
    %305 = arith.addf %298, %304 : vector<16x128xf32>
    %c1_209 = arith.constant 1 : index
    %c0_210 = arith.constant 0 : index
    %c0_211 = arith.constant 0 : index
    %306 = vector.load %arg10[%c1_209, %c0_210, %c0_211] : memref<9x16x16xf32, #tpu.memory_space<vmem>>, vector<1x16x16xf32>
    %307 = vector.shape_cast %306 : vector<1x16x16xf32> to vector<16x16xf32>
    %cst_212 = arith.constant dense<0.000000e+00> : vector<16x128xf32>
    %308 = tpu.matmul %307, %297, %cst_212 {dimension_numbers = #tpu.dot_dimension_numbers<[1], [0], [0], [1], [0, 0, 1, 1], [], []>} : vector<16x16xf32>, vector<16x128xf32>, vector<16x128xf32> -> vector<16x128xf32>
    %cst_213 = arith.constant 0.000000e+00 : f32
    %309 = vector.broadcast %cst_213 : f32 to vector<16x6xf32>
    %310 = vector.extract_strided_slice %308 {offsets = [0, 0], sizes = [16, 122], strides = [1, 1]} : vector<16x128xf32> to vector<16x122xf32>
    %311 = tpu.concatenate %309, %310 in 1 : vector<16x6xf32>, vector<16x122xf32> -> vector<16x128xf32>
    %312 = arith.addf %305, %311 : vector<16x128xf32>
    %c2_214 = arith.constant 2 : index
    %c0_215 = arith.constant 0 : index
    %c0_216 = arith.constant 0 : index
    %313 = vector.load %arg10[%c2_214, %c0_215, %c0_216] : memref<9x16x16xf32, #tpu.memory_space<vmem>>, vector<1x16x16xf32>
    %314 = vector.shape_cast %313 : vector<1x16x16xf32> to vector<16x16xf32>
    %cst_217 = arith.constant dense<0.000000e+00> : vector<16x128xf32>
    %315 = tpu.matmul %314, %297, %cst_217 {dimension_numbers = #tpu.dot_dimension_numbers<[1], [0], [0], [1], [0, 0, 1, 1], [], []>} : vector<16x16xf32>, vector<16x128xf32>, vector<16x128xf32> -> vector<16x128xf32>
    %cst_218 = arith.constant 0.000000e+00 : f32
    %316 = vector.broadcast %cst_218 : f32 to vector<16x5xf32>
    %317 = vector.extract_strided_slice %315 {offsets = [0, 0], sizes = [16, 123], strides = [1, 1]} : vector<16x128xf32> to vector<16x123xf32>
    %318 = tpu.concatenate %316, %317 in 1 : vector<16x5xf32>, vector<16x123xf32> -> vector<16x128xf32>
    %319 = arith.addf %312, %318 : vector<16x128xf32>
    %c3_219 = arith.constant 3 : index
    %c0_220 = arith.constant 0 : index
    %c0_221 = arith.constant 0 : index
    %320 = vector.load %arg10[%c3_219, %c0_220, %c0_221] : memref<9x16x16xf32, #tpu.memory_space<vmem>>, vector<1x16x16xf32>
    %321 = vector.shape_cast %320 : vector<1x16x16xf32> to vector<16x16xf32>
    %cst_222 = arith.constant dense<0.000000e+00> : vector<16x128xf32>
    %322 = tpu.matmul %321, %297, %cst_222 {dimension_numbers = #tpu.dot_dimension_numbers<[1], [0], [0], [1], [0, 0, 1, 1], [], []>} : vector<16x16xf32>, vector<16x128xf32>, vector<16x128xf32> -> vector<16x128xf32>
    %cst_223 = arith.constant 0.000000e+00 : f32
    %323 = vector.broadcast %cst_223 : f32 to vector<16x1xf32>
    %324 = vector.extract_strided_slice %322 {offsets = [0, 0], sizes = [16, 127], strides = [1, 1]} : vector<16x128xf32> to vector<16x127xf32>
    %325 = tpu.concatenate %323, %324 in 1 : vector<16x1xf32>, vector<16x127xf32> -> vector<16x128xf32>
    %326 = arith.addf %319, %325 : vector<16x128xf32>
    %c4_224 = arith.constant 4 : index
    %c0_225 = arith.constant 0 : index
    %c0_226 = arith.constant 0 : index
    %327 = vector.load %arg10[%c4_224, %c0_225, %c0_226] : memref<9x16x16xf32, #tpu.memory_space<vmem>>, vector<1x16x16xf32>
    %328 = vector.shape_cast %327 : vector<1x16x16xf32> to vector<16x16xf32>
    %cst_227 = arith.constant dense<0.000000e+00> : vector<16x128xf32>
    %329 = tpu.matmul %328, %297, %cst_227 {dimension_numbers = #tpu.dot_dimension_numbers<[1], [0], [0], [1], [0, 0, 1, 1], [], []>} : vector<16x16xf32>, vector<16x128xf32>, vector<16x128xf32> -> vector<16x128xf32>
    %330 = arith.addf %326, %329 : vector<16x128xf32>
    %c5_228 = arith.constant 5 : index
    %c0_229 = arith.constant 0 : index
    %c0_230 = arith.constant 0 : index
    %331 = vector.load %arg10[%c5_228, %c0_229, %c0_230] : memref<9x16x16xf32, #tpu.memory_space<vmem>>, vector<1x16x16xf32>
    %332 = vector.shape_cast %331 : vector<1x16x16xf32> to vector<16x16xf32>
    %cst_231 = arith.constant dense<0.000000e+00> : vector<16x128xf32>
    %333 = tpu.matmul %332, %297, %cst_231 {dimension_numbers = #tpu.dot_dimension_numbers<[1], [0], [0], [1], [0, 0, 1, 1], [], []>} : vector<16x16xf32>, vector<16x128xf32>, vector<16x128xf32> -> vector<16x128xf32>
    %334 = vector.extract_strided_slice %333 {offsets = [0, 1], sizes = [16, 127], strides = [1, 1]} : vector<16x128xf32> to vector<16x127xf32>
    %cst_232 = arith.constant 0.000000e+00 : f32
    %335 = vector.broadcast %cst_232 : f32 to vector<16x1xf32>
    %336 = tpu.concatenate %334, %335 in 1 : vector<16x127xf32>, vector<16x1xf32> -> vector<16x128xf32>
    %337 = arith.addf %330, %336 : vector<16x128xf32>
    %c6_233 = arith.constant 6 : index
    %c0_234 = arith.constant 0 : index
    %c0_235 = arith.constant 0 : index
    %338 = vector.load %arg10[%c6_233, %c0_234, %c0_235] : memref<9x16x16xf32, #tpu.memory_space<vmem>>, vector<1x16x16xf32>
    %339 = vector.shape_cast %338 : vector<1x16x16xf32> to vector<16x16xf32>
    %cst_236 = arith.constant dense<0.000000e+00> : vector<16x128xf32>
    %340 = tpu.matmul %339, %297, %cst_236 {dimension_numbers = #tpu.dot_dimension_numbers<[1], [0], [0], [1], [0, 0, 1, 1], [], []>} : vector<16x16xf32>, vector<16x128xf32>, vector<16x128xf32> -> vector<16x128xf32>
    %341 = vector.extract_strided_slice %340 {offsets = [0, 5], sizes = [16, 123], strides = [1, 1]} : vector<16x128xf32> to vector<16x123xf32>
    %cst_237 = arith.constant 0.000000e+00 : f32
    %342 = vector.broadcast %cst_237 : f32 to vector<16x5xf32>
    %343 = tpu.concatenate %341, %342 in 1 : vector<16x123xf32>, vector<16x5xf32> -> vector<16x128xf32>
    %344 = arith.addf %337, %343 : vector<16x128xf32>
    %c7_238 = arith.constant 7 : index
    %c0_239 = arith.constant 0 : index
    %c0_240 = arith.constant 0 : index
    %345 = vector.load %arg10[%c7_238, %c0_239, %c0_240] : memref<9x16x16xf32, #tpu.memory_space<vmem>>, vector<1x16x16xf32>
    %346 = vector.shape_cast %345 : vector<1x16x16xf32> to vector<16x16xf32>
    %cst_241 = arith.constant dense<0.000000e+00> : vector<16x128xf32>
    %347 = tpu.matmul %346, %297, %cst_241 {dimension_numbers = #tpu.dot_dimension_numbers<[1], [0], [0], [1], [0, 0, 1, 1], [], []>} : vector<16x16xf32>, vector<16x128xf32>, vector<16x128xf32> -> vector<16x128xf32>
    %348 = vector.extract_strided_slice %347 {offsets = [0, 6], sizes = [16, 122], strides = [1, 1]} : vector<16x128xf32> to vector<16x122xf32>
    %cst_242 = arith.constant 0.000000e+00 : f32
    %349 = vector.broadcast %cst_242 : f32 to vector<16x6xf32>
    %350 = tpu.concatenate %348, %349 in 1 : vector<16x122xf32>, vector<16x6xf32> -> vector<16x128xf32>
    %351 = arith.addf %344, %350 : vector<16x128xf32>
    %c8_243 = arith.constant 8 : index
    %c0_244 = arith.constant 0 : index
    %c0_245 = arith.constant 0 : index
    %352 = vector.load %arg10[%c8_243, %c0_244, %c0_245] : memref<9x16x16xf32, #tpu.memory_space<vmem>>, vector<1x16x16xf32>
    %353 = vector.shape_cast %352 : vector<1x16x16xf32> to vector<16x16xf32>
    %cst_246 = arith.constant dense<0.000000e+00> : vector<16x128xf32>
    %354 = tpu.matmul %353, %297, %cst_246 {dimension_numbers = #tpu.dot_dimension_numbers<[1], [0], [0], [1], [0, 0, 1, 1], [], []>} : vector<16x16xf32>, vector<16x128xf32>, vector<16x128xf32> -> vector<16x128xf32>
    %355 = vector.extract_strided_slice %354 {offsets = [0, 7], sizes = [16, 121], strides = [1, 1]} : vector<16x128xf32> to vector<16x121xf32>
    %cst_247 = arith.constant 0.000000e+00 : f32
    %356 = vector.broadcast %cst_247 : f32 to vector<16x7xf32>
    %357 = tpu.concatenate %355, %356 in 1 : vector<16x121xf32>, vector<16x7xf32> -> vector<16x128xf32>
    %358 = arith.addf %351, %357 : vector<16x128xf32>
    %c0_248 = arith.constant 0 : index
    %c0_249 = arith.constant 0 : index
    %359 = vector.load %arg11[%c0_248, %c0_249] : memref<16x1xf32, #tpu.memory_space<vmem>>, vector<16x1xf32>
    %360 = vector.broadcast %359 : vector<16x1xf32> to vector<16x128xf32>
    %361 = arith.addf %358, %360 : vector<16x128xf32>
    %cst_250 = arith.constant 0.000000e+00 : f32
    %362 = vector.broadcast %cst_250 : f32 to vector<16x128xf32>
    %363 = arith.maximumf %361, %362 : vector<16x128xf32>
    %c0_251 = arith.constant 0 : index
    %c0_252 = arith.constant 0 : index
    %364 = vector.load %arg36[%c0_251, %c0_252] : memref<1x128xf32, #tpu.memory_space<vmem>>, vector<1x128xf32>
    %365 = vector.broadcast %364 : vector<1x128xf32> to vector<16x128xf32>
    %366 = arith.mulf %363, %365 : vector<16x128xf32>
    %367 = vector.extract_strided_slice %366 {offsets = [0, 1], sizes = [16, 127], strides = [1, 1]} : vector<16x128xf32> to vector<16x127xf32>
    %cst_253 = arith.constant 0.000000e+00 : f32
    %368 = vector.broadcast %cst_253 : f32 to vector<16x1xf32>
    %369 = tpu.concatenate %367, %368 in 1 : vector<16x127xf32>, vector<16x1xf32> -> vector<16x128xf32>
    %370 = arith.maximumf %366, %369 : vector<16x128xf32>
    %371 = vector.extract_strided_slice %370 {offsets = [0, 6], sizes = [16, 122], strides = [1, 1]} : vector<16x128xf32> to vector<16x122xf32>
    %cst_254 = arith.constant 0.000000e+00 : f32
    %372 = vector.broadcast %cst_254 : f32 to vector<16x6xf32>
    %373 = tpu.concatenate %371, %372 in 1 : vector<16x122xf32>, vector<16x6xf32> -> vector<16x128xf32>
    %374 = arith.maximumf %370, %373 : vector<16x128xf32>
    %c0_255 = arith.constant 0 : index
    %c0_256 = arith.constant 0 : index
    %375 = vector.load %arg41[%c0_255, %c0_256] : memref<128x128xf32, #tpu.memory_space<vmem>>, vector<128x128xf32>
    %cst_257 = arith.constant dense<0.000000e+00> : vector<16x128xf32>
    %376 = tpu.matmul %374, %375, %cst_257 {dimension_numbers = #tpu.dot_dimension_numbers<[1], [0], [0], [1], [0, 0, 1, 1], [], []>} : vector<16x128xf32>, vector<128x128xf32>, vector<16x128xf32> -> vector<16x128xf32>
    %cst_258 = arith.constant 0.000000e+00 : f32
    %377 = vector.broadcast %cst_258 : f32 to vector<32x128xf32>
    %c0_259 = arith.constant 0 : index
    %c0_260 = arith.constant 0 : index
    %c0_261 = arith.constant 0 : index
    %378 = vector.load %arg12[%c0_259, %c0_260, %c0_261] : memref<9x32x16xf32, #tpu.memory_space<vmem>>, vector<1x32x16xf32>
    %379 = vector.shape_cast %378 : vector<1x32x16xf32> to vector<32x16xf32>
    %cst_262 = arith.constant dense<0.000000e+00> : vector<32x128xf32>
    %380 = tpu.matmul %379, %376, %cst_262 {dimension_numbers = #tpu.dot_dimension_numbers<[1], [0], [0], [1], [0, 0, 1, 1], [], []>} : vector<32x16xf32>, vector<16x128xf32>, vector<32x128xf32> -> vector<32x128xf32>
    %cst_263 = arith.constant 0.000000e+00 : f32
    %381 = vector.broadcast %cst_263 : f32 to vector<32x5xf32>
    %382 = vector.extract_strided_slice %380 {offsets = [0, 0], sizes = [32, 123], strides = [1, 1]} : vector<32x128xf32> to vector<32x123xf32>
    %383 = tpu.concatenate %381, %382 in 1 : vector<32x5xf32>, vector<32x123xf32> -> vector<32x128xf32>
    %384 = arith.addf %377, %383 : vector<32x128xf32>
    %c1_264 = arith.constant 1 : index
    %c0_265 = arith.constant 0 : index
    %c0_266 = arith.constant 0 : index
    %385 = vector.load %arg12[%c1_264, %c0_265, %c0_266] : memref<9x32x16xf32, #tpu.memory_space<vmem>>, vector<1x32x16xf32>
    %386 = vector.shape_cast %385 : vector<1x32x16xf32> to vector<32x16xf32>
    %cst_267 = arith.constant dense<0.000000e+00> : vector<32x128xf32>
    %387 = tpu.matmul %386, %376, %cst_267 {dimension_numbers = #tpu.dot_dimension_numbers<[1], [0], [0], [1], [0, 0, 1, 1], [], []>} : vector<32x16xf32>, vector<16x128xf32>, vector<32x128xf32> -> vector<32x128xf32>
    %cst_268 = arith.constant 0.000000e+00 : f32
    %388 = vector.broadcast %cst_268 : f32 to vector<32x4xf32>
    %389 = vector.extract_strided_slice %387 {offsets = [0, 0], sizes = [32, 124], strides = [1, 1]} : vector<32x128xf32> to vector<32x124xf32>
    %390 = tpu.concatenate %388, %389 in 1 : vector<32x4xf32>, vector<32x124xf32> -> vector<32x128xf32>
    %391 = arith.addf %384, %390 : vector<32x128xf32>
    %c2_269 = arith.constant 2 : index
    %c0_270 = arith.constant 0 : index
    %c0_271 = arith.constant 0 : index
    %392 = vector.load %arg12[%c2_269, %c0_270, %c0_271] : memref<9x32x16xf32, #tpu.memory_space<vmem>>, vector<1x32x16xf32>
    %393 = vector.shape_cast %392 : vector<1x32x16xf32> to vector<32x16xf32>
    %cst_272 = arith.constant dense<0.000000e+00> : vector<32x128xf32>
    %394 = tpu.matmul %393, %376, %cst_272 {dimension_numbers = #tpu.dot_dimension_numbers<[1], [0], [0], [1], [0, 0, 1, 1], [], []>} : vector<32x16xf32>, vector<16x128xf32>, vector<32x128xf32> -> vector<32x128xf32>
    %cst_273 = arith.constant 0.000000e+00 : f32
    %395 = vector.broadcast %cst_273 : f32 to vector<32x3xf32>
    %396 = vector.extract_strided_slice %394 {offsets = [0, 0], sizes = [32, 125], strides = [1, 1]} : vector<32x128xf32> to vector<32x125xf32>
    %397 = tpu.concatenate %395, %396 in 1 : vector<32x3xf32>, vector<32x125xf32> -> vector<32x128xf32>
    %398 = arith.addf %391, %397 : vector<32x128xf32>
    %c3_274 = arith.constant 3 : index
    %c0_275 = arith.constant 0 : index
    %c0_276 = arith.constant 0 : index
    %399 = vector.load %arg12[%c3_274, %c0_275, %c0_276] : memref<9x32x16xf32, #tpu.memory_space<vmem>>, vector<1x32x16xf32>
    %400 = vector.shape_cast %399 : vector<1x32x16xf32> to vector<32x16xf32>
    %cst_277 = arith.constant dense<0.000000e+00> : vector<32x128xf32>
    %401 = tpu.matmul %400, %376, %cst_277 {dimension_numbers = #tpu.dot_dimension_numbers<[1], [0], [0], [1], [0, 0, 1, 1], [], []>} : vector<32x16xf32>, vector<16x128xf32>, vector<32x128xf32> -> vector<32x128xf32>
    %cst_278 = arith.constant 0.000000e+00 : f32
    %402 = vector.broadcast %cst_278 : f32 to vector<32x1xf32>
    %403 = vector.extract_strided_slice %401 {offsets = [0, 0], sizes = [32, 127], strides = [1, 1]} : vector<32x128xf32> to vector<32x127xf32>
    %404 = tpu.concatenate %402, %403 in 1 : vector<32x1xf32>, vector<32x127xf32> -> vector<32x128xf32>
    %405 = arith.addf %398, %404 : vector<32x128xf32>
    %c4_279 = arith.constant 4 : index
    %c0_280 = arith.constant 0 : index
    %c0_281 = arith.constant 0 : index
    %406 = vector.load %arg12[%c4_279, %c0_280, %c0_281] : memref<9x32x16xf32, #tpu.memory_space<vmem>>, vector<1x32x16xf32>
    %407 = vector.shape_cast %406 : vector<1x32x16xf32> to vector<32x16xf32>
    %cst_282 = arith.constant dense<0.000000e+00> : vector<32x128xf32>
    %408 = tpu.matmul %407, %376, %cst_282 {dimension_numbers = #tpu.dot_dimension_numbers<[1], [0], [0], [1], [0, 0, 1, 1], [], []>} : vector<32x16xf32>, vector<16x128xf32>, vector<32x128xf32> -> vector<32x128xf32>
    %409 = arith.addf %405, %408 : vector<32x128xf32>
    %c5_283 = arith.constant 5 : index
    %c0_284 = arith.constant 0 : index
    %c0_285 = arith.constant 0 : index
    %410 = vector.load %arg12[%c5_283, %c0_284, %c0_285] : memref<9x32x16xf32, #tpu.memory_space<vmem>>, vector<1x32x16xf32>
    %411 = vector.shape_cast %410 : vector<1x32x16xf32> to vector<32x16xf32>
    %cst_286 = arith.constant dense<0.000000e+00> : vector<32x128xf32>
    %412 = tpu.matmul %411, %376, %cst_286 {dimension_numbers = #tpu.dot_dimension_numbers<[1], [0], [0], [1], [0, 0, 1, 1], [], []>} : vector<32x16xf32>, vector<16x128xf32>, vector<32x128xf32> -> vector<32x128xf32>
    %413 = vector.extract_strided_slice %412 {offsets = [0, 1], sizes = [32, 127], strides = [1, 1]} : vector<32x128xf32> to vector<32x127xf32>
    %cst_287 = arith.constant 0.000000e+00 : f32
    %414 = vector.broadcast %cst_287 : f32 to vector<32x1xf32>
    %415 = tpu.concatenate %413, %414 in 1 : vector<32x127xf32>, vector<32x1xf32> -> vector<32x128xf32>
    %416 = arith.addf %409, %415 : vector<32x128xf32>
    %c6_288 = arith.constant 6 : index
    %c0_289 = arith.constant 0 : index
    %c0_290 = arith.constant 0 : index
    %417 = vector.load %arg12[%c6_288, %c0_289, %c0_290] : memref<9x32x16xf32, #tpu.memory_space<vmem>>, vector<1x32x16xf32>
    %418 = vector.shape_cast %417 : vector<1x32x16xf32> to vector<32x16xf32>
    %cst_291 = arith.constant dense<0.000000e+00> : vector<32x128xf32>
    %419 = tpu.matmul %418, %376, %cst_291 {dimension_numbers = #tpu.dot_dimension_numbers<[1], [0], [0], [1], [0, 0, 1, 1], [], []>} : vector<32x16xf32>, vector<16x128xf32>, vector<32x128xf32> -> vector<32x128xf32>
    %420 = vector.extract_strided_slice %419 {offsets = [0, 3], sizes = [32, 125], strides = [1, 1]} : vector<32x128xf32> to vector<32x125xf32>
    %cst_292 = arith.constant 0.000000e+00 : f32
    %421 = vector.broadcast %cst_292 : f32 to vector<32x3xf32>
    %422 = tpu.concatenate %420, %421 in 1 : vector<32x125xf32>, vector<32x3xf32> -> vector<32x128xf32>
    %423 = arith.addf %416, %422 : vector<32x128xf32>
    %c7_293 = arith.constant 7 : index
    %c0_294 = arith.constant 0 : index
    %c0_295 = arith.constant 0 : index
    %424 = vector.load %arg12[%c7_293, %c0_294, %c0_295] : memref<9x32x16xf32, #tpu.memory_space<vmem>>, vector<1x32x16xf32>
    %425 = vector.shape_cast %424 : vector<1x32x16xf32> to vector<32x16xf32>
    %cst_296 = arith.constant dense<0.000000e+00> : vector<32x128xf32>
    %426 = tpu.matmul %425, %376, %cst_296 {dimension_numbers = #tpu.dot_dimension_numbers<[1], [0], [0], [1], [0, 0, 1, 1], [], []>} : vector<32x16xf32>, vector<16x128xf32>, vector<32x128xf32> -> vector<32x128xf32>
    %427 = vector.extract_strided_slice %426 {offsets = [0, 4], sizes = [32, 124], strides = [1, 1]} : vector<32x128xf32> to vector<32x124xf32>
    %cst_297 = arith.constant 0.000000e+00 : f32
    %428 = vector.broadcast %cst_297 : f32 to vector<32x4xf32>
    %429 = tpu.concatenate %427, %428 in 1 : vector<32x124xf32>, vector<32x4xf32> -> vector<32x128xf32>
    %430 = arith.addf %423, %429 : vector<32x128xf32>
    %c8_298 = arith.constant 8 : index
    %c0_299 = arith.constant 0 : index
    %c0_300 = arith.constant 0 : index
    %431 = vector.load %arg12[%c8_298, %c0_299, %c0_300] : memref<9x32x16xf32, #tpu.memory_space<vmem>>, vector<1x32x16xf32>
    %432 = vector.shape_cast %431 : vector<1x32x16xf32> to vector<32x16xf32>
    %cst_301 = arith.constant dense<0.000000e+00> : vector<32x128xf32>
    %433 = tpu.matmul %432, %376, %cst_301 {dimension_numbers = #tpu.dot_dimension_numbers<[1], [0], [0], [1], [0, 0, 1, 1], [], []>} : vector<32x16xf32>, vector<16x128xf32>, vector<32x128xf32> -> vector<32x128xf32>
    %434 = vector.extract_strided_slice %433 {offsets = [0, 5], sizes = [32, 123], strides = [1, 1]} : vector<32x128xf32> to vector<32x123xf32>
    %cst_302 = arith.constant 0.000000e+00 : f32
    %435 = vector.broadcast %cst_302 : f32 to vector<32x5xf32>
    %436 = tpu.concatenate %434, %435 in 1 : vector<32x123xf32>, vector<32x5xf32> -> vector<32x128xf32>
    %437 = arith.addf %430, %436 : vector<32x128xf32>
    %c0_303 = arith.constant 0 : index
    %c0_304 = arith.constant 0 : index
    %438 = vector.load %arg13[%c0_303, %c0_304] : memref<32x1xf32, #tpu.memory_space<vmem>>, vector<32x1xf32>
    %439 = vector.broadcast %438 : vector<32x1xf32> to vector<32x128xf32>
    %440 = arith.addf %437, %439 : vector<32x128xf32>
    %cst_305 = arith.constant 0.000000e+00 : f32
    %441 = vector.broadcast %cst_305 : f32 to vector<32x128xf32>
    %442 = arith.maximumf %440, %441 : vector<32x128xf32>
    %c0_306 = arith.constant 0 : index
    %c0_307 = arith.constant 0 : index
    %443 = vector.load %arg37[%c0_306, %c0_307] : memref<1x128xf32, #tpu.memory_space<vmem>>, vector<1x128xf32>
    %444 = vector.broadcast %443 : vector<1x128xf32> to vector<32x128xf32>
    %445 = arith.mulf %442, %444 : vector<32x128xf32>
    %cst_308 = arith.constant 0.000000e+00 : f32
    %446 = vector.broadcast %cst_308 : f32 to vector<32x128xf32>
    %c0_309 = arith.constant 0 : index
    %c0_310 = arith.constant 0 : index
    %c0_311 = arith.constant 0 : index
    %447 = vector.load %arg14[%c0_309, %c0_310, %c0_311] : memref<9x32x32xf32, #tpu.memory_space<vmem>>, vector<1x32x32xf32>
    %448 = vector.shape_cast %447 : vector<1x32x32xf32> to vector<32x32xf32>
    %cst_312 = arith.constant dense<0.000000e+00> : vector<32x128xf32>
    %449 = tpu.matmul %448, %445, %cst_312 {dimension_numbers = #tpu.dot_dimension_numbers<[1], [0], [0], [1], [0, 0, 1, 1], [], []>} : vector<32x32xf32>, vector<32x128xf32>, vector<32x128xf32> -> vector<32x128xf32>
    %cst_313 = arith.constant 0.000000e+00 : f32
    %450 = vector.broadcast %cst_313 : f32 to vector<32x5xf32>
    %451 = vector.extract_strided_slice %449 {offsets = [0, 0], sizes = [32, 123], strides = [1, 1]} : vector<32x128xf32> to vector<32x123xf32>
    %452 = tpu.concatenate %450, %451 in 1 : vector<32x5xf32>, vector<32x123xf32> -> vector<32x128xf32>
    %453 = arith.addf %446, %452 : vector<32x128xf32>
    %c1_314 = arith.constant 1 : index
    %c0_315 = arith.constant 0 : index
    %c0_316 = arith.constant 0 : index
    %454 = vector.load %arg14[%c1_314, %c0_315, %c0_316] : memref<9x32x32xf32, #tpu.memory_space<vmem>>, vector<1x32x32xf32>
    %455 = vector.shape_cast %454 : vector<1x32x32xf32> to vector<32x32xf32>
    %cst_317 = arith.constant dense<0.000000e+00> : vector<32x128xf32>
    %456 = tpu.matmul %455, %445, %cst_317 {dimension_numbers = #tpu.dot_dimension_numbers<[1], [0], [0], [1], [0, 0, 1, 1], [], []>} : vector<32x32xf32>, vector<32x128xf32>, vector<32x128xf32> -> vector<32x128xf32>
    %cst_318 = arith.constant 0.000000e+00 : f32
    %457 = vector.broadcast %cst_318 : f32 to vector<32x4xf32>
    %458 = vector.extract_strided_slice %456 {offsets = [0, 0], sizes = [32, 124], strides = [1, 1]} : vector<32x128xf32> to vector<32x124xf32>
    %459 = tpu.concatenate %457, %458 in 1 : vector<32x4xf32>, vector<32x124xf32> -> vector<32x128xf32>
    %460 = arith.addf %453, %459 : vector<32x128xf32>
    %c2_319 = arith.constant 2 : index
    %c0_320 = arith.constant 0 : index
    %c0_321 = arith.constant 0 : index
    %461 = vector.load %arg14[%c2_319, %c0_320, %c0_321] : memref<9x32x32xf32, #tpu.memory_space<vmem>>, vector<1x32x32xf32>
    %462 = vector.shape_cast %461 : vector<1x32x32xf32> to vector<32x32xf32>
    %cst_322 = arith.constant dense<0.000000e+00> : vector<32x128xf32>
    %463 = tpu.matmul %462, %445, %cst_322 {dimension_numbers = #tpu.dot_dimension_numbers<[1], [0], [0], [1], [0, 0, 1, 1], [], []>} : vector<32x32xf32>, vector<32x128xf32>, vector<32x128xf32> -> vector<32x128xf32>
    %cst_323 = arith.constant 0.000000e+00 : f32
    %464 = vector.broadcast %cst_323 : f32 to vector<32x3xf32>
    %465 = vector.extract_strided_slice %463 {offsets = [0, 0], sizes = [32, 125], strides = [1, 1]} : vector<32x128xf32> to vector<32x125xf32>
    %466 = tpu.concatenate %464, %465 in 1 : vector<32x3xf32>, vector<32x125xf32> -> vector<32x128xf32>
    %467 = arith.addf %460, %466 : vector<32x128xf32>
    %c3_324 = arith.constant 3 : index
    %c0_325 = arith.constant 0 : index
    %c0_326 = arith.constant 0 : index
    %468 = vector.load %arg14[%c3_324, %c0_325, %c0_326] : memref<9x32x32xf32, #tpu.memory_space<vmem>>, vector<1x32x32xf32>
    %469 = vector.shape_cast %468 : vector<1x32x32xf32> to vector<32x32xf32>
    %cst_327 = arith.constant dense<0.000000e+00> : vector<32x128xf32>
    %470 = tpu.matmul %469, %445, %cst_327 {dimension_numbers = #tpu.dot_dimension_numbers<[1], [0], [0], [1], [0, 0, 1, 1], [], []>} : vector<32x32xf32>, vector<32x128xf32>, vector<32x128xf32> -> vector<32x128xf32>
    %cst_328 = arith.constant 0.000000e+00 : f32
    %471 = vector.broadcast %cst_328 : f32 to vector<32x1xf32>
    %472 = vector.extract_strided_slice %470 {offsets = [0, 0], sizes = [32, 127], strides = [1, 1]} : vector<32x128xf32> to vector<32x127xf32>
    %473 = tpu.concatenate %471, %472 in 1 : vector<32x1xf32>, vector<32x127xf32> -> vector<32x128xf32>
    %474 = arith.addf %467, %473 : vector<32x128xf32>
    %c4_329 = arith.constant 4 : index
    %c0_330 = arith.constant 0 : index
    %c0_331 = arith.constant 0 : index
    %475 = vector.load %arg14[%c4_329, %c0_330, %c0_331] : memref<9x32x32xf32, #tpu.memory_space<vmem>>, vector<1x32x32xf32>
    %476 = vector.shape_cast %475 : vector<1x32x32xf32> to vector<32x32xf32>
    %cst_332 = arith.constant dense<0.000000e+00> : vector<32x128xf32>
    %477 = tpu.matmul %476, %445, %cst_332 {dimension_numbers = #tpu.dot_dimension_numbers<[1], [0], [0], [1], [0, 0, 1, 1], [], []>} : vector<32x32xf32>, vector<32x128xf32>, vector<32x128xf32> -> vector<32x128xf32>
    %478 = arith.addf %474, %477 : vector<32x128xf32>
    %c5_333 = arith.constant 5 : index
    %c0_334 = arith.constant 0 : index
    %c0_335 = arith.constant 0 : index
    %479 = vector.load %arg14[%c5_333, %c0_334, %c0_335] : memref<9x32x32xf32, #tpu.memory_space<vmem>>, vector<1x32x32xf32>
    %480 = vector.shape_cast %479 : vector<1x32x32xf32> to vector<32x32xf32>
    %cst_336 = arith.constant dense<0.000000e+00> : vector<32x128xf32>
    %481 = tpu.matmul %480, %445, %cst_336 {dimension_numbers = #tpu.dot_dimension_numbers<[1], [0], [0], [1], [0, 0, 1, 1], [], []>} : vector<32x32xf32>, vector<32x128xf32>, vector<32x128xf32> -> vector<32x128xf32>
    %482 = vector.extract_strided_slice %481 {offsets = [0, 1], sizes = [32, 127], strides = [1, 1]} : vector<32x128xf32> to vector<32x127xf32>
    %cst_337 = arith.constant 0.000000e+00 : f32
    %483 = vector.broadcast %cst_337 : f32 to vector<32x1xf32>
    %484 = tpu.concatenate %482, %483 in 1 : vector<32x127xf32>, vector<32x1xf32> -> vector<32x128xf32>
    %485 = arith.addf %478, %484 : vector<32x128xf32>
    %c6_338 = arith.constant 6 : index
    %c0_339 = arith.constant 0 : index
    %c0_340 = arith.constant 0 : index
    %486 = vector.load %arg14[%c6_338, %c0_339, %c0_340] : memref<9x32x32xf32, #tpu.memory_space<vmem>>, vector<1x32x32xf32>
    %487 = vector.shape_cast %486 : vector<1x32x32xf32> to vector<32x32xf32>
    %cst_341 = arith.constant dense<0.000000e+00> : vector<32x128xf32>
    %488 = tpu.matmul %487, %445, %cst_341 {dimension_numbers = #tpu.dot_dimension_numbers<[1], [0], [0], [1], [0, 0, 1, 1], [], []>} : vector<32x32xf32>, vector<32x128xf32>, vector<32x128xf32> -> vector<32x128xf32>
    %489 = vector.extract_strided_slice %488 {offsets = [0, 3], sizes = [32, 125], strides = [1, 1]} : vector<32x128xf32> to vector<32x125xf32>
    %cst_342 = arith.constant 0.000000e+00 : f32
    %490 = vector.broadcast %cst_342 : f32 to vector<32x3xf32>
    %491 = tpu.concatenate %489, %490 in 1 : vector<32x125xf32>, vector<32x3xf32> -> vector<32x128xf32>
    %492 = arith.addf %485, %491 : vector<32x128xf32>
    %c7_343 = arith.constant 7 : index
    %c0_344 = arith.constant 0 : index
    %c0_345 = arith.constant 0 : index
    %493 = vector.load %arg14[%c7_343, %c0_344, %c0_345] : memref<9x32x32xf32, #tpu.memory_space<vmem>>, vector<1x32x32xf32>
    %494 = vector.shape_cast %493 : vector<1x32x32xf32> to vector<32x32xf32>
    %cst_346 = arith.constant dense<0.000000e+00> : vector<32x128xf32>
    %495 = tpu.matmul %494, %445, %cst_346 {dimension_numbers = #tpu.dot_dimension_numbers<[1], [0], [0], [1], [0, 0, 1, 1], [], []>} : vector<32x32xf32>, vector<32x128xf32>, vector<32x128xf32> -> vector<32x128xf32>
    %496 = vector.extract_strided_slice %495 {offsets = [0, 4], sizes = [32, 124], strides = [1, 1]} : vector<32x128xf32> to vector<32x124xf32>
    %cst_347 = arith.constant 0.000000e+00 : f32
    %497 = vector.broadcast %cst_347 : f32 to vector<32x4xf32>
    %498 = tpu.concatenate %496, %497 in 1 : vector<32x124xf32>, vector<32x4xf32> -> vector<32x128xf32>
    %499 = arith.addf %492, %498 : vector<32x128xf32>
    %c8_348 = arith.constant 8 : index
    %c0_349 = arith.constant 0 : index
    %c0_350 = arith.constant 0 : index
    %500 = vector.load %arg14[%c8_348, %c0_349, %c0_350] : memref<9x32x32xf32, #tpu.memory_space<vmem>>, vector<1x32x32xf32>
    %501 = vector.shape_cast %500 : vector<1x32x32xf32> to vector<32x32xf32>
    %cst_351 = arith.constant dense<0.000000e+00> : vector<32x128xf32>
    %502 = tpu.matmul %501, %445, %cst_351 {dimension_numbers = #tpu.dot_dimension_numbers<[1], [0], [0], [1], [0, 0, 1, 1], [], []>} : vector<32x32xf32>, vector<32x128xf32>, vector<32x128xf32> -> vector<32x128xf32>
    %503 = vector.extract_strided_slice %502 {offsets = [0, 5], sizes = [32, 123], strides = [1, 1]} : vector<32x128xf32> to vector<32x123xf32>
    %cst_352 = arith.constant 0.000000e+00 : f32
    %504 = vector.broadcast %cst_352 : f32 to vector<32x5xf32>
    %505 = tpu.concatenate %503, %504 in 1 : vector<32x123xf32>, vector<32x5xf32> -> vector<32x128xf32>
    %506 = arith.addf %499, %505 : vector<32x128xf32>
    %c0_353 = arith.constant 0 : index
    %c0_354 = arith.constant 0 : index
    %507 = vector.load %arg15[%c0_353, %c0_354] : memref<32x1xf32, #tpu.memory_space<vmem>>, vector<32x1xf32>
    %508 = vector.broadcast %507 : vector<32x1xf32> to vector<32x128xf32>
    %509 = arith.addf %506, %508 : vector<32x128xf32>
    %cst_355 = arith.constant 0.000000e+00 : f32
    %510 = vector.broadcast %cst_355 : f32 to vector<32x128xf32>
    %511 = arith.maximumf %509, %510 : vector<32x128xf32>
    %c0_356 = arith.constant 0 : index
    %c0_357 = arith.constant 0 : index
    %512 = vector.load %arg37[%c0_356, %c0_357] : memref<1x128xf32, #tpu.memory_space<vmem>>, vector<1x128xf32>
    %513 = vector.broadcast %512 : vector<1x128xf32> to vector<32x128xf32>
    %514 = arith.mulf %511, %513 : vector<32x128xf32>
    %515 = vector.extract_strided_slice %514 {offsets = [0, 1], sizes = [32, 127], strides = [1, 1]} : vector<32x128xf32> to vector<32x127xf32>
    %cst_358 = arith.constant 0.000000e+00 : f32
    %516 = vector.broadcast %cst_358 : f32 to vector<32x1xf32>
    %517 = tpu.concatenate %515, %516 in 1 : vector<32x127xf32>, vector<32x1xf32> -> vector<32x128xf32>
    %518 = arith.maximumf %514, %517 : vector<32x128xf32>
    %519 = vector.extract_strided_slice %518 {offsets = [0, 4], sizes = [32, 124], strides = [1, 1]} : vector<32x128xf32> to vector<32x124xf32>
    %cst_359 = arith.constant 0.000000e+00 : f32
    %520 = vector.broadcast %cst_359 : f32 to vector<32x4xf32>
    %521 = tpu.concatenate %519, %520 in 1 : vector<32x124xf32>, vector<32x4xf32> -> vector<32x128xf32>
    %522 = arith.maximumf %518, %521 : vector<32x128xf32>
    %c0_360 = arith.constant 0 : index
    %c0_361 = arith.constant 0 : index
    %523 = vector.load %arg42[%c0_360, %c0_361] : memref<128x128xf32, #tpu.memory_space<vmem>>, vector<128x128xf32>
    %cst_362 = arith.constant dense<0.000000e+00> : vector<32x128xf32>
    %524 = tpu.matmul %522, %523, %cst_362 {dimension_numbers = #tpu.dot_dimension_numbers<[1], [0], [0], [1], [0, 0, 1, 1], [], []>} : vector<32x128xf32>, vector<128x128xf32>, vector<32x128xf32> -> vector<32x128xf32>
    %cst_363 = arith.constant 0.000000e+00 : f32
    %525 = vector.broadcast %cst_363 : f32 to vector<64x128xf32>
    %c4_364 = arith.constant 4 : index
    %c0_365 = arith.constant 0 : index
    %c0_366 = arith.constant 0 : index
    %526 = vector.load %arg16[%c4_364, %c0_365, %c0_366] : memref<9x64x32xf32, #tpu.memory_space<vmem>>, vector<1x64x32xf32>
    %527 = vector.shape_cast %526 : vector<1x64x32xf32> to vector<64x32xf32>
    %cst_367 = arith.constant dense<0.000000e+00> : vector<64x128xf32>
    %528 = tpu.matmul %527, %524, %cst_367 {dimension_numbers = #tpu.dot_dimension_numbers<[1], [0], [0], [1], [0, 0, 1, 1], [], []>} : vector<64x32xf32>, vector<32x128xf32>, vector<64x128xf32> -> vector<64x128xf32>
    %529 = arith.addf %525, %528 : vector<64x128xf32>
    %c0_368 = arith.constant 0 : index
    %c0_369 = arith.constant 0 : index
    %530 = vector.load %arg17[%c0_368, %c0_369] : memref<64x1xf32, #tpu.memory_space<vmem>>, vector<64x1xf32>
    %531 = vector.broadcast %530 : vector<64x1xf32> to vector<64x128xf32>
    %532 = arith.addf %529, %531 : vector<64x128xf32>
    %cst_370 = arith.constant 0.000000e+00 : f32
    %533 = vector.broadcast %cst_370 : f32 to vector<64x128xf32>
    %534 = arith.maximumf %532, %533 : vector<64x128xf32>
    %c0_371 = arith.constant 0 : index
    %c0_372 = arith.constant 0 : index
    %535 = vector.load %arg38[%c0_371, %c0_372] : memref<1x128xf32, #tpu.memory_space<vmem>>, vector<1x128xf32>
    %536 = vector.broadcast %535 : vector<1x128xf32> to vector<64x128xf32>
    %537 = arith.mulf %534, %536 : vector<64x128xf32>
    %cst_373 = arith.constant 0.000000e+00 : f32
    %538 = vector.broadcast %cst_373 : f32 to vector<64x128xf32>
    %c4_374 = arith.constant 4 : index
    %c0_375 = arith.constant 0 : index
    %c0_376 = arith.constant 0 : index
    %539 = vector.load %arg18[%c4_374, %c0_375, %c0_376] : memref<9x64x64xf32, #tpu.memory_space<vmem>>, vector<1x64x64xf32>
    %540 = vector.shape_cast %539 : vector<1x64x64xf32> to vector<64x64xf32>
    %cst_377 = arith.constant dense<0.000000e+00> : vector<64x128xf32>
    %541 = tpu.matmul %540, %537, %cst_377 {dimension_numbers = #tpu.dot_dimension_numbers<[1], [0], [0], [1], [0, 0, 1, 1], [], []>} : vector<64x64xf32>, vector<64x128xf32>, vector<64x128xf32> -> vector<64x128xf32>
    %542 = arith.addf %538, %541 : vector<64x128xf32>
    %c0_378 = arith.constant 0 : index
    %c0_379 = arith.constant 0 : index
    %543 = vector.load %arg19[%c0_378, %c0_379] : memref<64x1xf32, #tpu.memory_space<vmem>>, vector<64x1xf32>
    %544 = vector.broadcast %543 : vector<64x1xf32> to vector<64x128xf32>
    %545 = arith.addf %542, %544 : vector<64x128xf32>
    %cst_380 = arith.constant 0.000000e+00 : f32
    %546 = vector.broadcast %cst_380 : f32 to vector<64x128xf32>
    %547 = arith.maximumf %545, %546 : vector<64x128xf32>
    %c0_381 = arith.constant 0 : index
    %c0_382 = arith.constant 0 : index
    %548 = vector.load %arg38[%c0_381, %c0_382] : memref<1x128xf32, #tpu.memory_space<vmem>>, vector<1x128xf32>
    %549 = vector.broadcast %548 : vector<1x128xf32> to vector<64x128xf32>
    %550 = arith.mulf %547, %549 : vector<64x128xf32>
    %c0_383 = arith.constant 0 : index
    %c0_384 = arith.constant 0 : index
    %551 = vector.load %arg43[%c0_383, %c0_384] : memref<128x128xf32, #tpu.memory_space<vmem>>, vector<128x128xf32>
    %cst_385 = arith.constant dense<0.000000e+00> : vector<64x128xf32>
    %552 = tpu.matmul %550, %551, %cst_385 {dimension_numbers = #tpu.dot_dimension_numbers<[1], [0], [0], [1], [0, 0, 1, 1], [], []>} : vector<64x128xf32>, vector<128x128xf32>, vector<64x128xf32> -> vector<64x128xf32>
    %cst_386 = arith.constant 0.000000e+00 : f32
    %553 = vector.broadcast %cst_386 : f32 to vector<32x128xf32>
    %c0_387 = arith.constant 0 : index
    %c0_388 = arith.constant 0 : index
    %c0_389 = arith.constant 0 : index
    %554 = vector.load %arg20[%c0_387, %c0_388, %c0_389] : memref<9x32x32xf32, #tpu.memory_space<vmem>>, vector<1x32x32xf32>
    %555 = vector.shape_cast %554 : vector<1x32x32xf32> to vector<32x32xf32>
    %cst_390 = arith.constant dense<0.000000e+00> : vector<32x128xf32>
    %556 = tpu.matmul %555, %514, %cst_390 {dimension_numbers = #tpu.dot_dimension_numbers<[1], [0], [0], [1], [0, 0, 1, 1], [], []>} : vector<32x32xf32>, vector<32x128xf32>, vector<32x128xf32> -> vector<32x128xf32>
    %cst_391 = arith.constant 0.000000e+00 : f32
    %557 = vector.broadcast %cst_391 : f32 to vector<32x5xf32>
    %558 = vector.extract_strided_slice %556 {offsets = [0, 0], sizes = [32, 123], strides = [1, 1]} : vector<32x128xf32> to vector<32x123xf32>
    %559 = tpu.concatenate %557, %558 in 1 : vector<32x5xf32>, vector<32x123xf32> -> vector<32x128xf32>
    %560 = arith.addf %553, %559 : vector<32x128xf32>
    %c1_392 = arith.constant 1 : index
    %c0_393 = arith.constant 0 : index
    %c0_394 = arith.constant 0 : index
    %561 = vector.load %arg20[%c1_392, %c0_393, %c0_394] : memref<9x32x32xf32, #tpu.memory_space<vmem>>, vector<1x32x32xf32>
    %562 = vector.shape_cast %561 : vector<1x32x32xf32> to vector<32x32xf32>
    %cst_395 = arith.constant dense<0.000000e+00> : vector<32x128xf32>
    %563 = tpu.matmul %562, %514, %cst_395 {dimension_numbers = #tpu.dot_dimension_numbers<[1], [0], [0], [1], [0, 0, 1, 1], [], []>} : vector<32x32xf32>, vector<32x128xf32>, vector<32x128xf32> -> vector<32x128xf32>
    %cst_396 = arith.constant 0.000000e+00 : f32
    %564 = vector.broadcast %cst_396 : f32 to vector<32x4xf32>
    %565 = vector.extract_strided_slice %563 {offsets = [0, 0], sizes = [32, 124], strides = [1, 1]} : vector<32x128xf32> to vector<32x124xf32>
    %566 = tpu.concatenate %564, %565 in 1 : vector<32x4xf32>, vector<32x124xf32> -> vector<32x128xf32>
    %567 = arith.addf %560, %566 : vector<32x128xf32>
    %c2_397 = arith.constant 2 : index
    %c0_398 = arith.constant 0 : index
    %c0_399 = arith.constant 0 : index
    %568 = vector.load %arg20[%c2_397, %c0_398, %c0_399] : memref<9x32x32xf32, #tpu.memory_space<vmem>>, vector<1x32x32xf32>
    %569 = vector.shape_cast %568 : vector<1x32x32xf32> to vector<32x32xf32>
    %cst_400 = arith.constant dense<0.000000e+00> : vector<32x128xf32>
    %570 = tpu.matmul %569, %514, %cst_400 {dimension_numbers = #tpu.dot_dimension_numbers<[1], [0], [0], [1], [0, 0, 1, 1], [], []>} : vector<32x32xf32>, vector<32x128xf32>, vector<32x128xf32> -> vector<32x128xf32>
    %cst_401 = arith.constant 0.000000e+00 : f32
    %571 = vector.broadcast %cst_401 : f32 to vector<32x3xf32>
    %572 = vector.extract_strided_slice %570 {offsets = [0, 0], sizes = [32, 125], strides = [1, 1]} : vector<32x128xf32> to vector<32x125xf32>
    %573 = tpu.concatenate %571, %572 in 1 : vector<32x3xf32>, vector<32x125xf32> -> vector<32x128xf32>
    %574 = arith.addf %567, %573 : vector<32x128xf32>
    %c3_402 = arith.constant 3 : index
    %c0_403 = arith.constant 0 : index
    %c0_404 = arith.constant 0 : index
    %575 = vector.load %arg20[%c3_402, %c0_403, %c0_404] : memref<9x32x32xf32, #tpu.memory_space<vmem>>, vector<1x32x32xf32>
    %576 = vector.shape_cast %575 : vector<1x32x32xf32> to vector<32x32xf32>
    %cst_405 = arith.constant dense<0.000000e+00> : vector<32x128xf32>
    %577 = tpu.matmul %576, %514, %cst_405 {dimension_numbers = #tpu.dot_dimension_numbers<[1], [0], [0], [1], [0, 0, 1, 1], [], []>} : vector<32x32xf32>, vector<32x128xf32>, vector<32x128xf32> -> vector<32x128xf32>
    %cst_406 = arith.constant 0.000000e+00 : f32
    %578 = vector.broadcast %cst_406 : f32 to vector<32x1xf32>
    %579 = vector.extract_strided_slice %577 {offsets = [0, 0], sizes = [32, 127], strides = [1, 1]} : vector<32x128xf32> to vector<32x127xf32>
    %580 = tpu.concatenate %578, %579 in 1 : vector<32x1xf32>, vector<32x127xf32> -> vector<32x128xf32>
    %581 = arith.addf %574, %580 : vector<32x128xf32>
    %c4_407 = arith.constant 4 : index
    %c0_408 = arith.constant 0 : index
    %c0_409 = arith.constant 0 : index
    %582 = vector.load %arg20[%c4_407, %c0_408, %c0_409] : memref<9x32x32xf32, #tpu.memory_space<vmem>>, vector<1x32x32xf32>
    %583 = vector.shape_cast %582 : vector<1x32x32xf32> to vector<32x32xf32>
    %cst_410 = arith.constant dense<0.000000e+00> : vector<32x128xf32>
    %584 = tpu.matmul %583, %514, %cst_410 {dimension_numbers = #tpu.dot_dimension_numbers<[1], [0], [0], [1], [0, 0, 1, 1], [], []>} : vector<32x32xf32>, vector<32x128xf32>, vector<32x128xf32> -> vector<32x128xf32>
    %585 = arith.addf %581, %584 : vector<32x128xf32>
    %c5_411 = arith.constant 5 : index
    %c0_412 = arith.constant 0 : index
    %c0_413 = arith.constant 0 : index
    %586 = vector.load %arg20[%c5_411, %c0_412, %c0_413] : memref<9x32x32xf32, #tpu.memory_space<vmem>>, vector<1x32x32xf32>
    %587 = vector.shape_cast %586 : vector<1x32x32xf32> to vector<32x32xf32>
    %cst_414 = arith.constant dense<0.000000e+00> : vector<32x128xf32>
    %588 = tpu.matmul %587, %514, %cst_414 {dimension_numbers = #tpu.dot_dimension_numbers<[1], [0], [0], [1], [0, 0, 1, 1], [], []>} : vector<32x32xf32>, vector<32x128xf32>, vector<32x128xf32> -> vector<32x128xf32>
    %589 = vector.extract_strided_slice %588 {offsets = [0, 1], sizes = [32, 127], strides = [1, 1]} : vector<32x128xf32> to vector<32x127xf32>
    %cst_415 = arith.constant 0.000000e+00 : f32
    %590 = vector.broadcast %cst_415 : f32 to vector<32x1xf32>
    %591 = tpu.concatenate %589, %590 in 1 : vector<32x127xf32>, vector<32x1xf32> -> vector<32x128xf32>
    %592 = arith.addf %585, %591 : vector<32x128xf32>
    %c6_416 = arith.constant 6 : index
    %c0_417 = arith.constant 0 : index
    %c0_418 = arith.constant 0 : index
    %593 = vector.load %arg20[%c6_416, %c0_417, %c0_418] : memref<9x32x32xf32, #tpu.memory_space<vmem>>, vector<1x32x32xf32>
    %594 = vector.shape_cast %593 : vector<1x32x32xf32> to vector<32x32xf32>
    %cst_419 = arith.constant dense<0.000000e+00> : vector<32x128xf32>
    %595 = tpu.matmul %594, %514, %cst_419 {dimension_numbers = #tpu.dot_dimension_numbers<[1], [0], [0], [1], [0, 0, 1, 1], [], []>} : vector<32x32xf32>, vector<32x128xf32>, vector<32x128xf32> -> vector<32x128xf32>
    %596 = vector.extract_strided_slice %595 {offsets = [0, 3], sizes = [32, 125], strides = [1, 1]} : vector<32x128xf32> to vector<32x125xf32>
    %cst_420 = arith.constant 0.000000e+00 : f32
    %597 = vector.broadcast %cst_420 : f32 to vector<32x3xf32>
    %598 = tpu.concatenate %596, %597 in 1 : vector<32x125xf32>, vector<32x3xf32> -> vector<32x128xf32>
    %599 = arith.addf %592, %598 : vector<32x128xf32>
    %c7_421 = arith.constant 7 : index
    %c0_422 = arith.constant 0 : index
    %c0_423 = arith.constant 0 : index
    %600 = vector.load %arg20[%c7_421, %c0_422, %c0_423] : memref<9x32x32xf32, #tpu.memory_space<vmem>>, vector<1x32x32xf32>
    %601 = vector.shape_cast %600 : vector<1x32x32xf32> to vector<32x32xf32>
    %cst_424 = arith.constant dense<0.000000e+00> : vector<32x128xf32>
    %602 = tpu.matmul %601, %514, %cst_424 {dimension_numbers = #tpu.dot_dimension_numbers<[1], [0], [0], [1], [0, 0, 1, 1], [], []>} : vector<32x32xf32>, vector<32x128xf32>, vector<32x128xf32> -> vector<32x128xf32>
    %603 = vector.extract_strided_slice %602 {offsets = [0, 4], sizes = [32, 124], strides = [1, 1]} : vector<32x128xf32> to vector<32x124xf32>
    %cst_425 = arith.constant 0.000000e+00 : f32
    %604 = vector.broadcast %cst_425 : f32 to vector<32x4xf32>
    %605 = tpu.concatenate %603, %604 in 1 : vector<32x124xf32>, vector<32x4xf32> -> vector<32x128xf32>
    %606 = arith.addf %599, %605 : vector<32x128xf32>
    %c8_426 = arith.constant 8 : index
    %c0_427 = arith.constant 0 : index
    %c0_428 = arith.constant 0 : index
    %607 = vector.load %arg20[%c8_426, %c0_427, %c0_428] : memref<9x32x32xf32, #tpu.memory_space<vmem>>, vector<1x32x32xf32>
    %608 = vector.shape_cast %607 : vector<1x32x32xf32> to vector<32x32xf32>
    %cst_429 = arith.constant dense<0.000000e+00> : vector<32x128xf32>
    %609 = tpu.matmul %608, %514, %cst_429 {dimension_numbers = #tpu.dot_dimension_numbers<[1], [0], [0], [1], [0, 0, 1, 1], [], []>} : vector<32x32xf32>, vector<32x128xf32>, vector<32x128xf32> -> vector<32x128xf32>
    %610 = vector.extract_strided_slice %609 {offsets = [0, 5], sizes = [32, 123], strides = [1, 1]} : vector<32x128xf32> to vector<32x123xf32>
    %cst_430 = arith.constant 0.000000e+00 : f32
    %611 = vector.broadcast %cst_430 : f32 to vector<32x5xf32>
    %612 = tpu.concatenate %610, %611 in 1 : vector<32x123xf32>, vector<32x5xf32> -> vector<32x128xf32>
    %613 = arith.addf %606, %612 : vector<32x128xf32>
    %c0_431 = arith.constant 0 : index
    %c0_432 = arith.constant 0 : index
    %c0_433 = arith.constant 0 : index
    %614 = vector.load %arg21[%c0_431, %c0_432, %c0_433] : memref<9x32x64xf32, #tpu.memory_space<vmem>>, vector<1x32x64xf32>
    %615 = vector.shape_cast %614 : vector<1x32x64xf32> to vector<32x64xf32>
    %cst_434 = arith.constant dense<0.000000e+00> : vector<32x128xf32>
    %616 = tpu.matmul %615, %552, %cst_434 {dimension_numbers = #tpu.dot_dimension_numbers<[1], [0], [0], [1], [0, 0, 1, 1], [], []>} : vector<32x64xf32>, vector<64x128xf32>, vector<32x128xf32> -> vector<32x128xf32>
    %cst_435 = arith.constant 0.000000e+00 : f32
    %617 = vector.broadcast %cst_435 : f32 to vector<32x5xf32>
    %618 = vector.extract_strided_slice %616 {offsets = [0, 0], sizes = [32, 123], strides = [1, 1]} : vector<32x128xf32> to vector<32x123xf32>
    %619 = tpu.concatenate %617, %618 in 1 : vector<32x5xf32>, vector<32x123xf32> -> vector<32x128xf32>
    %620 = arith.addf %613, %619 : vector<32x128xf32>
    %c1_436 = arith.constant 1 : index
    %c0_437 = arith.constant 0 : index
    %c0_438 = arith.constant 0 : index
    %621 = vector.load %arg21[%c1_436, %c0_437, %c0_438] : memref<9x32x64xf32, #tpu.memory_space<vmem>>, vector<1x32x64xf32>
    %622 = vector.shape_cast %621 : vector<1x32x64xf32> to vector<32x64xf32>
    %cst_439 = arith.constant dense<0.000000e+00> : vector<32x128xf32>
    %623 = tpu.matmul %622, %552, %cst_439 {dimension_numbers = #tpu.dot_dimension_numbers<[1], [0], [0], [1], [0, 0, 1, 1], [], []>} : vector<32x64xf32>, vector<64x128xf32>, vector<32x128xf32> -> vector<32x128xf32>
    %cst_440 = arith.constant 0.000000e+00 : f32
    %624 = vector.broadcast %cst_440 : f32 to vector<32x4xf32>
    %625 = vector.extract_strided_slice %623 {offsets = [0, 0], sizes = [32, 124], strides = [1, 1]} : vector<32x128xf32> to vector<32x124xf32>
    %626 = tpu.concatenate %624, %625 in 1 : vector<32x4xf32>, vector<32x124xf32> -> vector<32x128xf32>
    %627 = arith.addf %620, %626 : vector<32x128xf32>
    %c2_441 = arith.constant 2 : index
    %c0_442 = arith.constant 0 : index
    %c0_443 = arith.constant 0 : index
    %628 = vector.load %arg21[%c2_441, %c0_442, %c0_443] : memref<9x32x64xf32, #tpu.memory_space<vmem>>, vector<1x32x64xf32>
    %629 = vector.shape_cast %628 : vector<1x32x64xf32> to vector<32x64xf32>
    %cst_444 = arith.constant dense<0.000000e+00> : vector<32x128xf32>
    %630 = tpu.matmul %629, %552, %cst_444 {dimension_numbers = #tpu.dot_dimension_numbers<[1], [0], [0], [1], [0, 0, 1, 1], [], []>} : vector<32x64xf32>, vector<64x128xf32>, vector<32x128xf32> -> vector<32x128xf32>
    %cst_445 = arith.constant 0.000000e+00 : f32
    %631 = vector.broadcast %cst_445 : f32 to vector<32x3xf32>
    %632 = vector.extract_strided_slice %630 {offsets = [0, 0], sizes = [32, 125], strides = [1, 1]} : vector<32x128xf32> to vector<32x125xf32>
    %633 = tpu.concatenate %631, %632 in 1 : vector<32x3xf32>, vector<32x125xf32> -> vector<32x128xf32>
    %634 = arith.addf %627, %633 : vector<32x128xf32>
    %c3_446 = arith.constant 3 : index
    %c0_447 = arith.constant 0 : index
    %c0_448 = arith.constant 0 : index
    %635 = vector.load %arg21[%c3_446, %c0_447, %c0_448] : memref<9x32x64xf32, #tpu.memory_space<vmem>>, vector<1x32x64xf32>
    %636 = vector.shape_cast %635 : vector<1x32x64xf32> to vector<32x64xf32>
    %cst_449 = arith.constant dense<0.000000e+00> : vector<32x128xf32>
    %637 = tpu.matmul %636, %552, %cst_449 {dimension_numbers = #tpu.dot_dimension_numbers<[1], [0], [0], [1], [0, 0, 1, 1], [], []>} : vector<32x64xf32>, vector<64x128xf32>, vector<32x128xf32> -> vector<32x128xf32>
    %cst_450 = arith.constant 0.000000e+00 : f32
    %638 = vector.broadcast %cst_450 : f32 to vector<32x1xf32>
    %639 = vector.extract_strided_slice %637 {offsets = [0, 0], sizes = [32, 127], strides = [1, 1]} : vector<32x128xf32> to vector<32x127xf32>
    %640 = tpu.concatenate %638, %639 in 1 : vector<32x1xf32>, vector<32x127xf32> -> vector<32x128xf32>
    %641 = arith.addf %634, %640 : vector<32x128xf32>
    %c4_451 = arith.constant 4 : index
    %c0_452 = arith.constant 0 : index
    %c0_453 = arith.constant 0 : index
    %642 = vector.load %arg21[%c4_451, %c0_452, %c0_453] : memref<9x32x64xf32, #tpu.memory_space<vmem>>, vector<1x32x64xf32>
    %643 = vector.shape_cast %642 : vector<1x32x64xf32> to vector<32x64xf32>
    %cst_454 = arith.constant dense<0.000000e+00> : vector<32x128xf32>
    %644 = tpu.matmul %643, %552, %cst_454 {dimension_numbers = #tpu.dot_dimension_numbers<[1], [0], [0], [1], [0, 0, 1, 1], [], []>} : vector<32x64xf32>, vector<64x128xf32>, vector<32x128xf32> -> vector<32x128xf32>
    %645 = arith.addf %641, %644 : vector<32x128xf32>
    %c5_455 = arith.constant 5 : index
    %c0_456 = arith.constant 0 : index
    %c0_457 = arith.constant 0 : index
    %646 = vector.load %arg21[%c5_455, %c0_456, %c0_457] : memref<9x32x64xf32, #tpu.memory_space<vmem>>, vector<1x32x64xf32>
    %647 = vector.shape_cast %646 : vector<1x32x64xf32> to vector<32x64xf32>
    %cst_458 = arith.constant dense<0.000000e+00> : vector<32x128xf32>
    %648 = tpu.matmul %647, %552, %cst_458 {dimension_numbers = #tpu.dot_dimension_numbers<[1], [0], [0], [1], [0, 0, 1, 1], [], []>} : vector<32x64xf32>, vector<64x128xf32>, vector<32x128xf32> -> vector<32x128xf32>
    %649 = vector.extract_strided_slice %648 {offsets = [0, 1], sizes = [32, 127], strides = [1, 1]} : vector<32x128xf32> to vector<32x127xf32>
    %cst_459 = arith.constant 0.000000e+00 : f32
    %650 = vector.broadcast %cst_459 : f32 to vector<32x1xf32>
    %651 = tpu.concatenate %649, %650 in 1 : vector<32x127xf32>, vector<32x1xf32> -> vector<32x128xf32>
    %652 = arith.addf %645, %651 : vector<32x128xf32>
    %c6_460 = arith.constant 6 : index
    %c0_461 = arith.constant 0 : index
    %c0_462 = arith.constant 0 : index
    %653 = vector.load %arg21[%c6_460, %c0_461, %c0_462] : memref<9x32x64xf32, #tpu.memory_space<vmem>>, vector<1x32x64xf32>
    %654 = vector.shape_cast %653 : vector<1x32x64xf32> to vector<32x64xf32>
    %cst_463 = arith.constant dense<0.000000e+00> : vector<32x128xf32>
    %655 = tpu.matmul %654, %552, %cst_463 {dimension_numbers = #tpu.dot_dimension_numbers<[1], [0], [0], [1], [0, 0, 1, 1], [], []>} : vector<32x64xf32>, vector<64x128xf32>, vector<32x128xf32> -> vector<32x128xf32>
    %656 = vector.extract_strided_slice %655 {offsets = [0, 3], sizes = [32, 125], strides = [1, 1]} : vector<32x128xf32> to vector<32x125xf32>
    %cst_464 = arith.constant 0.000000e+00 : f32
    %657 = vector.broadcast %cst_464 : f32 to vector<32x3xf32>
    %658 = tpu.concatenate %656, %657 in 1 : vector<32x125xf32>, vector<32x3xf32> -> vector<32x128xf32>
    %659 = arith.addf %652, %658 : vector<32x128xf32>
    %c7_465 = arith.constant 7 : index
    %c0_466 = arith.constant 0 : index
    %c0_467 = arith.constant 0 : index
    %660 = vector.load %arg21[%c7_465, %c0_466, %c0_467] : memref<9x32x64xf32, #tpu.memory_space<vmem>>, vector<1x32x64xf32>
    %661 = vector.shape_cast %660 : vector<1x32x64xf32> to vector<32x64xf32>
    %cst_468 = arith.constant dense<0.000000e+00> : vector<32x128xf32>
    %662 = tpu.matmul %661, %552, %cst_468 {dimension_numbers = #tpu.dot_dimension_numbers<[1], [0], [0], [1], [0, 0, 1, 1], [], []>} : vector<32x64xf32>, vector<64x128xf32>, vector<32x128xf32> -> vector<32x128xf32>
    %663 = vector.extract_strided_slice %662 {offsets = [0, 4], sizes = [32, 124], strides = [1, 1]} : vector<32x128xf32> to vector<32x124xf32>
    %cst_469 = arith.constant 0.000000e+00 : f32
    %664 = vector.broadcast %cst_469 : f32 to vector<32x4xf32>
    %665 = tpu.concatenate %663, %664 in 1 : vector<32x124xf32>, vector<32x4xf32> -> vector<32x128xf32>
    %666 = arith.addf %659, %665 : vector<32x128xf32>
    %c8_470 = arith.constant 8 : index
    %c0_471 = arith.constant 0 : index
    %c0_472 = arith.constant 0 : index
    %667 = vector.load %arg21[%c8_470, %c0_471, %c0_472] : memref<9x32x64xf32, #tpu.memory_space<vmem>>, vector<1x32x64xf32>
    %668 = vector.shape_cast %667 : vector<1x32x64xf32> to vector<32x64xf32>
    %cst_473 = arith.constant dense<0.000000e+00> : vector<32x128xf32>
    %669 = tpu.matmul %668, %552, %cst_473 {dimension_numbers = #tpu.dot_dimension_numbers<[1], [0], [0], [1], [0, 0, 1, 1], [], []>} : vector<32x64xf32>, vector<64x128xf32>, vector<32x128xf32> -> vector<32x128xf32>
    %670 = vector.extract_strided_slice %669 {offsets = [0, 5], sizes = [32, 123], strides = [1, 1]} : vector<32x128xf32> to vector<32x123xf32>
    %cst_474 = arith.constant 0.000000e+00 : f32
    %671 = vector.broadcast %cst_474 : f32 to vector<32x5xf32>
    %672 = tpu.concatenate %670, %671 in 1 : vector<32x123xf32>, vector<32x5xf32> -> vector<32x128xf32>
    %673 = arith.addf %666, %672 : vector<32x128xf32>
    %c0_475 = arith.constant 0 : index
    %c0_476 = arith.constant 0 : index
    %674 = vector.load %arg22[%c0_475, %c0_476] : memref<32x1xf32, #tpu.memory_space<vmem>>, vector<32x1xf32>
    %675 = vector.broadcast %674 : vector<32x1xf32> to vector<32x128xf32>
    %676 = arith.addf %673, %675 : vector<32x128xf32>
    %cst_477 = arith.constant 0.000000e+00 : f32
    %677 = vector.broadcast %cst_477 : f32 to vector<32x128xf32>
    %678 = arith.maximumf %676, %677 : vector<32x128xf32>
    %c0_478 = arith.constant 0 : index
    %c0_479 = arith.constant 0 : index
    %679 = vector.load %arg37[%c0_478, %c0_479] : memref<1x128xf32, #tpu.memory_space<vmem>>, vector<1x128xf32>
    %680 = vector.broadcast %679 : vector<1x128xf32> to vector<32x128xf32>
    %681 = arith.mulf %678, %680 : vector<32x128xf32>
    %c0_480 = arith.constant 0 : index
    %c0_481 = arith.constant 0 : index
    %682 = vector.load %arg44[%c0_480, %c0_481] : memref<128x128xf32, #tpu.memory_space<vmem>>, vector<128x128xf32>
    %cst_482 = arith.constant dense<0.000000e+00> : vector<32x128xf32>
    %683 = tpu.matmul %681, %682, %cst_482 {dimension_numbers = #tpu.dot_dimension_numbers<[1], [0], [0], [1], [0, 0, 1, 1], [], []>} : vector<32x128xf32>, vector<128x128xf32>, vector<32x128xf32> -> vector<32x128xf32>
    %cst_483 = arith.constant 0.000000e+00 : f32
    %684 = vector.broadcast %cst_483 : f32 to vector<16x128xf32>
    %c0_484 = arith.constant 0 : index
    %c0_485 = arith.constant 0 : index
    %c0_486 = arith.constant 0 : index
    %685 = vector.load %arg23[%c0_484, %c0_485, %c0_486] : memref<9x16x16xf32, #tpu.memory_space<vmem>>, vector<1x16x16xf32>
    %686 = vector.shape_cast %685 : vector<1x16x16xf32> to vector<16x16xf32>
    %cst_487 = arith.constant dense<0.000000e+00> : vector<16x128xf32>
    %687 = tpu.matmul %686, %366, %cst_487 {dimension_numbers = #tpu.dot_dimension_numbers<[1], [0], [0], [1], [0, 0, 1, 1], [], []>} : vector<16x16xf32>, vector<16x128xf32>, vector<16x128xf32> -> vector<16x128xf32>
    %cst_488 = arith.constant 0.000000e+00 : f32
    %688 = vector.broadcast %cst_488 : f32 to vector<16x7xf32>
    %689 = vector.extract_strided_slice %687 {offsets = [0, 0], sizes = [16, 121], strides = [1, 1]} : vector<16x128xf32> to vector<16x121xf32>
    %690 = tpu.concatenate %688, %689 in 1 : vector<16x7xf32>, vector<16x121xf32> -> vector<16x128xf32>
    %691 = arith.addf %684, %690 : vector<16x128xf32>
    %c1_489 = arith.constant 1 : index
    %c0_490 = arith.constant 0 : index
    %c0_491 = arith.constant 0 : index
    %692 = vector.load %arg23[%c1_489, %c0_490, %c0_491] : memref<9x16x16xf32, #tpu.memory_space<vmem>>, vector<1x16x16xf32>
    %693 = vector.shape_cast %692 : vector<1x16x16xf32> to vector<16x16xf32>
    %cst_492 = arith.constant dense<0.000000e+00> : vector<16x128xf32>
    %694 = tpu.matmul %693, %366, %cst_492 {dimension_numbers = #tpu.dot_dimension_numbers<[1], [0], [0], [1], [0, 0, 1, 1], [], []>} : vector<16x16xf32>, vector<16x128xf32>, vector<16x128xf32> -> vector<16x128xf32>
    %cst_493 = arith.constant 0.000000e+00 : f32
    %695 = vector.broadcast %cst_493 : f32 to vector<16x6xf32>
    %696 = vector.extract_strided_slice %694 {offsets = [0, 0], sizes = [16, 122], strides = [1, 1]} : vector<16x128xf32> to vector<16x122xf32>
    %697 = tpu.concatenate %695, %696 in 1 : vector<16x6xf32>, vector<16x122xf32> -> vector<16x128xf32>
    %698 = arith.addf %691, %697 : vector<16x128xf32>
    %c2_494 = arith.constant 2 : index
    %c0_495 = arith.constant 0 : index
    %c0_496 = arith.constant 0 : index
    %699 = vector.load %arg23[%c2_494, %c0_495, %c0_496] : memref<9x16x16xf32, #tpu.memory_space<vmem>>, vector<1x16x16xf32>
    %700 = vector.shape_cast %699 : vector<1x16x16xf32> to vector<16x16xf32>
    %cst_497 = arith.constant dense<0.000000e+00> : vector<16x128xf32>
    %701 = tpu.matmul %700, %366, %cst_497 {dimension_numbers = #tpu.dot_dimension_numbers<[1], [0], [0], [1], [0, 0, 1, 1], [], []>} : vector<16x16xf32>, vector<16x128xf32>, vector<16x128xf32> -> vector<16x128xf32>
    %cst_498 = arith.constant 0.000000e+00 : f32
    %702 = vector.broadcast %cst_498 : f32 to vector<16x5xf32>
    %703 = vector.extract_strided_slice %701 {offsets = [0, 0], sizes = [16, 123], strides = [1, 1]} : vector<16x128xf32> to vector<16x123xf32>
    %704 = tpu.concatenate %702, %703 in 1 : vector<16x5xf32>, vector<16x123xf32> -> vector<16x128xf32>
    %705 = arith.addf %698, %704 : vector<16x128xf32>
    %c3_499 = arith.constant 3 : index
    %c0_500 = arith.constant 0 : index
    %c0_501 = arith.constant 0 : index
    %706 = vector.load %arg23[%c3_499, %c0_500, %c0_501] : memref<9x16x16xf32, #tpu.memory_space<vmem>>, vector<1x16x16xf32>
    %707 = vector.shape_cast %706 : vector<1x16x16xf32> to vector<16x16xf32>
    %cst_502 = arith.constant dense<0.000000e+00> : vector<16x128xf32>
    %708 = tpu.matmul %707, %366, %cst_502 {dimension_numbers = #tpu.dot_dimension_numbers<[1], [0], [0], [1], [0, 0, 1, 1], [], []>} : vector<16x16xf32>, vector<16x128xf32>, vector<16x128xf32> -> vector<16x128xf32>
    %cst_503 = arith.constant 0.000000e+00 : f32
    %709 = vector.broadcast %cst_503 : f32 to vector<16x1xf32>
    %710 = vector.extract_strided_slice %708 {offsets = [0, 0], sizes = [16, 127], strides = [1, 1]} : vector<16x128xf32> to vector<16x127xf32>
    %711 = tpu.concatenate %709, %710 in 1 : vector<16x1xf32>, vector<16x127xf32> -> vector<16x128xf32>
    %712 = arith.addf %705, %711 : vector<16x128xf32>
    %c4_504 = arith.constant 4 : index
    %c0_505 = arith.constant 0 : index
    %c0_506 = arith.constant 0 : index
    %713 = vector.load %arg23[%c4_504, %c0_505, %c0_506] : memref<9x16x16xf32, #tpu.memory_space<vmem>>, vector<1x16x16xf32>
    %714 = vector.shape_cast %713 : vector<1x16x16xf32> to vector<16x16xf32>
    %cst_507 = arith.constant dense<0.000000e+00> : vector<16x128xf32>
    %715 = tpu.matmul %714, %366, %cst_507 {dimension_numbers = #tpu.dot_dimension_numbers<[1], [0], [0], [1], [0, 0, 1, 1], [], []>} : vector<16x16xf32>, vector<16x128xf32>, vector<16x128xf32> -> vector<16x128xf32>
    %716 = arith.addf %712, %715 : vector<16x128xf32>
    %c5_508 = arith.constant 5 : index
    %c0_509 = arith.constant 0 : index
    %c0_510 = arith.constant 0 : index
    %717 = vector.load %arg23[%c5_508, %c0_509, %c0_510] : memref<9x16x16xf32, #tpu.memory_space<vmem>>, vector<1x16x16xf32>
    %718 = vector.shape_cast %717 : vector<1x16x16xf32> to vector<16x16xf32>
    %cst_511 = arith.constant dense<0.000000e+00> : vector<16x128xf32>
    %719 = tpu.matmul %718, %366, %cst_511 {dimension_numbers = #tpu.dot_dimension_numbers<[1], [0], [0], [1], [0, 0, 1, 1], [], []>} : vector<16x16xf32>, vector<16x128xf32>, vector<16x128xf32> -> vector<16x128xf32>
    %720 = vector.extract_strided_slice %719 {offsets = [0, 1], sizes = [16, 127], strides = [1, 1]} : vector<16x128xf32> to vector<16x127xf32>
    %cst_512 = arith.constant 0.000000e+00 : f32
    %721 = vector.broadcast %cst_512 : f32 to vector<16x1xf32>
    %722 = tpu.concatenate %720, %721 in 1 : vector<16x127xf32>, vector<16x1xf32> -> vector<16x128xf32>
    %723 = arith.addf %716, %722 : vector<16x128xf32>
    %c6_513 = arith.constant 6 : index
    %c0_514 = arith.constant 0 : index
    %c0_515 = arith.constant 0 : index
    %724 = vector.load %arg23[%c6_513, %c0_514, %c0_515] : memref<9x16x16xf32, #tpu.memory_space<vmem>>, vector<1x16x16xf32>
    %725 = vector.shape_cast %724 : vector<1x16x16xf32> to vector<16x16xf32>
    %cst_516 = arith.constant dense<0.000000e+00> : vector<16x128xf32>
    %726 = tpu.matmul %725, %366, %cst_516 {dimension_numbers = #tpu.dot_dimension_numbers<[1], [0], [0], [1], [0, 0, 1, 1], [], []>} : vector<16x16xf32>, vector<16x128xf32>, vector<16x128xf32> -> vector<16x128xf32>
    %727 = vector.extract_strided_slice %726 {offsets = [0, 5], sizes = [16, 123], strides = [1, 1]} : vector<16x128xf32> to vector<16x123xf32>
    %cst_517 = arith.constant 0.000000e+00 : f32
    %728 = vector.broadcast %cst_517 : f32 to vector<16x5xf32>
    %729 = tpu.concatenate %727, %728 in 1 : vector<16x123xf32>, vector<16x5xf32> -> vector<16x128xf32>
    %730 = arith.addf %723, %729 : vector<16x128xf32>
    %c7_518 = arith.constant 7 : index
    %c0_519 = arith.constant 0 : index
    %c0_520 = arith.constant 0 : index
    %731 = vector.load %arg23[%c7_518, %c0_519, %c0_520] : memref<9x16x16xf32, #tpu.memory_space<vmem>>, vector<1x16x16xf32>
    %732 = vector.shape_cast %731 : vector<1x16x16xf32> to vector<16x16xf32>
    %cst_521 = arith.constant dense<0.000000e+00> : vector<16x128xf32>
    %733 = tpu.matmul %732, %366, %cst_521 {dimension_numbers = #tpu.dot_dimension_numbers<[1], [0], [0], [1], [0, 0, 1, 1], [], []>} : vector<16x16xf32>, vector<16x128xf32>, vector<16x128xf32> -> vector<16x128xf32>
    %734 = vector.extract_strided_slice %733 {offsets = [0, 6], sizes = [16, 122], strides = [1, 1]} : vector<16x128xf32> to vector<16x122xf32>
    %cst_522 = arith.constant 0.000000e+00 : f32
    %735 = vector.broadcast %cst_522 : f32 to vector<16x6xf32>
    %736 = tpu.concatenate %734, %735 in 1 : vector<16x122xf32>, vector<16x6xf32> -> vector<16x128xf32>
    %737 = arith.addf %730, %736 : vector<16x128xf32>
    %c8_523 = arith.constant 8 : index
    %c0_524 = arith.constant 0 : index
    %c0_525 = arith.constant 0 : index
    %738 = vector.load %arg23[%c8_523, %c0_524, %c0_525] : memref<9x16x16xf32, #tpu.memory_space<vmem>>, vector<1x16x16xf32>
    %739 = vector.shape_cast %738 : vector<1x16x16xf32> to vector<16x16xf32>
    %cst_526 = arith.constant dense<0.000000e+00> : vector<16x128xf32>
    %740 = tpu.matmul %739, %366, %cst_526 {dimension_numbers = #tpu.dot_dimension_numbers<[1], [0], [0], [1], [0, 0, 1, 1], [], []>} : vector<16x16xf32>, vector<16x128xf32>, vector<16x128xf32> -> vector<16x128xf32>
    %741 = vector.extract_strided_slice %740 {offsets = [0, 7], sizes = [16, 121], strides = [1, 1]} : vector<16x128xf32> to vector<16x121xf32>
    %cst_527 = arith.constant 0.000000e+00 : f32
    %742 = vector.broadcast %cst_527 : f32 to vector<16x7xf32>
    %743 = tpu.concatenate %741, %742 in 1 : vector<16x121xf32>, vector<16x7xf32> -> vector<16x128xf32>
    %744 = arith.addf %737, %743 : vector<16x128xf32>
    %c0_528 = arith.constant 0 : index
    %c0_529 = arith.constant 0 : index
    %c0_530 = arith.constant 0 : index
    %745 = vector.load %arg24[%c0_528, %c0_529, %c0_530] : memref<9x16x32xf32, #tpu.memory_space<vmem>>, vector<1x16x32xf32>
    %746 = vector.shape_cast %745 : vector<1x16x32xf32> to vector<16x32xf32>
    %cst_531 = arith.constant dense<0.000000e+00> : vector<16x128xf32>
    %747 = tpu.matmul %746, %683, %cst_531 {dimension_numbers = #tpu.dot_dimension_numbers<[1], [0], [0], [1], [0, 0, 1, 1], [], []>} : vector<16x32xf32>, vector<32x128xf32>, vector<16x128xf32> -> vector<16x128xf32>
    %cst_532 = arith.constant 0.000000e+00 : f32
    %748 = vector.broadcast %cst_532 : f32 to vector<16x7xf32>
    %749 = vector.extract_strided_slice %747 {offsets = [0, 0], sizes = [16, 121], strides = [1, 1]} : vector<16x128xf32> to vector<16x121xf32>
    %750 = tpu.concatenate %748, %749 in 1 : vector<16x7xf32>, vector<16x121xf32> -> vector<16x128xf32>
    %751 = arith.addf %744, %750 : vector<16x128xf32>
    %c1_533 = arith.constant 1 : index
    %c0_534 = arith.constant 0 : index
    %c0_535 = arith.constant 0 : index
    %752 = vector.load %arg24[%c1_533, %c0_534, %c0_535] : memref<9x16x32xf32, #tpu.memory_space<vmem>>, vector<1x16x32xf32>
    %753 = vector.shape_cast %752 : vector<1x16x32xf32> to vector<16x32xf32>
    %cst_536 = arith.constant dense<0.000000e+00> : vector<16x128xf32>
    %754 = tpu.matmul %753, %683, %cst_536 {dimension_numbers = #tpu.dot_dimension_numbers<[1], [0], [0], [1], [0, 0, 1, 1], [], []>} : vector<16x32xf32>, vector<32x128xf32>, vector<16x128xf32> -> vector<16x128xf32>
    %cst_537 = arith.constant 0.000000e+00 : f32
    %755 = vector.broadcast %cst_537 : f32 to vector<16x6xf32>
    %756 = vector.extract_strided_slice %754 {offsets = [0, 0], sizes = [16, 122], strides = [1, 1]} : vector<16x128xf32> to vector<16x122xf32>
    %757 = tpu.concatenate %755, %756 in 1 : vector<16x6xf32>, vector<16x122xf32> -> vector<16x128xf32>
    %758 = arith.addf %751, %757 : vector<16x128xf32>
    %c2_538 = arith.constant 2 : index
    %c0_539 = arith.constant 0 : index
    %c0_540 = arith.constant 0 : index
    %759 = vector.load %arg24[%c2_538, %c0_539, %c0_540] : memref<9x16x32xf32, #tpu.memory_space<vmem>>, vector<1x16x32xf32>
    %760 = vector.shape_cast %759 : vector<1x16x32xf32> to vector<16x32xf32>
    %cst_541 = arith.constant dense<0.000000e+00> : vector<16x128xf32>
    %761 = tpu.matmul %760, %683, %cst_541 {dimension_numbers = #tpu.dot_dimension_numbers<[1], [0], [0], [1], [0, 0, 1, 1], [], []>} : vector<16x32xf32>, vector<32x128xf32>, vector<16x128xf32> -> vector<16x128xf32>
    %cst_542 = arith.constant 0.000000e+00 : f32
    %762 = vector.broadcast %cst_542 : f32 to vector<16x5xf32>
    %763 = vector.extract_strided_slice %761 {offsets = [0, 0], sizes = [16, 123], strides = [1, 1]} : vector<16x128xf32> to vector<16x123xf32>
    %764 = tpu.concatenate %762, %763 in 1 : vector<16x5xf32>, vector<16x123xf32> -> vector<16x128xf32>
    %765 = arith.addf %758, %764 : vector<16x128xf32>
    %c3_543 = arith.constant 3 : index
    %c0_544 = arith.constant 0 : index
    %c0_545 = arith.constant 0 : index
    %766 = vector.load %arg24[%c3_543, %c0_544, %c0_545] : memref<9x16x32xf32, #tpu.memory_space<vmem>>, vector<1x16x32xf32>
    %767 = vector.shape_cast %766 : vector<1x16x32xf32> to vector<16x32xf32>
    %cst_546 = arith.constant dense<0.000000e+00> : vector<16x128xf32>
    %768 = tpu.matmul %767, %683, %cst_546 {dimension_numbers = #tpu.dot_dimension_numbers<[1], [0], [0], [1], [0, 0, 1, 1], [], []>} : vector<16x32xf32>, vector<32x128xf32>, vector<16x128xf32> -> vector<16x128xf32>
    %cst_547 = arith.constant 0.000000e+00 : f32
    %769 = vector.broadcast %cst_547 : f32 to vector<16x1xf32>
    %770 = vector.extract_strided_slice %768 {offsets = [0, 0], sizes = [16, 127], strides = [1, 1]} : vector<16x128xf32> to vector<16x127xf32>
    %771 = tpu.concatenate %769, %770 in 1 : vector<16x1xf32>, vector<16x127xf32> -> vector<16x128xf32>
    %772 = arith.addf %765, %771 : vector<16x128xf32>
    %c4_548 = arith.constant 4 : index
    %c0_549 = arith.constant 0 : index
    %c0_550 = arith.constant 0 : index
    %773 = vector.load %arg24[%c4_548, %c0_549, %c0_550] : memref<9x16x32xf32, #tpu.memory_space<vmem>>, vector<1x16x32xf32>
    %774 = vector.shape_cast %773 : vector<1x16x32xf32> to vector<16x32xf32>
    %cst_551 = arith.constant dense<0.000000e+00> : vector<16x128xf32>
    %775 = tpu.matmul %774, %683, %cst_551 {dimension_numbers = #tpu.dot_dimension_numbers<[1], [0], [0], [1], [0, 0, 1, 1], [], []>} : vector<16x32xf32>, vector<32x128xf32>, vector<16x128xf32> -> vector<16x128xf32>
    %776 = arith.addf %772, %775 : vector<16x128xf32>
    %c5_552 = arith.constant 5 : index
    %c0_553 = arith.constant 0 : index
    %c0_554 = arith.constant 0 : index
    %777 = vector.load %arg24[%c5_552, %c0_553, %c0_554] : memref<9x16x32xf32, #tpu.memory_space<vmem>>, vector<1x16x32xf32>
    %778 = vector.shape_cast %777 : vector<1x16x32xf32> to vector<16x32xf32>
    %cst_555 = arith.constant dense<0.000000e+00> : vector<16x128xf32>
    %779 = tpu.matmul %778, %683, %cst_555 {dimension_numbers = #tpu.dot_dimension_numbers<[1], [0], [0], [1], [0, 0, 1, 1], [], []>} : vector<16x32xf32>, vector<32x128xf32>, vector<16x128xf32> -> vector<16x128xf32>
    %780 = vector.extract_strided_slice %779 {offsets = [0, 1], sizes = [16, 127], strides = [1, 1]} : vector<16x128xf32> to vector<16x127xf32>
    %cst_556 = arith.constant 0.000000e+00 : f32
    %781 = vector.broadcast %cst_556 : f32 to vector<16x1xf32>
    %782 = tpu.concatenate %780, %781 in 1 : vector<16x127xf32>, vector<16x1xf32> -> vector<16x128xf32>
    %783 = arith.addf %776, %782 : vector<16x128xf32>
    %c6_557 = arith.constant 6 : index
    %c0_558 = arith.constant 0 : index
    %c0_559 = arith.constant 0 : index
    %784 = vector.load %arg24[%c6_557, %c0_558, %c0_559] : memref<9x16x32xf32, #tpu.memory_space<vmem>>, vector<1x16x32xf32>
    %785 = vector.shape_cast %784 : vector<1x16x32xf32> to vector<16x32xf32>
    %cst_560 = arith.constant dense<0.000000e+00> : vector<16x128xf32>
    %786 = tpu.matmul %785, %683, %cst_560 {dimension_numbers = #tpu.dot_dimension_numbers<[1], [0], [0], [1], [0, 0, 1, 1], [], []>} : vector<16x32xf32>, vector<32x128xf32>, vector<16x128xf32> -> vector<16x128xf32>
    %787 = vector.extract_strided_slice %786 {offsets = [0, 5], sizes = [16, 123], strides = [1, 1]} : vector<16x128xf32> to vector<16x123xf32>
    %cst_561 = arith.constant 0.000000e+00 : f32
    %788 = vector.broadcast %cst_561 : f32 to vector<16x5xf32>
    %789 = tpu.concatenate %787, %788 in 1 : vector<16x123xf32>, vector<16x5xf32> -> vector<16x128xf32>
    %790 = arith.addf %783, %789 : vector<16x128xf32>
    %c7_562 = arith.constant 7 : index
    %c0_563 = arith.constant 0 : index
    %c0_564 = arith.constant 0 : index
    %791 = vector.load %arg24[%c7_562, %c0_563, %c0_564] : memref<9x16x32xf32, #tpu.memory_space<vmem>>, vector<1x16x32xf32>
    %792 = vector.shape_cast %791 : vector<1x16x32xf32> to vector<16x32xf32>
    %cst_565 = arith.constant dense<0.000000e+00> : vector<16x128xf32>
    %793 = tpu.matmul %792, %683, %cst_565 {dimension_numbers = #tpu.dot_dimension_numbers<[1], [0], [0], [1], [0, 0, 1, 1], [], []>} : vector<16x32xf32>, vector<32x128xf32>, vector<16x128xf32> -> vector<16x128xf32>
    %794 = vector.extract_strided_slice %793 {offsets = [0, 6], sizes = [16, 122], strides = [1, 1]} : vector<16x128xf32> to vector<16x122xf32>
    %cst_566 = arith.constant 0.000000e+00 : f32
    %795 = vector.broadcast %cst_566 : f32 to vector<16x6xf32>
    %796 = tpu.concatenate %794, %795 in 1 : vector<16x122xf32>, vector<16x6xf32> -> vector<16x128xf32>
    %797 = arith.addf %790, %796 : vector<16x128xf32>
    %c8_567 = arith.constant 8 : index
    %c0_568 = arith.constant 0 : index
    %c0_569 = arith.constant 0 : index
    %798 = vector.load %arg24[%c8_567, %c0_568, %c0_569] : memref<9x16x32xf32, #tpu.memory_space<vmem>>, vector<1x16x32xf32>
    %799 = vector.shape_cast %798 : vector<1x16x32xf32> to vector<16x32xf32>
    %cst_570 = arith.constant dense<0.000000e+00> : vector<16x128xf32>
    %800 = tpu.matmul %799, %683, %cst_570 {dimension_numbers = #tpu.dot_dimension_numbers<[1], [0], [0], [1], [0, 0, 1, 1], [], []>} : vector<16x32xf32>, vector<32x128xf32>, vector<16x128xf32> -> vector<16x128xf32>
    %801 = vector.extract_strided_slice %800 {offsets = [0, 7], sizes = [16, 121], strides = [1, 1]} : vector<16x128xf32> to vector<16x121xf32>
    %cst_571 = arith.constant 0.000000e+00 : f32
    %802 = vector.broadcast %cst_571 : f32 to vector<16x7xf32>
    %803 = tpu.concatenate %801, %802 in 1 : vector<16x121xf32>, vector<16x7xf32> -> vector<16x128xf32>
    %804 = arith.addf %797, %803 : vector<16x128xf32>
    %c0_572 = arith.constant 0 : index
    %c0_573 = arith.constant 0 : index
    %805 = vector.load %arg25[%c0_572, %c0_573] : memref<16x1xf32, #tpu.memory_space<vmem>>, vector<16x1xf32>
    %806 = vector.broadcast %805 : vector<16x1xf32> to vector<16x128xf32>
    %807 = arith.addf %804, %806 : vector<16x128xf32>
    %cst_574 = arith.constant 0.000000e+00 : f32
    %808 = vector.broadcast %cst_574 : f32 to vector<16x128xf32>
    %809 = arith.maximumf %807, %808 : vector<16x128xf32>
    %c0_575 = arith.constant 0 : index
    %c0_576 = arith.constant 0 : index
    %810 = vector.load %arg36[%c0_575, %c0_576] : memref<1x128xf32, #tpu.memory_space<vmem>>, vector<1x128xf32>
    %811 = vector.broadcast %810 : vector<1x128xf32> to vector<16x128xf32>
    %812 = arith.mulf %809, %811 : vector<16x128xf32>
    %c0_577 = arith.constant 0 : index
    %c0_578 = arith.constant 0 : index
    %813 = vector.load %arg45[%c0_577, %c0_578] : memref<128x128xf32, #tpu.memory_space<vmem>>, vector<128x128xf32>
    %cst_579 = arith.constant dense<0.000000e+00> : vector<16x128xf32>
    %814 = tpu.matmul %812, %813, %cst_579 {dimension_numbers = #tpu.dot_dimension_numbers<[1], [0], [0], [1], [0, 0, 1, 1], [], []>} : vector<16x128xf32>, vector<128x128xf32>, vector<16x128xf32> -> vector<16x128xf32>
    %cst_580 = arith.constant 0.000000e+00 : f32
    %815 = vector.broadcast %cst_580 : f32 to vector<8x128xf32>
    %c0_581 = arith.constant 0 : index
    %c0_582 = arith.constant 0 : index
    %c0_583 = arith.constant 0 : index
    %816 = vector.load %arg26[%c0_581, %c0_582, %c0_583] : memref<9x8x8xf32, #tpu.memory_space<vmem>>, vector<1x8x8xf32>
    %817 = vector.shape_cast %816 : vector<1x8x8xf32> to vector<8x8xf32>
    %cst_584 = arith.constant dense<0.000000e+00> : vector<8x128xf32>
    %818 = tpu.matmul %817, %218, %cst_584 {dimension_numbers = #tpu.dot_dimension_numbers<[1], [0], [0], [1], [0, 0, 1, 1], [], []>} : vector<8x8xf32>, vector<8x128xf32>, vector<8x128xf32> -> vector<8x128xf32>
    %cst_585 = arith.constant 0.000000e+00 : f32
    %819 = vector.broadcast %cst_585 : f32 to vector<8x11xf32>
    %820 = vector.extract_strided_slice %818 {offsets = [0, 0], sizes = [8, 117], strides = [1, 1]} : vector<8x128xf32> to vector<8x117xf32>
    %821 = tpu.concatenate %819, %820 in 1 : vector<8x11xf32>, vector<8x117xf32> -> vector<8x128xf32>
    %822 = arith.addf %815, %821 : vector<8x128xf32>
    %c1_586 = arith.constant 1 : index
    %c0_587 = arith.constant 0 : index
    %c0_588 = arith.constant 0 : index
    %823 = vector.load %arg26[%c1_586, %c0_587, %c0_588] : memref<9x8x8xf32, #tpu.memory_space<vmem>>, vector<1x8x8xf32>
    %824 = vector.shape_cast %823 : vector<1x8x8xf32> to vector<8x8xf32>
    %cst_589 = arith.constant dense<0.000000e+00> : vector<8x128xf32>
    %825 = tpu.matmul %824, %218, %cst_589 {dimension_numbers = #tpu.dot_dimension_numbers<[1], [0], [0], [1], [0, 0, 1, 1], [], []>} : vector<8x8xf32>, vector<8x128xf32>, vector<8x128xf32> -> vector<8x128xf32>
    %cst_590 = arith.constant 0.000000e+00 : f32
    %826 = vector.broadcast %cst_590 : f32 to vector<8x10xf32>
    %827 = vector.extract_strided_slice %825 {offsets = [0, 0], sizes = [8, 118], strides = [1, 1]} : vector<8x128xf32> to vector<8x118xf32>
    %828 = tpu.concatenate %826, %827 in 1 : vector<8x10xf32>, vector<8x118xf32> -> vector<8x128xf32>
    %829 = arith.addf %822, %828 : vector<8x128xf32>
    %c2_591 = arith.constant 2 : index
    %c0_592 = arith.constant 0 : index
    %c0_593 = arith.constant 0 : index
    %830 = vector.load %arg26[%c2_591, %c0_592, %c0_593] : memref<9x8x8xf32, #tpu.memory_space<vmem>>, vector<1x8x8xf32>
    %831 = vector.shape_cast %830 : vector<1x8x8xf32> to vector<8x8xf32>
    %cst_594 = arith.constant dense<0.000000e+00> : vector<8x128xf32>
    %832 = tpu.matmul %831, %218, %cst_594 {dimension_numbers = #tpu.dot_dimension_numbers<[1], [0], [0], [1], [0, 0, 1, 1], [], []>} : vector<8x8xf32>, vector<8x128xf32>, vector<8x128xf32> -> vector<8x128xf32>
    %cst_595 = arith.constant 0.000000e+00 : f32
    %833 = vector.broadcast %cst_595 : f32 to vector<8x9xf32>
    %834 = vector.extract_strided_slice %832 {offsets = [0, 0], sizes = [8, 119], strides = [1, 1]} : vector<8x128xf32> to vector<8x119xf32>
    %835 = tpu.concatenate %833, %834 in 1 : vector<8x9xf32>, vector<8x119xf32> -> vector<8x128xf32>
    %836 = arith.addf %829, %835 : vector<8x128xf32>
    %c3_596 = arith.constant 3 : index
    %c0_597 = arith.constant 0 : index
    %c0_598 = arith.constant 0 : index
    %837 = vector.load %arg26[%c3_596, %c0_597, %c0_598] : memref<9x8x8xf32, #tpu.memory_space<vmem>>, vector<1x8x8xf32>
    %838 = vector.shape_cast %837 : vector<1x8x8xf32> to vector<8x8xf32>
    %cst_599 = arith.constant dense<0.000000e+00> : vector<8x128xf32>
    %839 = tpu.matmul %838, %218, %cst_599 {dimension_numbers = #tpu.dot_dimension_numbers<[1], [0], [0], [1], [0, 0, 1, 1], [], []>} : vector<8x8xf32>, vector<8x128xf32>, vector<8x128xf32> -> vector<8x128xf32>
    %cst_600 = arith.constant 0.000000e+00 : f32
    %840 = vector.broadcast %cst_600 : f32 to vector<8x1xf32>
    %841 = vector.extract_strided_slice %839 {offsets = [0, 0], sizes = [8, 127], strides = [1, 1]} : vector<8x128xf32> to vector<8x127xf32>
    %842 = tpu.concatenate %840, %841 in 1 : vector<8x1xf32>, vector<8x127xf32> -> vector<8x128xf32>
    %843 = arith.addf %836, %842 : vector<8x128xf32>
    %c4_601 = arith.constant 4 : index
    %c0_602 = arith.constant 0 : index
    %c0_603 = arith.constant 0 : index
    %844 = vector.load %arg26[%c4_601, %c0_602, %c0_603] : memref<9x8x8xf32, #tpu.memory_space<vmem>>, vector<1x8x8xf32>
    %845 = vector.shape_cast %844 : vector<1x8x8xf32> to vector<8x8xf32>
    %cst_604 = arith.constant dense<0.000000e+00> : vector<8x128xf32>
    %846 = tpu.matmul %845, %218, %cst_604 {dimension_numbers = #tpu.dot_dimension_numbers<[1], [0], [0], [1], [0, 0, 1, 1], [], []>} : vector<8x8xf32>, vector<8x128xf32>, vector<8x128xf32> -> vector<8x128xf32>
    %847 = arith.addf %843, %846 : vector<8x128xf32>
    %c5_605 = arith.constant 5 : index
    %c0_606 = arith.constant 0 : index
    %c0_607 = arith.constant 0 : index
    %848 = vector.load %arg26[%c5_605, %c0_606, %c0_607] : memref<9x8x8xf32, #tpu.memory_space<vmem>>, vector<1x8x8xf32>
    %849 = vector.shape_cast %848 : vector<1x8x8xf32> to vector<8x8xf32>
    %cst_608 = arith.constant dense<0.000000e+00> : vector<8x128xf32>
    %850 = tpu.matmul %849, %218, %cst_608 {dimension_numbers = #tpu.dot_dimension_numbers<[1], [0], [0], [1], [0, 0, 1, 1], [], []>} : vector<8x8xf32>, vector<8x128xf32>, vector<8x128xf32> -> vector<8x128xf32>
    %851 = vector.extract_strided_slice %850 {offsets = [0, 1], sizes = [8, 127], strides = [1, 1]} : vector<8x128xf32> to vector<8x127xf32>
    %cst_609 = arith.constant 0.000000e+00 : f32
    %852 = vector.broadcast %cst_609 : f32 to vector<8x1xf32>
    %853 = tpu.concatenate %851, %852 in 1 : vector<8x127xf32>, vector<8x1xf32> -> vector<8x128xf32>
    %854 = arith.addf %847, %853 : vector<8x128xf32>
    %c6_610 = arith.constant 6 : index
    %c0_611 = arith.constant 0 : index
    %c0_612 = arith.constant 0 : index
    %855 = vector.load %arg26[%c6_610, %c0_611, %c0_612] : memref<9x8x8xf32, #tpu.memory_space<vmem>>, vector<1x8x8xf32>
    %856 = vector.shape_cast %855 : vector<1x8x8xf32> to vector<8x8xf32>
    %cst_613 = arith.constant dense<0.000000e+00> : vector<8x128xf32>
    %857 = tpu.matmul %856, %218, %cst_613 {dimension_numbers = #tpu.dot_dimension_numbers<[1], [0], [0], [1], [0, 0, 1, 1], [], []>} : vector<8x8xf32>, vector<8x128xf32>, vector<8x128xf32> -> vector<8x128xf32>
    %858 = vector.extract_strided_slice %857 {offsets = [0, 9], sizes = [8, 119], strides = [1, 1]} : vector<8x128xf32> to vector<8x119xf32>
    %cst_614 = arith.constant 0.000000e+00 : f32
    %859 = vector.broadcast %cst_614 : f32 to vector<8x9xf32>
    %860 = tpu.concatenate %858, %859 in 1 : vector<8x119xf32>, vector<8x9xf32> -> vector<8x128xf32>
    %861 = arith.addf %854, %860 : vector<8x128xf32>
    %c7_615 = arith.constant 7 : index
    %c0_616 = arith.constant 0 : index
    %c0_617 = arith.constant 0 : index
    %862 = vector.load %arg26[%c7_615, %c0_616, %c0_617] : memref<9x8x8xf32, #tpu.memory_space<vmem>>, vector<1x8x8xf32>
    %863 = vector.shape_cast %862 : vector<1x8x8xf32> to vector<8x8xf32>
    %cst_618 = arith.constant dense<0.000000e+00> : vector<8x128xf32>
    %864 = tpu.matmul %863, %218, %cst_618 {dimension_numbers = #tpu.dot_dimension_numbers<[1], [0], [0], [1], [0, 0, 1, 1], [], []>} : vector<8x8xf32>, vector<8x128xf32>, vector<8x128xf32> -> vector<8x128xf32>
    %865 = vector.extract_strided_slice %864 {offsets = [0, 10], sizes = [8, 118], strides = [1, 1]} : vector<8x128xf32> to vector<8x118xf32>
    %cst_619 = arith.constant 0.000000e+00 : f32
    %866 = vector.broadcast %cst_619 : f32 to vector<8x10xf32>
    %867 = tpu.concatenate %865, %866 in 1 : vector<8x118xf32>, vector<8x10xf32> -> vector<8x128xf32>
    %868 = arith.addf %861, %867 : vector<8x128xf32>
    %c8_620 = arith.constant 8 : index
    %c0_621 = arith.constant 0 : index
    %c0_622 = arith.constant 0 : index
    %869 = vector.load %arg26[%c8_620, %c0_621, %c0_622] : memref<9x8x8xf32, #tpu.memory_space<vmem>>, vector<1x8x8xf32>
    %870 = vector.shape_cast %869 : vector<1x8x8xf32> to vector<8x8xf32>
    %cst_623 = arith.constant dense<0.000000e+00> : vector<8x128xf32>
    %871 = tpu.matmul %870, %218, %cst_623 {dimension_numbers = #tpu.dot_dimension_numbers<[1], [0], [0], [1], [0, 0, 1, 1], [], []>} : vector<8x8xf32>, vector<8x128xf32>, vector<8x128xf32> -> vector<8x128xf32>
    %872 = vector.extract_strided_slice %871 {offsets = [0, 11], sizes = [8, 117], strides = [1, 1]} : vector<8x128xf32> to vector<8x117xf32>
    %cst_624 = arith.constant 0.000000e+00 : f32
    %873 = vector.broadcast %cst_624 : f32 to vector<8x11xf32>
    %874 = tpu.concatenate %872, %873 in 1 : vector<8x117xf32>, vector<8x11xf32> -> vector<8x128xf32>
    %875 = arith.addf %868, %874 : vector<8x128xf32>
    %c0_625 = arith.constant 0 : index
    %c0_626 = arith.constant 0 : index
    %c0_627 = arith.constant 0 : index
    %876 = vector.load %arg27[%c0_625, %c0_626, %c0_627] : memref<9x8x16xf32, #tpu.memory_space<vmem>>, vector<1x8x16xf32>
    %877 = vector.shape_cast %876 : vector<1x8x16xf32> to vector<8x16xf32>
    %cst_628 = arith.constant dense<0.000000e+00> : vector<8x128xf32>
    %878 = tpu.matmul %877, %814, %cst_628 {dimension_numbers = #tpu.dot_dimension_numbers<[1], [0], [0], [1], [0, 0, 1, 1], [], []>} : vector<8x16xf32>, vector<16x128xf32>, vector<8x128xf32> -> vector<8x128xf32>
    %cst_629 = arith.constant 0.000000e+00 : f32
    %879 = vector.broadcast %cst_629 : f32 to vector<8x11xf32>
    %880 = vector.extract_strided_slice %878 {offsets = [0, 0], sizes = [8, 117], strides = [1, 1]} : vector<8x128xf32> to vector<8x117xf32>
    %881 = tpu.concatenate %879, %880 in 1 : vector<8x11xf32>, vector<8x117xf32> -> vector<8x128xf32>
    %882 = arith.addf %875, %881 : vector<8x128xf32>
    %c1_630 = arith.constant 1 : index
    %c0_631 = arith.constant 0 : index
    %c0_632 = arith.constant 0 : index
    %883 = vector.load %arg27[%c1_630, %c0_631, %c0_632] : memref<9x8x16xf32, #tpu.memory_space<vmem>>, vector<1x8x16xf32>
    %884 = vector.shape_cast %883 : vector<1x8x16xf32> to vector<8x16xf32>
    %cst_633 = arith.constant dense<0.000000e+00> : vector<8x128xf32>
    %885 = tpu.matmul %884, %814, %cst_633 {dimension_numbers = #tpu.dot_dimension_numbers<[1], [0], [0], [1], [0, 0, 1, 1], [], []>} : vector<8x16xf32>, vector<16x128xf32>, vector<8x128xf32> -> vector<8x128xf32>
    %cst_634 = arith.constant 0.000000e+00 : f32
    %886 = vector.broadcast %cst_634 : f32 to vector<8x10xf32>
    %887 = vector.extract_strided_slice %885 {offsets = [0, 0], sizes = [8, 118], strides = [1, 1]} : vector<8x128xf32> to vector<8x118xf32>
    %888 = tpu.concatenate %886, %887 in 1 : vector<8x10xf32>, vector<8x118xf32> -> vector<8x128xf32>
    %889 = arith.addf %882, %888 : vector<8x128xf32>
    %c2_635 = arith.constant 2 : index
    %c0_636 = arith.constant 0 : index
    %c0_637 = arith.constant 0 : index
    %890 = vector.load %arg27[%c2_635, %c0_636, %c0_637] : memref<9x8x16xf32, #tpu.memory_space<vmem>>, vector<1x8x16xf32>
    %891 = vector.shape_cast %890 : vector<1x8x16xf32> to vector<8x16xf32>
    %cst_638 = arith.constant dense<0.000000e+00> : vector<8x128xf32>
    %892 = tpu.matmul %891, %814, %cst_638 {dimension_numbers = #tpu.dot_dimension_numbers<[1], [0], [0], [1], [0, 0, 1, 1], [], []>} : vector<8x16xf32>, vector<16x128xf32>, vector<8x128xf32> -> vector<8x128xf32>
    %cst_639 = arith.constant 0.000000e+00 : f32
    %893 = vector.broadcast %cst_639 : f32 to vector<8x9xf32>
    %894 = vector.extract_strided_slice %892 {offsets = [0, 0], sizes = [8, 119], strides = [1, 1]} : vector<8x128xf32> to vector<8x119xf32>
    %895 = tpu.concatenate %893, %894 in 1 : vector<8x9xf32>, vector<8x119xf32> -> vector<8x128xf32>
    %896 = arith.addf %889, %895 : vector<8x128xf32>
    %c3_640 = arith.constant 3 : index
    %c0_641 = arith.constant 0 : index
    %c0_642 = arith.constant 0 : index
    %897 = vector.load %arg27[%c3_640, %c0_641, %c0_642] : memref<9x8x16xf32, #tpu.memory_space<vmem>>, vector<1x8x16xf32>
    %898 = vector.shape_cast %897 : vector<1x8x16xf32> to vector<8x16xf32>
    %cst_643 = arith.constant dense<0.000000e+00> : vector<8x128xf32>
    %899 = tpu.matmul %898, %814, %cst_643 {dimension_numbers = #tpu.dot_dimension_numbers<[1], [0], [0], [1], [0, 0, 1, 1], [], []>} : vector<8x16xf32>, vector<16x128xf32>, vector<8x128xf32> -> vector<8x128xf32>
    %cst_644 = arith.constant 0.000000e+00 : f32
    %900 = vector.broadcast %cst_644 : f32 to vector<8x1xf32>
    %901 = vector.extract_strided_slice %899 {offsets = [0, 0], sizes = [8, 127], strides = [1, 1]} : vector<8x128xf32> to vector<8x127xf32>
    %902 = tpu.concatenate %900, %901 in 1 : vector<8x1xf32>, vector<8x127xf32> -> vector<8x128xf32>
    %903 = arith.addf %896, %902 : vector<8x128xf32>
    %c4_645 = arith.constant 4 : index
    %c0_646 = arith.constant 0 : index
    %c0_647 = arith.constant 0 : index
    %904 = vector.load %arg27[%c4_645, %c0_646, %c0_647] : memref<9x8x16xf32, #tpu.memory_space<vmem>>, vector<1x8x16xf32>
    %905 = vector.shape_cast %904 : vector<1x8x16xf32> to vector<8x16xf32>
    %cst_648 = arith.constant dense<0.000000e+00> : vector<8x128xf32>
    %906 = tpu.matmul %905, %814, %cst_648 {dimension_numbers = #tpu.dot_dimension_numbers<[1], [0], [0], [1], [0, 0, 1, 1], [], []>} : vector<8x16xf32>, vector<16x128xf32>, vector<8x128xf32> -> vector<8x128xf32>
    %907 = arith.addf %903, %906 : vector<8x128xf32>
    %c5_649 = arith.constant 5 : index
    %c0_650 = arith.constant 0 : index
    %c0_651 = arith.constant 0 : index
    %908 = vector.load %arg27[%c5_649, %c0_650, %c0_651] : memref<9x8x16xf32, #tpu.memory_space<vmem>>, vector<1x8x16xf32>
    %909 = vector.shape_cast %908 : vector<1x8x16xf32> to vector<8x16xf32>
    %cst_652 = arith.constant dense<0.000000e+00> : vector<8x128xf32>
    %910 = tpu.matmul %909, %814, %cst_652 {dimension_numbers = #tpu.dot_dimension_numbers<[1], [0], [0], [1], [0, 0, 1, 1], [], []>} : vector<8x16xf32>, vector<16x128xf32>, vector<8x128xf32> -> vector<8x128xf32>
    %911 = vector.extract_strided_slice %910 {offsets = [0, 1], sizes = [8, 127], strides = [1, 1]} : vector<8x128xf32> to vector<8x127xf32>
    %cst_653 = arith.constant 0.000000e+00 : f32
    %912 = vector.broadcast %cst_653 : f32 to vector<8x1xf32>
    %913 = tpu.concatenate %911, %912 in 1 : vector<8x127xf32>, vector<8x1xf32> -> vector<8x128xf32>
    %914 = arith.addf %907, %913 : vector<8x128xf32>
    %c6_654 = arith.constant 6 : index
    %c0_655 = arith.constant 0 : index
    %c0_656 = arith.constant 0 : index
    %915 = vector.load %arg27[%c6_654, %c0_655, %c0_656] : memref<9x8x16xf32, #tpu.memory_space<vmem>>, vector<1x8x16xf32>
    %916 = vector.shape_cast %915 : vector<1x8x16xf32> to vector<8x16xf32>
    %cst_657 = arith.constant dense<0.000000e+00> : vector<8x128xf32>
    %917 = tpu.matmul %916, %814, %cst_657 {dimension_numbers = #tpu.dot_dimension_numbers<[1], [0], [0], [1], [0, 0, 1, 1], [], []>} : vector<8x16xf32>, vector<16x128xf32>, vector<8x128xf32> -> vector<8x128xf32>
    %918 = vector.extract_strided_slice %917 {offsets = [0, 9], sizes = [8, 119], strides = [1, 1]} : vector<8x128xf32> to vector<8x119xf32>
    %cst_658 = arith.constant 0.000000e+00 : f32
    %919 = vector.broadcast %cst_658 : f32 to vector<8x9xf32>
    %920 = tpu.concatenate %918, %919 in 1 : vector<8x119xf32>, vector<8x9xf32> -> vector<8x128xf32>
    %921 = arith.addf %914, %920 : vector<8x128xf32>
    %c7_659 = arith.constant 7 : index
    %c0_660 = arith.constant 0 : index
    %c0_661 = arith.constant 0 : index
    %922 = vector.load %arg27[%c7_659, %c0_660, %c0_661] : memref<9x8x16xf32, #tpu.memory_space<vmem>>, vector<1x8x16xf32>
    %923 = vector.shape_cast %922 : vector<1x8x16xf32> to vector<8x16xf32>
    %cst_662 = arith.constant dense<0.000000e+00> : vector<8x128xf32>
    %924 = tpu.matmul %923, %814, %cst_662 {dimension_numbers = #tpu.dot_dimension_numbers<[1], [0], [0], [1], [0, 0, 1, 1], [], []>} : vector<8x16xf32>, vector<16x128xf32>, vector<8x128xf32> -> vector<8x128xf32>
    %925 = vector.extract_strided_slice %924 {offsets = [0, 10], sizes = [8, 118], strides = [1, 1]} : vector<8x128xf32> to vector<8x118xf32>
    %cst_663 = arith.constant 0.000000e+00 : f32
    %926 = vector.broadcast %cst_663 : f32 to vector<8x10xf32>
    %927 = tpu.concatenate %925, %926 in 1 : vector<8x118xf32>, vector<8x10xf32> -> vector<8x128xf32>
    %928 = arith.addf %921, %927 : vector<8x128xf32>
    %c8_664 = arith.constant 8 : index
    %c0_665 = arith.constant 0 : index
    %c0_666 = arith.constant 0 : index
    %929 = vector.load %arg27[%c8_664, %c0_665, %c0_666] : memref<9x8x16xf32, #tpu.memory_space<vmem>>, vector<1x8x16xf32>
    %930 = vector.shape_cast %929 : vector<1x8x16xf32> to vector<8x16xf32>
    %cst_667 = arith.constant dense<0.000000e+00> : vector<8x128xf32>
    %931 = tpu.matmul %930, %814, %cst_667 {dimension_numbers = #tpu.dot_dimension_numbers<[1], [0], [0], [1], [0, 0, 1, 1], [], []>} : vector<8x16xf32>, vector<16x128xf32>, vector<8x128xf32> -> vector<8x128xf32>
    %932 = vector.extract_strided_slice %931 {offsets = [0, 11], sizes = [8, 117], strides = [1, 1]} : vector<8x128xf32> to vector<8x117xf32>
    %cst_668 = arith.constant 0.000000e+00 : f32
    %933 = vector.broadcast %cst_668 : f32 to vector<8x11xf32>
    %934 = tpu.concatenate %932, %933 in 1 : vector<8x117xf32>, vector<8x11xf32> -> vector<8x128xf32>
    %935 = arith.addf %928, %934 : vector<8x128xf32>
    %c0_669 = arith.constant 0 : index
    %c0_670 = arith.constant 0 : index
    %936 = vector.load %arg28[%c0_669, %c0_670] : memref<8x1xf32, #tpu.memory_space<vmem>>, vector<8x1xf32>
    %937 = vector.broadcast %936 : vector<8x1xf32> to vector<8x128xf32>
    %938 = arith.addf %935, %937 : vector<8x128xf32>
    %cst_671 = arith.constant 0.000000e+00 : f32
    %939 = vector.broadcast %cst_671 : f32 to vector<8x128xf32>
    %940 = arith.maximumf %938, %939 : vector<8x128xf32>
    %c0_672 = arith.constant 0 : index
    %c0_673 = arith.constant 0 : index
    %941 = vector.load %arg35[%c0_672, %c0_673] : memref<1x128xf32, #tpu.memory_space<vmem>>, vector<1x128xf32>
    %942 = vector.broadcast %941 : vector<1x128xf32> to vector<8x128xf32>
    %943 = arith.mulf %940, %942 : vector<8x128xf32>
    %c0_674 = arith.constant 0 : index
    %c0_675 = arith.constant 0 : index
    %944 = vector.load %arg46[%c0_674, %c0_675] : memref<128x384xf32, #tpu.memory_space<vmem>>, vector<128x384xf32>
    %cst_676 = arith.constant dense<0.000000e+00> : vector<8x384xf32>
    %945 = tpu.matmul %943, %944, %cst_676 {dimension_numbers = #tpu.dot_dimension_numbers<[1], [0], [0], [1], [0, 0, 1, 1], [], []>} : vector<8x128xf32>, vector<128x384xf32>, vector<8x384xf32> -> vector<8x384xf32>
    %cst_677 = arith.constant 0.000000e+00 : f32
    %946 = vector.broadcast %cst_677 : f32 to vector<4x384xf32>
    %c0_678 = arith.constant 0 : index
    %c0_679 = arith.constant 0 : index
    %c0_680 = arith.constant 0 : index
    %947 = vector.load %arg29[%c0_678, %c0_679, %c0_680] : memref<9x4x4xf32, #tpu.memory_space<vmem>>, vector<1x4x4xf32>
    %948 = vector.shape_cast %947 : vector<1x4x4xf32> to vector<4x4xf32>
    %cst_681 = arith.constant dense<0.000000e+00> : vector<4x384xf32>
    %949 = tpu.matmul %948, %70, %cst_681 {dimension_numbers = #tpu.dot_dimension_numbers<[1], [0], [0], [1], [0, 0, 1, 1], [], []>} : vector<4x4xf32>, vector<4x384xf32>, vector<4x384xf32> -> vector<4x384xf32>
    %cst_682 = arith.constant 0.000000e+00 : f32
    %950 = vector.broadcast %cst_682 : f32 to vector<4x19xf32>
    %951 = vector.extract_strided_slice %949 {offsets = [0, 0], sizes = [4, 365], strides = [1, 1]} : vector<4x384xf32> to vector<4x365xf32>
    %952 = tpu.concatenate %950, %951 in 1 : vector<4x19xf32>, vector<4x365xf32> -> vector<4x384xf32>
    %953 = arith.addf %946, %952 : vector<4x384xf32>
    %c1_683 = arith.constant 1 : index
    %c0_684 = arith.constant 0 : index
    %c0_685 = arith.constant 0 : index
    %954 = vector.load %arg29[%c1_683, %c0_684, %c0_685] : memref<9x4x4xf32, #tpu.memory_space<vmem>>, vector<1x4x4xf32>
    %955 = vector.shape_cast %954 : vector<1x4x4xf32> to vector<4x4xf32>
    %cst_686 = arith.constant dense<0.000000e+00> : vector<4x384xf32>
    %956 = tpu.matmul %955, %70, %cst_686 {dimension_numbers = #tpu.dot_dimension_numbers<[1], [0], [0], [1], [0, 0, 1, 1], [], []>} : vector<4x4xf32>, vector<4x384xf32>, vector<4x384xf32> -> vector<4x384xf32>
    %cst_687 = arith.constant 0.000000e+00 : f32
    %957 = vector.broadcast %cst_687 : f32 to vector<4x18xf32>
    %958 = vector.extract_strided_slice %956 {offsets = [0, 0], sizes = [4, 366], strides = [1, 1]} : vector<4x384xf32> to vector<4x366xf32>
    %959 = tpu.concatenate %957, %958 in 1 : vector<4x18xf32>, vector<4x366xf32> -> vector<4x384xf32>
    %960 = arith.addf %953, %959 : vector<4x384xf32>
    %c2_688 = arith.constant 2 : index
    %c0_689 = arith.constant 0 : index
    %c0_690 = arith.constant 0 : index
    %961 = vector.load %arg29[%c2_688, %c0_689, %c0_690] : memref<9x4x4xf32, #tpu.memory_space<vmem>>, vector<1x4x4xf32>
    %962 = vector.shape_cast %961 : vector<1x4x4xf32> to vector<4x4xf32>
    %cst_691 = arith.constant dense<0.000000e+00> : vector<4x384xf32>
    %963 = tpu.matmul %962, %70, %cst_691 {dimension_numbers = #tpu.dot_dimension_numbers<[1], [0], [0], [1], [0, 0, 1, 1], [], []>} : vector<4x4xf32>, vector<4x384xf32>, vector<4x384xf32> -> vector<4x384xf32>
    %cst_692 = arith.constant 0.000000e+00 : f32
    %964 = vector.broadcast %cst_692 : f32 to vector<4x17xf32>
    %965 = vector.extract_strided_slice %963 {offsets = [0, 0], sizes = [4, 367], strides = [1, 1]} : vector<4x384xf32> to vector<4x367xf32>
    %966 = tpu.concatenate %964, %965 in 1 : vector<4x17xf32>, vector<4x367xf32> -> vector<4x384xf32>
    %967 = arith.addf %960, %966 : vector<4x384xf32>
    %c3_693 = arith.constant 3 : index
    %c0_694 = arith.constant 0 : index
    %c0_695 = arith.constant 0 : index
    %968 = vector.load %arg29[%c3_693, %c0_694, %c0_695] : memref<9x4x4xf32, #tpu.memory_space<vmem>>, vector<1x4x4xf32>
    %969 = vector.shape_cast %968 : vector<1x4x4xf32> to vector<4x4xf32>
    %cst_696 = arith.constant dense<0.000000e+00> : vector<4x384xf32>
    %970 = tpu.matmul %969, %70, %cst_696 {dimension_numbers = #tpu.dot_dimension_numbers<[1], [0], [0], [1], [0, 0, 1, 1], [], []>} : vector<4x4xf32>, vector<4x384xf32>, vector<4x384xf32> -> vector<4x384xf32>
    %cst_697 = arith.constant 0.000000e+00 : f32
    %971 = vector.broadcast %cst_697 : f32 to vector<4x1xf32>
    %972 = vector.extract_strided_slice %970 {offsets = [0, 0], sizes = [4, 383], strides = [1, 1]} : vector<4x384xf32> to vector<4x383xf32>
    %973 = tpu.concatenate %971, %972 in 1 : vector<4x1xf32>, vector<4x383xf32> -> vector<4x384xf32>
    %974 = arith.addf %967, %973 : vector<4x384xf32>
    %c4_698 = arith.constant 4 : index
    %c0_699 = arith.constant 0 : index
    %c0_700 = arith.constant 0 : index
    %975 = vector.load %arg29[%c4_698, %c0_699, %c0_700] : memref<9x4x4xf32, #tpu.memory_space<vmem>>, vector<1x4x4xf32>
    %976 = vector.shape_cast %975 : vector<1x4x4xf32> to vector<4x4xf32>
    %cst_701 = arith.constant dense<0.000000e+00> : vector<4x384xf32>
    %977 = tpu.matmul %976, %70, %cst_701 {dimension_numbers = #tpu.dot_dimension_numbers<[1], [0], [0], [1], [0, 0, 1, 1], [], []>} : vector<4x4xf32>, vector<4x384xf32>, vector<4x384xf32> -> vector<4x384xf32>
    %978 = arith.addf %974, %977 : vector<4x384xf32>
    %c5_702 = arith.constant 5 : index
    %c0_703 = arith.constant 0 : index
    %c0_704 = arith.constant 0 : index
    %979 = vector.load %arg29[%c5_702, %c0_703, %c0_704] : memref<9x4x4xf32, #tpu.memory_space<vmem>>, vector<1x4x4xf32>
    %980 = vector.shape_cast %979 : vector<1x4x4xf32> to vector<4x4xf32>
    %cst_705 = arith.constant dense<0.000000e+00> : vector<4x384xf32>
    %981 = tpu.matmul %980, %70, %cst_705 {dimension_numbers = #tpu.dot_dimension_numbers<[1], [0], [0], [1], [0, 0, 1, 1], [], []>} : vector<4x4xf32>, vector<4x384xf32>, vector<4x384xf32> -> vector<4x384xf32>
    %982 = vector.extract_strided_slice %981 {offsets = [0, 1], sizes = [4, 383], strides = [1, 1]} : vector<4x384xf32> to vector<4x383xf32>
    %cst_706 = arith.constant 0.000000e+00 : f32
    %983 = vector.broadcast %cst_706 : f32 to vector<4x1xf32>
    %984 = tpu.concatenate %982, %983 in 1 : vector<4x383xf32>, vector<4x1xf32> -> vector<4x384xf32>
    %985 = arith.addf %978, %984 : vector<4x384xf32>
    %c6_707 = arith.constant 6 : index
    %c0_708 = arith.constant 0 : index
    %c0_709 = arith.constant 0 : index
    %986 = vector.load %arg29[%c6_707, %c0_708, %c0_709] : memref<9x4x4xf32, #tpu.memory_space<vmem>>, vector<1x4x4xf32>
    %987 = vector.shape_cast %986 : vector<1x4x4xf32> to vector<4x4xf32>
    %cst_710 = arith.constant dense<0.000000e+00> : vector<4x384xf32>
    %988 = tpu.matmul %987, %70, %cst_710 {dimension_numbers = #tpu.dot_dimension_numbers<[1], [0], [0], [1], [0, 0, 1, 1], [], []>} : vector<4x4xf32>, vector<4x384xf32>, vector<4x384xf32> -> vector<4x384xf32>
    %989 = vector.extract_strided_slice %988 {offsets = [0, 17], sizes = [4, 367], strides = [1, 1]} : vector<4x384xf32> to vector<4x367xf32>
    %cst_711 = arith.constant 0.000000e+00 : f32
    %990 = vector.broadcast %cst_711 : f32 to vector<4x17xf32>
    %991 = tpu.concatenate %989, %990 in 1 : vector<4x367xf32>, vector<4x17xf32> -> vector<4x384xf32>
    %992 = arith.addf %985, %991 : vector<4x384xf32>
    %c7_712 = arith.constant 7 : index
    %c0_713 = arith.constant 0 : index
    %c0_714 = arith.constant 0 : index
    %993 = vector.load %arg29[%c7_712, %c0_713, %c0_714] : memref<9x4x4xf32, #tpu.memory_space<vmem>>, vector<1x4x4xf32>
    %994 = vector.shape_cast %993 : vector<1x4x4xf32> to vector<4x4xf32>
    %cst_715 = arith.constant dense<0.000000e+00> : vector<4x384xf32>
    %995 = tpu.matmul %994, %70, %cst_715 {dimension_numbers = #tpu.dot_dimension_numbers<[1], [0], [0], [1], [0, 0, 1, 1], [], []>} : vector<4x4xf32>, vector<4x384xf32>, vector<4x384xf32> -> vector<4x384xf32>
    %996 = vector.extract_strided_slice %995 {offsets = [0, 18], sizes = [4, 366], strides = [1, 1]} : vector<4x384xf32> to vector<4x366xf32>
    %cst_716 = arith.constant 0.000000e+00 : f32
    %997 = vector.broadcast %cst_716 : f32 to vector<4x18xf32>
    %998 = tpu.concatenate %996, %997 in 1 : vector<4x366xf32>, vector<4x18xf32> -> vector<4x384xf32>
    %999 = arith.addf %992, %998 : vector<4x384xf32>
    %c8_717 = arith.constant 8 : index
    %c0_718 = arith.constant 0 : index
    %c0_719 = arith.constant 0 : index
    %1000 = vector.load %arg29[%c8_717, %c0_718, %c0_719] : memref<9x4x4xf32, #tpu.memory_space<vmem>>, vector<1x4x4xf32>
    %1001 = vector.shape_cast %1000 : vector<1x4x4xf32> to vector<4x4xf32>
    %cst_720 = arith.constant dense<0.000000e+00> : vector<4x384xf32>
    %1002 = tpu.matmul %1001, %70, %cst_720 {dimension_numbers = #tpu.dot_dimension_numbers<[1], [0], [0], [1], [0, 0, 1, 1], [], []>} : vector<4x4xf32>, vector<4x384xf32>, vector<4x384xf32> -> vector<4x384xf32>
    %1003 = vector.extract_strided_slice %1002 {offsets = [0, 19], sizes = [4, 365], strides = [1, 1]} : vector<4x384xf32> to vector<4x365xf32>
    %cst_721 = arith.constant 0.000000e+00 : f32
    %1004 = vector.broadcast %cst_721 : f32 to vector<4x19xf32>
    %1005 = tpu.concatenate %1003, %1004 in 1 : vector<4x365xf32>, vector<4x19xf32> -> vector<4x384xf32>
    %1006 = arith.addf %999, %1005 : vector<4x384xf32>
    %c0_722 = arith.constant 0 : index
    %c0_723 = arith.constant 0 : index
    %c0_724 = arith.constant 0 : index
    %1007 = vector.load %arg30[%c0_722, %c0_723, %c0_724] : memref<9x4x8xf32, #tpu.memory_space<vmem>>, vector<1x4x8xf32>
    %1008 = vector.shape_cast %1007 : vector<1x4x8xf32> to vector<4x8xf32>
    %cst_725 = arith.constant dense<0.000000e+00> : vector<4x384xf32>
    %1009 = tpu.matmul %1008, %945, %cst_725 {dimension_numbers = #tpu.dot_dimension_numbers<[1], [0], [0], [1], [0, 0, 1, 1], [], []>} : vector<4x8xf32>, vector<8x384xf32>, vector<4x384xf32> -> vector<4x384xf32>
    %cst_726 = arith.constant 0.000000e+00 : f32
    %1010 = vector.broadcast %cst_726 : f32 to vector<4x19xf32>
    %1011 = vector.extract_strided_slice %1009 {offsets = [0, 0], sizes = [4, 365], strides = [1, 1]} : vector<4x384xf32> to vector<4x365xf32>
    %1012 = tpu.concatenate %1010, %1011 in 1 : vector<4x19xf32>, vector<4x365xf32> -> vector<4x384xf32>
    %1013 = arith.addf %1006, %1012 : vector<4x384xf32>
    %c1_727 = arith.constant 1 : index
    %c0_728 = arith.constant 0 : index
    %c0_729 = arith.constant 0 : index
    %1014 = vector.load %arg30[%c1_727, %c0_728, %c0_729] : memref<9x4x8xf32, #tpu.memory_space<vmem>>, vector<1x4x8xf32>
    %1015 = vector.shape_cast %1014 : vector<1x4x8xf32> to vector<4x8xf32>
    %cst_730 = arith.constant dense<0.000000e+00> : vector<4x384xf32>
    %1016 = tpu.matmul %1015, %945, %cst_730 {dimension_numbers = #tpu.dot_dimension_numbers<[1], [0], [0], [1], [0, 0, 1, 1], [], []>} : vector<4x8xf32>, vector<8x384xf32>, vector<4x384xf32> -> vector<4x384xf32>
    %cst_731 = arith.constant 0.000000e+00 : f32
    %1017 = vector.broadcast %cst_731 : f32 to vector<4x18xf32>
    %1018 = vector.extract_strided_slice %1016 {offsets = [0, 0], sizes = [4, 366], strides = [1, 1]} : vector<4x384xf32> to vector<4x366xf32>
    %1019 = tpu.concatenate %1017, %1018 in 1 : vector<4x18xf32>, vector<4x366xf32> -> vector<4x384xf32>
    %1020 = arith.addf %1013, %1019 : vector<4x384xf32>
    %c2_732 = arith.constant 2 : index
    %c0_733 = arith.constant 0 : index
    %c0_734 = arith.constant 0 : index
    %1021 = vector.load %arg30[%c2_732, %c0_733, %c0_734] : memref<9x4x8xf32, #tpu.memory_space<vmem>>, vector<1x4x8xf32>
    %1022 = vector.shape_cast %1021 : vector<1x4x8xf32> to vector<4x8xf32>
    %cst_735 = arith.constant dense<0.000000e+00> : vector<4x384xf32>
    %1023 = tpu.matmul %1022, %945, %cst_735 {dimension_numbers = #tpu.dot_dimension_numbers<[1], [0], [0], [1], [0, 0, 1, 1], [], []>} : vector<4x8xf32>, vector<8x384xf32>, vector<4x384xf32> -> vector<4x384xf32>
    %cst_736 = arith.constant 0.000000e+00 : f32
    %1024 = vector.broadcast %cst_736 : f32 to vector<4x17xf32>
    %1025 = vector.extract_strided_slice %1023 {offsets = [0, 0], sizes = [4, 367], strides = [1, 1]} : vector<4x384xf32> to vector<4x367xf32>
    %1026 = tpu.concatenate %1024, %1025 in 1 : vector<4x17xf32>, vector<4x367xf32> -> vector<4x384xf32>
    %1027 = arith.addf %1020, %1026 : vector<4x384xf32>
    %c3_737 = arith.constant 3 : index
    %c0_738 = arith.constant 0 : index
    %c0_739 = arith.constant 0 : index
    %1028 = vector.load %arg30[%c3_737, %c0_738, %c0_739] : memref<9x4x8xf32, #tpu.memory_space<vmem>>, vector<1x4x8xf32>
    %1029 = vector.shape_cast %1028 : vector<1x4x8xf32> to vector<4x8xf32>
    %cst_740 = arith.constant dense<0.000000e+00> : vector<4x384xf32>
    %1030 = tpu.matmul %1029, %945, %cst_740 {dimension_numbers = #tpu.dot_dimension_numbers<[1], [0], [0], [1], [0, 0, 1, 1], [], []>} : vector<4x8xf32>, vector<8x384xf32>, vector<4x384xf32> -> vector<4x384xf32>
    %cst_741 = arith.constant 0.000000e+00 : f32
    %1031 = vector.broadcast %cst_741 : f32 to vector<4x1xf32>
    %1032 = vector.extract_strided_slice %1030 {offsets = [0, 0], sizes = [4, 383], strides = [1, 1]} : vector<4x384xf32> to vector<4x383xf32>
    %1033 = tpu.concatenate %1031, %1032 in 1 : vector<4x1xf32>, vector<4x383xf32> -> vector<4x384xf32>
    %1034 = arith.addf %1027, %1033 : vector<4x384xf32>
    %c4_742 = arith.constant 4 : index
    %c0_743 = arith.constant 0 : index
    %c0_744 = arith.constant 0 : index
    %1035 = vector.load %arg30[%c4_742, %c0_743, %c0_744] : memref<9x4x8xf32, #tpu.memory_space<vmem>>, vector<1x4x8xf32>
    %1036 = vector.shape_cast %1035 : vector<1x4x8xf32> to vector<4x8xf32>
    %cst_745 = arith.constant dense<0.000000e+00> : vector<4x384xf32>
    %1037 = tpu.matmul %1036, %945, %cst_745 {dimension_numbers = #tpu.dot_dimension_numbers<[1], [0], [0], [1], [0, 0, 1, 1], [], []>} : vector<4x8xf32>, vector<8x384xf32>, vector<4x384xf32> -> vector<4x384xf32>
    %1038 = arith.addf %1034, %1037 : vector<4x384xf32>
    %c5_746 = arith.constant 5 : index
    %c0_747 = arith.constant 0 : index
    %c0_748 = arith.constant 0 : index
    %1039 = vector.load %arg30[%c5_746, %c0_747, %c0_748] : memref<9x4x8xf32, #tpu.memory_space<vmem>>, vector<1x4x8xf32>
    %1040 = vector.shape_cast %1039 : vector<1x4x8xf32> to vector<4x8xf32>
    %cst_749 = arith.constant dense<0.000000e+00> : vector<4x384xf32>
    %1041 = tpu.matmul %1040, %945, %cst_749 {dimension_numbers = #tpu.dot_dimension_numbers<[1], [0], [0], [1], [0, 0, 1, 1], [], []>} : vector<4x8xf32>, vector<8x384xf32>, vector<4x384xf32> -> vector<4x384xf32>
    %1042 = vector.extract_strided_slice %1041 {offsets = [0, 1], sizes = [4, 383], strides = [1, 1]} : vector<4x384xf32> to vector<4x383xf32>
    %cst_750 = arith.constant 0.000000e+00 : f32
    %1043 = vector.broadcast %cst_750 : f32 to vector<4x1xf32>
    %1044 = tpu.concatenate %1042, %1043 in 1 : vector<4x383xf32>, vector<4x1xf32> -> vector<4x384xf32>
    %1045 = arith.addf %1038, %1044 : vector<4x384xf32>
    %c6_751 = arith.constant 6 : index
    %c0_752 = arith.constant 0 : index
    %c0_753 = arith.constant 0 : index
    %1046 = vector.load %arg30[%c6_751, %c0_752, %c0_753] : memref<9x4x8xf32, #tpu.memory_space<vmem>>, vector<1x4x8xf32>
    %1047 = vector.shape_cast %1046 : vector<1x4x8xf32> to vector<4x8xf32>
    %cst_754 = arith.constant dense<0.000000e+00> : vector<4x384xf32>
    %1048 = tpu.matmul %1047, %945, %cst_754 {dimension_numbers = #tpu.dot_dimension_numbers<[1], [0], [0], [1], [0, 0, 1, 1], [], []>} : vector<4x8xf32>, vector<8x384xf32>, vector<4x384xf32> -> vector<4x384xf32>
    %1049 = vector.extract_strided_slice %1048 {offsets = [0, 17], sizes = [4, 367], strides = [1, 1]} : vector<4x384xf32> to vector<4x367xf32>
    %cst_755 = arith.constant 0.000000e+00 : f32
    %1050 = vector.broadcast %cst_755 : f32 to vector<4x17xf32>
    %1051 = tpu.concatenate %1049, %1050 in 1 : vector<4x367xf32>, vector<4x17xf32> -> vector<4x384xf32>
    %1052 = arith.addf %1045, %1051 : vector<4x384xf32>
    %c7_756 = arith.constant 7 : index
    %c0_757 = arith.constant 0 : index
    %c0_758 = arith.constant 0 : index
    %1053 = vector.load %arg30[%c7_756, %c0_757, %c0_758] : memref<9x4x8xf32, #tpu.memory_space<vmem>>, vector<1x4x8xf32>
    %1054 = vector.shape_cast %1053 : vector<1x4x8xf32> to vector<4x8xf32>
    %cst_759 = arith.constant dense<0.000000e+00> : vector<4x384xf32>
    %1055 = tpu.matmul %1054, %945, %cst_759 {dimension_numbers = #tpu.dot_dimension_numbers<[1], [0], [0], [1], [0, 0, 1, 1], [], []>} : vector<4x8xf32>, vector<8x384xf32>, vector<4x384xf32> -> vector<4x384xf32>
    %1056 = vector.extract_strided_slice %1055 {offsets = [0, 18], sizes = [4, 366], strides = [1, 1]} : vector<4x384xf32> to vector<4x366xf32>
    %cst_760 = arith.constant 0.000000e+00 : f32
    %1057 = vector.broadcast %cst_760 : f32 to vector<4x18xf32>
    %1058 = tpu.concatenate %1056, %1057 in 1 : vector<4x366xf32>, vector<4x18xf32> -> vector<4x384xf32>
    %1059 = arith.addf %1052, %1058 : vector<4x384xf32>
    %c8_761 = arith.constant 8 : index
    %c0_762 = arith.constant 0 : index
    %c0_763 = arith.constant 0 : index
    %1060 = vector.load %arg30[%c8_761, %c0_762, %c0_763] : memref<9x4x8xf32, #tpu.memory_space<vmem>>, vector<1x4x8xf32>
    %1061 = vector.shape_cast %1060 : vector<1x4x8xf32> to vector<4x8xf32>
    %cst_764 = arith.constant dense<0.000000e+00> : vector<4x384xf32>
    %1062 = tpu.matmul %1061, %945, %cst_764 {dimension_numbers = #tpu.dot_dimension_numbers<[1], [0], [0], [1], [0, 0, 1, 1], [], []>} : vector<4x8xf32>, vector<8x384xf32>, vector<4x384xf32> -> vector<4x384xf32>
    %1063 = vector.extract_strided_slice %1062 {offsets = [0, 19], sizes = [4, 365], strides = [1, 1]} : vector<4x384xf32> to vector<4x365xf32>
    %cst_765 = arith.constant 0.000000e+00 : f32
    %1064 = vector.broadcast %cst_765 : f32 to vector<4x19xf32>
    %1065 = tpu.concatenate %1063, %1064 in 1 : vector<4x365xf32>, vector<4x19xf32> -> vector<4x384xf32>
    %1066 = arith.addf %1059, %1065 : vector<4x384xf32>
    %c0_766 = arith.constant 0 : index
    %c0_767 = arith.constant 0 : index
    %1067 = vector.load %arg31[%c0_766, %c0_767] : memref<4x1xf32, #tpu.memory_space<vmem>>, vector<4x1xf32>
    %1068 = vector.broadcast %1067 : vector<4x1xf32> to vector<4x384xf32>
    %1069 = arith.addf %1066, %1068 : vector<4x384xf32>
    %cst_768 = arith.constant 0.000000e+00 : f32
    %1070 = vector.broadcast %cst_768 : f32 to vector<4x384xf32>
    %1071 = arith.maximumf %1069, %1070 : vector<4x384xf32>
    %c0_769 = arith.constant 0 : index
    %c0_770 = arith.constant 0 : index
    %1072 = vector.load %arg34[%c0_769, %c0_770] : memref<1x384xf32, #tpu.memory_space<vmem>>, vector<1x384xf32>
    %1073 = vector.broadcast %1072 : vector<1x384xf32> to vector<4x384xf32>
    %1074 = arith.mulf %1071, %1073 : vector<4x384xf32>
    %c0_771 = arith.constant 0 : index
    %c0_772 = arith.constant 0 : index
    %1075 = vector.load %arg32[%c0_771, %c0_772] : memref<4x1xf32, #tpu.memory_space<vmem>>, vector<4x1xf32>
    %1076 = vector.broadcast %1075 : vector<4x1xf32> to vector<4x384xf32>
    %1077 = arith.mulf %1076, %1074 : vector<4x384xf32>
    %cst_773 = arith.constant dense<0.000000e+00> : vector<384xf32>
    %1078 = vector.multi_reduction <add>, %1077, %cst_773 [0] : vector<4x384xf32> to vector<384xf32>
    %1079 = vector.shape_cast %1078 : vector<384xf32> to vector<1x384xf32>
    %c0_774 = arith.constant 0 : index
    %c0_775 = arith.constant 0 : index
    %1080 = vector.load %arg33[%c0_774, %c0_775] : memref<1x1xf32, #tpu.memory_space<vmem>>, vector<1x1xf32>
    %1081 = vector.broadcast %1080 : vector<1x1xf32> to vector<1x384xf32>
    %1082 = arith.addf %1079, %1081 : vector<1x384xf32>
    %c0_776 = arith.constant 0 : index
    %c0_777 = arith.constant 0 : index
    %c0_778 = arith.constant 0 : index
    %1083 = vector.load %arg47[%c0_776, %c0_777, %c0_778] : memref<1x1x384xf32, #tpu.memory_space<vmem>>, vector<1x1x384xf32>
    %1084 = vector.shape_cast %1083 : vector<1x1x384xf32> to vector<1x384xf32>
    %1085 = vector.shape_cast %1082 : vector<1x384xf32> to vector<1x1x384xf32>
    tpu.vector_store %arg47[%c0_776, %c0_777, %c0_778], %1085 {strides = array<i32>} : memref<1x1x384xf32, #tpu.memory_space<vmem>>, vector<1x1x384xf32>,
    return
  }
  func.func @transform_0(%arg0: i32) -> (i32, i32, i32) {
    %c0_i32 = arith.constant 0 : i32
    %c0_i32_0 = arith.constant 0 : i32
    %c0_i32_1 = arith.constant 0 : i32
    return %arg0, %c0_i32, %c0_i32_0 : i32, i32, i32
  }
  func.func @transform_1(%arg0: i32) -> (i32, i32, i32) {
    %c0_i32 = arith.constant 0 : i32
    %c0_i32_0 = arith.constant 0 : i32
    %c0_i32_1 = arith.constant 0 : i32
    %c0_i32_2 = arith.constant 0 : i32
    return %c0_i32, %c0_i32_0, %c0_i32_1 : i32, i32, i32
  }
  func.func @transform_2(%arg0: i32) -> (i32, i32) {
    %c0_i32 = arith.constant 0 : i32
    %c0_i32_0 = arith.constant 0 : i32
    %c0_i32_1 = arith.constant 0 : i32
    return %c0_i32, %c0_i32_0 : i32, i32
  }
  func.func @transform_3(%arg0: i32) -> (i32, i32, i32) {
    %c0_i32 = arith.constant 0 : i32
    %c0_i32_0 = arith.constant 0 : i32
    %c0_i32_1 = arith.constant 0 : i32
    %c0_i32_2 = arith.constant 0 : i32
    return %c0_i32, %c0_i32_0, %c0_i32_1 : i32, i32, i32
  }
  func.func @transform_4(%arg0: i32) -> (i32, i32) {
    %c0_i32 = arith.constant 0 : i32
    %c0_i32_0 = arith.constant 0 : i32
    %c0_i32_1 = arith.constant 0 : i32
    return %c0_i32, %c0_i32_0 : i32, i32
  }
  func.func @transform_5(%arg0: i32) -> (i32, i32, i32) {
    %c0_i32 = arith.constant 0 : i32
    %c0_i32_0 = arith.constant 0 : i32
    %c0_i32_1 = arith.constant 0 : i32
    %c0_i32_2 = arith.constant 0 : i32
    return %c0_i32, %c0_i32_0, %c0_i32_1 : i32, i32, i32
  }
  func.func @transform_6(%arg0: i32) -> (i32, i32) {
    %c0_i32 = arith.constant 0 : i32
    %c0_i32_0 = arith.constant 0 : i32
    %c0_i32_1 = arith.constant 0 : i32
    return %c0_i32, %c0_i32_0 : i32, i32
  }
  func.func @transform_7(%arg0: i32) -> (i32, i32, i32) {
    %c0_i32 = arith.constant 0 : i32
    %c0_i32_0 = arith.constant 0 : i32
    %c0_i32_1 = arith.constant 0 : i32
    %c0_i32_2 = arith.constant 0 : i32
    return %c0_i32, %c0_i32_0, %c0_i32_1 : i32, i32, i32
  }
  func.func @transform_8(%arg0: i32) -> (i32, i32) {
    %c0_i32 = arith.constant 0 : i32
    %c0_i32_0 = arith.constant 0 : i32
    %c0_i32_1 = arith.constant 0 : i32
    return %c0_i32, %c0_i32_0 : i32, i32
  }
  func.func @transform_9(%arg0: i32) -> (i32, i32, i32) {
    %c0_i32 = arith.constant 0 : i32
    %c0_i32_0 = arith.constant 0 : i32
    %c0_i32_1 = arith.constant 0 : i32
    %c0_i32_2 = arith.constant 0 : i32
    return %c0_i32, %c0_i32_0, %c0_i32_1 : i32, i32, i32
  }
  func.func @transform_10(%arg0: i32) -> (i32, i32) {
    %c0_i32 = arith.constant 0 : i32
    %c0_i32_0 = arith.constant 0 : i32
    %c0_i32_1 = arith.constant 0 : i32
    return %c0_i32, %c0_i32_0 : i32, i32
  }
  func.func @transform_11(%arg0: i32) -> (i32, i32, i32) {
    %c0_i32 = arith.constant 0 : i32
    %c0_i32_0 = arith.constant 0 : i32
    %c0_i32_1 = arith.constant 0 : i32
    %c0_i32_2 = arith.constant 0 : i32
    return %c0_i32, %c0_i32_0, %c0_i32_1 : i32, i32, i32
  }
  func.func @transform_12(%arg0: i32) -> (i32, i32) {
    %c0_i32 = arith.constant 0 : i32
    %c0_i32_0 = arith.constant 0 : i32
    %c0_i32_1 = arith.constant 0 : i32
    return %c0_i32, %c0_i32_0 : i32, i32
  }
  func.func @transform_13(%arg0: i32) -> (i32, i32, i32) {
    %c0_i32 = arith.constant 0 : i32
    %c0_i32_0 = arith.constant 0 : i32
    %c0_i32_1 = arith.constant 0 : i32
    %c0_i32_2 = arith.constant 0 : i32
    return %c0_i32, %c0_i32_0, %c0_i32_1 : i32, i32, i32
  }
  func.func @transform_14(%arg0: i32) -> (i32, i32) {
    %c0_i32 = arith.constant 0 : i32
    %c0_i32_0 = arith.constant 0 : i32
    %c0_i32_1 = arith.constant 0 : i32
    return %c0_i32, %c0_i32_0 : i32, i32
  }
  func.func @transform_15(%arg0: i32) -> (i32, i32, i32) {
    %c0_i32 = arith.constant 0 : i32
    %c0_i32_0 = arith.constant 0 : i32
    %c0_i32_1 = arith.constant 0 : i32
    %c0_i32_2 = arith.constant 0 : i32
    return %c0_i32, %c0_i32_0, %c0_i32_1 : i32, i32, i32
  }
  func.func @transform_16(%arg0: i32) -> (i32, i32) {
    %c0_i32 = arith.constant 0 : i32
    %c0_i32_0 = arith.constant 0 : i32
    %c0_i32_1 = arith.constant 0 : i32
    return %c0_i32, %c0_i32_0 : i32, i32
  }
  func.func @transform_17(%arg0: i32) -> (i32, i32, i32) {
    %c0_i32 = arith.constant 0 : i32
    %c0_i32_0 = arith.constant 0 : i32
    %c0_i32_1 = arith.constant 0 : i32
    %c0_i32_2 = arith.constant 0 : i32
    return %c0_i32, %c0_i32_0, %c0_i32_1 : i32, i32, i32
  }
  func.func @transform_18(%arg0: i32) -> (i32, i32) {
    %c0_i32 = arith.constant 0 : i32
    %c0_i32_0 = arith.constant 0 : i32
    %c0_i32_1 = arith.constant 0 : i32
    return %c0_i32, %c0_i32_0 : i32, i32
  }
  func.func @transform_19(%arg0: i32) -> (i32, i32, i32) {
    %c0_i32 = arith.constant 0 : i32
    %c0_i32_0 = arith.constant 0 : i32
    %c0_i32_1 = arith.constant 0 : i32
    %c0_i32_2 = arith.constant 0 : i32
    return %c0_i32, %c0_i32_0, %c0_i32_1 : i32, i32, i32
  }
  func.func @transform_20(%arg0: i32) -> (i32, i32, i32) {
    %c0_i32 = arith.constant 0 : i32
    %c0_i32_0 = arith.constant 0 : i32
    %c0_i32_1 = arith.constant 0 : i32
    %c0_i32_2 = arith.constant 0 : i32
    return %c0_i32, %c0_i32_0, %c0_i32_1 : i32, i32, i32
  }
  func.func @transform_21(%arg0: i32) -> (i32, i32) {
    %c0_i32 = arith.constant 0 : i32
    %c0_i32_0 = arith.constant 0 : i32
    %c0_i32_1 = arith.constant 0 : i32
    return %c0_i32, %c0_i32_0 : i32, i32
  }
  func.func @transform_22(%arg0: i32) -> (i32, i32, i32) {
    %c0_i32 = arith.constant 0 : i32
    %c0_i32_0 = arith.constant 0 : i32
    %c0_i32_1 = arith.constant 0 : i32
    %c0_i32_2 = arith.constant 0 : i32
    return %c0_i32, %c0_i32_0, %c0_i32_1 : i32, i32, i32
  }
  func.func @transform_23(%arg0: i32) -> (i32, i32, i32) {
    %c0_i32 = arith.constant 0 : i32
    %c0_i32_0 = arith.constant 0 : i32
    %c0_i32_1 = arith.constant 0 : i32
    %c0_i32_2 = arith.constant 0 : i32
    return %c0_i32, %c0_i32_0, %c0_i32_1 : i32, i32, i32
  }
  func.func @transform_24(%arg0: i32) -> (i32, i32) {
    %c0_i32 = arith.constant 0 : i32
    %c0_i32_0 = arith.constant 0 : i32
    %c0_i32_1 = arith.constant 0 : i32
    return %c0_i32, %c0_i32_0 : i32, i32
  }
  func.func @transform_25(%arg0: i32) -> (i32, i32, i32) {
    %c0_i32 = arith.constant 0 : i32
    %c0_i32_0 = arith.constant 0 : i32
    %c0_i32_1 = arith.constant 0 : i32
    %c0_i32_2 = arith.constant 0 : i32
    return %c0_i32, %c0_i32_0, %c0_i32_1 : i32, i32, i32
  }
  func.func @transform_26(%arg0: i32) -> (i32, i32, i32) {
    %c0_i32 = arith.constant 0 : i32
    %c0_i32_0 = arith.constant 0 : i32
    %c0_i32_1 = arith.constant 0 : i32
    %c0_i32_2 = arith.constant 0 : i32
    return %c0_i32, %c0_i32_0, %c0_i32_1 : i32, i32, i32
  }
  func.func @transform_27(%arg0: i32) -> (i32, i32) {
    %c0_i32 = arith.constant 0 : i32
    %c0_i32_0 = arith.constant 0 : i32
    %c0_i32_1 = arith.constant 0 : i32
    return %c0_i32, %c0_i32_0 : i32, i32
  }
  func.func @transform_28(%arg0: i32) -> (i32, i32, i32) {
    %c0_i32 = arith.constant 0 : i32
    %c0_i32_0 = arith.constant 0 : i32
    %c0_i32_1 = arith.constant 0 : i32
    %c0_i32_2 = arith.constant 0 : i32
    return %c0_i32, %c0_i32_0, %c0_i32_1 : i32, i32, i32
  }
  func.func @transform_29(%arg0: i32) -> (i32, i32, i32) {
    %c0_i32 = arith.constant 0 : i32
    %c0_i32_0 = arith.constant 0 : i32
    %c0_i32_1 = arith.constant 0 : i32
    %c0_i32_2 = arith.constant 0 : i32
    return %c0_i32, %c0_i32_0, %c0_i32_1 : i32, i32, i32
  }
  func.func @transform_30(%arg0: i32) -> (i32, i32) {
    %c0_i32 = arith.constant 0 : i32
    %c0_i32_0 = arith.constant 0 : i32
    %c0_i32_1 = arith.constant 0 : i32
    return %c0_i32, %c0_i32_0 : i32, i32
  }
  func.func @transform_31(%arg0: i32) -> (i32, i32) {
    %c0_i32 = arith.constant 0 : i32
    %c0_i32_0 = arith.constant 0 : i32
    %c0_i32_1 = arith.constant 0 : i32
    return %c0_i32, %c0_i32_0 : i32, i32
  }
  func.func @transform_32(%arg0: i32) -> (i32, i32) {
    %c0_i32 = arith.constant 0 : i32
    %c0_i32_0 = arith.constant 0 : i32
    %c0_i32_1 = arith.constant 0 : i32
    return %c0_i32, %c0_i32_0 : i32, i32
  }
  func.func @transform_33(%arg0: i32) -> (i32, i32) {
    %c0_i32 = arith.constant 0 : i32
    %c0_i32_0 = arith.constant 0 : i32
    %c0_i32_1 = arith.constant 0 : i32
    return %c0_i32, %c0_i32_0 : i32, i32
  }
  func.func @transform_34(%arg0: i32) -> (i32, i32) {
    %c0_i32 = arith.constant 0 : i32
    %c0_i32_0 = arith.constant 0 : i32
    %c0_i32_1 = arith.constant 0 : i32
    return %c0_i32, %c0_i32_0 : i32, i32
  }
  func.func @transform_35(%arg0: i32) -> (i32, i32) {
    %c0_i32 = arith.constant 0 : i32
    %c0_i32_0 = arith.constant 0 : i32
    %c0_i32_1 = arith.constant 0 : i32
    return %c0_i32, %c0_i32_0 : i32, i32
  }
  func.func @transform_36(%arg0: i32) -> (i32, i32) {
    %c0_i32 = arith.constant 0 : i32
    %c0_i32_0 = arith.constant 0 : i32
    %c0_i32_1 = arith.constant 0 : i32
    return %c0_i32, %c0_i32_0 : i32, i32
  }
  func.func @transform_37(%arg0: i32) -> (i32, i32) {
    %c0_i32 = arith.constant 0 : i32
    %c0_i32_0 = arith.constant 0 : i32
    %c0_i32_1 = arith.constant 0 : i32
    return %c0_i32, %c0_i32_0 : i32, i32
  }
  func.func @transform_38(%arg0: i32) -> (i32, i32) {
    %c0_i32 = arith.constant 0 : i32
    %c0_i32_0 = arith.constant 0 : i32
    %c0_i32_1 = arith.constant 0 : i32
    return %c0_i32, %c0_i32_0 : i32, i32
  }
  func.func @transform_39(%arg0: i32) -> (i32, i32) {
    %c0_i32 = arith.constant 0 : i32
    %c0_i32_0 = arith.constant 0 : i32
    %c0_i32_1 = arith.constant 0 : i32
    return %c0_i32, %c0_i32_0 : i32, i32
  }
  func.func @transform_40(%arg0: i32) -> (i32, i32) {
    %c0_i32 = arith.constant 0 : i32
    %c0_i32_0 = arith.constant 0 : i32
    %c0_i32_1 = arith.constant 0 : i32
    return %c0_i32, %c0_i32_0 : i32, i32
  }
  func.func @transform_41(%arg0: i32) -> (i32, i32) {
    %c0_i32 = arith.constant 0 : i32
    %c0_i32_0 = arith.constant 0 : i32
    %c0_i32_1 = arith.constant 0 : i32
    return %c0_i32, %c0_i32_0 : i32, i32
  }
  func.func @transform_42(%arg0: i32) -> (i32, i32) {
    %c0_i32 = arith.constant 0 : i32
    %c0_i32_0 = arith.constant 0 : i32
    %c0_i32_1 = arith.constant 0 : i32
    return %c0_i32, %c0_i32_0 : i32, i32
  }
  func.func @transform_43(%arg0: i32) -> (i32, i32) {
    %c0_i32 = arith.constant 0 : i32
    %c0_i32_0 = arith.constant 0 : i32
    %c0_i32_1 = arith.constant 0 : i32
    return %c0_i32, %c0_i32_0 : i32, i32
  }
  func.func @transform_44(%arg0: i32) -> (i32, i32) {
    %c0_i32 = arith.constant 0 : i32
    %c0_i32_0 = arith.constant 0 : i32
    %c0_i32_1 = arith.constant 0 : i32
    return %c0_i32, %c0_i32_0 : i32, i32
  }
  func.func @transform_45(%arg0: i32) -> (i32, i32) {
    %c0_i32 = arith.constant 0 : i32
    %c0_i32_0 = arith.constant 0 : i32
    %c0_i32_1 = arith.constant 0 : i32
    return %c0_i32, %c0_i32_0 : i32, i32
  }
  func.func @transform_46(%arg0: i32) -> (i32, i32, i32) {
    %c0_i32 = arith.constant 0 : i32
    %c0_i32_0 = arith.constant 0 : i32
    %c0_i32_1 = arith.constant 0 : i32
    return %arg0, %c0_i32, %c0_i32_0 : i32, i32, i32
  }
}

</mosaic_0001>

<bundles_post_ra>
// kernel: forward.1
= control target key start
LH: loop header
LB: loop body
LE: loop exit
PB: predicated region body
PF: predicated region fallthrough
CT: control target
= control target key end

     0   :  { %s13198_s6 = smov 1   ;;  %s13199_s10 = smov 2   ;;  %s15940_s0 = inlined_call_operand.smem [shape: u32[47], index: -1, kind: input, shape index: {}] }
   0x1   :  { %s13321_s5 = sld [smem:[%s15940_s0]]   ;;  %s13200_s14 = smov 3  }
   0x2   :  { %s13326_s9 = sld [smem:[%s15940_s0 + %s13198_s6]]   ;;  %s13201_s18 = smov 4  }
   0x3   :  { %s13331_s13 = sld [smem:[%s15940_s0 + %s13199_s10]]   ;;  %s13202_s22 = smov 5  }
   0x4   :  { %s13336_s17 = sld [smem:[%s15940_s0 + %s13200_s14]]   ;;  %s13203_s26 = smov 6  }
   0x5   :  { %s13341_s21 = sld [smem:[%s15940_s0 + %s13201_s18]]   ;;  %s13204_s30 = smov 7  }
   0x6   :  { %s13346_s25 = sld [smem:[%s15940_s0 + %s13202_s22]]   ;;  %s13205_s4 = smov 8  }
   0x7   :  { %16035 = sst [smem:[#allocation85_spill]] %s13321_s5  ;;  %s13206_s10 = smov 9  }
   0x8   :  { %16036 = sst [smem:[#allocation86_spill]] %s13326_s9  ;;  %s13207_s15 = smov 10  }
   0x9   :  { %16037 = sst [smem:[#allocation87_spill]] %s13331_s13  ;;  %s13208_s20 = smov 11  }
   0xa   :  { %16038 = sst [smem:[#allocation88_spill]] %s13336_s17  ;;  %s13210_s1 = smov 13  }
   0xb   :  { %s13351_s29 = sld [smem:[%s15940_s0 + %s13203_s26]]   ;;  %s13209_s26 = smov 12  }
   0xc   :  { %16039 = sst [smem:[#allocation89_spill]] %s13346_s25  ;;  %s13211_s7 = smov 14  }
   0xd   :  { %s13356_s3 = sld [smem:[%s15940_s0 + %s13204_s30]]   ;;  %s13213_s22 = smov 16  }
   0xe   :  { %s13361_s8 = sld [smem:[%s15940_s0 + %s13205_s4]]   ;;  %s13214_s28 = smov 17  }
   0xf   :  { %s13366_s14 = sld [smem:[%s15940_s0 + %s13206_s10]]   ;;  %s13231_s10 = smov 34  }
  0x10   :  { %s13371_s19 = sld [smem:[%s15940_s0 + %s13207_s15]]   ;;  %s13212_s15 = smov 15  }
  0x11   :  { %s13376_s24 = sld [smem:[%s15940_s0 + %s13208_s20]]   ;;  %s13232_s16 = smov 35  }
  0x12   :  { %s13381_s30 = sld [smem:[%s15940_s0 + %s13209_s26]]   ;;  %s13233_s23 = smov 36  }
  0x13   :  { %16040 = sst [smem:[#allocation90_spill]] %s13356_s3 }
  0x14   :  { %16041 = sst [smem:[#allocation91_spill]] %s13361_s8 }
  0x15   :  { %16042 = sst [smem:[#allocation92_spill]] %s13366_s14 }
  0x16   :  { %16043 = sst [smem:[#allocation93_spill]] %s13371_s19 }
  0x17   :  { %16044 = sst [smem:[#allocation94_spill]] %s13376_s24 }
  0x18   :  { %s13386_s6 = sld [smem:[%s15940_s0 + %s13210_s1]]   ;;  %s13230_s1 = smov 33  }
  0x19   :  { %s13391_s12 = sld [smem:[%s15940_s0 + %s13211_s7]]   ;;  %s13215_s7 = smov 18  }
  0x1a   :  { %s13396_s20 = sld [smem:[%s15940_s0 + %s13212_s15]]   ;;  %s13216_s15 = smov 19  }
  0x1b   :  { %s13401_s27 = sld [smem:[%s15940_s0 + %s13213_s22]]   ;;  %s13217_s22 = smov 20  }
  0x1c   :  { %s13406_s4 = sld [smem:[%s15940_s0 + %s13214_s28]]   ;;  %s13218_s28 = smov 21  }
  0x1d   :  { %s13411_s5 = sld [smem:[%s15940_s0 + %s13215_s7]]   ;;  %s13219_s7 = smov 22  }
  0x1e   :  { %16045 = sst [smem:[#allocation95_spill]] %s13386_s6 }
  0x1f   :  { %16046 = sst [smem:[#allocation96_spill]] %s13391_s12 }
  0x20   :  { %16047 = sst [smem:[#allocation97_spill]] %s13396_s20 }
  0x21   :  { %s13416_s20 = sld [smem:[%s15940_s0 + %s13216_s15]]   ;;  %s13220_s15 = smov 23  }
  0x22   :  { %16048 = sst [smem:[#allocation98_spill]] %s13406_s4 }
  0x23   :  { %16049 = sst [smem:[#allocation99_spill]] %s13411_s5 }
  0x24   :  { %s13421_s6 = sld [smem:[%s15940_s0 + %s13217_s22]]   ;;  %s13221_s22 = smov 24  }
  0x25   :  { %s13426_s4 = sld [smem:[%s15940_s0 + %s13218_s28]]   ;;  %s13222_s28 = smov 25  }
  0x26   :  { %s13431_s24 = sld [smem:[%s15940_s0 + %s13219_s7]]   ;;  %s13223_s7 = smov 26  }
  0x27   :  { %16050 = sst [smem:[#allocation100_spill]] %s13416_s20 }
  0x28   :  { %s13436_s20 = sld [smem:[%s15940_s0 + %s13220_s15]]   ;;  %s13224_s15 = smov 27  }
  0x29   :  { %s13441_s14 = sld [smem:[%s15940_s0 + %s13221_s22]]   ;;  %s13225_s22 = smov 28  }
  0x2a   :  { %16051 = sst [smem:[#allocation101_spill]] %s13421_s6 }
  0x2b   :  { %16052 = sst [smem:[#allocation102_spill]] %s13426_s4 }
  0x2c   :  { %s13446_s4 = sld [smem:[%s15940_s0 + %s13222_s28]]   ;;  %s13226_s28 = smov 29  }
  0x2d   :  { %s13451_s3 = sld [smem:[%s15940_s0 + %s13223_s7]]   ;;  %s13227_s7 = smov 30  }
  0x2e   :  { %16053 = sst [smem:[#allocation103_spill]] %s13436_s20 }
  0x2f   :  { %16054 = sst [smem:[#allocation104_spill]] %s13441_s14 }
  0x30   :  { %s13456_s20 = sld [smem:[%s15940_s0 + %s13224_s15]]   ;;  %s13228_s15 = smov 31  }
  0x31   :  { %s13461_s25 = sld [smem:[%s15940_s0 + %s13225_s22]]   ;;  %s13229_s22 = smov 32  }
  0x32   :  { %16055 = sst [smem:[#allocation105_spill]] %s13446_s4 }
  0x33   :  { %16056 = sst [smem:[#allocation106_spill]] %s13451_s3 }
  0x34   :  { %s13466_s4 = sld [smem:[%s15940_s0 + %s13226_s28]]   ;;  %s13238_s28 = smov 41  }
  0x35   :  { %s13471_s3 = sld [smem:[%s15940_s0 + %s13227_s7]]  }
  0x36   :  { %16057 = sst [smem:[#allocation107_spill]] %s13456_s20 }
  0x37   :  { %s13476_s20 = sld [smem:[%s15940_s0 + %s13228_s15]]  }
  0x38   :  { %s11070_s17 = sld [smem:[%s15940_s0 + %s13229_s22]]  }
  0x39   :  { %s13494_s9 = sld [smem:[%s15940_s0 + %s13232_s16]]   ;;  %s13236_s16 = smov 39  }
  0x3a   :  { %16058 = sst [smem:[#allocation108_spill]] %s13466_s4 }
  0x3b   :  { %16059 = sst [smem:[#allocation109_spill]] %s13471_s3 }
  0x3c   :  { %s13484_s4 = sld [smem:[%s15940_s0 + %s13230_s1]]   ;;  %s13234_s1 = smov 37  }
  0x3d   :  { %16060 = sst [smem:[#allocation110_spill]] %s13476_s20 }
  0x3e   :  { %s13489_s3 = sld [smem:[%s15940_s0 + %s13231_s10]]   ;;  %s13235_s10 = smov 38   ;;  %v98_v0 = vstv %s11070_s17 }
  0x3f   :  { %16063 = sst [smem:[#allocation113_spill]] %s13494_s9  ;;  %99 = vst [vmem:[#allocation2] sm:$0x1] %v98_v0  ;;  %s13239_s17 = smov 42  }
  0x40   :  { %s13499_s20 = sld [smem:[%s15940_s0 + %s13233_s23]]   ;;  %s13237_s23 = smov 40  }
  0x41   :  { %s13514_s22 = sld [smem:[%s15940_s0 + %s13236_s16]]   ;;  %s13240_s16 = smov 43  }
  0x42   :  { %16061 = sst [smem:[#allocation111_spill]] %s13484_s4  ;;  %s13241_s9 = smov 44  }
  0x43   :  { %s13504_s4 = sld [smem:[%s15940_s0 + %s13234_s1]]  }
  0x44   :  { %16062 = sst [smem:[#allocation112_spill]] %s13489_s3 }
  0x45   :  { %s13509_s3 = sld [smem:[%s15940_s0 + %s13235_s10]]  }
  0x46   :  { %s13519_s1 = sld [smem:[%s15940_s0 + %s13237_s23]]  }
  0x47   :  { %16066 = sst [smem:[#allocation116_spill]] %s13514_s22 }
  0x48   :  { %s13524_s10 = sld [smem:[%s15940_s0 + %s13238_s28]]  }
  0x49   :  { %16064 = sst [smem:[#allocation114_spill]] %s13504_s4  ;;  %s13242_s4 = smov 45  }
  0x4a   :  { %s13529_s15 = sld [smem:[%s15940_s0 + %s13239_s17]]   ;;  %s13243_s17 = smov 46  }
  0x4b   :  { %16065 = sst [smem:[#allocation115_spill]] %s13509_s3 }
  0x4c   :  { %16067 = sst [smem:[#allocation117_spill]] %s13519_s1 }
  0x4d   :  { %s13534_s3 = sld [smem:[%s15940_s0 + %s13240_s16]]  }
  0x4e   :  { %16068 = sst [smem:[#allocation118_spill]] %s13524_s10 }
  0x4f   :  { %s13539_s1 = sld [smem:[%s15940_s0 + %s13241_s9]]  }
  0x50   :  { %16069 = sst [smem:[#allocation119_spill]] %s13529_s15 }
  0x51   :  { %s13544_s10 = sld [smem:[%s15940_s0 + %s13242_s4]]  }
  0x52   :  { %s13549_s15 = sld [smem:[%s15940_s0 + %s13243_s17]]  }
  0x53   :  { %100 = vsyncpa [#allocation4], 0 }
  0x54   :  { %101 = vsyncpa [#allocation6], 0 }
  0x55   :  { %102 = vsyncpa [#allocation9], 0 }
  0x56   :  { %103 = vsyncpa [#allocation12], 0 }
  0x57   :  { %104 = vsyncpa [#allocation15], 0 }
  0x58   :  { %105 = vsyncpa [#allocation18], 0 }
  0x59   :  { %106 = vsyncpa [#allocation21], 0 }
  0x5a   :  { %107 = vsyncpa [#allocation24], 0 }
  0x5b   :  { %108 = vsyncpa [#allocation27], 0 }
  0x5c   :  { %109 = vsyncpa [#allocation30], 0 }
  0x5d   :  { %110 = vsyncpa [#allocation33], 0 }
  0x5e   :  { %111 = vsyncpa [#allocation36], 0 }
  0x5f   :  { %112 = vsyncpa [#allocation39], 0 }
  0x60   :  { %113 = vsyncpa [#allocation42], 0 }
  0x61   :  { %114 = vsyncpa [#allocation45], 0 }
  0x62   :  { %115 = vsyncpa [#allocation48], 0 }
  0x63   :  { %116 = vsyncpa [#allocation51], 0 }
  0x64   :  { %117 = vsyncpa [#allocation54], 0 }
  0x65   :  { %118 = vsyncpa [#allocation57], 0 }
  0x66   :  { %119 = vsyncpa [#allocation60], 0 }
  0x67   :  { %120 = vsyncpa [#allocation63], 0  ;;  %s13551_s0 = smov 0  }
  0x68 LB: > { %s16070_s19 = sld [smem:[#allocation93_spill]]  ;;  %s13557_s22 = sadd.s32 4294967295, %s13196_s0   ;;  %s13196_s0 = sphi %s13551_s0, %s126_s0  }
  0x69   : > { %s16071_s14 = sld [smem:[#allocation104_spill]]  ;;  %p11087_p0 = scmp.ge.s32.totalorder %s13196_s0, 1 }
  0x6a   : > { %s16072_s13 = sld [smem:[#allocation87_spill]]  ;;  %p1128_p1 = scmp.lt.s32.totalorder %s13196_s0, 3 }
  0x6b   : > { %s16073_s12 = sld [smem:[#allocation96_spill]] }
  0x6c   : > { %s16074_s6 = sld [smem:[#allocation101_spill]]  ;;  %p13561_p2 = pnand %p11087_p0, %p1128_p1 }
  0x6d   : > { %s16075_s5 = sld [smem:[#allocation99_spill]]  ;;  %p11763_p3 = scmp.eq.s32.totalorder (!%p13561_p2), %s13557_s22, 0 }
  0x6e   : > { %s16076_s8 = sld [smem:[#allocation91_spill]]  ;;  %1132 = sbr.rel (%p13561_p2) target bundleno = 635 (0x27b), region = 12 }
  0x6f   : > { %s13244_s9 = smov (!%p13561_p2), [#allocation5]   ;;  %s1180_s26 = sshll.u32 (!%p13561_p2), %s13341_s21, 4  ;;  %s13570_s26 = int_to_ptr.hbm [resolvable:$true] %s1180_s26 }
  0x70   : > { %s1154_s18 = sshll.u32 (!%p13561_p2), %s16072_s13, 4  ;;  %s1156_s23 = sshll.u32 (!%p13561_p2), %s13244_s9, 4  ;;  %s1155_s18 = int_to_ptr.hbm [resolvable:$true] %s1154_s18  ;;  %s1157_s23 = int_to_ptr.vmem [resolvable:$true] %s1156_s23 }
  0x71   : > { %s11986_s4 = sshra.s32 (!%p13561_p2), %s1155_s18, 4  ;;  %s11992_s2 = scalar_lea.hbm (!%p13561_p2), %s16072_s13, 4  ;;  %s11987_s4 = int_to_ptr.hbm [resolvable:$true] %s11986_s4 }
  0x72   : > { %s11988_s28 = scalar_lea.hbm (!%p13561_p2), %s11987_s4, 4  ;;  %p11993_p7 = scmp.lt.s32.totalorder (!%p13561_p2), %s11987_s4, %s16072_s13 }
  0x73   : > { %p11989_p4 = scmp.ne.s32.totalorder %s11987_s4, %s11988_s28  ;;  %p11994_p8 = scmp.lt.s32.totalorder %s11992_s2, %s11988_s28 }
  0x75   : > { %p11990_p5 = pnand %p11989_p4, %p11763_p3  ;;  %p11995_p9 = por %p11994_p8, %p11993_p7 }
  0x77   : > { %p11991_p6 = pneg %p11990_p5 }
  0x79   : > { %p11996_p10 = pnand %p11995_p9, %p11991_p6 }
  0x7b   : > { %11999 = shalt.err (!%p11996_p10)
}
  0x7c   : > { %11606 = dma.hbm_to_vmem [thread:$0]  (%p11763_p3), %s1155_s18, 64, %s1157_s23, [#allocation6]  }
  0x7d   : > { %s1206_s17 = sshll.u32 %s13351_s29, 4  ;;  %s13245_s7 = smov [#allocation8]   ;;  %s13579_s17 = int_to_ptr.hbm [resolvable:$true] %s1206_s17 }
  0x7e   : > { %s1182_s11 = sshll.u32 %s13245_s7, 4  ;;  %s12014_s9 = sshra.s32 %s13570_s26, 4  ;;  %s1183_s11 = int_to_ptr.vmem [resolvable:$true] %s1182_s11  ;;  %s12015_s9 = int_to_ptr.hbm [resolvable:$true] %s12014_s9 }
  0x7f   : > { %s12016_s4 = scalar_lea.hbm %s12015_s9, 8  ;;  %s12020_s28 = scalar_lea.hbm %s13341_s21, 8 }
  0x80   : > { %p12017_p11 = scmp.ne.s32.totalorder %s12015_s9, %s12016_s4  ;;  %p12021_p0 = scmp.lt.s32.totalorder %s12015_s9, %s13341_s21 }
  0x81   : > { %p12022_p1 = scmp.lt.s32.totalorder %s12020_s28, %s12016_s4 }
  0x82   : > { %p12018_p12 = pnand %p12017_p11, %p11763_p3 }
  0x83   : > { %p12023_p4 = por %p12022_p1, %p12021_p0 }
  0x84   : > { %p12019_p13 = pneg %p12018_p12 }
  0x86   : > { %p12024_p5 = pnand %p12023_p4, %p12019_p13 }
  0x88   : > { %12027 = shalt.err (!%p12024_p5)
}
  0x89   : > { %11610 = dma.hbm_to_vmem [thread:$0]  (%p11763_p3), %s13570_s26, 128, %s1183_s11, [#allocation9]  }
  0x8a   : > { %s13246_s18 = smov [#allocation11]   ;;  %s12042_s2 = sshra.s32 %s13579_s17, 4  ;;  %s12043_s2 = int_to_ptr.hbm [resolvable:$true] %s12042_s2 }
  0x8b   : > { %s1208_s23 = sshll.u32 %s13246_s18, 4  ;;  %s12044_s7 = scalar_lea.hbm %s12043_s2, 8  ;;  %s1209_s23 = int_to_ptr.vmem [resolvable:$true] %s1208_s23 }
  0x8c   : > { %p12045_p6 = scmp.ne.s32.totalorder %s12043_s2, %s12044_s7  ;;  %s12048_s9 = scalar_lea.hbm %s13351_s29, 8 }
  0x8d   : > { %p12049_p9 = scmp.lt.s32.totalorder %s12043_s2, %s13351_s29  ;;  %p12050_p10 = scmp.lt.s32.totalorder %s12048_s9, %s12044_s7 }
  0x8e   : > { %p12046_p7 = pnand %p12045_p6, %p11763_p3 }
  0x8f   : > { %p12051_p11 = por %p12050_p10, %p12049_p9 }
  0x90   : > { %p12047_p8 = pneg %p12046_p7 }
  0x92   : > { %p12052_p12 = pnand %p12051_p11, %p12047_p8 }
  0x94   : > { %12055 = shalt.err (!%p12052_p12)
}
  0x95   : > { %11614 = dma.hbm_to_vmem [thread:$0]  (%p11763_p3), %s13579_s17, 128, %s1209_s23, [#allocation12]  }
  0x96   : > { %s1231_s26 = sshll.u32 %s16076_s8, 4  ;;  %s13247_s11 = smov [#allocation14]   ;;  %s1232_s26 = int_to_ptr.hbm [resolvable:$true] %s1231_s26 }
  0x97   : > { %s1233_s4 = sshll.u32 %s13247_s11, 4  ;;  %s1259_s28 = sshll.u32 %s16070_s19, 4  ;;  %s1234_s4 = int_to_ptr.vmem [resolvable:$true] %s1233_s4  ;;  %s1260_s28 = int_to_ptr.hbm [resolvable:$true] %s1259_s28 }
  0x98   : > { %s12070_s18 = sshra.s32 %s1232_s26, 4  ;;  %s12076_s7 = scalar_lea.hbm %s16076_s8, 16  ;;  %s12071_s18 = int_to_ptr.hbm [resolvable:$true] %s12070_s18 }
  0x99   : > { %s12072_s2 = scalar_lea.hbm %s12071_s18, 16  ;;  %p12077_p4 = scmp.lt.s32.totalorder %s12071_s18, %s16076_s8 }
  0x9a   : > { %p12073_p13 = scmp.ne.s32.totalorder %s12071_s18, %s12072_s2  ;;  %p12078_p5 = scmp.lt.s32.totalorder %s12076_s7, %s12072_s2 }
  0x9c   : > { %p12074_p0 = pnand %p12073_p13, %p11763_p3  ;;  %p12079_p6 = por %p12078_p5, %p12077_p4 }
  0x9e   : > { %p12075_p1 = pneg %p12074_p0 }
  0xa0   : > { %p12080_p7 = pnand %p12079_p6, %p12075_p1 }
  0xa2   : > { %12083 = shalt.err (!%p12080_p7)
}
  0xa3   : > { %s15969_s17 = smov 128   ;;  %s15971_s23 = smov 8  }
  0xa4   : > { %11618 = dma.hbm_to_vmem [thread:$0]  (%p11763_p3), %s1232_s26, 256, %s1234_s4, [#allocation15], %s15969_s17, %s15969_s17, %s15971_s23  }
  0xa5   : > { %s13250_s9 = smov [#allocation17]   ;;  %s1287_s18 = sshll.u32 %s13381_s30, 4  ;;  %s13609_s18 = int_to_ptr.hbm [resolvable:$true] %s1287_s18 }
  0xa6   : > { %s1261_s11 = sshll.u32 %s13250_s9, 4  ;;  %s12098_s2 = sshra.s32 %s1260_s28, 4  ;;  %s1262_s11 = int_to_ptr.vmem [resolvable:$true] %s1261_s11  ;;  %s12099_s2 = int_to_ptr.hbm [resolvable:$true] %s12098_s2 }
  0xa7   : > { %s12100_s7 = scalar_lea.hbm %s12099_s2, 16  ;;  %s12104_s8 = scalar_lea.hbm %s16070_s19, 16 }
  0xa8   : > { %p12101_p8 = scmp.ne.s32.totalorder %s12099_s2, %s12100_s7  ;;  %p12105_p11 = scmp.lt.s32.totalorder %s12099_s2, %s16070_s19 }
  0xa9   : > { %p12106_p12 = scmp.lt.s32.totalorder %s12104_s8, %s12100_s7 }
  0xaa   : > { %p12102_p9 = pnand %p12101_p8, %p11763_p3 }
  0xab   : > { %p12107_p13 = por %p12106_p12, %p12105_p11 }
  0xac   : > { %p12103_p10 = pneg %p12102_p9 }
  0xae   : > { %p12108_p0 = pnand %p12107_p13, %p12103_p10 }
  0xb0   : > { %12111 = shalt.err (!%p12108_p0)
}
  0xb1   : > { %11622 = dma.hbm_to_vmem [thread:$0]  (%p11763_p3), %s1260_s28, 256, %s1262_s11, [#allocation18], %s15969_s17, %s15969_s17, %s15971_s23  }
  0xb2   : > { %s1315_s26 = sshll.u32 %s16073_s12, 4  ;;  %s13251_s4 = smov [#allocation20]   ;;  %s13621_s26 = int_to_ptr.hbm [resolvable:$true] %s1315_s26 }
  0xb3   : > { %s1289_s9 = sshll.u32 %s13251_s4, 4  ;;  %s12126_s8 = sshra.s32 %s13609_s18, 4  ;;  %s1290_s9 = int_to_ptr.vmem [resolvable:$true] %s1289_s9  ;;  %s12127_s8 = int_to_ptr.hbm [resolvable:$true] %s12126_s8 }
  0xb4   : > { %s12128_s2 = scalar_lea.hbm %s12127_s8, 32  ;;  %s12132_s7 = scalar_lea.hbm %s13381_s30, 32 }
  0xb5   : > { %p12129_p1 = scmp.ne.s32.totalorder %s12127_s8, %s12128_s2  ;;  %p12133_p6 = scmp.lt.s32.totalorder %s12127_s8, %s13381_s30 }
  0xb6   : > { %p12134_p7 = scmp.lt.s32.totalorder %s12132_s7, %s12128_s2 }
  0xb7   : > { %p12130_p4 = pnand %p12129_p1, %p11763_p3 }
  0xb8   : > { %p12135_p8 = por %p12134_p7, %p12133_p6 }
  0xb9   : > { %p12131_p5 = pneg %p12130_p4 }
  0xbb   : > { %p12136_p9 = pnand %p12135_p8, %p12131_p5 }
  0xbd   : > { %12139 = shalt.err (!%p12136_p9)
}
  0xbe   : > { %11626 = dma.hbm_to_vmem [thread:$0]  (%p11763_p3), %s13609_s18, 512, %s1290_s9, [#allocation21], %s15969_s17, %s15969_s17, %s15971_s23  }
  0xbf   : > { %s13252_s28 = smov [#allocation23]   ;;  %s1343_s4 = sshll.u32 %s13401_s27, 4  ;;  %s13635_s4 = int_to_ptr.hbm [resolvable:$true] %s1343_s4 }
  0xc0   : > { %s1317_s11 = sshll.u32 %s13252_s28, 4  ;;  %s12154_s8 = sshra.s32 %s13621_s26, 4  ;;  %s1318_s11 = int_to_ptr.vmem [resolvable:$true] %s1317_s11  ;;  %s12155_s8 = int_to_ptr.hbm [resolvable:$true] %s12154_s8 }
  0xc1   : > { %s12156_s2 = scalar_lea.hbm %s12155_s8, 32  ;;  %s12160_s7 = scalar_lea.hbm %s16073_s12, 32 }
  0xc2   : > { %p12157_p10 = scmp.ne.s32.totalorder %s12155_s8, %s12156_s2  ;;  %p12161_p13 = scmp.lt.s32.totalorder %s12155_s8, %s16073_s12 }
  0xc3   : > { %p12162_p0 = scmp.lt.s32.totalorder %s12160_s7, %s12156_s2 }
  0xc4   : > { %p12158_p11 = pnand %p12157_p10, %p11763_p3 }
  0xc5   : > { %p12163_p1 = por %p12162_p0, %p12161_p13 }
  0xc6   : > { %p12159_p12 = pneg %p12158_p11 }
  0xc8   : > { %p12164_p4 = pnand %p12163_p1, %p12159_p12 }
  0xca   : > { %12167 = shalt.err (!%p12164_p4)
}
  0xcb   : > { %11630 = dma.hbm_to_vmem [thread:$0]  (%p11763_p3), %s13621_s26, 512, %s1318_s11, [#allocation24], %s15969_s17, %s15969_s17, %s15971_s23  }
  0xcc   : > { %s1371_s18 = sshll.u32 %s16075_s5, 4  ;;  %s13253_s9 = smov [#allocation26]   ;;  %s13649_s18 = int_to_ptr.hbm [resolvable:$true] %s1371_s18 }
  0xcd   : > { %s1345_s28 = sshll.u32 %s13253_s9, 4  ;;  %s12182_s8 = sshra.s32 %s13635_s4, 4  ;;  %s1346_s28 = int_to_ptr.vmem [resolvable:$true] %s1345_s28  ;;  %s12183_s8 = int_to_ptr.hbm [resolvable:$true] %s12182_s8 }
  0xce   : > { %s12184_s2 = scalar_lea.hbm %s12183_s8, 64  ;;  %s12188_s7 = scalar_lea.hbm %s13401_s27, 64 }
  0xcf   : > { %p12185_p5 = scmp.ne.s32.totalorder %s12183_s8, %s12184_s2  ;;  %p12189_p8 = scmp.lt.s32.totalorder %s12183_s8, %s13401_s27 }
  0xd0   : > { %p12190_p9 = scmp.lt.s32.totalorder %s12188_s7, %s12184_s2 }
  0xd1   : > { %p12186_p6 = pnand %p12185_p5, %p11763_p3 }
  0xd2   : > { %p12191_p10 = por %p12190_p9, %p12189_p8 }
  0xd3   : > { %p12187_p7 = pneg %p12186_p6 }
  0xd5   : > { %p12192_p11 = pnand %p12191_p10, %p12187_p7 }
  0xd7   : > { %12195 = shalt.err (!%p12192_p11)
}
  0xd8   : > { %11634 = dma.hbm_to_vmem [thread:$0]  (%p11763_p3), %s13635_s4, 1024, %s1346_s28, [#allocation27], %s15969_s17, %s15969_s17, %s15971_s23  }
  0xd9   : > { %s13254_s26 = smov [#allocation29]   ;;  %s1399_s9 = sshll.u32 %s16074_s6, 4  ;;  %s13663_s9 = int_to_ptr.hbm [resolvable:$true] %s1399_s9 }
  0xda   : > { %s1373_s11 = sshll.u32 %s13254_s26, 4  ;;  %s12210_s8 = sshra.s32 %s13649_s18, 4  ;;  %s1374_s11 = int_to_ptr.vmem [resolvable:$true] %s1373_s11  ;;  %s12211_s8 = int_to_ptr.hbm [resolvable:$true] %s12210_s8 }
  0xdb   : > { %s12212_s2 = scalar_lea.hbm %s12211_s8, 64  ;;  %s12216_s7 = scalar_lea.hbm %s16075_s5, 64 }
  0xdc   : > { %p12213_p12 = scmp.ne.s32.totalorder %s12211_s8, %s12212_s2  ;;  %p12217_p1 = scmp.lt.s32.totalorder %s12211_s8, %s16075_s5 }
  0xdd   : > { %p12218_p4 = scmp.lt.s32.totalorder %s12216_s7, %s12212_s2 }
  0xde   : > { %p12214_p13 = pnand %p12213_p12, %p11763_p3 }
  0xdf   : > { %p12219_p5 = por %p12218_p4, %p12217_p1 }
  0xe0   : > { %p12215_p0 = pneg %p12214_p13 }
  0xe2   : > { %p12220_p6 = pnand %p12219_p5, %p12215_p0 }
  0xe4   : > { %12223 = shalt.err (!%p12220_p6)
}
  0xe5   : > { %11638 = dma.hbm_to_vmem [thread:$0]  (%p11763_p3), %s13649_s18, 1024, %s1374_s11, [#allocation30], %s15969_s17, %s15969_s17, %s15971_s23  }
  0xe6   : > { %s1427_s4 = sshll.u32 %s13431_s24, 4  ;;  %s13255_s28 = smov [#allocation32]   ;;  %s13677_s4 = int_to_ptr.hbm [resolvable:$true] %s1427_s4 }
  0xe7   : > { %s1401_s26 = sshll.u32 %s13255_s28, 4  ;;  %s12238_s8 = sshra.s32 %s13663_s9, 4  ;;  %s1402_s26 = int_to_ptr.vmem [resolvable:$true] %s1401_s26  ;;  %s12239_s8 = int_to_ptr.hbm [resolvable:$true] %s12238_s8 }
  0xe8   : > { %s12240_s2 = scalar_lea.hbm %s12239_s8, 288  ;;  %s12244_s7 = scalar_lea.hbm %s16074_s6, 288 }
  0xe9   : > { %p12241_p7 = scmp.ne.s32.totalorder %s12239_s8, %s12240_s2  ;;  %p12245_p10 = scmp.lt.s32.totalorder %s12239_s8, %s16074_s6 }
  0xea   : > { %p12246_p11 = scmp.lt.s32.totalorder %s12244_s7, %s12240_s2 }
  0xeb   : > { %p12242_p8 = pnand %p12241_p7, %p11763_p3 }
  0xec   : > { %p12247_p12 = por %p12246_p11, %p12245_p10 }
  0xed   : > { %p12243_p9 = pneg %p12242_p8 }
  0xef   : > { %p12248_p13 = pnand %p12247_p12, %p12243_p9 }
  0xf1   : > { %12251 = shalt.err (!%p12248_p13)
}
  0xf2   : > { %11642 = dma.hbm_to_vmem [thread:$0]  (%p11763_p3), %s13663_s9, 4608, %s1402_s26, [#allocation33], %s15969_s17, %s15969_s17, %s15971_s23  }
  0xf3   : > { %s13256_s18 = smov [#allocation35]   ;;  %s1455_s28 = sshll.u32 %s16071_s14, 4  ;;  %s13691_s28 = int_to_ptr.hbm [resolvable:$true] %s1455_s28 }
  0xf4   : > { %s1429_s11 = sshll.u32 %s13256_s18, 4  ;;  %s12266_s8 = sshra.s32 %s13677_s4, 4  ;;  %s1430_s11 = int_to_ptr.vmem [resolvable:$true] %s1429_s11  ;;  %s12267_s8 = int_to_ptr.hbm [resolvable:$true] %s12266_s8 }
  0xf5   : > { %s12268_s2 = scalar_lea.hbm %s12267_s8, 144  ;;  %s12272_s7 = scalar_lea.hbm %s13431_s24, 144 }
  0xf6   : > { %p12269_p0 = scmp.ne.s32.totalorder %s12267_s8, %s12268_s2  ;;  %p12273_p5 = scmp.lt.s32.totalorder %s12267_s8, %s13431_s24 }
  0xf7   : > { %p12274_p6 = scmp.lt.s32.totalorder %s12272_s7, %s12268_s2 }
  0xf8   : > { %p12270_p1 = pnand %p12269_p0, %p11763_p3 }
  0xf9   : > { %p12275_p7 = por %p12274_p6, %p12273_p5 }
  0xfa   : > { %p12271_p4 = pneg %p12270_p1 }
  0xfc   : > { %p12276_p8 = pnand %p12275_p7, %p12271_p4 }
  0xfe   : > { %12279 = shalt.err (!%p12276_p8)
}
  0xff   : > { %11646 = dma.hbm_to_vmem [thread:$0]  (%p11763_p3), %s13677_s4, 2304, %s1430_s11, [#allocation36], %s15969_s17, %s15969_s17, %s15971_s23  }
 0x100   : > { %s13257_s9 = smov [#allocation38]   ;;  %s1489_s18 = sshll.u32 %s13461_s25, 4  ;;  %s1490_s18 = int_to_ptr.hbm [resolvable:$true] %s1489_s18 }
 0x101   : > { %s1457_s26 = sshll.u32 %s13257_s9, 4  ;;  %s12294_s8 = sshra.s32 %s13691_s28, 4  ;;  %s1458_s26 = int_to_ptr.vmem [resolvable:$true] %s1457_s26  ;;  %s12295_s8 = int_to_ptr.hbm [resolvable:$true] %s12294_s8 }
 0x102   : > { %s12296_s2 = scalar_lea.hbm %s12295_s8, 16  ;;  %s12300_s7 = scalar_lea.hbm %s16071_s14, 16 }
 0x103   : > { %p12297_p9 = scmp.ne.s32.totalorder %s12295_s8, %s12296_s2  ;;  %p12301_p12 = scmp.lt.s32.totalorder %s12295_s8, %s16071_s14 }
 0x104   : > { %p12302_p13 = scmp.lt.s32.totalorder %s12300_s7, %s12296_s2 }
 0x105   : > { %p12298_p10 = pnand %p12297_p9, %p11763_p3 }
 0x106   : > { %p12303_p0 = por %p12302_p13, %p12301_p12 }
 0x107   : > { %p12299_p11 = pneg %p12298_p10 }
 0x109   : > { %p12304_p1 = pnand %p12303_p0, %p12299_p11 }
 0x10b   : > { %12307 = shalt.err (!%p12304_p1)
}
 0x10c   : > { %s16078_s4 = sld [smem:[#allocation110_spill]]  ;;  %s13258_s11 = smov [#allocation41]  }
 0x10d   : > { %11650 = dma.hbm_to_vmem [thread:$0]  (%p11763_p3), %s13691_s28, 256, %s1458_s26, [#allocation39], %s15969_s17, %s15969_s17, %s15971_s23  }
 0x10e   : > { %s1491_s9 = sshll.u32 %s13258_s11, 4  ;;  %s12322_s8 = sshra.s32 %s1490_s18, 4  ;;  %s1492_s9 = int_to_ptr.vmem [resolvable:$true] %s1491_s9  ;;  %s12323_s8 = int_to_ptr.hbm [resolvable:$true] %s12322_s8 }
 0x10f   : > { %s12324_s2 = scalar_lea.hbm %s12323_s8, 36  ;;  %s12328_s7 = scalar_lea.hbm %s13461_s25, 36 }
 0x110   : > { %p12325_p4 = scmp.ne.s32.totalorder %s12323_s8, %s12324_s2  ;;  %p12329_p7 = scmp.lt.s32.totalorder %s12323_s8, %s13461_s25 }
 0x111   : > { %p12330_p8 = scmp.lt.s32.totalorder %s12328_s7, %s12324_s2 }
 0x112   : > { %s1519_s5 = sshll.u32 %s16078_s4, 4  ;;  %p12326_p5 = pnand %p12325_p4, %p11763_p3  ;;  %s13717_s5 = int_to_ptr.hbm [resolvable:$true] %s1519_s5 }
 0x113   : > { %p12331_p9 = por %p12330_p8, %p12329_p7 }
 0x114   : > { %p12327_p6 = pneg %p12326_p5 }
 0x116   : > { %p12332_p10 = pnand %p12331_p9, %p12327_p6 }
 0x118   : > { %12335 = shalt.err (!%p12332_p10)
}
 0x119   : > { %s15974_s28 = smov 64   ;;  %s16079_s26 = sld [smem:[#allocation112_spill]] }
 0x11a   : > { %s15975_s11 = smov 4   ;;  %s13261_s23 = smov [#allocation44]  }
 0x11b   : > { %11654 = dma.hbm_to_vmem [thread:$0]  (%p11763_p3), %s1490_s18, 576, %s1492_s9, [#allocation42], %s15974_s28, %s15974_s28, %s15975_s11  }
 0x11c   : > { %s1521_s8 = sshll.u32 %s13261_s23, 4  ;;  %s12350_s2 = sshra.s32 %s13717_s5, 4  ;;  %s1522_s8 = int_to_ptr.vmem [resolvable:$true] %s1521_s8  ;;  %s12351_s2 = int_to_ptr.hbm [resolvable:$true] %s12350_s2 }
 0x11d   : > { %s12352_s7 = scalar_lea.hbm %s12351_s2, 4  ;;  %s12356_s6 = scalar_lea.hbm %s16078_s4, 4 }
 0x11e   : > { %p12353_p11 = scmp.ne.s32.totalorder %s12351_s2, %s12352_s7  ;;  %p12357_p0 = scmp.lt.s32.totalorder %s12351_s2, %s16078_s4 }
 0x11f   : > { %s1546_s17 = sshll.u32 %s16079_s26, 4  ;;  %p12358_p1 = scmp.lt.s32.totalorder %s12356_s6, %s12352_s7  ;;  %s13729_s17 = int_to_ptr.hbm [resolvable:$true] %s1546_s17 }
 0x120   : > { %p12354_p12 = pnand %p12353_p11, %p11763_p3 }
 0x121   : > { %p12359_p4 = por %p12358_p1, %p12357_p0 }
 0x122   : > { %p12355_p13 = pneg %p12354_p12 }
 0x124   : > { %p12360_p5 = pnand %p12359_p4, %p12355_p13 }
 0x126   : > { %12363 = shalt.err (!%p12360_p5)
}
 0x127   : > { %11658 = dma.hbm_to_vmem [thread:$0]  (%p11763_p3), %s13717_s5, 64, %s1522_s8, [#allocation45]  }
 0x128   : > { %s13262_s23 = smov [#allocation47]   ;;  %s1570_s9 = sshll.u32 %s13499_s20, 4  ;;  %s13740_s9 = int_to_ptr.hbm [resolvable:$true] %s1570_s9 }
 0x129   : > { %s1548_s18 = sshll.u32 %s13262_s23, 4  ;;  %s12378_s2 = sshra.s32 %s13729_s17, 4  ;;  %s1549_s18 = int_to_ptr.vmem [resolvable:$true] %s1548_s18  ;;  %s12379_s2 = int_to_ptr.hbm [resolvable:$true] %s12378_s2 }
 0x12a   : > { %s12380_s6 = scalar_lea.hbm %s12379_s2, 1  ;;  %s12384_s7 = scalar_lea.hbm %s16079_s26, 1 }
 0x12b   : > { %p12381_p6 = scmp.ne.s32.totalorder %s12379_s2, %s12380_s6  ;;  %p12385_p9 = scmp.lt.s32.totalorder %s12379_s2, %s16079_s26 }
 0x12c   : > { %p12386_p10 = scmp.lt.s32.totalorder %s12384_s7, %s12380_s6 }
 0x12d   : > { %p12382_p7 = pnand %p12381_p6, %p11763_p3 }
 0x12e   : > { %p12387_p11 = por %p12386_p10, %p12385_p9 }
 0x12f   : > { %p12383_p8 = pneg %p12382_p7 }
 0x131   : > { %p12388_p12 = pnand %p12387_p11, %p12383_p8 }
 0x133   : > { %12391 = shalt.err (!%p12388_p12)
}
 0x134   : > { %s16080_s5 = sld [smem:[#allocation115_spill]]  ;;  %s13263_s23 = smov [#allocation50]  }
 0x135   : > { %11662 = dma.hbm_to_vmem [thread:$0]  (%p11763_p3), %s13729_s17, 16, %s1549_s18, [#allocation48]  }
 0x136   : > { %s1572_s28 = sshll.u32 %s13263_s23, 4  ;;  %s12406_s2 = sshra.s32 %s13740_s9, 4  ;;  %s1573_s28 = int_to_ptr.vmem [resolvable:$true] %s1572_s28  ;;  %s12407_s2 = int_to_ptr.hbm [resolvable:$true] %s12406_s2 }
 0x137   : > { %s12408_s6 = scalar_lea.hbm %s12407_s2, 1  ;;  %s12412_s7 = scalar_lea.hbm %s13499_s20, 1 }
 0x138   : > { %p12409_p13 = scmp.ne.s32.totalorder %s12407_s2, %s12408_s6  ;;  %p12413_p4 = scmp.lt.s32.totalorder %s12407_s2, %s13499_s20 }
 0x139   : > { %p12414_p5 = scmp.lt.s32.totalorder %s12412_s7, %s12408_s6 }
 0x13a   : > { %s1593_s8 = sshll.u32 %s16080_s5, 4  ;;  %p12410_p0 = pnand %p12409_p13, %p11763_p3  ;;  %s13751_s8 = int_to_ptr.hbm [resolvable:$true] %s1593_s8 }
 0x13b   : > { %p12415_p6 = por %p12414_p5, %p12413_p4 }
 0x13c   : > { %p12411_p1 = pneg %p12410_p0 }
 0x13e   : > { %p12416_p7 = pnand %p12415_p6, %p12411_p1 }
 0x140   : > { %12419 = shalt.err (!%p12416_p7)
}
 0x141   : > { %s16081_s17 = sld [smem:[#allocation117_spill]]  ;;  %s13264_s18 = smov [#allocation53]  }
 0x142   : > { %11666 = dma.hbm_to_vmem [thread:$0]  (%p11763_p3), %s13740_s9, 16, %s1573_s28, [#allocation51]  }
 0x143   : > { %s1595_s23 = sshll.u32 %s13264_s18, 4  ;;  %s12434_s2 = sshra.s32 %s13751_s8, 4  ;;  %s1596_s23 = int_to_ptr.vmem [resolvable:$true] %s1595_s23  ;;  %s12435_s2 = int_to_ptr.hbm [resolvable:$true] %s12434_s2 }
 0x144   : > { %s12436_s6 = scalar_lea.hbm %s12435_s2, 384  ;;  %s12440_s7 = scalar_lea.hbm %s16080_s5, 384 }
 0x145   : > { %p12437_p8 = scmp.ne.s32.totalorder %s12435_s2, %s12436_s6  ;;  %p12441_p11 = scmp.lt.s32.totalorder %s12435_s2, %s16080_s5 }
 0x146   : > { %p12442_p12 = scmp.lt.s32.totalorder %s12440_s7, %s12436_s6 }
 0x147   : > { %s1621_s11 = sshll.u32 %s16081_s17, 4  ;;  %p12438_p9 = pnand %p12437_p8, %p11763_p3  ;;  %s13762_s11 = int_to_ptr.hbm [resolvable:$true] %s1621_s11 }
 0x148   : > { %p12443_p13 = por %p12442_p12, %p12441_p11 }
 0x149   : > { %p12439_p10 = pneg %p12438_p9 }
 0x14b   : > { %p12444_p0 = pnand %p12443_p13, %p12439_p10 }
 0x14d   : > { %12447 = shalt.err (!%p12444_p0)
}
 0x14e   : > { %s16082_s28 = smov 8   ;;  %s16083_s9 = smov 128  }
 0x14f   : > { %s16084_s18 = sld [smem:[#allocation119_spill]]  ;;  %s13265_s12 = smov [#allocation56]  }
 0x150   : > { %11670 = dma.hbm_to_vmem [thread:$0]  (%p11763_p3), %s13751_s8, 6144, %s1596_s23, [#allocation54], %s16083_s9, %s16083_s9, %s16082_s28  }
 0x151   : > { %s1623_s13 = sshll.u32 %s13265_s12, 4  ;;  %s12462_s2 = sshra.s32 %s13762_s11, 4  ;;  %s1624_s13 = int_to_ptr.vmem [resolvable:$true] %s1623_s13  ;;  %s12463_s2 = int_to_ptr.hbm [resolvable:$true] %s12462_s2 }
 0x152   : > { %s12464_s6 = scalar_lea.hbm %s12463_s2, 128  ;;  %s12468_s7 = scalar_lea.hbm %s16081_s17, 128 }
 0x153   : > { %p12465_p1 = scmp.ne.s32.totalorder %s12463_s2, %s12464_s6  ;;  %p12469_p6 = scmp.lt.s32.totalorder %s12463_s2, %s16081_s17 }
 0x154   : > { %p12470_p7 = scmp.lt.s32.totalorder %s12468_s7, %s12464_s6 }
 0x155   : > { %s1649_s4 = sshll.u32 %s16084_s18, 4  ;;  %p12466_p4 = pnand %p12465_p1, %p11763_p3  ;;  %s13776_s4 = int_to_ptr.hbm [resolvable:$true] %s1649_s4 }
 0x156   : > { %p12471_p8 = por %p12470_p7, %p12469_p6 }
 0x157   : > { %p12467_p5 = pneg %p12466_p4 }
 0x159   : > { %p12472_p9 = pnand %p12471_p8, %p12467_p5 }
 0x15b   : > { %12475 = shalt.err (!%p12472_p9)
}
 0x15c   : > { %s16085_s12 = sld [smem:[#allocation86_spill]]  ;;  %s13266_s8 = smov [#allocation59]  }
 0x15d   : > { %11674 = dma.hbm_to_vmem [thread:$0]  (%p11763_p3), %s13762_s11, 2048, %s1624_s13, [#allocation57], %s16083_s9, %s16083_s9, %s16082_s28  }
 0x15e   : > { %s1651_s23 = sshll.u32 %s13266_s8, 4  ;;  %s12490_s6 = sshra.s32 %s13776_s4, 4  ;;  %s1652_s23 = int_to_ptr.vmem [resolvable:$true] %s1651_s23  ;;  %s12491_s6 = int_to_ptr.hbm [resolvable:$true] %s12490_s6 }
 0x15f   : > { %s12492_s7 = scalar_lea.hbm %s12491_s6, 128  ;;  %s12496_s5 = scalar_lea.hbm %s16084_s18, 128 }
 0x160   : > { %p12493_p10 = scmp.ne.s32.totalorder %s12491_s6, %s12492_s7  ;;  %p12497_p13 = scmp.lt.s32.totalorder %s12491_s6, %s16084_s18 }
 0x161   : > { %p12498_p0 = scmp.lt.s32.totalorder %s12496_s5, %s12492_s7 }
 0x162   : > { %s1139_s2 = sshll.u32 %s16085_s12, 4  ;;  %p12494_p11 = pnand %p12493_p10, %p11763_p3  ;;  %s1140_s2 = int_to_ptr.hbm [resolvable:$true] %s1139_s2 }
 0x163   : > { %p12499_p1 = por %p12498_p0, %p12497_p13 }
 0x164   : > { %p12495_p12 = pneg %p12494_p11 }
 0x166   : > { %p12500_p4 = pnand %p12499_p1, %p12495_p12 }
 0x168   : > { %12503 = shalt.err (!%p12500_p4)
}
 0x169   : > { %s16086_s13 = sld [smem:[#allocation88_spill]]  ;;  %s13267_s11 = smov [#allocation3]  }
 0x16a   : > { %11678 = dma.hbm_to_vmem [thread:$0]  (%p11763_p3), %s13776_s4, 2048, %s1652_s23, [#allocation60], %s16083_s9, %s16083_s9, %s16082_s28  }
 0x16b   : > { %s1141_s8 = sshll.u32 %s13267_s11, 4  ;;  %s12518_s5 = sshra.s32 %s1140_s2, 4  ;;  %s1142_s8 = int_to_ptr.vmem [resolvable:$true] %s1141_s8  ;;  %s12519_s5 = int_to_ptr.hbm [resolvable:$true] %s12518_s5 }
 0x16c   : > { %s12520_s6 = scalar_lea.hbm %s12519_s5, 36  ;;  %s12524_s7 = scalar_lea.hbm %s16085_s12, 36 }
 0x16d   : > { %p12521_p5 = scmp.ne.s32.totalorder %s12519_s5, %s12520_s6  ;;  %p12525_p8 = scmp.lt.s32.totalorder %s12519_s5, %s16085_s12 }
 0x16e   : > { %p12526_p9 = scmp.lt.s32.totalorder %s12524_s7, %s12520_s6 }
 0x16f   : > { %s1165_s14 = sshll.u32 %s16086_s13, 4  ;;  %p12522_p6 = pnand %p12521_p5, %p11763_p3  ;;  %s13802_s14 = int_to_ptr.hbm [resolvable:$true] %s1165_s14 }
 0x170   : > { %p12527_p10 = por %p12526_p9, %p12525_p8 }
 0x171   : > { %p12523_p7 = pneg %p12522_p6 }
 0x173   : > { %p12528_p11 = pnand %p12527_p10, %p12523_p7 }
 0x175   : > { %12531 = shalt.err (!%p12528_p11)
}
 0x176   : > { %s16087_s4 = smov 4   ;;  %s16088_s23 = smov 64  }
 0x177   : > { %s16089_s11 = sld [smem:[#allocation89_spill]]  ;;  %s13268_s18 = smov [#allocation7]  }
 0x178   : > { %11604 = dma.hbm_to_vmem [thread:$0]  (%p11763_p3), %s1140_s2, 576, %s1142_s8, [#allocation4], %s16088_s23, %s16088_s23, %s16087_s4  }
 0x179   : > { %s1167_s19 = sshll.u32 %s13268_s18, 4  ;;  %s12546_s5 = sshra.s32 %s13802_s14, 4  ;;  %s1168_s19 = int_to_ptr.vmem [resolvable:$true] %s1167_s19  ;;  %s12547_s5 = int_to_ptr.hbm [resolvable:$true] %s12546_s5 }
 0x17a   : > { %s12548_s6 = scalar_lea.hbm %s12547_s5, 72  ;;  %s12552_s7 = scalar_lea.hbm %s16086_s13, 72 }
 0x17b   : > { %p12549_p12 = scmp.ne.s32.totalorder %s12547_s5, %s12548_s6  ;;  %p12553_p1 = scmp.lt.s32.totalorder %s12547_s5, %s16086_s13 }
 0x17c   : > { %p12554_p4 = scmp.lt.s32.totalorder %s12552_s7, %s12548_s6 }
 0x17d   : > { %s1191_s17 = sshll.u32 %s16089_s11, 4  ;;  %p12550_p13 = pnand %p12549_p12, %p11763_p3  ;;  %s13814_s17 = int_to_ptr.hbm [resolvable:$true] %s1191_s17 }
 0x17e   : > { %p12555_p5 = por %p12554_p4, %p12553_p1 }
 0x17f   : > { %p12551_p0 = pneg %p12550_p13 }
 0x181   : > { %p12556_p6 = pnand %p12555_p5, %p12551_p0 }
 0x183   : > { %12559 = shalt.err (!%p12556_p6)
}
 0x184   : > { %s16090_s18 = sld [smem:[#allocation90_spill]]  ;;  %s13269_s2 = smov [#allocation10]  }
 0x185   : > { %11608 = dma.hbm_to_vmem [thread:$0]  (%p11763_p3), %s13802_s14, 1152, %s1168_s19, [#allocation6], %s16083_s9, %s16083_s9, %s16082_s28  }
 0x186   : > { %s1193_s8 = sshll.u32 %s13269_s2, 4  ;;  %s12574_s23 = sshra.s32 %s13814_s17, 4  ;;  %s1194_s8 = int_to_ptr.vmem [resolvable:$true] %s1193_s8  ;;  %s12575_s23 = int_to_ptr.hbm [resolvable:$true] %s12574_s23 }
 0x187   : > { %s12576_s5 = scalar_lea.hbm %s12575_s23, 72  ;;  %s12580_s6 = scalar_lea.hbm %s16089_s11, 72 }
 0x188   : > { %p12577_p7 = scmp.ne.s32.totalorder %s12575_s23, %s12576_s5  ;;  %p12581_p10 = scmp.lt.s32.totalorder %s12575_s23, %s16089_s11 }
 0x189   : > { %p12582_p11 = scmp.lt.s32.totalorder %s12580_s6, %s12576_s5 }
 0x18a   : > { %s1217_s4 = sshll.u32 %s16090_s18, 4  ;;  %p12578_p8 = pnand %p12577_p7, %p11763_p3  ;;  %s13828_s4 = int_to_ptr.hbm [resolvable:$true] %s1217_s4 }
 0x18b   : > { %p12583_p12 = por %p12582_p11, %p12581_p10 }
 0x18c   : > { %p12579_p9 = pneg %p12578_p8 }
 0x18e   : > { %p12584_p13 = pnand %p12583_p12, %p12579_p9 }
 0x190   : > { %12587 = shalt.err (!%p12584_p13)
}
 0x191   : > { %s16091_s14 = sld [smem:[#allocation92_spill]]  ;;  %s13270_s7 = smov [#allocation13]  }
 0x192   : > { %11612 = dma.hbm_to_vmem [thread:$0]  (%p11763_p3), %s13814_s17, 1152, %s1194_s8, [#allocation9], %s16083_s9, %s16083_s9, %s16082_s28  }
 0x193   : > { %s1219_s2 = sshll.u32 %s13270_s7, 4  ;;  %s12602_s23 = sshra.s32 %s13828_s4, 4  ;;  %s1220_s2 = int_to_ptr.vmem [resolvable:$true] %s1219_s2  ;;  %s12603_s23 = int_to_ptr.hbm [resolvable:$true] %s12602_s23 }
 0x194   : > { %s12604_s5 = scalar_lea.hbm %s12603_s23, 144  ;;  %s12608_s6 = scalar_lea.hbm %s16090_s18, 144 }
 0x195   : > { %p12605_p0 = scmp.ne.s32.totalorder %s12603_s23, %s12604_s5  ;;  %p12609_p5 = scmp.lt.s32.totalorder %s12603_s23, %s16090_s18 }
 0x196   : > { %p12610_p6 = scmp.lt.s32.totalorder %s12608_s6, %s12604_s5 }
 0x197   : > { %s1245_s19 = sshll.u32 %s16091_s14, 4  ;;  %p12606_p1 = pnand %p12605_p0, %p11763_p3  ;;  %s13842_s19 = int_to_ptr.hbm [resolvable:$true] %s1245_s19 }
 0x198   : > { %p12611_p7 = por %p12610_p6, %p12609_p5 }
 0x199   : > { %p12607_p4 = pneg %p12606_p1 }
 0x19b   : > { %p12612_p8 = pnand %p12611_p7, %p12607_p4 }
 0x19d   : > { %12615 = shalt.err (!%p12612_p8)
}
 0x19e   : > { %s16092_s17 = sld [smem:[#allocation94_spill]]  ;;  %s13271_s8 = smov [#allocation16]  }
 0x19f   : > { %11616 = dma.hbm_to_vmem [thread:$0]  (%p11763_p3), %s13828_s4, 2304, %s1220_s2, [#allocation12], %s16083_s9, %s16083_s9, %s16082_s28  }
 0x1a0   : > { %s1247_s7 = sshll.u32 %s13271_s8, 4  ;;  %s12630_s23 = sshra.s32 %s13842_s19, 4  ;;  %s1248_s7 = int_to_ptr.vmem [resolvable:$true] %s1247_s7  ;;  %s12631_s23 = int_to_ptr.hbm [resolvable:$true] %s12630_s23 }
 0x1a1   : > { %s12632_s5 = scalar_lea.hbm %s12631_s23, 144  ;;  %s12636_s6 = scalar_lea.hbm %s16091_s14, 144 }
 0x1a2   : > { %p12633_p9 = scmp.ne.s32.totalorder %s12631_s23, %s12632_s5  ;;  %p12637_p12 = scmp.lt.s32.totalorder %s12631_s23, %s16091_s14 }
 0x1a3   : > { %p12638_p13 = scmp.lt.s32.totalorder %s12636_s6, %s12632_s5 }
 0x1a4   : > { %s1273_s11 = sshll.u32 %s16092_s17, 4  ;;  %p12634_p10 = pnand %p12633_p9, %p11763_p3  ;;  %s13856_s11 = int_to_ptr.hbm [resolvable:$true] %s1273_s11 }
 0x1a5   : > { %p12639_p0 = por %p12638_p13, %p12637_p12 }
 0x1a6   : > { %p12635_p11 = pneg %p12634_p10 }
 0x1a8   : > { %p12640_p1 = pnand %p12639_p0, %p12635_p11 }
 0x1aa   : > { %12643 = shalt.err (!%p12640_p1)
}
 0x1ab   : > { %s16093_s4 = sld [smem:[#allocation95_spill]]  ;;  %s13272_s8 = smov [#allocation19]  }
 0x1ac   : > { %11620 = dma.hbm_to_vmem [thread:$0]  (%p11763_p3), %s13842_s19, 2304, %s1248_s7, [#allocation15], %s16083_s9, %s16083_s9, %s16082_s28  }
 0x1ad   : > { %s1275_s12 = sshll.u32 %s13272_s8, 4  ;;  %s12658_s23 = sshra.s32 %s13856_s11, 4  ;;  %s1276_s12 = int_to_ptr.vmem [resolvable:$true] %s1275_s12  ;;  %s12659_s23 = int_to_ptr.hbm [resolvable:$true] %s12658_s23 }
 0x1ae   : > { %s12660_s5 = scalar_lea.hbm %s12659_s23, 288  ;;  %s12664_s6 = scalar_lea.hbm %s16092_s17, 288 }
 0x1af   : > { %p12661_p4 = scmp.ne.s32.totalorder %s12659_s23, %s12660_s5  ;;  %p12665_p7 = scmp.lt.s32.totalorder %s12659_s23, %s16092_s17 }
 0x1b0   : > { %p12666_p8 = scmp.lt.s32.totalorder %s12664_s6, %s12660_s5 }
 0x1b1   : > { %s1301_s2 = sshll.u32 %s16093_s4, 4  ;;  %p12662_p5 = pnand %p12661_p4, %p11763_p3  ;;  %s13870_s2 = int_to_ptr.hbm [resolvable:$true] %s1301_s2 }
 0x1b2   : > { %p12667_p9 = por %p12666_p8, %p12665_p7 }
 0x1b3   : > { %p12663_p6 = pneg %p12662_p5 }
 0x1b5   : > { %p12668_p10 = pnand %p12667_p9, %p12663_p6 }
 0x1b7   : > { %12671 = shalt.err (!%p12668_p10)
}
 0x1b8   : > { %s16094_s19 = sld [smem:[#allocation97_spill]]  ;;  %s13273_s7 = smov [#allocation22]  }
 0x1b9   : > { %11624 = dma.hbm_to_vmem [thread:$0]  (%p11763_p3), %s13856_s11, 4608, %s1276_s12, [#allocation18], %s16083_s9, %s16083_s9, %s16082_s28  }
 0x1ba   : > { %s1303_s8 = sshll.u32 %s13273_s7, 4  ;;  %s12686_s23 = sshra.s32 %s13870_s2, 4  ;;  %s1304_s8 = int_to_ptr.vmem [resolvable:$true] %s1303_s8  ;;  %s12687_s23 = int_to_ptr.hbm [resolvable:$true] %s12686_s23 }
 0x1bb   : > { %s12688_s5 = scalar_lea.hbm %s12687_s23, 288  ;;  %s12692_s6 = scalar_lea.hbm %s16093_s4, 288 }
 0x1bc   : > { %p12689_p11 = scmp.ne.s32.totalorder %s12687_s23, %s12688_s5  ;;  %p12693_p0 = scmp.lt.s32.totalorder %s12687_s23, %s16093_s4 }
 0x1bd   : > { %p12694_p1 = scmp.lt.s32.totalorder %s12692_s6, %s12688_s5 }
 0x1be   : > { %s1329_s13 = sshll.u32 %s16094_s19, 4  ;;  %p12690_p12 = pnand %p12689_p11, %p11763_p3  ;;  %s13884_s13 = int_to_ptr.hbm [resolvable:$true] %s1329_s13 }
 0x1bf   : > { %p12695_p4 = por %p12694_p1, %p12693_p0 }
 0x1c0   : > { %p12691_p13 = pneg %p12690_p12 }
 0x1c2   : > { %p12696_p5 = pnand %p12695_p4, %p12691_p13 }
 0x1c4   : > { %12699 = shalt.err (!%p12696_p5)
}
 0x1c5   : > { %s16095_s12 = sld [smem:[#allocation98_spill]]  ;;  %s13274_s7 = smov [#allocation25]  }
 0x1c6   : > { %11628 = dma.hbm_to_vmem [thread:$0]  (%p11763_p3), %s13870_s2, 4608, %s1304_s8, [#allocation21], %s16083_s9, %s16083_s9, %s16082_s28  }
 0x1c7   : > { %s1331_s14 = sshll.u32 %s13274_s7, 4  ;;  %s12714_s23 = sshra.s32 %s13884_s13, 4  ;;  %s1332_s14 = int_to_ptr.vmem [resolvable:$true] %s1331_s14  ;;  %s12715_s23 = int_to_ptr.hbm [resolvable:$true] %s12714_s23 }
 0x1c8   : > { %s12716_s5 = scalar_lea.hbm %s12715_s23, 576  ;;  %s12720_s6 = scalar_lea.hbm %s16094_s19, 576 }
 0x1c9   : > { %p12717_p6 = scmp.ne.s32.totalorder %s12715_s23, %s12716_s5  ;;  %p12721_p9 = scmp.lt.s32.totalorder %s12715_s23, %s16094_s19 }
 0x1ca   : > { %p12722_p10 = scmp.lt.s32.totalorder %s12720_s6, %s12716_s5 }
 0x1cb   : > { %s1357_s11 = sshll.u32 %s16095_s12, 4  ;;  %p12718_p7 = pnand %p12717_p6, %p11763_p3  ;;  %s13898_s11 = int_to_ptr.hbm [resolvable:$true] %s1357_s11 }
 0x1cc   : > { %p12723_p11 = por %p12722_p10, %p12721_p9 }
 0x1cd   : > { %p12719_p8 = pneg %p12718_p7 }
 0x1cf   : > { %p12724_p12 = pnand %p12723_p11, %p12719_p8 }
 0x1d1   : > { %12727 = shalt.err (!%p12724_p12)
}
 0x1d2   : > { %s16096_s2 = sld [smem:[#allocation100_spill]]  ;;  %s13275_s8 = smov [#allocation28]  }
 0x1d3   : > { %11632 = dma.hbm_to_vmem [thread:$0]  (%p11763_p3), %s13884_s13, 9216, %s1332_s14, [#allocation24], %s16083_s9, %s16083_s9, %s16082_s28  }
 0x1d4   : > { %s1359_s7 = sshll.u32 %s13275_s8, 4  ;;  %s12742_s23 = sshra.s32 %s13898_s11, 4  ;;  %s1360_s7 = int_to_ptr.vmem [resolvable:$true] %s1359_s7  ;;  %s12743_s23 = int_to_ptr.hbm [resolvable:$true] %s12742_s23 }
 0x1d5   : > { %s12744_s5 = scalar_lea.hbm %s12743_s23, 576  ;;  %s12748_s6 = scalar_lea.hbm %s16095_s12, 576 }
 0x1d6   : > { %p12745_p13 = scmp.ne.s32.totalorder %s12743_s23, %s12744_s5  ;;  %p12749_p4 = scmp.lt.s32.totalorder %s12743_s23, %s16095_s12 }
 0x1d7   : > { %p12750_p5 = scmp.lt.s32.totalorder %s12748_s6, %s12744_s5 }
 0x1d8   : > { %s1385_s4 = sshll.u32 %s16096_s2, 4  ;;  %p12746_p0 = pnand %p12745_p13, %p11763_p3  ;;  %s13912_s4 = int_to_ptr.hbm [resolvable:$true] %s1385_s4 }
 0x1d9   : > { %p12751_p6 = por %p12750_p5, %p12749_p4 }
 0x1da   : > { %p12747_p1 = pneg %p12746_p0 }
 0x1dc   : > { %p12752_p7 = pnand %p12751_p6, %p12747_p1 }
 0x1de   : > { %12755 = shalt.err (!%p12752_p7)
}
 0x1df   : > { %s16097_s13 = sld [smem:[#allocation102_spill]]  ;;  %s13276_s8 = smov [#allocation31]  }
 0x1e0   : > { %11636 = dma.hbm_to_vmem [thread:$0]  (%p11763_p3), %s13898_s11, 9216, %s1360_s7, [#allocation27], %s16083_s9, %s16083_s9, %s16082_s28  }
 0x1e1   : > { %s1387_s17 = sshll.u32 %s13276_s8, 4  ;;  %s12770_s23 = sshra.s32 %s13912_s4, 4  ;;  %s1388_s17 = int_to_ptr.vmem [resolvable:$true] %s1387_s17  ;;  %s12771_s23 = int_to_ptr.hbm [resolvable:$true] %s12770_s23 }
 0x1e2   : > { %s12772_s5 = scalar_lea.hbm %s12771_s23, 288  ;;  %s12776_s6 = scalar_lea.hbm %s16096_s2, 288 }
 0x1e3   : > { %p12773_p8 = scmp.ne.s32.totalorder %s12771_s23, %s12772_s5  ;;  %p12777_p11 = scmp.lt.s32.totalorder %s12771_s23, %s16096_s2 }
 0x1e4   : > { %p12778_p12 = scmp.lt.s32.totalorder %s12776_s6, %s12772_s5 }
 0x1e5   : > { %s1413_s14 = sshll.u32 %s16097_s13, 4  ;;  %p12774_p9 = pnand %p12773_p8, %p11763_p3  ;;  %s13926_s14 = int_to_ptr.hbm [resolvable:$true] %s1413_s14 }
 0x1e6   : > { %p12779_p13 = por %p12778_p12, %p12777_p11 }
 0x1e7   : > { %p12775_p10 = pneg %p12774_p9 }
 0x1e9   : > { %p12780_p0 = pnand %p12779_p13, %p12775_p10 }
 0x1eb   : > { %12783 = shalt.err (!%p12780_p0)
}
 0x1ec   : > { %s16098_s11 = sld [smem:[#allocation103_spill]]  ;;  %s13277_s7 = smov [#allocation34]  }
 0x1ed   : > { %11640 = dma.hbm_to_vmem [thread:$0]  (%p11763_p3), %s13912_s4, 4608, %s1388_s17, [#allocation30], %s16083_s9, %s16083_s9, %s16082_s28  }
 0x1ee   : > { %s1415_s8 = sshll.u32 %s13277_s7, 4  ;;  %s12798_s23 = sshra.s32 %s13926_s14, 4  ;;  %s1416_s8 = int_to_ptr.vmem [resolvable:$true] %s1415_s8  ;;  %s12799_s23 = int_to_ptr.hbm [resolvable:$true] %s12798_s23 }
 0x1ef   : > { %s12800_s5 = scalar_lea.hbm %s12799_s23, 32  ;;  %s12804_s6 = scalar_lea.hbm %s16097_s13, 32 }
 0x1f0   : > { %p12801_p1 = scmp.ne.s32.totalorder %s12799_s23, %s12800_s5  ;;  %p12805_p6 = scmp.lt.s32.totalorder %s12799_s23, %s16097_s13 }
 0x1f1   : > { %p12806_p7 = scmp.lt.s32.totalorder %s12804_s6, %s12800_s5 }
 0x1f2   : > { %s1441_s12 = sshll.u32 %s16098_s11, 4  ;;  %p12802_p4 = pnand %p12801_p1, %p11763_p3  ;;  %s13940_s12 = int_to_ptr.hbm [resolvable:$true] %s1441_s12 }
 0x1f3   : > { %p12807_p8 = por %p12806_p7, %p12805_p6 }
 0x1f4   : > { %p12803_p5 = pneg %p12802_p4 }
 0x1f6   : > { %p12808_p9 = pnand %p12807_p8, %p12803_p5 }
 0x1f8   : > { %12811 = shalt.err (!%p12808_p9)
}
 0x1f9   : > { %s16099_s17 = sld [smem:[#allocation105_spill]]  ;;  %s13278_s7 = smov [#allocation37]  }
 0x1fa   : > { %11644 = dma.hbm_to_vmem [thread:$0]  (%p11763_p3), %s13926_s14, 512, %s1416_s8, [#allocation33], %s16083_s9, %s16083_s9, %s16082_s28  }
 0x1fb   : > { %s1443_s2 = sshll.u32 %s13278_s7, 4  ;;  %s12826_s23 = sshra.s32 %s13940_s12, 4  ;;  %s1444_s2 = int_to_ptr.vmem [resolvable:$true] %s1443_s2  ;;  %s12827_s23 = int_to_ptr.hbm [resolvable:$true] %s12826_s23 }
 0x1fc   : > { %s12828_s5 = scalar_lea.hbm %s12827_s23, 144  ;;  %s12832_s6 = scalar_lea.hbm %s16098_s11, 144 }
 0x1fd   : > { %p12829_p10 = scmp.ne.s32.totalorder %s12827_s23, %s12828_s5  ;;  %p12833_p13 = scmp.lt.s32.totalorder %s12827_s23, %s16098_s11 }
 0x1fe   : > { %p12834_p0 = scmp.lt.s32.totalorder %s12832_s6, %s12828_s5 }
 0x1ff   : > { %s1469_s4 = sshll.u32 %s16099_s17, 4  ;;  %p12830_p11 = pnand %p12829_p10, %p11763_p3  ;;  %s13954_s4 = int_to_ptr.hbm [resolvable:$true] %s1469_s4 }
 0x200   : > { %p12835_p1 = por %p12834_p0, %p12833_p13 }
 0x201   : > { %p12831_p12 = pneg %p12830_p11 }
 0x203   : > { %p12836_p4 = pnand %p12835_p1, %p12831_p12 }
 0x205   : > { %12839 = shalt.err (!%p12836_p4)
}
 0x206   : > { %s16100_s14 = sld [smem:[#allocation109_spill]]  ;;  %s13279_s8 = smov [#allocation40]  }
 0x207   : > { %11648 = dma.hbm_to_vmem [thread:$0]  (%p11763_p3), %s13940_s12, 2304, %s1444_s2, [#allocation36], %s16083_s9, %s16083_s9, %s16082_s28  }
 0x208   : > { %s1471_s7 = sshll.u32 %s13279_s8, 4  ;;  %s12854_s23 = sshra.s32 %s13954_s4, 4  ;;  %s1472_s7 = int_to_ptr.vmem [resolvable:$true] %s1471_s7  ;;  %s12855_s23 = int_to_ptr.hbm [resolvable:$true] %s12854_s23 }
 0x209   : > { %s12856_s5 = scalar_lea.hbm %s12855_s23, 72  ;;  %s12860_s6 = scalar_lea.hbm %s16099_s17, 72 }
 0x20a   : > { %p12857_p5 = scmp.ne.s32.totalorder %s12855_s23, %s12856_s5  ;;  %p12861_p8 = scmp.lt.s32.totalorder %s12855_s23, %s16099_s17 }
 0x20b   : > { %p12862_p9 = scmp.lt.s32.totalorder %s12860_s6, %s12856_s5 }
 0x20c   : > { %s1507_s13 = sshll.u32 %s16100_s14, 4  ;;  %p12858_p6 = pnand %p12857_p5, %p11763_p3  ;;  %s13968_s13 = int_to_ptr.hbm [resolvable:$true] %s1507_s13 }
 0x20d   : > { %p12863_p10 = por %p12862_p9, %p12861_p8 }
 0x20e   : > { %p12859_p7 = pneg %p12858_p6 }
 0x210   : > { %p12864_p11 = pnand %p12863_p10, %p12859_p7 }
 0x212   : > { %12867 = shalt.err (!%p12864_p11)
}
 0x213   : > { %s16101_s12 = sld [smem:[#allocation111_spill]]  ;;  %s13280_s8 = smov [#allocation43]  }
 0x214   : > { %11652 = dma.hbm_to_vmem [thread:$0]  (%p11763_p3), %s13954_s4, 1152, %s1472_s7, [#allocation39], %s16083_s9, %s16083_s9, %s16082_s28  }
 0x215   : > { %s1509_s11 = sshll.u32 %s13280_s8, 4  ;;  %s12882_s23 = sshra.s32 %s13968_s13, 4  ;;  %s1510_s11 = int_to_ptr.vmem [resolvable:$true] %s1509_s11  ;;  %s12883_s23 = int_to_ptr.hbm [resolvable:$true] %s12882_s23 }
 0x216   : > { %s12884_s5 = scalar_lea.hbm %s12883_s23, 4  ;;  %s12888_s6 = scalar_lea.hbm %s16100_s14, 4 }
 0x217   : > { %p12885_p12 = scmp.ne.s32.totalorder %s12883_s23, %s12884_s5  ;;  %p12889_p1 = scmp.lt.s32.totalorder %s12883_s23, %s16100_s14 }
 0x218   : > { %p12890_p4 = scmp.lt.s32.totalorder %s12888_s6, %s12884_s5 }
 0x219   : > { %s1534_s2 = sshll.u32 %s16101_s12, 4  ;;  %p12886_p13 = pnand %p12885_p12, %p11763_p3  ;;  %s13982_s2 = int_to_ptr.hbm [resolvable:$true] %s1534_s2 }
 0x21a   : > { %p12891_p5 = por %p12890_p4, %p12889_p1 }
 0x21b   : > { %p12887_p0 = pneg %p12886_p13 }
 0x21d   : > { %p12892_p6 = pnand %p12891_p5, %p12887_p0 }
 0x21f   : > { %12895 = shalt.err (!%p12892_p6)
}
 0x220   : > { %s16102_s4 = sld [smem:[#allocation113_spill]]  ;;  %s13281_s7 = smov [#allocation46]  }
 0x221   : > { %11656 = dma.hbm_to_vmem [thread:$0]  (%p11763_p3), %s13968_s13, 64, %s1510_s11, [#allocation42]  }
 0x222   : > { %s1536_s8 = sshll.u32 %s13281_s7, 4  ;;  %s12910_s23 = sshra.s32 %s13982_s2, 4  ;;  %s1537_s8 = int_to_ptr.vmem [resolvable:$true] %s1536_s8  ;;  %s12911_s23 = int_to_ptr.hbm [resolvable:$true] %s12910_s23 }
 0x223   : > { %s12912_s5 = scalar_lea.hbm %s12911_s23, 3  ;;  %s12916_s6 = scalar_lea.hbm %s16101_s12, 3 }
 0x224   : > { %p12913_p7 = scmp.ne.s32.totalorder %s12911_s23, %s12912_s5  ;;  %p12917_p10 = scmp.lt.s32.totalorder %s12911_s23, %s16101_s12 }
 0x225   : > { %p12918_p11 = scmp.lt.s32.totalorder %s12916_s6, %s12912_s5 }
 0x226   : > { %s1558_s17 = sshll.u32 %s16102_s4, 4  ;;  %p12914_p8 = pnand %p12913_p7, %p11763_p3  ;;  %s13993_s17 = int_to_ptr.hbm [resolvable:$true] %s1558_s17 }
 0x227   : > { %p12919_p12 = por %p12918_p11, %p12917_p10 }
 0x228   : > { %p12915_p9 = pneg %p12914_p8 }
 0x22a   : > { %p12920_p13 = pnand %p12919_p12, %p12915_p9 }
 0x22c   : > { %12923 = shalt.err (!%p12920_p13)
}
 0x22d   : > { %s16103_s13 = sld [smem:[#allocation114_spill]]  ;;  %s13282_s7 = smov [#allocation49]  }
 0x22e   : > { %11660 = dma.hbm_to_vmem [thread:$0]  (%p11763_p3), %s13982_s2, 48, %s1537_s8, [#allocation45]  }
 0x22f   : > { %s1560_s14 = sshll.u32 %s13282_s7, 4  ;;  %s12938_s23 = sshra.s32 %s13993_s17, 4  ;;  %s1561_s14 = int_to_ptr.vmem [resolvable:$true] %s1560_s14  ;;  %s12939_s23 = int_to_ptr.hbm [resolvable:$true] %s12938_s23 }
 0x230   : > { %s12940_s5 = scalar_lea.hbm %s12939_s23, 1  ;;  %s12944_s6 = scalar_lea.hbm %s16102_s4, 1 }
 0x231   : > { %p12941_p0 = scmp.ne.s32.totalorder %s12939_s23, %s12940_s5  ;;  %p12945_p5 = scmp.lt.s32.totalorder %s12939_s23, %s16102_s4 }
 0x232   : > { %p12946_p6 = scmp.lt.s32.totalorder %s12944_s6, %s12940_s5 }
 0x233   : > { %s1582_s11 = sshll.u32 %s16103_s13, 4  ;;  %p12942_p1 = pnand %p12941_p0, %p11763_p3  ;;  %s14004_s11 = int_to_ptr.hbm [resolvable:$true] %s1582_s11 }
 0x234   : > { %p12947_p7 = por %p12946_p6, %p12945_p5 }
 0x235   : > { %p12943_p4 = pneg %p12942_p1 }
 0x237   : > { %p12948_p8 = pnand %p12947_p7, %p12943_p4 }
 0x239   : > { %12951 = shalt.err (!%p12948_p8)
}
 0x23a   : > { %s16104_s2 = sld [smem:[#allocation116_spill]]  ;;  %s13283_s8 = smov [#allocation52]  }
 0x23b   : > { %11664 = dma.hbm_to_vmem [thread:$0]  (%p11763_p3), %s13993_s17, 16, %s1561_s14, [#allocation48]  }
 0x23c   : > { %s1584_s7 = sshll.u32 %s13283_s8, 4  ;;  %s12966_s23 = sshra.s32 %s14004_s11, 4  ;;  %s1585_s7 = int_to_ptr.vmem [resolvable:$true] %s1584_s7  ;;  %s12967_s23 = int_to_ptr.hbm [resolvable:$true] %s12966_s23 }
 0x23d   : > { %s12968_s5 = scalar_lea.hbm %s12967_s23, 1  ;;  %s12972_s6 = scalar_lea.hbm %s16103_s13, 1 }
 0x23e   : > { %p12969_p9 = scmp.ne.s32.totalorder %s12967_s23, %s12968_s5  ;;  %p12973_p12 = scmp.lt.s32.totalorder %s12967_s23, %s16103_s13 }
 0x23f   : > { %p12974_p13 = scmp.lt.s32.totalorder %s12972_s6, %s12968_s5 }
 0x240   : > { %s1607_s12 = sshll.u32 %s16104_s2, 4  ;;  %p12970_p10 = pnand %p12969_p9, %p11763_p3  ;;  %s14015_s12 = int_to_ptr.hbm [resolvable:$true] %s1607_s12 }
 0x241   : > { %p12975_p0 = por %p12974_p13, %p12973_p12 }
 0x242   : > { %p12971_p11 = pneg %p12970_p10 }
 0x244   : > { %p12976_p1 = pnand %p12975_p0, %p12971_p11 }
 0x246   : > { %12979 = shalt.err (!%p12976_p1)
}
 0x247   : > { %s16105_s17 = sld [smem:[#allocation118_spill]]  ;;  %s13284_s8 = smov [#allocation55]  }
 0x248   : > { %11668 = dma.hbm_to_vmem [thread:$0]  (%p11763_p3), %s14004_s11, 16, %s1585_s7, [#allocation51]  }
 0x249   : > { %s1609_s4 = sshll.u32 %s13284_s8, 4  ;;  %s12994_s23 = sshra.s32 %s14015_s12, 4  ;;  %s1610_s4 = int_to_ptr.vmem [resolvable:$true] %s1609_s4  ;;  %s12995_s23 = int_to_ptr.hbm [resolvable:$true] %s12994_s23 }
 0x24a   : > { %s12996_s5 = scalar_lea.hbm %s12995_s23, 128  ;;  %s13000_s6 = scalar_lea.hbm %s16104_s2, 128 }
 0x24b   : > { %p12997_p4 = scmp.ne.s32.totalorder %s12995_s23, %s12996_s5  ;;  %p13001_p7 = scmp.lt.s32.totalorder %s12995_s23, %s16104_s2 }
 0x24c   : > { %p13002_p8 = scmp.lt.s32.totalorder %s13000_s6, %s12996_s5 }
 0x24d   : > { %s1635_s14 = sshll.u32 %s16105_s17, 4  ;;  %p12998_p5 = pnand %p12997_p4, %p11763_p3  ;;  %s14026_s14 = int_to_ptr.hbm [resolvable:$true] %s1635_s14 }
 0x24e   : > { %p13003_p9 = por %p13002_p8, %p13001_p7 }
 0x24f   : > { %p12999_p6 = pneg %p12998_p5 }
 0x251   : > { %p13004_p10 = pnand %p13003_p9, %p12999_p6 }
 0x253   : > { %13007 = shalt.err (!%p13004_p10)
}
 0x254   : > { %11672 = dma.hbm_to_vmem [thread:$0]  (%p11763_p3), %s14015_s12, 2048, %s1610_s4, [#allocation54], %s16083_s9, %s16083_s9, %s16082_s28  }
 0x255   : > { %s13285_s11 = smov [#allocation58]   ;;  %s1663_s8 = sshll.u32 %s13534_s3, 4  ;;  %s14040_s8 = int_to_ptr.hbm [resolvable:$true] %s1663_s8 }
 0x256   : > { %s1637_s7 = sshll.u32 %s13285_s11, 4  ;;  %s13022_s23 = sshra.s32 %s14026_s14, 4  ;;  %s1638_s7 = int_to_ptr.vmem [resolvable:$true] %s1637_s7  ;;  %s13023_s23 = int_to_ptr.hbm [resolvable:$true] %s13022_s23 }
 0x257   : > { %s13024_s5 = scalar_lea.hbm %s13023_s23, 128  ;;  %s13028_s6 = scalar_lea.hbm %s16105_s17, 128 }
 0x258   : > { %p13025_p11 = scmp.ne.s32.totalorder %s13023_s23, %s13024_s5  ;;  %p13029_p0 = scmp.lt.s32.totalorder %s13023_s23, %s16105_s17 }
 0x259   : > { %p13030_p1 = scmp.lt.s32.totalorder %s13028_s6, %s13024_s5 }
 0x25a   : > { %p13026_p12 = pnand %p13025_p11, %p11763_p3 }
 0x25b   : > { %p13031_p4 = por %p13030_p1, %p13029_p0 }
 0x25c   : > { %p13027_p13 = pneg %p13026_p12 }
 0x25e   : > { %p13032_p5 = pnand %p13031_p4, %p13027_p13 }
 0x260   : > { %13035 = shalt.err (!%p13032_p5)
}
 0x261   : > { %11676 = dma.hbm_to_vmem [thread:$0]  (%p11763_p3), %s14026_s14, 2048, %s1638_s7, [#allocation57], %s16083_s9, %s16083_s9, %s16082_s28  }
 0x262   : > { %s1677_s12 = sshll.u32 %s13539_s1, 4  ;;  %s13286_s4 = smov [#allocation61]   ;;  %s14054_s12 = int_to_ptr.hbm [resolvable:$true] %s1677_s12 }
 0x263   : > { %s1665_s11 = sshll.u32 %s13286_s4, 4  ;;  %s13050_s23 = sshra.s32 %s14040_s8, 4  ;;  %s1666_s11 = int_to_ptr.vmem [resolvable:$true] %s1665_s11  ;;  %s13051_s23 = int_to_ptr.hbm [resolvable:$true] %s13050_s23 }
 0x264   : > { %s13052_s5 = scalar_lea.hbm %s13051_s23, 128  ;;  %s13056_s6 = scalar_lea.hbm %s13534_s3, 128 }
 0x265   : > { %p13053_p6 = scmp.ne.s32.totalorder %s13051_s23, %s13052_s5  ;;  %p13057_p9 = scmp.lt.s32.totalorder %s13051_s23, %s13534_s3 }
 0x266   : > { %p13058_p10 = scmp.lt.s32.totalorder %s13056_s6, %s13052_s5 }
 0x267   : > { %p13054_p7 = pnand %p13053_p6, %p11763_p3 }
 0x268   : > { %p13059_p11 = por %p13058_p10, %p13057_p9 }
 0x269   : > { %p13055_p8 = pneg %p13054_p7 }
 0x26b   : > { %p13060_p12 = pnand %p13059_p11, %p13055_p8 }
 0x26d   : > { %13063 = shalt.err (!%p13060_p12)
}
 0x26e   : > { %11680 = dma.hbm_to_vmem [thread:$0]  (%p11763_p3), %s14040_s8, 2048, %s1666_s11, [#allocation60], %s16083_s9, %s16083_s9, %s16082_s28  }
 0x26f   : > { %s13287_s14 = smov [#allocation62]   ;;  %s13078_s4 = sshra.s32 %s14054_s12, 4  ;;  %s13079_s4 = int_to_ptr.hbm [resolvable:$true] %s13078_s4 }
 0x270   : > { %s1679_s7 = sshll.u32 %s13287_s14, 4  ;;  %s13080_s23 = scalar_lea.hbm %s13079_s4, 128  ;;  %s1680_s7 = int_to_ptr.vmem [resolvable:$true] %s1679_s7 }
 0x271   : > { %p13081_p13 = scmp.ne.s32.totalorder %s13079_s4, %s13080_s23  ;;  %s13084_s5 = scalar_lea.hbm %s13539_s1, 128 }
 0x272   : > { %p13085_p4 = scmp.lt.s32.totalorder %s13079_s4, %s13539_s1  ;;  %p13086_p5 = scmp.lt.s32.totalorder %s13084_s5, %s13080_s23 }
 0x273   : > { %p13082_p0 = pnand %p13081_p13, %p11763_p3 }
 0x274   : > { %p13087_p6 = por %p13086_p5, %p13085_p4 }
 0x275   : > { %p13083_p1 = pneg %p13082_p0 }
 0x277   : > { %p13088_p7 = pnand %p13087_p6, %p13083_p1 }
 0x279   : > { %13091 = shalt.err (!%p13088_p7)
}
 0x27a   : > { %11682 = dma.hbm_to_vmem [thread:$0]  (%p11763_p3), %s14054_s12, 2048, %s1680_s7, [#allocation63], %s16083_s9, %s16083_s9, %s16082_s28  }
 0x27b PF: > { %1706 = sbr.rel (%p13561_p2) target bundleno = 6533 (0x1985), region = 204  ;;  %p11803_p8 = scmp.eq.s32.totalorder (!%p13561_p2), %s13557_s22, 0 }
 0x280   : > { %13111 = dma.done.wait (%p11803_p8), [#allocation4], 576  }
 0x281   : > { %13113 = vsyncadd (%p11803_p8), [#allocation4], 4294966720 }
 0x282   : > { %13115 = dma.done.wait (%p11803_p8), [#allocation6], 1216  }
 0x283   : > { %13117 = vsyncadd (%p11803_p8), [#allocation6], 4294966080 }
 0x284   : > { %13119 = dma.done.wait (%p11803_p8), [#allocation9], 1280  }
 0x285   : > { %13121 = vsyncadd (%p11803_p8), [#allocation9], 4294966016 }
 0x286   : > { %13123 = dma.done.wait (%p11803_p8), [#allocation12], 2432  }
 0x287   : > { %13125 = vsyncadd (%p11803_p8), [#allocation12], 4294964864 }
 0x288   : > { %13127 = dma.done.wait (%p11803_p8), [#allocation15], 2560  }
 0x289   : > { %13129 = vsyncadd (%p11803_p8), [#allocation15], 4294964736 }
 0x28a   : > { %13131 = dma.done.wait (%p11803_p8), [#allocation18], 4864  }
 0x28b   : > { %13133 = vsyncadd (%p11803_p8), [#allocation18], 4294962432 }
 0x28c   : > { %13135 = dma.done.wait (%p11803_p8), [#allocation21], 5120  }
 0x28d   : > { %13137 = vsyncadd (%p11803_p8), [#allocation21], 4294962176 }
 0x28e   : > { %13139 = dma.done.wait (%p11803_p8), [#allocation24], 9728  }
 0x28f   : > { %13141 = vsyncadd (%p11803_p8), [#allocation24], 4294957568 }
 0x290   : > { %13143 = dma.done.wait (%p11803_p8), [#allocation27], 10240  }
 0x291   : > { %13145 = vsyncadd (%p11803_p8), [#allocation27], 4294957056 }
 0x292   : > { %13147 = dma.done.wait (%p11803_p8), [#allocation30], 5632  }
 0x293   : > { %13149 = vsyncadd (%p11803_p8), [#allocation30], 4294961664 }
 0x294   : > { %13151 = dma.done.wait (%p11803_p8), [#allocation33], 5120  }
 0x295   : > { %13153 = vsyncadd (%p11803_p8), [#allocation33], 4294962176 }
 0x296   : > { %13155 = dma.done.wait (%p11803_p8), [#allocation36], 4608  }
 0x297   : > { %13157 = vsyncadd (%p11803_p8), [#allocation36], 4294962688 }
 0x298   : > { %13159 = dma.done.wait (%p11803_p8), [#allocation39], 1408  }
 0x299   : > { %13161 = vsyncadd (%p11803_p8), [#allocation39], 4294965888 }
 0x29a   : > { %13163 = dma.done.wait (%p11803_p8), [#allocation42], 640  }
 0x29b   : > { %13165 = vsyncadd (%p11803_p8), [#allocation42], 4294966656 }
 0x29c   : > { %13167 = dma.done.wait (%p11803_p8), [#allocation45], 112  }
 0x29d   : > { %13169 = vsyncadd (%p11803_p8), [#allocation45], 4294967184 }
 0x29e   : > { %13171 = dma.done.wait (%p11803_p8), [#allocation48], 32  }
 0x29f   : > { %13173 = vsyncadd (%p11803_p8), [#allocation48], 4294967264 }
 0x2a0   : > { %13175 = dma.done.wait (%p11803_p8), [#allocation51], 32  }
 0x2a1   : > { %13177 = vsyncadd (%p11803_p8), [#allocation51], 4294967264 }
 0x2a2   : > { %13179 = dma.done.wait (%p11803_p8), [#allocation54], 8192  }
 0x2a3   : > { %13181 = vsyncadd (%p11803_p8), [#allocation54], 4294959104 }
 0x2a4   : > { %13183 = dma.done.wait (%p11803_p8), [#allocation57], 4096  }
 0x2a5   : > { %13185 = vsyncadd (%p11803_p8), [#allocation57], 4294963200 }
 0x2a6   : > { %13187 = dma.done.wait (%p11803_p8), [#allocation60], 4096  }
 0x2a7   : > { %13189 = vsyncadd (%p11803_p8), [#allocation60], 4294963200 }
 0x2a8   : > { %13191 = dma.done.wait (%p11803_p8), [#allocation63], 2048  }
 0x2a9   : > { %13193 = vsyncadd (%p11803_p8), [#allocation63], 4294965248  ;;  %s16106_s16 = sld [smem:[#allocation85_spill]]  ;;  %p2011_p2 = scmp.lt.s32.totalorder %s13557_s22, 1  ;;  %vm2035_vm0 = vcmask 1042432   ;;  %vm2031_vm1 = vcmask 23552  }
 0x2aa   : > { %v2022_v3 = vld [vmem:[#allocation3] sm:$0xf]  ;;  %v2122_v7 = vld [vmem:[#allocation3 + $0x4] sm:$0xf]  ;;  %v2218_v11 = vld [vmem:[#allocation3 + $0x8] sm:$0xf] }
 0x2ab   : > { %s16200_s22 = smov (!%p2011_p2, %s13557_s22), 1  ;;  %v2314_v15 = vld [vmem:[#allocation3 + $0xc] sm:$0xf]  ;;  %v2410_v19 = vld [vmem:[#allocation3 + $0x10] sm:$0xf]  ;;  %s16010_s8 = smov 19  }
 0x2ac   : > { %s11601_s28 = smul.u32 12, %s16200_s22  ;;  %v2490_v23 = vld [vmem:[#allocation3 + $0x14] sm:$0xf]  ;;  %v2586_v27 = vld [vmem:[#allocation3 + $0x18] sm:$0xf]  ;;  %s16008_s12 = smov 18  }
 0x2ad   : > { %v2682_v31 = vld [vmem:[#allocation3 + $0x1c] sm:$0xf]  ;;  %v2778_v35 = vld [vmem:[#allocation3 + $0x20] sm:$0xf]  ;;  %s16006_s11 = smov 17   ;;  %s13291_s6 = smov 1  }
 0x2ae   : > { %s13292_s14 = smov 127   ;;  %v13293_v54 = vmov 0   ;;  %s16004_s7 = smov 111   ;;  %vm16019_vm2 = vcmask 154624   ;;  %vm16018_vm3 = vcmask 146432   ;;  %vm16017_vm4 = vcmask 138240  }
 0x2af   : > { %s2015_s9 = scalar_lea.vmem %s16106_s16, %s11601_s28  ;;  %11966 = vset.pattern.permute.xlu0 %v13293_v54  ;;  %11977 = vset.pattern.permute.xlu2 %v13293_v54  ;;  %s16000_s4 = smov 110   ;;  %vm2399_vm5 = vcmask 7168   ;;  %vm2575_vm6 = vcmask 1039360   ;;  %vm16016_vm7 = vcmask 908288   ;;  %vm16003_vm8 = vcmask 900096  }
 0x2b0   : > { %v14171_v1 = vld [vmem:[%s2015_s9] sm:$0x77]  ;;  %v14173_v2 = vld [vmem:[%s2015_s9 + $0x8] sm:$0x7]  ;;  %11978 = vset.pattern.permute.xlu1 %v13293_v54  ;;  %s15998_s23 = smov 109   ;;  %vm16002_vm9 = vcmask 891904  }
 0x2b1   : > { %2025 = vst [vmem:[#allocation1] ss:$2 sm:$0xff] %v14171_v1  ;;  %vm16034_vm10 = vcmask 1043456   ;;  %vm3041_vm11 = vcmask 31744   ;;  %s16029_s5 = smov 11   ;;  %s16027_s16 = smov 10  }
 0x2b2   : > { %2027 = vst [vmem:[#allocation1 + $0x10] ss:$2 sm:$0xff] %v14173_v2  ;;  %s16025_s28 = smov 9   ;;  %s16014_s9 = smov 117   ;;  %vm16032_vm12 = vcmask 80896   ;;  %vm16033_vm13 = vcmask 89088  }
 0x2b3   : > { %vm16031_vm14 = vcmask 72704   ;;  %vm16022_vm15 = vcmask 973824  }
 0x2b8   : > { %v2028_v4 = vld.sshfl [vmem:[#allocation1] sm:$0xff pattern:$0x75316420]  ;;  %v2029_v5 = vld.sshfl [vmem:[#allocation1 + $0x8] sm:$0xff pattern:$0x75316420] }
 0x2b9   : > { %11171 = vmatpush.msk.msra.mxu0 %vm2035_vm0, %v2028_v4  ;;  %v2030_v6 = vld.sshfl [vmem:[#allocation1 + $0x10] sm:$0xff pattern:$0x75316420]  ;;  %11173 = vmatpush.msk.msra.mxu1 %vm2035_vm0, %v2029_v5  ;;  %2123 = vst [vmem:[#allocation1] ss:$2 sm:$0xff] %v14171_v1 }
 0x2ba   : > { %11175 = vmatpush.msk.msra.mxu2 %vm2035_vm0, %v2030_v6  ;;  %2125 = vst [vmem:[#allocation1 + $0x10] ss:$2 sm:$0xff] %v14173_v2  ;;  %11172 = vmatmul.msk.f32.vlgmr.msra.gmra.mxu0 %vm2031_vm1, %v2022_v3 }
 0x2bb   : > { %11176 = vmatmul.msk.f32.vlgmr.msra.gmra.mxu2 %vm2031_vm1, %v2022_v3  ;;  %11174 = vmatmul.msk.f32.vlgmr.msra.gmra.mxu1 %vm2031_vm1, %v2022_v3  ;;  %v2873_v3 = vld [vmem:[#allocation5] sm:$0xf] }
 0x2c0   : > { %v2126_v8 = vld.sshfl [vmem:[#allocation1] sm:$0xff pattern:$0x75316420]  ;;  %v2127_v9 = vld.sshfl [vmem:[#allocation1 + $0x8] sm:$0xff pattern:$0x75316420] }
 0x2c1   : > { %11177 = vmatpush.msk.msra.mxu3 %vm2035_vm0, %v2126_v8  ;;  %11179 = vmatpush.msk.msrb.mxu0 %vm2035_vm0, %v2127_v9  ;;  %2219 = vst [vmem:[#allocation1] ss:$2 sm:$0xff] %v14171_v1  ;;  %v2128_v10 = vld.sshfl [vmem:[#allocation1 + $0x10] sm:$0xff pattern:$0x75316420] }
 0x2c2   : > { %11178 = vmatmul.msk.f32.vlgmr.msra.gmra.mxu3 %vm2031_vm1, %v2122_v7  ;;  %11180 = vmatmul.msk.f32.vlgmr.msrb.gmra.mxu0 %vm2031_vm1, %v2122_v7  ;;  %2221 = vst [vmem:[#allocation1 + $0x10] ss:$2 sm:$0xff] %v14173_v2 }
 0x2c3   : > { %11181 = vmatpush.msk.msrb.mxu1 %vm2035_vm0, %v2128_v10 }
 0x2c4   : > { %11182 = vmatmul.msk.f32.vlgmr.msrb.gmra.mxu1 %vm2031_vm1, %v2122_v7 }
 0x2c8   : > { %v2222_v12 = vld.sshfl [vmem:[#allocation1] sm:$0xff pattern:$0x75316420]  ;;  %v2223_v13 = vld.sshfl [vmem:[#allocation1 + $0x8] sm:$0xff pattern:$0x75316420] }
 0x2c9   : > { %11183 = vmatpush.msk.msrb.mxu2 %vm2035_vm0, %v2222_v12  ;;  %11185 = vmatpush.msk.msrb.mxu3 %vm2035_vm0, %v2223_v13  ;;  %2315 = vst [vmem:[#allocation1] ss:$2 sm:$0xff] %v14171_v1  ;;  %v2224_v14 = vld.sshfl [vmem:[#allocation1 + $0x10] sm:$0xff pattern:$0x75316420] }
 0x2ca   : > { %11184 = vmatmul.msk.f32.vlgmr.msrb.gmra.mxu2 %vm2031_vm1, %v2218_v11  ;;  %11186 = vmatmul.msk.f32.vlgmr.msrb.gmra.mxu3 %vm2031_vm1, %v2218_v11  ;;  %2317 = vst [vmem:[#allocation1 + $0x10] ss:$2 sm:$0xff] %v14173_v2 }
 0x2cb   : > { %11187 = vmatpush.msk.msra.mxu0 %vm2035_vm0, %v2224_v14 }
 0x2cc   : > { %11188 = vmatmul.msk.f32.vlgmr.msra.gmra.mxu0 %vm2031_vm1, %v2218_v11 }
 0x2d0   : > { %v2319_v16 = vld.sshfl [vmem:[#allocation1 + $0x8] sm:$0xff pattern:$0x75316420]  ;;  %v2318_v17 = vld.sshfl [vmem:[#allocation1] sm:$0xff pattern:$0x75316420] }
 0x2d1   : > { %11191 = vmatpush.msk.msra.mxu2 %vm2035_vm0, %v2319_v16  ;;  %11189 = vmatpush.msk.msra.mxu1 %vm2035_vm0, %v2318_v17  ;;  %2411 = vst [vmem:[#allocation1] ss:$2 sm:$0xff] %v14171_v1  ;;  %v2320_v18 = vld.sshfl [vmem:[#allocation1 + $0x10] sm:$0xff pattern:$0x75316420] }
 0x2d2   : > { %11192 = vmatmul.msk.f32.vlgmr.msra.gmra.mxu2 %vm2031_vm1, %v2314_v15  ;;  %11190 = vmatmul.msk.f32.vlgmr.msra.gmra.mxu1 %vm2031_vm1, %v2314_v15  ;;  %2413 = vst [vmem:[#allocation1 + $0x10] ss:$2 sm:$0xff] %v14173_v2 }
 0x2d3   : > { %11193 = vmatpush.msk.msra.mxu3 %vm2035_vm0, %v2320_v18 }
 0x2d4   : > { %11194 = vmatmul.msk.f32.vlgmr.msra.gmra.mxu3 %vm2031_vm1, %v2314_v15 }
 0x2d8   : > { %v2414_v20 = vld.sshfl [vmem:[#allocation1] sm:$0xff pattern:$0x75316420]  ;;  %v2415_v21 = vld.sshfl [vmem:[#allocation1 + $0x8] sm:$0xff pattern:$0x75316420] }
 0x2d9   : > { %11195 = vmatpush.msk.msrb.mxu0 %vm2035_vm0, %v2414_v20  ;;  %11197 = vmatpush.msk.msrb.mxu1 %vm2035_vm0, %v2415_v21  ;;  %2491 = vst [vmem:[#allocation1] ss:$2 sm:$0xff] %v14171_v1  ;;  %v2416_v22 = vld.sshfl [vmem:[#allocation1 + $0x10] sm:$0xff pattern:$0x75316420] }
 0x2da   : > { %11196 = vmatmul.msk.f32.vlgmr.msrb.gmra.mxu0 %vm2031_vm1, %v2410_v19  ;;  %11198 = vmatmul.msk.f32.vlgmr.msrb.gmra.mxu1 %vm2031_vm1, %v2410_v19  ;;  %2493 = vst [vmem:[#allocation1 + $0x10] ss:$2 sm:$0xff] %v14173_v2 }
 0x2db   : > { %11199 = vmatpush.msk.msrb.mxu2 %vm2035_vm0, %v2416_v22 }
 0x2dc   : > { %11200 = vmatmul.msk.f32.vlgmr.msrb.gmra.mxu2 %vm2031_vm1, %v2410_v19 }
 0x2e0   : > { %v2494_v24 = vld.sshfl [vmem:[#allocation1] sm:$0xff pattern:$0x75316420]  ;;  %v2495_v25 = vld.sshfl [vmem:[#allocation1 + $0x8] sm:$0xff pattern:$0x75316420] }
 0x2e1   : > { %11201 = vmatpush.msk.msrb.mxu3 %vm2035_vm0, %v2494_v24  ;;  %11203 = vmatpush.msk.msra.mxu0 %vm2035_vm0, %v2495_v25  ;;  %2587 = vst [vmem:[#allocation1] ss:$2 sm:$0xff] %v14171_v1  ;;  %v2496_v26 = vld.sshfl [vmem:[#allocation1 + $0x10] sm:$0xff pattern:$0x75316420] }
 0x2e2   : > { %11202 = vmatmul.msk.f32.vlgmr.msrb.gmra.mxu3 %vm2031_vm1, %v2490_v23  ;;  %11204 = vmatmul.msk.f32.vlgmr.msra.gmra.mxu0 %vm2031_vm1, %v2490_v23  ;;  %2589 = vst [vmem:[#allocation1 + $0x10] ss:$2 sm:$0xff] %v14173_v2 }
 0x2e3   : > { %11205 = vmatpush.msk.msra.mxu1 %vm2035_vm0, %v2496_v26 }
 0x2e4   : > { %11206 = vmatmul.msk.f32.vlgmr.msra.gmra.mxu1 %vm2031_vm1, %v2490_v23 }
 0x2e8   : > { %v2590_v28 = vld.sshfl [vmem:[#allocation1] sm:$0xff pattern:$0x75316420]  ;;  %v2591_v29 = vld.sshfl [vmem:[#allocation1 + $0x8] sm:$0xff pattern:$0x75316420] }
 0x2e9   : > { %11207 = vmatpush.msk.msra.mxu2 %vm2035_vm0, %v2590_v28  ;;  %11209 = vmatpush.msk.msra.mxu3 %vm2035_vm0, %v2591_v29  ;;  %2683 = vst [vmem:[#allocation1] ss:$2 sm:$0xff] %v14171_v1  ;;  %v2592_v30 = vld.sshfl [vmem:[#allocation1 + $0x10] sm:$0xff pattern:$0x75316420] }
 0x2ea   : > { %11208 = vmatmul.msk.f32.vlgmr.msra.gmra.mxu2 %vm2031_vm1, %v2586_v27  ;;  %11210 = vmatmul.msk.f32.vlgmr.msra.gmra.mxu3 %vm2031_vm1, %v2586_v27  ;;  %2685 = vst [vmem:[#allocation1 + $0x10] ss:$2 sm:$0xff] %v14173_v2 }
 0x2eb   : > { %11211 = vmatpush.msk.msrb.mxu0 %vm2035_vm0, %v2592_v30 }
 0x2ec   : > { %11212 = vmatmul.msk.f32.vlgmr.msrb.gmra.mxu0 %vm2031_vm1, %v2586_v27 }
 0x2f0   : > { %v2687_v32 = vld.sshfl [vmem:[#allocation1 + $0x8] sm:$0xff pattern:$0x75316420]  ;;  %v2686_v33 = vld.sshfl [vmem:[#allocation1] sm:$0xff pattern:$0x75316420] }
 0x2f1   : > { %11215 = vmatpush.msk.msrb.mxu2 %vm2035_vm0, %v2687_v32  ;;  %v2688_v34 = vld.sshfl [vmem:[#allocation1 + $0x10] sm:$0xff pattern:$0x75316420]  ;;  %11213 = vmatpush.msk.msrb.mxu1 %vm2035_vm0, %v2686_v33  ;;  %2779 = vst [vmem:[#allocation1] ss:$2 sm:$0xff] %v14171_v1 }
 0x2f2   : > { %11217 = vmatpush.msk.msrb.mxu3 %vm2035_vm0, %v2688_v34  ;;  %2781 = vst [vmem:[#allocation1 + $0x10] ss:$2 sm:$0xff] %v14173_v2  ;;  %11216 = vmatmul.msk.f32.vlgmr.msrb.gmra.mxu2 %vm2031_vm1, %v2682_v31 }
 0x2f3   : > { %11218 = vmatmul.msk.f32.vlgmr.msrb.gmra.mxu3 %vm2031_vm1, %v2682_v31  ;;  %11214 = vmatmul.msk.f32.vlgmr.msrb.gmra.mxu1 %vm2031_vm1, %v2682_v31 }
 0x2f8   : > { %v2782_v36 = vld.sshfl [vmem:[#allocation1] sm:$0xff pattern:$0x75316420]  ;;  %v2783_v37 = vld.sshfl [vmem:[#allocation1 + $0x8] sm:$0xff pattern:$0x75316420] }
 0x2f9   : > { %v2784_v38 = vld.sshfl [vmem:[#allocation1 + $0x10] sm:$0xff pattern:$0x75316420]  ;;  %11219 = vmatpush.msk.msra.mxu0 %vm2035_vm0, %v2782_v36  ;;  %11221 = vmatpush.msk.msra.mxu1 %vm2035_vm0, %v2783_v37 }
 0x2fa   : > { %11223 = vmatpush.msk.msra.mxu2 %vm2035_vm0, %v2784_v38  ;;  %11220 = vmatmul.msk.f32.vlgmr.msra.gmra.mxu0 %vm2031_vm1, %v2778_v35  ;;  %vm16021_vm0 = vcmask 965632  }
 0x2fb   : > { %11224 = vmatmul.msk.f32.vlgmr.msra.gmra.mxu2 %vm2031_vm1, %v2778_v35  ;;  %11222 = vmatmul.msk.f32.vlgmr.msra.gmra.mxu1 %vm2031_vm1, %v2778_v35 }
 0x337   : > { %v2059_v39 = vpop.f32.mrf.mxu0 }
 0x338   : > { %2105 = vrot.lane.b32.xlu0 %v2059_v39, %s16010_s8  ;;  %v2079_v40 = vpop.f32.mrf.mxu1 }
 0x33e   : > { %v2099_v41 = vpop.f32.mrf.mxu2 }
 0x33f   : > { %2109 = vrot.lane.b32.xlu1 %v2099_v41, %s16010_s8  ;;  %v2175_v42 = vpop.f32.mrf.mxu0 }
 0x340   : > { %2107 = vrot.lane.b32.xlu0 %v2079_v40, %s16010_s8  ;;  %2203 = vrot.lane.b32.xlu2 %v2175_v42, %s16008_s12  ;;  %s13306_s8 = smov 7  }
 0x341   : > { %v2195_v44 = vpop.f32.mrf.mxu1 }
 0x345   : > { %v2155_v43 = vpop.f32.mrf.mxu3 }
 0x347   : > { %2201 = vrot.lane.b32.xlu1 %v2155_v43, %s16008_s12 }
 0x348   : > { %2205 = vrot.lane.b32.xlu2 %v2195_v44, %s16008_s12  ;;  %s13305_s12 = smov 123  }
 0x349   : > { %v2291_v45 = vpop.f32.mrf.mxu0 }
 0x34d   : > { %v2251_v46 = vpop.f32.mrf.mxu2  ;;  %v2271_v47 = vpop.f32.mrf.mxu3 }
 0x34e   : > { %2297 = vrot.lane.b32.xlu0 %v2251_v46, %s16006_s11 }
 0x34f   : > { %2299 = vrot.lane.b32.xlu1 %v2271_v47, %s16006_s11  ;;  %v2347_v48 = vpop.f32.mrf.mxu1 }
 0x350   : > { %2301 = vrot.lane.b32.xlu2 %v2291_v45, %s16006_s11  ;;  %s13304_s11 = smov 6  }
 0x355   : > { %v2367_v49 = vpop.f32.mrf.mxu2 }
 0x356   : > { %2393 = vrot.lane.b32.xlu0 %v2347_v48, %s13291_s6 }
 0x357   : > { %2395 = vrot.lane.b32.xlu1 %v2367_v49, %s13291_s6  ;;  %v14258_v50 = vpop.f32.mrf.mxu0  ;;  %v2387_v51 = vpop.f32.mrf.mxu3 }
 0x358   : > { %v14260_v52 = vpop.f32.mrf.mxu1  ;;  %2397 = vrot.lane.b32.xlu2 %v2387_v51, %s13291_s6 }
 0x35f   : > { %v2543_v53 = vpop.f32.mrf.mxu0  ;;  %v14265_v56 = vpop.f32.mrf.mxu2 }
 0x360   : > { %2571 = vrot.lane.b32.xlu1 %v2543_v53, %s13292_s14 }
 0x361   : > { %v2563_v55 = vpop.f32.mrf.mxu1 }
 0x362   : > { %2573 = vrot.lane.b32.xlu2 %v2563_v55, %s13292_s14 }
 0x365   : > { %v2523_v57 = vpop.f32.mrf.mxu3 }
 0x366   : > { %2569 = vrot.lane.b32.xlu0 %v2523_v57, %s13292_s14 }
 0x369   : > { %v2659_v58 = vpop.f32.mrf.mxu0 }
 0x36a   : > { %2669 = vrot.lane.b32.xlu2 %v2659_v58, %s16004_s7 }
 0x36d   : > { %v2619_v59 = vpop.f32.mrf.mxu2  ;;  %v2639_v60 = vpop.f32.mrf.mxu3 }
 0x36e   : > { %2665 = vrot.lane.b32.xlu0 %v2619_v59, %s16004_s7  ;;  %2667 = vrot.lane.b32.xlu1 %v2639_v60, %s16004_s7  ;;  %s13303_s7 = smov 5  }
 0x370   : > { %v2715_v61 = vpop.f32.mrf.mxu1 }
 0x375   : > { %v2735_v62 = vpop.f32.mrf.mxu2 }
 0x376   : > { %v2755_v63 = vpop.f32.mrf.mxu3  ;;  %2761 = vrot.lane.b32.xlu0 %v2715_v61, %s16000_s4  ;;  %2763 = vrot.lane.b32.xlu1 %v2735_v62, %s16000_s4 }
 0x377   : > { %2765 = vrot.lane.b32.xlu2 %v2755_v63, %s16000_s4  ;;  %v2811_v0 = vpop.f32.mrf.mxu0 }
 0x378   : > { %v2831_v1 = vpop.f32.mrf.mxu1 }
 0x37e   : > { %v2851_v2 = vpop.f32.mrf.mxu2  ;;  %2859 = vrot.lane.b32.xlu1 %v2831_v1, %s15998_s23  ;;  %2857 = vrot.lane.b32.xlu0 %v2811_v0, %s15998_s23 }
 0x37f   : > { %2861 = vrot.lane.b32.xlu2 %v2851_v2, %s15998_s23  ;;  %s16012_s23 = smov 119  }
 0x386   : > { %2876 = vperm.xlu0 %11966, %v2873_v3  }
 0x39a   : > { %v2204_v4 = vpop.permute.xlu2 %2203 }
 0x3a2   : > { %v2206_v7 = vpop.permute.xlu2 %2205 }
 0x3a3   : > { %v2209_v21 = vsel %vm16018_vm3, %v2204_v4, %v2206_v7 }
 0x3aa   : > { %v2106_v6 = vpop.permute.xlu0 %2105  ;;  %v2302_v10 = vpop.permute.xlu2 %2301 }
 0x3ab   : > { %v2117_v28 = vsel %vm16019_vm2, 0.0, %v2106_v6 }
 0x3b1   : > { %v2110_v5 = vpop.permute.xlu1 %2109 }
 0x3b2   : > { %v2108_v9 = vpop.permute.xlu0 %2107  ;;  %v2398_v13 = vpop.permute.xlu2 %2397 }
 0x3b3   : > { %v2113_v20 = vsel %vm16019_vm2, %v2108_v9, %v2110_v5  ;;  %v2112_v29 = vsel %vm16019_vm2, %v2106_v6, %v2108_v9  ;;  %v14304_v9 = vld [vmem:[#allocation46] sm:$0x7]  ;;  %vm3964_vm2 = vcmask 1006592  }
 0x3b4   : > { %v2216_v25 = vadd.f32 %v2209_v21, %v2113_v20 }
 0x3b9   : > { %v2202_v8 = vpop.permute.xlu1 %2201 }
 0x3ba   : > { %v2208_v30 = vsel %vm16018_vm3, %v2202_v8, %v2204_v4  ;;  %v2213_v31 = vsel %vm16018_vm3, 0.0, %v2202_v8  ;;  %vm3797_vm3 = vcmask 39936  }
 0x3bb   : > { %v2214_v35 = vadd.f32 %v2213_v31, %v2117_v28  ;;  %v2215_v36 = vadd.f32 %v2208_v30, %v2112_v29  ;;  %v2979_v30 = vld [vmem:[#allocation53 + $0x178] sm:$0xff]  ;;  %v2978_v31 = vld [vmem:[#allocation53 + $0x170] sm:$0xff] }
 0x3bc   : > { %v2574_v16 = vpop.permute.xlu2 %2573  ;;  %3020 = vmatpush.msrb.mxu1 %v2979_v30  ;;  %v2949_v30 = vld [vmem:[#allocation53 + $0x88] sm:$0xff] }
 0x3bd   : > { %v2581_v47 = vsel %vm2575_vm6, %v2574_v16, 0.0 }
 0x3be   : > { %3021 = vmatpush.msrb.mxu1 %v2978_v31  ;;  %v2932_v31 = vld [vmem:[#allocation53] sm:$0xff] }
 0x3c0   : > { %v2298_v12 = vpop.permute.xlu0 %2297 }
 0x3c1   : > { %v2300_v11 = vpop.permute.xlu1 %2299  ;;  %v2309_v34 = vsel %vm16017_vm4, 0.0, %v2298_v12 }
 0x3c2   : > { %v2305_v22 = vsel %vm16017_vm4, %v2300_v11, %v2302_v10  ;;  %v2304_v33 = vsel %vm16017_vm4, %v2298_v12, %v2300_v11  ;;  %v2310_v42 = vadd.f32 %v2309_v34, %v2214_v35  ;;  %v2975_v34 = vld [vmem:[#allocation53 + $0x158] sm:$0xff]  ;;  %v2974_v35 = vld [vmem:[#allocation53 + $0x150] sm:$0xff]  ;;  %vm3752_vm4 = vcmask 48128  }
 0x3c3   : > { %v2312_v27 = vadd.f32 %v2305_v22, %v2216_v25  ;;  %v2311_v43 = vadd.f32 %v2304_v33, %v2215_v36  ;;  %v2976_v33 = vld [vmem:[#allocation53 + $0x160] sm:$0xff]  ;;  %v2973_v36 = vld [vmem:[#allocation53 + $0x148] sm:$0xff] }
 0x3c4   : > { %v2670_v19 = vpop.permute.xlu2 %2669 }
 0x3c5   : > { %v2677_v49 = vsel %vm16016_vm7, %v2670_v19, 0.0 }
 0x3c8   : > { %v2394_v15 = vpop.permute.xlu0 %2393 }
 0x3c9   : > { %v2396_v14 = vpop.permute.xlu1 %2395  ;;  %v2405_v39 = vsel %vm2399_vm5, 0.0, %v2394_v15 }
 0x3ca   : > { %v2401_v26 = vsel %vm2399_vm5, %v2396_v14, %v2398_v13  ;;  %v2400_v38 = vsel %vm2399_vm5, %v2394_v15, %v2396_v14  ;;  %v2406_v45 = vadd.f32 %v2405_v39, %v2310_v42  ;;  %v2887_v13 = vperm.slane %v14304_v9, 0  ;;  %v2970_v39 = vld [vmem:[#allocation53 + $0x130] sm:$0xff]  ;;  %v2967_v42 = vld [vmem:[#allocation53 + $0x118] sm:$0xff] }
 0x3cb   : > { %v2408_v32 = vadd.f32 %v2401_v26, %v2312_v27  ;;  %v2407_v46 = vadd.f32 %v2400_v38, %v2311_v43  ;;  %v2888_v14 = vperm.slane %v14304_v9, 1  ;;  %v2971_v38 = vld [vmem:[#allocation53 + $0x138] sm:$0xff] }
 0x3cc   : > { %v2486_v55 = vadd.f32 %v14258_v50, %v2406_v45 }
 0x3cd   : > { %v2488_v44 = vadd.f32 %v14265_v56, %v2408_v32  ;;  %v2487_v54 = vadd.f32 %v14260_v52, %v2407_v46  ;;  %v2977_v32 = vld [vmem:[#allocation53 + $0x168] sm:$0xff] }
 0x3ce   : > { %3022 = vmatpush.msrb.mxu1 %v2977_v32  ;;  %v2948_v32 = vld [vmem:[#allocation53 + $0x80] sm:$0xff] }
 0x3cf   : > { %v2584_v48 = vadd.f32 %v2581_v47, %v2488_v44  ;;  %v2966_v44 = vld [vmem:[#allocation53 + $0x110] sm:$0xff] }
 0x3d0   : > { %3023 = vmatpush.msrb.mxu1 %v2976_v33 }
 0x3d1   : > { %v2766_v37 = vpop.permute.xlu2 %2765  ;;  %v2680_v59 = vadd.f32 %v2677_v49, %v2584_v48 }
 0x3d2   : > { %v2572_v17 = vpop.permute.xlu1 %2571  ;;  %v2773_v0 = vsel %vm16003_vm8, %v2766_v37, 0.0  ;;  %3024 = vmatpush.msrb.mxu1 %v2975_v34 }
 0x3d3   : > { %v2577_v51 = vsel %vm2575_vm6, %v2572_v17, %v2574_v16  ;;  %v2776_v6 = vadd.f32 %v2773_v0, %v2680_v59  ;;  %v2889_v16 = vperm.slane %v14304_v9, 2  ;;  %v2962_v59 = vld [vmem:[#allocation53 + $0xf0] sm:$0xff]  ;;  %v2943_v0 = vld [vmem:[#allocation53 + $0x58] sm:$0xff] }
 0x3d4   : > { %v2583_v60 = vadd.f32 %v2577_v51, %v2487_v54  ;;  %3025 = vmatpush.msrb.mxu1 %v2974_v35  ;;  %v2965_v54 = vld [vmem:[#allocation53 + $0x108] sm:$0xff] }
 0x3d6   : > { %3026 = vmatpush.msrb.mxu1 %v2973_v36 }
 0x3d8   : > { %v2570_v18 = vpop.permute.xlu0 %2569 }
 0x3d9   : > { %v2576_v53 = vsel %vm2575_vm6, %v2570_v18, %v2572_v17  ;;  %v2862_v62 = vpop.permute.xlu2 %2861 }
 0x3da   : > { %v2582_v61 = vadd.f32 %v2576_v53, %v2486_v55  ;;  %v2869_v50 = vsel %vm16002_vm9, %v2862_v62, 0.0  ;;  %v2964_v55 = vld [vmem:[#allocation53 + $0x100] sm:$0xff] }
 0x3db   : > { %v2872_v10 = vadd.f32 %v2869_v50, %v2776_v6  ;;  %v2957_v50 = vld [vmem:[#allocation53 + $0xc8] sm:$0xff]  ;;  %v2939_v6 = vld [vmem:[#allocation53 + $0x38] sm:$0xff] }
 0x3e0   : > { %v2666_v23 = vpop.permute.xlu0 %2665  ;;  %v2668_v24 = vpop.permute.xlu1 %2667 }
 0x3e1   : > { %v2672_v57 = vsel %vm16016_vm7, %v2666_v23, %v2668_v24  ;;  %v2673_v56 = vsel %vm16016_vm7, %v2668_v24, %v2670_v19  ;;  %vm3707_vm7 = vcmask 56320  }
 0x3e2   : > { %v2678_v52 = vadd.f32 %v2672_v57, %v2582_v61  ;;  %v2679_v3 = vadd.f32 %v2673_v56, %v2583_v60  ;;  %v2947_v57 = vld [vmem:[#allocation53 + $0x78] sm:$0xff]  ;;  %v2945_v60 = vld [vmem:[#allocation53 + $0x68] sm:$0xff] }
 0x3e3   : > { %v2963_v56 = vld [vmem:[#allocation53 + $0xf8] sm:$0xff]  ;;  %2980 = vmatpush.msra.mxu3 %v2947_v57  ;;  %v2961_v61 = vld [vmem:[#allocation53 + $0xe8] sm:$0xff] }
 0x3e4   : > { %3000 = vmatpush.msrb.mxu0 %v2963_v56 }
 0x3e6   : > { %3001 = vmatpush.msrb.mxu0 %v2962_v59 }
 0x3e8   : > { %v2762_v40 = vpop.permute.xlu0 %2761  ;;  %v2764_v41 = vpop.permute.xlu1 %2763  ;;  %3002 = vmatpush.msrb.mxu0 %v2961_v61 }
 0x3e9   : > { %v2768_v1 = vsel %vm16003_vm8, %v2762_v40, %v2764_v41  ;;  %v2769_v2 = vsel %vm16003_vm8, %v2764_v41, %v2766_v37  ;;  %v2972_v37 = vld [vmem:[#allocation53 + $0x140] sm:$0xff]  ;;  %v2969_v40 = vld [vmem:[#allocation53 + $0x128] sm:$0xff] }
 0x3ea   : > { %v2774_v7 = vadd.f32 %v2768_v1, %v2678_v52  ;;  %v2775_v8 = vadd.f32 %v2769_v2, %v2679_v3  ;;  %3027 = vmatpush.msrb.mxu1 %v2972_v37  ;;  %v2968_v41 = vld [vmem:[#allocation53 + $0x120] sm:$0xff]  ;;  %v2959_v1 = vld [vmem:[#allocation53 + $0xd8] sm:$0xff]  ;;  %v2942_v2 = vld [vmem:[#allocation53 + $0x50] sm:$0xff] }
 0x3eb   : > { %v2958_v52 = vld [vmem:[#allocation53 + $0xd0] sm:$0xff]  ;;  %v2941_v3 = vld [vmem:[#allocation53 + $0x48] sm:$0xff] }
 0x3ec   : > { %3028 = vmatpush.msrb.mxu1 %v2971_v38 }
 0x3ee   : > { %3029 = vmatpush.msrb.mxu1 %v2970_v39 }
 0x3f0   : > { %v2858_v58 = vpop.permute.xlu0 %2857  ;;  %v2860_v63 = vpop.permute.xlu1 %2859  ;;  %3030 = vmatpush.msrb.mxu1 %v2969_v40 }
 0x3f1   : > { %v2865_v4 = vsel %vm16002_vm9, %v2860_v63, %v2862_v62  ;;  %v2864_v5 = vsel %vm16002_vm9, %v2858_v58, %v2860_v63  ;;  %v2946_v58 = vld [vmem:[#allocation53 + $0x70] sm:$0xff]  ;;  %v2944_v62 = vld [vmem:[#allocation53 + $0x60] sm:$0xff]  ;;  %vm16020_vm9 = vcmask 957440  }
 0x3f2   : > { %v2871_v11 = vadd.f32 %v2865_v4, %v2775_v8  ;;  %v2870_v12 = vadd.f32 %v2864_v5, %v2774_v7  ;;  %3031 = vmatpush.msrb.mxu1 %v2968_v41  ;;  %2981 = vmatpush.msra.mxu3 %v2946_v58  ;;  %v2960_v63 = vld [vmem:[#allocation53 + $0xe0] sm:$0xff]  ;;  %v2955_v7 = vld [vmem:[#allocation53 + $0xb8] sm:$0xff]  ;;  %v2938_v8 = vld [vmem:[#allocation53 + $0x30] sm:$0xff] }
 0x3f3   : > { %3003 = vmatpush.msrb.mxu0 %v2960_v63  ;;  %v2940_v4 = vld [vmem:[#allocation53 + $0x40] sm:$0xff]  ;;  %v3324_v63 = vld [vmem:[#allocation8] sm:$0xff] }
 0x3f4   : > { %3032 = vmatpush.msrb.mxu1 %v2967_v42  ;;  %2982 = vmatpush.msra.mxu3 %v2945_v60  ;;  %v2956_v5 = vld [vmem:[#allocation53 + $0xc0] sm:$0xff] }
 0x3f5   : > { %3004 = vmatpush.msrb.mxu0 %v2959_v1 }
 0x3f6   : > { %3033 = vmatpush.msrb.mxu1 %v2966_v44  ;;  %2983 = vmatpush.msra.mxu3 %v2944_v62  ;;  %v3040_v44 = vld [vmem:[#allocation7] sm:$0xff] }
 0x3f7   : > { %3005 = vmatpush.msrb.mxu0 %v2958_v52 }
 0x3f8   : > { %v2877_v15 = vpop.permute.xlu0 %2876  ;;  %3034 = vmatpush.msrb.mxu1 %v2965_v54  ;;  %2984 = vmatpush.msra.mxu3 %v2943_v0  ;;  %v3261_v54 = vld [vmem:[#allocation7 + $0x38] sm:$0xff] }
 0x3f9   : > { %v2879_v17 = vadd.f32 %v2877_v15, %v2870_v12  ;;  %v2880_v18 = vadd.f32 %v2877_v15, %v2871_v11  ;;  %v2881_v19 = vadd.f32 %v2877_v15, %v2872_v10  ;;  %3006 = vmatpush.msrb.mxu0 %v2957_v50  ;;  %v2954_v10 = vld [vmem:[#allocation53 + $0xb0] sm:$0xff]  ;;  %v2937_v11 = vld [vmem:[#allocation53 + $0x28] sm:$0xff]  ;;  %v2936_v15 = vld [vmem:[#allocation53 + $0x20] sm:$0xff] }
 0x3fa   : > { %3035 = vmatpush.msrb.mxu1 %v2964_v55  ;;  %2985 = vmatpush.msra.mxu3 %v2942_v2  ;;  %v2953_v12 = vld [vmem:[#allocation53 + $0xa8] sm:$0xff] }
 0x3fb   : > { %v2882_v20 = vmax.f32 %v2879_v17, 0.0  ;;  %v2883_v21 = vmax.f32 %v2880_v18, 0.0  ;;  %v2884_v22 = vmax.f32 %v2881_v19, 0.0  ;;  %3007 = vmatpush.msrb.mxu0 %v2956_v5  ;;  %v2952_v17 = vld [vmem:[#allocation53 + $0xa0] sm:$0xff]  ;;  %v2935_v18 = vld [vmem:[#allocation53 + $0x18] sm:$0xff] }
 0x3fc   : > { %2986 = vmatpush.msra.mxu3 %v2941_v3  ;;  %v2951_v19 = vld [vmem:[#allocation53 + $0x98] sm:$0xff] }
 0x3fd   : > { %v14311_v23 = vmul.f32 %v2887_v13, %v2882_v20  ;;  %v14315_v24 = vmul.f32 %v2888_v14, %v2883_v21  ;;  %v14319_v25 = vmul.f32 %v2889_v16, %v2884_v22  ;;  %3008 = vmatpush.msrb.mxu0 %v2955_v7 }
 0x3fe   : > { %2987 = vmatpush.msra.mxu3 %v2940_v4 }
 0x3ff   : > { %2903 = vrot.lane.b32.xlu2 %v14319_v25, %s13292_s14  ;;  %v11967_v26 = vpack.i.bf16 %v14315_v24, %v14311_v23  ;;  %3009 = vmatpush.msrb.mxu0 %v2954_v10 }
 0x400   : > { %2988 = vmatpush.msra.mxu3 %v2939_v6 }
 0x401   : > { %11968 = vrot.lane.b32.xlu1 %v11967_v26, %s13292_s14  ;;  %3010 = vmatpush.msrb.mxu0 %v2953_v12  ;;  %v2934_v26 = vld [vmem:[#allocation53 + $0x10] sm:$0xff] }
 0x402   : > { %2989 = vmatpush.msra.mxu3 %v2938_v8 }
 0x403   : > { %3011 = vmatpush.msrb.mxu0 %v2952_v17 }
 0x404   : > { %2990 = vmatpush.msra.mxu3 %v2937_v11 }
 0x405   : > { %3012 = vmatpush.msrb.mxu0 %v2951_v19 }
 0x406   : > { %2991 = vmatpush.msra.mxu3 %v2936_v15 }
 0x408   : > { %2992 = vmatpush.msra.mxu3 %v2935_v18 }
 0x40a   : > { %2993 = vmatpush.msra.mxu3 %v2934_v26 }
 0x459   : > { %v2904_v27 = vpop.permute.xlu2 %2903 }
 0x45a   : > { %v2910_v28 = vsel %vm2575_vm6, %v2904_v27, 0.0 }
 0x45b   : > { %v14328_v29 = vmax.f32 %v14319_v25, %v2910_v28  ;;  %v2933_v28 = vld [vmem:[#allocation53 + $0x8] sm:$0xff] }
 0x45c   : > { %2994 = vmatpush.msra.mxu3 %v2933_v28 }
 0x45d   : > { %2921 = vrot.lane.b32.xlu2 %v14328_v29, %s16000_s4 }
 0x45e   : > { %2995 = vmatpush.msra.mxu3 %v2932_v31 }
 0x473   : > { %v11969_v43 = vpop.permute.xlu1 %11968 }
 0x474   : > { %v11971_v45 = vunpack.i.h.bf16 %v11969_v43  ;;  %v11970_v46 = vunpack.i.l.bf16 %v11969_v43 }
 0x476   : > { %v2905_v47 = vsel %vm2575_vm6, %v11970_v46, %v11971_v45  ;;  %v2906_v48 = vsel %vm2575_vm6, %v11971_v45, %v2904_v27  ;;  %v2950_v27 = vld [vmem:[#allocation53 + $0x90] sm:$0xff]  ;;  %v3198_v46 = vld [vmem:[#allocation7 + $0x28] sm:$0xff] }
 0x477   : > { %v14335_v49 = vmax.f32 %v14311_v23, %v2905_v47  ;;  %v14338_v51 = vmax.f32 %v14315_v24, %v2906_v48  ;;  %3013 = vmatpush.msrb.mxu0 %v2950_v27  ;;  %v3172_v45 = vld [vmem:[#allocation7 + $0x20] sm:$0xff]  ;;  %v3229_v47 = vld [vmem:[#allocation7 + $0x30] sm:$0xff]  ;;  %v3077_v48 = vld [vmem:[#allocation7 + $0x8] sm:$0xff] }
 0x479   : > { %v11972_v53 = vpack.i.bf16 %v14338_v51, %v14335_v49  ;;  %3014 = vmatpush.msrb.mxu0 %v2949_v30 }
 0x47b   : > { %11973 = vrot.lane.b32.xlu1 %v11972_v53, %s16000_s4  ;;  %3015 = vmatpush.msrb.mxu0 %v2948_v32  ;;  %v3141_v53 = vld [vmem:[#allocation7 + $0x18] sm:$0xff]  ;;  %s16023_s4 = smov 118   ;;  %v14383_v32 = vld [vmem:[#allocation47] ss:$0 sm:$0xff] }
 0x4b7   : > { %v2922_v20 = vpop.permute.xlu2 %2921 }
 0x4b8   : > { %v2928_v21 = vsel %vm16003_vm8, %v2922_v20, 0.0 }
 0x4b9   : > { %v2931_v22 = vmax.f32 %v14328_v29, %v2928_v21 }
 0x4bb   : > { %3036 = vmatmul.f32.vlgmr.msrb.gmra.mxu1 %v2931_v22 }
 0x4ed   : > { %v11974_v33 = vpop.permute.xlu1 %11973 }
 0x4ee   : > { %v11976_v34 = vunpack.i.h.bf16 %v11974_v33  ;;  %v11975_v35 = vunpack.i.l.bf16 %v11974_v33 }
 0x4f0   : > { %v2924_v36 = vsel %vm16003_vm8, %v11976_v34, %v2922_v20  ;;  %v2923_v29 = vsel %vm16003_vm8, %v11975_v35, %v11976_v34  ;;  %vm3338_vm8 = vcmask 64512  }
 0x4f1   : > { %v2929_v37 = vmax.f32 %v14335_v49, %v2923_v29  ;;  %v2930_v38 = vmax.f32 %v14338_v51, %v2924_v36  ;;  %v3293_v49 = vld [vmem:[#allocation7 + $0x40] sm:$0xff]  ;;  %v3109_v51 = vld [vmem:[#allocation7 + $0x10] sm:$0xff]  ;;  %v3369_v29 = vld [vmem:[#allocation10 + $0x8] sm:$0xff] }
 0x4f2   : > { %v3337_v36 = vld [vmem:[#allocation10] sm:$0xff] }
 0x4f3   : > { %2996 = vmatmul.f32.vlgmr.msra.gmra.mxu3 %v2929_v37  ;;  %3016 = vmatmul.f32.vlgmr.msrb.gmra.mxu0 %v2930_v38  ;;  %v3400_v37 = vld [vmem:[#allocation10 + $0x10] sm:$0xff]  ;;  %v3431_v38 = vld [vmem:[#allocation10 + $0x18] sm:$0xff] }
 0x538   : > { %v3037_v42 = vpop.f32.mrf.mxu1 }
 0x570   : > { %v3017_v39 = vpop.f32.mrf.mxu0 }
 0x576   : > { %v2997_v40 = vpop.f32.mrf.mxu3 }
 0x577   : > { %v3018_v41 = vadd.f32 %v3017_v39, %v2997_v40  ;;  %v3462_v39 = vld [vmem:[#allocation10 + $0x20] sm:$0xff]  ;;  %v3488_v40 = vld [vmem:[#allocation10 + $0x28] sm:$0xff] }
 0x579   : > { %v3038_v43 = vadd.f32 %v3037_v42, %v3018_v41  ;;  %v3519_v41 = vld [vmem:[#allocation10 + $0x30] sm:$0xff]  ;;  %v3550_v42 = vld [vmem:[#allocation10 + $0x38] sm:$0xff] }
 0x57b   : > { %11225 = vmatpush.msk.msrb.mxu2 %vm16034_vm10, %v3038_v43  ;;  %11233 = vmatpush.msk.msrb.mxu3 %vm16034_vm10, %v3038_v43 }
 0x57c   : > { %11235 = vmatpush.msk.msra.mxu0 %vm16034_vm10, %v3038_v43  ;;  %11237 = vmatpush.msk.msra.mxu1 %vm16034_vm10, %v3038_v43 }
 0x57d   : > { %11226 = vmatmul.msk.f32.vlgmr.msrb.gmra.mxu2 %vm3041_vm11, %v3040_v44  ;;  %11241 = vmatpush.msk.msra.mxu3 %vm16034_vm10, %v3038_v43 }
 0x57e   : > { %11227 = vmatpush.msk.msra.mxu2 %vm16034_vm10, %v3038_v43  ;;  %11234 = vmatmul.msk.f32.vlgmr.msrb.gmra.mxu3 %vm3041_vm11, %v3172_v45 }
 0x57f   : > { %11236 = vmatmul.msk.f32.vlgmr.msra.gmra.mxu0 %vm3041_vm11, %v3198_v46  ;;  %11238 = vmatmul.msk.f32.vlgmr.msra.gmra.mxu1 %vm3041_vm11, %v3229_v47 }
 0x580   : > { %11229 = vmatpush.msk.msrb.mxu2 %vm16034_vm10, %v3038_v43 }
 0x585   : > { %11228 = vmatmul.msk.f32.vlgmr.msra.gmra.mxu2 %vm3041_vm11, %v3077_v48 }
 0x586   : > { %11231 = vmatpush.msk.msra.mxu2 %vm16034_vm10, %v3038_v43  ;;  %11242 = vmatmul.msk.f32.vlgmr.msra.gmra.mxu3 %vm3041_vm11, %v3293_v49 }
 0x58d   : > { %11230 = vmatmul.msk.f32.vlgmr.msrb.gmra.mxu2 %vm3041_vm11, %v3109_v51 }
 0x58e   : > { %11239 = vmatpush.msk.msrb.mxu2 %vm16034_vm10, %v3038_v43  ;;  %v3581_v43 = vld [vmem:[#allocation10 + $0x40] sm:$0xff]  ;;  %vm6137_vm10 = vcmask 523264  }
 0x595   : > { %11232 = vmatmul.msk.f32.vlgmr.msra.gmra.mxu2 %vm3041_vm11, %v3141_v53 }
 0x59d   : > { %11240 = vmatmul.msk.f32.vlgmr.msrb.gmra.mxu2 %vm3041_vm11, %v3261_v54 }
 0x5fc   : > { %v3219_v58 = vpop.f32.mrf.mxu0  ;;  %v3250_v61 = vpop.f32.mrf.mxu1 }
 0x600   : > { %v3066_v55 = vpop.f32.mrf.mxu2 }
 0x601   : > { %3070 = vrot.lane.b32.xlu0 %v3066_v55, %s16029_s5  ;;  %v3193_v56 = vpop.f32.mrf.mxu3  ;;  %v3611_v55 = vld [vmem:[#allocation11] sm:$0xff] }
 0x608   : > { %v3098_v57 = vpop.f32.mrf.mxu2 }
 0x609   : > { %3102 = vrot.lane.b32.xlu1 %v3098_v57, %s16027_s16  ;;  %v3314_v60 = vpop.f32.mrf.mxu3 }
 0x610   : > { %v3130_v59 = vpop.f32.mrf.mxu2 }
 0x611   : > { %3134 = vrot.lane.b32.xlu2 %v3130_v59, %s16025_s28  ;;  %3223 = vrot.lane.b32.xlu1 %v3219_v58, %s13292_s14 }
 0x618   : > { %v3162_v62 = vpop.f32.mrf.mxu2 }
 0x619   : > { %3166 = vrot.lane.b32.xlu0 %v3162_v62, %s13291_s6  ;;  %3318 = vrot.lane.b32.xlu1 %v3314_v60, %s16014_s9 }
 0x61a   : > { %3254 = vrot.lane.b32.xlu2 %v3250_v61, %s16012_s23 }
 0x620   : > { %v3282_v0 = vpop.f32.mrf.mxu2 }
 0x621   : > { %3286 = vrot.lane.b32.xlu0 %v3282_v0, %s16023_s4 }
 0x622   : > { %3327 = vperm.xlu2 %11977, %v3324_v63  }
 0x66b   : > { %v3135_v52 = vpop.permute.xlu2 %3134 }
 0x66c   : > { %v3138_v6 = vsel %vm16031_vm14, 0.0, %v3135_v52 }
 0x673   : > { %v3071_v2 = vpop.permute.xlu0 %3070 }
 0x674   : > { %v3074_v50 = vsel %vm16033_vm13, 0.0, %v3071_v2  ;;  %v3255_v11 = vpop.permute.xlu2 %3254 }
 0x675   : > { %v3258_v18 = vsel %vm16022_vm15, %v3255_v11, 0.0 }
 0x67b   : > { %v3103_v1 = vpop.permute.xlu1 %3102 }
 0x67c   : > { %v3106_v3 = vsel %vm16032_vm12, 0.0, %v3103_v1  ;;  %v3328_v30 = vpop.permute.xlu2 %3327 }
 0x67d   : > { %v3107_v4 = vadd.f32 %v3106_v3, %v3074_v50 }
 0x67f   : > { %v3139_v7 = vadd.f32 %v3138_v6, %v3107_v4 }
 0x683   : > { %v3224_v5 = vpop.permute.xlu1 %3223 }
 0x684   : > { %v3226_v17 = vsel %vm2575_vm6, %v3224_v5, 0.0 }
 0x68b   : > { %v3167_v8 = vpop.permute.xlu0 %3166  ;;  %v3319_v20 = vpop.permute.xlu1 %3318 }
 0x68c   : > { %v3169_v10 = vsel %vm2399_vm5, 0.0, %v3167_v8  ;;  %v3322_v27 = vsel %vm16020_vm9, %v3319_v20, 0.0 }
 0x68d   : > { %v3170_v12 = vadd.f32 %v3169_v10, %v3139_v7 }
 0x68f   : > { %v3196_v15 = vadd.f32 %v3193_v56, %v3170_v12 }
 0x691   : > { %v3227_v19 = vadd.f32 %v3226_v17, %v3196_v15 }
 0x693   : > { %v3259_v21 = vadd.f32 %v3258_v18, %v3227_v19  ;;  %v3287_v22 = vpop.permute.xlu0 %3286 }
 0x694   : > { %v3290_v26 = vsel %vm16021_vm0, %v3287_v22, 0.0  ;;  %v3647_v22 = vld [vmem:[#allocation55 + $0x78] sm:$0xff] }
 0x695   : > { %v3291_v28 = vadd.f32 %v3290_v26, %v3259_v21  ;;  %v3646_v26 = vld [vmem:[#allocation55 + $0x70] sm:$0xff] }
 0x697   : > { %v3323_v31 = vadd.f32 %v3322_v27, %v3291_v28  ;;  %v3645_v27 = vld [vmem:[#allocation55 + $0x68] sm:$0xff]  ;;  %v3644_v28 = vld [vmem:[#allocation55 + $0x60] sm:$0xff] }
 0x699   : > { %v3330_v33 = vadd.f32 %v3328_v30, %v3323_v31  ;;  %v3643_v30 = vld [vmem:[#allocation55 + $0x58] sm:$0xff]  ;;  %v3642_v31 = vld [vmem:[#allocation55 + $0x50] sm:$0xff] }
 0x69b   : > { %v3331_v34 = vmax.f32 %v3330_v33, 0.0  ;;  %v3641_v33 = vld [vmem:[#allocation55 + $0x48] sm:$0xff] }
 0x69d   : > { %v3336_v35 = vmul.f32 %v14383_v32, %v3331_v34  ;;  %v3640_v34 = vld [vmem:[#allocation55 + $0x40] sm:$0xff] }
 0x69f   : > { %3357 = vmatpush.msrb.mxu0 %v3336_v35  ;;  %3388 = vmatpush.msrb.mxu1 %v3336_v35 }
 0x6a0   : > { %3419 = vmatpush.msra.mxu2 %v3336_v35  ;;  %3450 = vmatpush.msrb.mxu3 %v3336_v35 }
 0x6a1   : > { %11243 = vmatmul.msk.f32.vlgmr.msrb.gmra.mxu0 %vm3338_vm8, %v3337_v36  ;;  %11244 = vmatmul.msk.f32.vlgmr.msrb.gmra.mxu1 %vm3338_vm8, %v3369_v29  ;;  %v3637_v36 = vld [vmem:[#allocation55 + $0x28] sm:$0xff]  ;;  %v3636_v29 = vld [vmem:[#allocation55 + $0x20] sm:$0xff] }
 0x6a2   : > { %11245 = vmatmul.msk.f32.vlgmr.msra.gmra.mxu2 %vm3338_vm8, %v3400_v37  ;;  %3481 = vmatpush.msra.mxu0 %v3336_v35  ;;  %v3635_v37 = vld [vmem:[#allocation55 + $0x18] sm:$0xff] }
 0x6a3   : > { %3507 = vmatpush.msra.mxu1 %v3336_v35  ;;  %3538 = vmatpush.msrb.mxu2 %v3336_v35 }
 0x6a4   : > { %3569 = vmatpush.msra.mxu3 %v3336_v35  ;;  %3600 = vmatpush.msrb.mxu0 %v3336_v35  ;;  %v3638_v35 = vld [vmem:[#allocation55 + $0x30] sm:$0xff] }
 0x6a5   : > { %11246 = vmatmul.msk.f32.vlgmr.msrb.gmra.mxu3 %vm3338_vm8, %v3431_v38  ;;  %3648 = vmatpush.msrb.mxu1 %v3647_v22  ;;  %v3634_v38 = vld [vmem:[#allocation55 + $0x10] sm:$0xff] }
 0x6a7   : > { %3649 = vmatpush.msrb.mxu1 %v3646_v26 }
 0x6a9   : > { %11247 = vmatmul.msk.f32.vlgmr.msra.gmra.mxu0 %vm3338_vm8, %v3462_v39  ;;  %11248 = vmatmul.msk.f32.vlgmr.msra.gmra.mxu1 %vm3338_vm8, %v3488_v40 }
 0x6aa   : > { %11249 = vmatmul.msk.f32.vlgmr.msrb.gmra.mxu2 %vm3338_vm8, %v3519_v41  ;;  %3650 = vmatpush.msrb.mxu1 %v3645_v27 }
 0x6ac   : > { %3651 = vmatpush.msrb.mxu1 %v3644_v28  ;;  %v4060_v28 = vld [vmem:[#allocation14 + $0x8] sm:$0xff] }
 0x6ad   : > { %11250 = vmatmul.msk.f32.vlgmr.msra.gmra.mxu3 %vm3338_vm8, %v3550_v42  ;;  %v3633_v42 = vld [vmem:[#allocation55 + $0x8] sm:$0xff] }
 0x6ae   : > { %3652 = vmatpush.msrb.mxu1 %v3643_v30  ;;  %v4059_v30 = vld [vmem:[#allocation14] sm:$0xff] }
 0x6b0   : > { %3653 = vmatpush.msrb.mxu1 %v3642_v31 }
 0x6b1   : > { %11251 = vmatmul.msk.f32.vlgmr.msrb.gmra.mxu0 %vm3338_vm8, %v3581_v43  ;;  %v3632_v43 = vld [vmem:[#allocation55] sm:$0xff] }
 0x6b2   : > { %3654 = vmatpush.msrb.mxu1 %v3641_v33 }
 0x6b4   : > { %3655 = vmatpush.msrb.mxu1 %v3640_v34 }
 0x71e   : > { %v3359_v44 = vpop.f32.mrf.mxu0  ;;  %v3390_v45 = vpop.f32.mrf.mxu1 }
 0x71f   : > { %3394 = vrot.lane.b32.xlu1 %v3390_v45, %s16027_s16  ;;  %3363 = vrot.lane.b32.xlu0 %v3359_v44, %s16029_s5  ;;  %s13311_s16 = smov 124   ;;  %s13312_s5 = smov 125  }
 0x725   : > { %v3421_v46 = vpop.f32.mrf.mxu2 }
 0x726   : > { %3425 = vrot.lane.b32.xlu2 %v3421_v46, %s16025_s28  ;;  %v3483_v47 = vpop.f32.mrf.mxu0  ;;  %v3509_v48 = vpop.f32.mrf.mxu1  ;;  %s13310_s28 = smov 4  }
 0x727   : > { %3513 = vrot.lane.b32.xlu1 %v3509_v48, %s13292_s14  ;;  %v3668_v48 = vld [vmem:[#allocation13] sm:$0xff] }
 0x728   : > { %v3452_v49 = vpop.f32.mrf.mxu3 }
 0x729   : > { %3456 = vrot.lane.b32.xlu0 %v3452_v49, %s13291_s6  ;;  %v3713_v49 = vld [vmem:[#allocation13 + $0x10] sm:$0xff] }
 0x72d   : > { %v3540_v51 = vpop.f32.mrf.mxu2 }
 0x72e   : > { %3544 = vrot.lane.b32.xlu2 %v3540_v51, %s16012_s23  ;;  %v3602_v53 = vpop.f32.mrf.mxu0  ;;  %v3758_v51 = vld [vmem:[#allocation13 + $0x20] sm:$0xff]  ;;  %s13307_s23 = smov 122  }
 0x72f   : > { %3606 = vrot.lane.b32.xlu1 %v3602_v53, %s16014_s9  ;;  %v3925_v53 = vld [vmem:[#allocation13 + $0x60] sm:$0xff]  ;;  %s13308_s9 = smov 121  }
 0x730   : > { %v3571_v54 = vpop.f32.mrf.mxu3 }
 0x731   : > { %3575 = vrot.lane.b32.xlu0 %v3571_v54, %s16023_s4  ;;  %v3669_v54 = vld [vmem:[#allocation13 + $0x8] sm:$0xff] }
 0x736   : > { %3614 = vperm.xlu2 %11977, %v3611_v55   ;;  %v3714_v55 = vld [vmem:[#allocation13 + $0x18] sm:$0xff] }
 0x780   : > { %v3426_v58 = vpop.permute.xlu2 %3425 }
 0x781   : > { %v3428_v62 = vsel %vm16031_vm14, 0.0, %v3426_v58  ;;  %v3803_v58 = vld [vmem:[#allocation13 + $0x30] sm:$0xff]  ;;  %vm5080_vm14 = vcmask 1014784  }
 0x788   : > { %v3545_v3 = vpop.permute.xlu2 %3544 }
 0x789   : > { %v3547_v4 = vsel %vm16022_vm15, %v3545_v3, 0.0  ;;  %vm4083_vm15 = vcmask 130048  }
 0x790   : > { %v3615_v18 = vpop.permute.xlu2 %3614 }
 0x791   : > { %v3395_v57 = vpop.permute.xlu1 %3394  ;;  %v3364_v56 = vpop.permute.xlu0 %3363 }
 0x792   : > { %v3397_v59 = vsel %vm16032_vm12, 0.0, %v3395_v57  ;;  %v3366_v60 = vsel %vm16033_vm13, 0.0, %v3364_v56  ;;  %v3759_v57 = vld [vmem:[#allocation13 + $0x28] sm:$0xff]  ;;  %vm5009_vm12 = vcmask 1022976   ;;  %vm5203_vm13 = vcmask 261120  }
 0x793   : > { %v3398_v61 = vadd.f32 %v3397_v59, %v3366_v60  ;;  %v3926_v56 = vld [vmem:[#allocation13 + $0x68] sm:$0xff]  ;;  %v3847_v59 = vld [vmem:[#allocation13 + $0x40] sm:$0xff]  ;;  %v3881_v60 = vld [vmem:[#allocation13 + $0x50] sm:$0xff] }
 0x795   : > { %v3429_v0 = vadd.f32 %v3428_v62, %v3398_v61  ;;  %v3804_v61 = vld [vmem:[#allocation13 + $0x38] sm:$0xff]  ;;  %v3848_v62 = vld [vmem:[#allocation13 + $0x48] sm:$0xff] }
 0x799   : > { %v3514_v63 = vpop.permute.xlu1 %3513 }
 0x79a   : > { %v3516_v5 = vsel %vm2575_vm6, %v3514_v63, 0.0  ;;  %v3882_v63 = vld [vmem:[#allocation13 + $0x58] sm:$0xff] }
 0x79b   : > { %v3457_v1 = vpop.permute.xlu0 %3456 }
 0x79c   : > { %v3459_v2 = vsel %vm2399_vm5, 0.0, %v3457_v1  ;;  %v4015_v1 = vld [vmem:[#allocation13 + $0x80] sm:$0xff] }
 0x79d   : > { %v3460_v52 = vadd.f32 %v3459_v2, %v3429_v0  ;;  %v3970_v0 = vld [vmem:[#allocation13 + $0x70] sm:$0xff]  ;;  %v3971_v2 = vld [vmem:[#allocation13 + $0x78] sm:$0xff] }
 0x79f   : > { %v3486_v50 = vadd.f32 %v3483_v47, %v3460_v52  ;;  %v4016_v52 = vld [vmem:[#allocation13 + $0x88] sm:$0xff] }
 0x7a1   : > { %v3517_v6 = vadd.f32 %v3516_v5, %v3486_v50  ;;  %v3607_v7 = vpop.permute.xlu1 %3606 }
 0x7a2   : > { %v3609_v12 = vsel %vm16020_vm9, %v3607_v7, 0.0  ;;  %vm4009_vm9 = vcmask 998400  }
 0x7a3   : > { %v3576_v8 = vpop.permute.xlu0 %3575  ;;  %v3548_v10 = vadd.f32 %v3547_v4, %v3517_v6 }
 0x7a4   : > { %v3578_v11 = vsel %vm16021_vm0, %v3576_v8, 0.0 }
 0x7a5   : > { %v3579_v15 = vadd.f32 %v3578_v11, %v3548_v10 }
 0x7a7   : > { %v3610_v17 = vadd.f32 %v3609_v12, %v3579_v15 }
 0x7a9   : > { %v3617_v19 = vadd.f32 %v3615_v18, %v3610_v17 }
 0x7ab   : > { %v3618_v20 = vmax.f32 %v3617_v19, 0.0 }
 0x7ad   : > { %v14412_v21 = vmul.f32 %v14383_v32, %v3618_v20  ;;  %v3639_v32 = vld [vmem:[#allocation55 + $0x38] sm:$0xff] }
 0x7ae   : > { %3656 = vmatpush.msrb.mxu1 %v3639_v32 }
 0x7af   : > { %3621 = vrot.lane.b32.xlu0 %v14412_v21, %s13292_s14 }
 0x7b0   : > { %3657 = vmatpush.msrb.mxu1 %v3638_v35 }
 0x7b2   : > { %3658 = vmatpush.msrb.mxu1 %v3637_v36 }
 0x7b4   : > { %3659 = vmatpush.msrb.mxu1 %v3636_v29 }
 0x7b6   : > { %3660 = vmatpush.msrb.mxu1 %v3635_v37 }
 0x7b8   : > { %3661 = vmatpush.msrb.mxu1 %v3634_v38 }
 0x7ba   : > { %3662 = vmatpush.msrb.mxu1 %v3633_v42 }
 0x7bc   : > { %3663 = vmatpush.msrb.mxu1 %v3632_v43 }
 0x821   : > { %v3622_v39 = vpop.permute.xlu0 %3621 }
 0x822   : > { %v3624_v40 = vsel %vm2575_vm6, %v3622_v39, 0.0 }
 0x823   : > { %v3625_v41 = vmax.f32 %v14412_v21, %v3624_v40 }
 0x825   : > { %3627 = vrot.lane.b32.xlu1 %v3625_v41, %s16023_s4  ;;  %s13309_s4 = smov 3  }
 0x897   : > { %v3628_v44 = vpop.permute.xlu1 %3627 }
 0x898   : > { %v3630_v45 = vsel %vm16021_vm0, %v3628_v44, 0.0  ;;  %vm4054_vm0 = vcmask 990208  }
 0x899   : > { %v3631_v46 = vmax.f32 %v3625_v41, %v3630_v45 }
 0x89b   : > { %3664 = vmatmul.f32.vlgmr.msrb.gmra.mxu1 %v3631_v46 }
 0x918   : > { %v3665_v47 = vpop.f32.mrf.mxu1 }
 0x919   : > { %3691 = vmatpush.msra.mxu2 %v3665_v47  ;;  %3736 = vmatpush.msrb.mxu3 %v3665_v47 }
 0x91a   : > { %3781 = vmatpush.msra.mxu0 %v3665_v47  ;;  %3948 = vmatpush.msra.mxu1 %v3665_v47 }
 0x91b   : > { %11252 = vmatmul.msk.f32.vlgmr.msra.gmra.mxu2 %vm3338_vm8, %v3668_v48  ;;  %11254 = vmatmul.msk.f32.vlgmr.msrb.gmra.mxu3 %vm3338_vm8, %v3713_v49 }
 0x91c   : > { %11256 = vmatmul.msk.f32.vlgmr.msra.gmra.mxu0 %vm3338_vm8, %v3758_v51  ;;  %3826 = vmatpush.msrb.mxu2 %v3665_v47 }
 0x91d   : > { %3870 = vmatpush.msra.mxu3 %v3665_v47  ;;  %3904 = vmatpush.msrb.mxu0 %v3665_v47 }
 0x91e   : > { %3993 = vmatpush.msra.mxu2 %v3665_v47  ;;  %11264 = vmatmul.msk.f32.vlgmr.msra.gmra.mxu1 %vm3338_vm8, %v3925_v53 }
 0x91f   : > { %4038 = vmatpush.msrb.mxu3 %v3665_v47 }
 0x923   : > { %11253 = vmatmul.msk.f32.gmra.mxu2 %vm3338_vm8, %v3669_v54  ;;  %11255 = vmatmul.msk.f32.gmra.mxu3 %vm3338_vm8, %v3714_v55 }
 0x924   : > { %11257 = vmatmul.msk.f32.gmra.mxu0 %vm3338_vm8, %v3759_v57 }
 0x926   : > { %11265 = vmatmul.msk.f32.gmra.mxu1 %vm3338_vm8, %v3926_v56 }
 0x92b   : > { %11258 = vmatmul.msk.f32.vlgmr.msrb.gmra.mxu2 %vm3338_vm8, %v3803_v58  ;;  %11260 = vmatmul.msk.f32.vlgmr.msra.gmra.mxu3 %vm3338_vm8, %v3847_v59 }
 0x92c   : > { %11262 = vmatmul.msk.f32.vlgmr.msrb.gmra.mxu0 %vm3338_vm8, %v3881_v60 }
 0x933   : > { %11259 = vmatmul.msk.f32.gmra.mxu2 %vm3338_vm8, %v3804_v61  ;;  %11261 = vmatmul.msk.f32.gmra.mxu3 %vm3338_vm8, %v3848_v62 }
 0x934   : > { %11263 = vmatmul.msk.f32.gmra.mxu0 %vm3338_vm8, %v3882_v63 }
 0x93b   : > { %11266 = vmatmul.msk.f32.vlgmr.msra.gmra.mxu2 %vm3338_vm8, %v3970_v0  ;;  %11268 = vmatmul.msk.f32.vlgmr.msrb.gmra.mxu3 %vm3338_vm8, %v4015_v1 }
 0x943   : > { %11267 = vmatmul.msk.f32.gmra.mxu2 %vm3338_vm8, %v3971_v2  ;;  %11269 = vmatmul.msk.f32.gmra.mxu3 %vm3338_vm8, %v4016_v52 }
 0x999   : > { %v3783_v3 = vpop.f32.mrf.mxu0 }
 0x99a   : > { %3791 = vrot.lane.b32.xlu1 %v3783_v3, %s13303_s7 }
 0x99b   : > { %v3950_v50 = vpop.f32.mrf.mxu1 }
 0x99e   : > { %v3693_v4 = vpop.f32.mrf.mxu2  ;;  %v3738_v5 = vpop.f32.mrf.mxu3 }
 0x99f   : > { %3746 = vrot.lane.b32.xlu2 %v3738_v5, %s13304_s11 }
 0x9a1   : > { %v3786_v6 = vpop.f32.mrf.mxu0 }
 0x9a2   : > { %3958 = vrot.lane.b32.xlu1 %v3950_v50, %s13305_s12  ;;  %3793 = vrot.lane.b32.xlu0 %v3786_v6, %s13303_s7 }
 0x9a3   : > { %v3953_v10 = vpop.f32.mrf.mxu1 }
 0x9a6   : > { %v3696_v7 = vpop.f32.mrf.mxu2  ;;  %v3741_v8 = vpop.f32.mrf.mxu3 }
 0x9a7   : > { %3703 = vrot.lane.b32.xlu2 %v3696_v7, %s13306_s8 }
 0x9a9   : > { %v3906_v11 = vpop.f32.mrf.mxu0 }
 0x9aa   : > { %3960 = vrot.lane.b32.xlu0 %v3953_v10, %s13305_s12  ;;  %3701 = vrot.lane.b32.xlu1 %v3693_v4, %s13306_s8 }
 0x9ae   : > { %v3828_v12 = vpop.f32.mrf.mxu2  ;;  %v3872_v15 = vpop.f32.mrf.mxu3 }
 0x9af   : > { %3914 = vrot.lane.b32.xlu2 %v3906_v11, %s13292_s14 }
 0x9b1   : > { %v3909_v17 = vpop.f32.mrf.mxu0 }
 0x9b2   : > { %3748 = vrot.lane.b32.xlu0 %v3741_v8, %s13304_s11  ;;  %3916 = vrot.lane.b32.xlu1 %v3909_v17, %s13292_s14  ;;  %v14469_v17 = vld [vmem:[#allocation49] ss:$0 sm:$0xff] }
 0x9b6   : > { %v3831_v18 = vpop.f32.mrf.mxu2  ;;  %v3875_v19 = vpop.f32.mrf.mxu3 }
 0x9b7   : > { %3838 = vrot.lane.b32.xlu2 %v3831_v18, %s13291_s6 }
 0x9ba   : > { %3836 = vrot.lane.b32.xlu0 %v3828_v12, %s13291_s6 }
 0x9be   : > { %v3995_v20 = vpop.f32.mrf.mxu2  ;;  %v4040_v22 = vpop.f32.mrf.mxu3 }
 0x9c2   : > { %4003 = vrot.lane.b32.xlu0 %v3995_v20, %s13307_s23 }
 0x9c6   : > { %v3998_v26 = vpop.f32.mrf.mxu2  ;;  %v4043_v27 = vpop.f32.mrf.mxu3 }
 0x9c7   : > { %4050 = vrot.lane.b32.xlu1 %v4043_v27, %s13308_s9  ;;  %4005 = vrot.lane.b32.xlu2 %v3998_v26, %s13307_s23 }
 0x9ca   : > { %4068 = vperm.xlu0 %11966, %v4060_v28  }
 0x9cf   : > { %4063 = vperm.xlu1 %11978, %v4059_v30   ;;  %4048 = vrot.lane.b32.xlu2 %v4040_v22, %s13308_s9 }
 0x9f9   : > { %v3747_v31 = vpop.permute.xlu2 %3746 }
 0x9fa   : > { %v3753_v44 = vsel %vm3752_vm4, 0.0, %v3747_v31 }
 0xa01   : > { %v3704_v34 = vpop.permute.xlu2 %3703 }
 0xa02   : > { %v3709_v39 = vsel %vm3707_vm7, 0.0, %v3704_v34  ;;  %v4126_v34 = vld [vmem:[#allocation16 + $0x10] sm:$0xff] }
 0xa09   : > { %v3915_v36 = vpop.permute.xlu2 %3914 }
 0xa0a   : > { %v3920_v63 = vsel %vm2575_vm6, %v3915_v36, 0.0  ;;  %v4127_v36 = vld [vmem:[#allocation16 + $0x18] sm:$0xff] }
 0xa0c   : > { %v3792_v33 = vpop.permute.xlu1 %3791 }
 0xa0d   : > { %v3798_v51 = vsel %vm3797_vm3, 0.0, %v3792_v33  ;;  %v4081_v33 = vld [vmem:[#allocation16] sm:$0xff] }
 0xa11   : > { %v3839_v42 = vpop.permute.xlu2 %3838 }
 0xa12   : > { %v3843_v48 = vsel %vm2399_vm5, 0.0, %v3839_v42  ;;  %v4380_v42 = vld [vmem:[#allocation16 + $0x70] sm:$0xff] }
 0xa14   : > { %v3794_v32 = vpop.permute.xlu0 %3793  ;;  %v3959_v35 = vpop.permute.xlu1 %3958 }
 0xa15   : > { %v3799_v45 = vsel %vm3797_vm3, 0.0, %v3794_v32  ;;  %v3965_v50 = vsel %vm3964_vm2, %v3959_v35, 0.0  ;;  %v4170_v32 = vld [vmem:[#allocation16 + $0x20] sm:$0xff]  ;;  %v4214_v35 = vld [vmem:[#allocation16 + $0x30] sm:$0xff] }
 0xa1c   : > { %v3961_v29 = vpop.permute.xlu0 %3960  ;;  %v3702_v37 = vpop.permute.xlu1 %3701 }
 0xa1d   : > { %v3708_v40 = vsel %vm3707_vm7, 0.0, %v3702_v37  ;;  %v3966_v0 = vsel %vm3964_vm2, %v3961_v29, 0.0  ;;  %v4082_v29 = vld [vmem:[#allocation16 + $0x8] sm:$0xff] }
 0xa1e   : > { %v3755_v46 = vadd.f32 %v3753_v44, %v3708_v40  ;;  %v4171_v37 = vld [vmem:[#allocation16 + $0x28] sm:$0xff]  ;;  %v4258_v40 = vld [vmem:[#allocation16 + $0x40] sm:$0xff] }
 0xa1f   : > { %v4259_v44 = vld [vmem:[#allocation16 + $0x48] sm:$0xff] }
 0xa20   : > { %v3800_v54 = vadd.f32 %v3798_v51, %v3755_v46  ;;  %v4381_v46 = vld [vmem:[#allocation16 + $0x78] sm:$0xff] }
 0xa21   : > { %v4006_v62 = vpop.permute.xlu2 %4005 }
 0xa22   : > { %v4011_v3 = vsel %vm4009_vm9, %v4006_v62, 0.0 }
 0xa24   : > { %v3749_v38 = vpop.permute.xlu0 %3748  ;;  %v3917_v53 = vpop.permute.xlu1 %3916 }
 0xa25   : > { %v3754_v41 = vsel %vm3752_vm4, 0.0, %v3749_v38  ;;  %v3921_v58 = vsel %vm2575_vm6, %v3917_v53, 0.0  ;;  %v4215_v38 = vld [vmem:[#allocation16 + $0x38] sm:$0xff] }
 0xa26   : > { %v3756_v43 = vadd.f32 %v3754_v41, %v3709_v39  ;;  %v4292_v39 = vld [vmem:[#allocation16 + $0x50] sm:$0xff]  ;;  %v4336_v41 = vld [vmem:[#allocation16 + $0x60] sm:$0xff] }
 0xa28   : > { %v3801_v47 = vadd.f32 %v3799_v45, %v3756_v43  ;;  %v4293_v43 = vld [vmem:[#allocation16 + $0x58] sm:$0xff]  ;;  %v4337_v45 = vld [vmem:[#allocation16 + $0x68] sm:$0xff] }
 0xa29   : > { %v4049_v11 = vpop.permute.xlu2 %4048 }
 0xa2a   : > { %v3845_v49 = vadd.f32 %v3843_v48, %v3801_v47  ;;  %v4424_v47 = vld [vmem:[#allocation16 + $0x80] sm:$0xff]  ;;  %v4425_v48 = vld [vmem:[#allocation16 + $0x88] sm:$0xff] }
 0xa2c   : > { %v3837_v55 = vpop.permute.xlu0 %3836  ;;  %v3879_v57 = vadd.f32 %v3875_v19, %v3845_v49  ;;  %v4055_v19 = vsel %vm4054_vm0, %v4049_v11, 0.0 }
 0xa2d   : > { %v3842_v56 = vsel %vm2399_vm5, 0.0, %v3837_v55 }
 0xa2e   : > { %v3844_v59 = vadd.f32 %v3842_v56, %v3800_v54  ;;  %v3923_v61 = vadd.f32 %v3921_v58, %v3879_v57 }
 0xa30   : > { %v3878_v60 = vadd.f32 %v3872_v15, %v3844_v59  ;;  %v3968_v52 = vadd.f32 %v3966_v0, %v3923_v61  ;;  %v4467_v0 = vld [vmem:[#allocation17] sm:$0xff] }
 0xa32   : > { %v3922_v1 = vadd.f32 %v3920_v63, %v3878_v60  ;;  %v4013_v7 = vadd.f32 %v4011_v3, %v3968_v52 }
 0xa34   : > { %v4004_v2 = vpop.permute.xlu0 %4003  ;;  %v3967_v4 = vadd.f32 %v3965_v50, %v3922_v1 }
 0xa35   : > { %v4010_v5 = vsel %vm4009_vm9, %v4004_v2, 0.0 }
 0xa36   : > { %v4012_v12 = vadd.f32 %v4010_v5, %v3967_v4  ;;  %v4468_v4 = vld [vmem:[#allocation17 + $0x8] sm:$0xff] }
 0xa38   : > { %v4057_v22 = vadd.f32 %v4055_v19, %v4012_v12 }
 0xa39   : > { %v4051_v6 = vpop.permute.xlu1 %4050 }
 0xa3a   : > { %v4056_v8 = vsel %vm4054_vm0, %v4051_v6, 0.0 }
 0xa3b   : > { %v4058_v10 = vadd.f32 %v4056_v8, %v4013_v7 }
 0xa3c   : > { %v4069_v15 = vpop.permute.xlu0 %4068 }
 0xa3d   : > { %v4072_v18 = vadd.f32 %v4069_v15, %v4058_v10 }
 0xa3f   : > { %v4074_v20 = vmax.f32 %v4072_v18, 0.0 }
 0xa41   : > { %v4080_v26 = vmul.f32 %v14469_v17, %v4074_v20  ;;  %v4064_v27 = vpop.permute.xlu1 %4063 }
 0xa42   : > { %v4071_v28 = vadd.f32 %v4064_v27, %v4057_v22 }
 0xa43   : > { %4104 = vmatpush.msra.mxu0 %v4080_v26  ;;  %4148 = vmatpush.msrb.mxu1 %v4080_v26 }
 0xa44   : > { %v4073_v30 = vmax.f32 %v4071_v28, 0.0  ;;  %4192 = vmatpush.msrb.mxu2 %v4080_v26  ;;  %4236 = vmatpush.msra.mxu3 %v4080_v26 }
 0xa46   : > { %v4079_v31 = vmul.f32 %v14469_v17, %v4073_v30 }
 0xa48   : > { %4105 = vmatpush.msra.mxu0 %v4079_v31  ;;  %4149 = vmatpush.msrb.mxu1 %v4079_v31 }
 0xa49   : > { %4193 = vmatpush.msrb.mxu2 %v4079_v31  ;;  %4237 = vmatpush.msra.mxu3 %v4079_v31 }
 0xa4a   : > { %11270 = vmatmul.msk.f32.vlgmr.msra.gmra.mxu0 %vm4083_vm15, %v4081_v33  ;;  %11272 = vmatmul.msk.f32.vlgmr.msrb.gmra.mxu1 %vm4083_vm15, %v4126_v34 }
 0xa4b   : > { %11274 = vmatmul.msk.f32.vlgmr.msrb.gmra.mxu2 %vm4083_vm15, %v4170_v32  ;;  %4280 = vmatpush.msrb.mxu0 %v4080_v26 }
 0xa4c   : > { %4314 = vmatpush.msra.mxu1 %v4080_v26  ;;  %4358 = vmatpush.msra.mxu2 %v4080_v26 }
 0xa4d   : > { %4402 = vmatpush.msrb.mxu3 %v4080_v26  ;;  %4281 = vmatpush.msrb.mxu0 %v4079_v31 }
 0xa4e   : > { %11276 = vmatmul.msk.f32.vlgmr.msra.gmra.mxu3 %vm4083_vm15, %v4214_v35  ;;  %4315 = vmatpush.msra.mxu1 %v4079_v31 }
 0xa4f   : > { %4359 = vmatpush.msra.mxu2 %v4079_v31  ;;  %4403 = vmatpush.msrb.mxu3 %v4079_v31 }
 0xa50   : > { %4446 = vmatpush.msra.mxu0 %v4080_v26 }
 0xa52   : > { %4447 = vmatpush.msra.mxu0 %v4079_v31  ;;  %11273 = vmatmul.msk.f32.gmra.mxu1 %vm4083_vm15, %v4127_v36 }
 0xa53   : > { %11271 = vmatmul.msk.f32.gmra.mxu0 %vm4083_vm15, %v4082_v29  ;;  %11275 = vmatmul.msk.f32.gmra.mxu2 %vm4083_vm15, %v4171_v37 }
 0xa56   : > { %11277 = vmatmul.msk.f32.gmra.mxu3 %vm4083_vm15, %v4215_v38 }
 0xa5a   : > { %11280 = vmatmul.msk.f32.vlgmr.msra.gmra.mxu1 %vm4083_vm15, %v4292_v39 }
 0xa5b   : > { %11278 = vmatmul.msk.f32.vlgmr.msrb.gmra.mxu0 %vm4083_vm15, %v4258_v40  ;;  %11282 = vmatmul.msk.f32.vlgmr.msra.gmra.mxu2 %vm4083_vm15, %v4336_v41 }
 0xa5e   : > { %11284 = vmatmul.msk.f32.vlgmr.msrb.gmra.mxu3 %vm4083_vm15, %v4380_v42 }
 0xa62   : > { %11281 = vmatmul.msk.f32.gmra.mxu1 %vm4083_vm15, %v4293_v43 }
 0xa63   : > { %11279 = vmatmul.msk.f32.gmra.mxu0 %vm4083_vm15, %v4259_v44  ;;  %11283 = vmatmul.msk.f32.gmra.mxu2 %vm4083_vm15, %v4337_v45 }
 0xa66   : > { %11285 = vmatmul.msk.f32.gmra.mxu3 %vm4083_vm15, %v4381_v46 }
 0xa6b   : > { %11286 = vmatmul.msk.f32.vlgmr.msra.gmra.mxu0 %vm4083_vm15, %v4424_v47 }
 0xa73   : > { %11287 = vmatmul.msk.f32.gmra.mxu0 %vm4083_vm15, %v4425_v48 }
 0xac7   : > { %v4107_v49 = vpop.f32.mrf.mxu0  ;;  %v4151_v51 = vpop.f32.mrf.mxu1 }
 0xac8   : > { %4159 = vrot.lane.b32.xlu0 %v4151_v51, %s13304_s11  ;;  %4115 = vrot.lane.b32.xlu2 %v4107_v49, %s13306_s8 }
 0xace   : > { %v4195_v53 = vpop.f32.mrf.mxu2 }
 0xacf   : > { %4203 = vrot.lane.b32.xlu1 %v4195_v53, %s13303_s7  ;;  %v4154_v57 = vpop.f32.mrf.mxu1 }
 0xad0   : > { %v4110_v54 = vpop.f32.mrf.mxu0 }
 0xad1   : > { %v4239_v55 = vpop.f32.mrf.mxu3  ;;  %4117 = vrot.lane.b32.xlu0 %v4110_v54, %s13306_s8 }
 0xad2   : > { %4247 = vrot.lane.b32.xlu2 %v4239_v55, %s13291_s6 }
 0xad6   : > { %v4198_v56 = vpop.f32.mrf.mxu2 }
 0xad7   : > { %4161 = vrot.lane.b32.xlu1 %v4154_v57, %s13304_s11  ;;  %v4317_v61 = vpop.f32.mrf.mxu1 }
 0xad8   : > { %v4283_v58 = vpop.f32.mrf.mxu0 }
 0xad9   : > { %v4242_v59 = vpop.f32.mrf.mxu3  ;;  %4205 = vrot.lane.b32.xlu0 %v4198_v56, %s13303_s7 }
 0xada   : > { %4249 = vrot.lane.b32.xlu2 %v4242_v59, %s13291_s6 }
 0xade   : > { %v4361_v60 = vpop.f32.mrf.mxu2 }
 0xadf   : > { %4369 = vrot.lane.b32.xlu1 %v4361_v60, %s13305_s12  ;;  %v4320_v1 = vpop.f32.mrf.mxu1 }
 0xae0   : > { %v4286_v62 = vpop.f32.mrf.mxu0 }
 0xae1   : > { %v4405_v63 = vpop.f32.mrf.mxu3 }
 0xae2   : > { %4413 = vrot.lane.b32.xlu0 %v4405_v63, %s13307_s23  ;;  %4325 = vrot.lane.b32.xlu2 %v4317_v61, %s13292_s14 }
 0xae6   : > { %v4364_v52 = vpop.f32.mrf.mxu2 }
 0xae8   : > { %v4449_v2 = vpop.f32.mrf.mxu0 }
 0xae9   : > { %4457 = vrot.lane.b32.xlu1 %v4449_v2, %s13308_s9  ;;  %v4408_v3 = vpop.f32.mrf.mxu3 }
 0xaea   : > { %4471 = vperm.xlu0 %11966, %v4467_v0   ;;  %4327 = vrot.lane.b32.xlu2 %v4320_v1, %s13292_s14 }
 0xaf0   : > { %v4452_v50 = vpop.f32.mrf.mxu0 }
 0xaf1   : > { %4371 = vrot.lane.b32.xlu1 %v4364_v52, %s13305_s12 }
 0xaf2   : > { %4459 = vrot.lane.b32.xlu0 %v4452_v50, %s13308_s9  ;;  %4415 = vrot.lane.b32.xlu2 %v4408_v3, %s13307_s23 }
 0xaf9   : > { %4476 = vperm.xlu1 %11978, %v4468_v4  }
 0xb22   : > { %v4116_v5 = vpop.permute.xlu2 %4115 }
 0xb23   : > { %v4121_v12 = vsel %vm3707_vm7, 0.0, %v4116_v5 }
 0xb2c   : > { %v4248_v7 = vpop.permute.xlu2 %4247 }
 0xb2d   : > { %v4253_v27 = vsel %vm2399_vm5, 0.0, %v4248_v7 }
 0xb34   : > { %v4250_v18 = vpop.permute.xlu2 %4249 }
 0xb35   : > { %v4254_v44 = vsel %vm2399_vm5, 0.0, %v4250_v18  ;;  %v4520_v18 = vld [vmem:[#allocation56 + $0x58] sm:$0xff] }
 0xb3a   : > { %v4160_v6 = vpop.permute.xlu0 %4159 }
 0xb3b   : > { %v4165_v11 = vsel %vm3752_vm4, 0.0, %v4160_v6 }
 0xb3c   : > { %v4167_v19 = vadd.f32 %v4165_v11, %v4121_v12  ;;  %v4326_v30 = vpop.permute.xlu2 %4325  ;;  %v4523_v11 = vld [vmem:[#allocation56 + $0x70] sm:$0xff]  ;;  %v4522_v12 = vld [vmem:[#allocation56 + $0x68] sm:$0xff] }
 0xb3d   : > { %v4331_v35 = vsel %vm2575_vm6, %v4326_v30, 0.0  ;;  %v4513_v30 = vld [vmem:[#allocation56 + $0x20] sm:$0xff] }
 0xb41   : > { %v4204_v8 = vpop.permute.xlu1 %4203 }
 0xb42   : > { %v4209_v15 = vsel %vm3797_vm3, 0.0, %v4204_v8 }
 0xb43   : > { %v4118_v10 = vpop.permute.xlu0 %4117  ;;  %v4211_v20 = vadd.f32 %v4209_v15, %v4167_v19  ;;  %v4521_v15 = vld [vmem:[#allocation56 + $0x60] sm:$0xff]  ;;  %v4518_v19 = vld [vmem:[#allocation56 + $0x48] sm:$0xff] }
 0xb44   : > { %v4122_v32 = vsel %vm3707_vm7, 0.0, %v4118_v10  ;;  %v4328_v43 = vpop.permute.xlu2 %4327  ;;  %v4524_v10 = vld [vmem:[#allocation56 + $0x78] sm:$0xff] }
 0xb45   : > { %v4255_v28 = vadd.f32 %v4253_v27, %v4211_v20  ;;  %v4332_v55 = vsel %vm2575_vm6, %v4328_v43, 0.0  ;;  %4525 = vmatpush.msrb.mxu1 %v4524_v10  ;;  %v4517_v20 = vld [vmem:[#allocation56 + $0x40] sm:$0xff]  ;;  %v4514_v27 = vld [vmem:[#allocation56 + $0x28] sm:$0xff] }
 0xb46   : > { %v4950_v10 = vld [vmem:[#allocation19 + $0xd0] sm:$0xff] }
 0xb47   : > { %v4289_v33 = vadd.f32 %v4283_v58, %v4255_v28  ;;  %4526 = vmatpush.msrb.mxu1 %v4523_v11  ;;  %v5021_v11 = vld [vmem:[#allocation19 + $0xf0] sm:$0xff] }
 0xb49   : > { %v4162_v22 = vpop.permute.xlu1 %4161  ;;  %v4333_v39 = vadd.f32 %v4331_v35, %v4289_v33  ;;  %4527 = vmatpush.msrb.mxu1 %v4522_v12  ;;  %v5162_v35 = vld [vmem:[#allocation20 + $0x18] sm:$0xff] }
 0xb4a   : > { %v4166_v31 = vsel %vm3752_vm4, 0.0, %v4162_v22  ;;  %v4516_v22 = vld [vmem:[#allocation56 + $0x38] sm:$0xff]  ;;  %v4831_v12 = vld [vmem:[#allocation19 + $0x98] sm:$0xff] }
 0xb4b   : > { %v4206_v26 = vpop.permute.xlu0 %4205  ;;  %v4168_v36 = vadd.f32 %v4166_v31, %v4122_v32  ;;  %4528 = vmatpush.msrb.mxu1 %v4521_v15  ;;  %v4511_v32 = vld [vmem:[#allocation56 + $0x10] sm:$0xff]  ;;  %v4881_v15 = vld [vmem:[#allocation19 + $0xb8] sm:$0xff] }
 0xb4c   : > { %v4210_v29 = vsel %vm3797_vm3, 0.0, %v4206_v26  ;;  %v4416_v56 = vpop.permute.xlu2 %4415  ;;  %v4515_v26 = vld [vmem:[#allocation56 + $0x30] sm:$0xff] }
 0xb4d   : > { %v4212_v40 = vadd.f32 %v4210_v29, %v4168_v36  ;;  %v4420_v63 = vsel %vm4009_vm9, %v4416_v56, 0.0  ;;  %4529 = vmatpush.msrb.mxu1 %v4520_v18  ;;  %v4510_v36 = vld [vmem:[#allocation56 + $0x8] sm:$0xff]  ;;  %v4509_v29 = vld [vmem:[#allocation56] sm:$0xff] }
 0xb4e   : > { %v4690_v56 = vld [vmem:[#allocation19 + $0x50] sm:$0xff]  ;;  %v4951_v18 = vld [vmem:[#allocation19 + $0xd8] sm:$0xff] }
 0xb4f   : > { %v4256_v45 = vadd.f32 %v4254_v44, %v4212_v40 }
 0xb51   : > { %v4370_v34 = vpop.permute.xlu1 %4369  ;;  %v4290_v53 = vadd.f32 %v4286_v62, %v4256_v45  ;;  %v4548_v45 = vld [vmem:[#allocation19] sm:$0xff] }
 0xb52   : > { %v4375_v37 = vsel %vm3964_vm2, %v4370_v34, 0.0  ;;  %v4512_v34 = vld [vmem:[#allocation56 + $0x18] sm:$0xff] }
 0xb53   : > { %v4377_v41 = vadd.f32 %v4375_v37, %v4333_v39  ;;  %v4334_v58 = vadd.f32 %v4332_v55, %v4290_v53  ;;  %v4689_v53 = vld [vmem:[#allocation19 + $0x48] sm:$0xff]  ;;  %v4550_v55 = vld [vmem:[#allocation19 + $0x10] sm:$0xff] }
 0xb54   : > { %v4414_v38 = vpop.permute.xlu0 %4413 }
 0xb55   : > { %v4419_v42 = vsel %vm4009_vm9, %v4414_v38, 0.0 }
 0xb56   : > { %v4421_v46 = vadd.f32 %v4419_v42, %v4377_v41 }
 0xb5b   : > { %v4458_v47 = vpop.permute.xlu1 %4457 }
 0xb5c   : > { %v4472_v48 = vpop.permute.xlu0 %4471  ;;  %v4463_v49 = vsel %vm4054_vm0, %v4458_v47, 0.0  ;;  %v4688_v47 = vld [vmem:[#allocation19 + $0x40] sm:$0xff] }
 0xb5d   : > { %v4465_v51 = vadd.f32 %v4463_v49, %v4421_v46  ;;  %v4618_v46 = vld [vmem:[#allocation19 + $0x20] sm:$0xff]  ;;  %v4549_v49 = vld [vmem:[#allocation19 + $0x8] sm:$0xff] }
 0xb5f   : > { %v4479_v54 = vadd.f32 %v4472_v48, %v4465_v51  ;;  %v4758_v48 = vld [vmem:[#allocation19 + $0x60] sm:$0xff]  ;;  %v4619_v51 = vld [vmem:[#allocation19 + $0x28] sm:$0xff] }
 0xb61   : > { %v4481_v57 = vmax.f32 %v4479_v54, 0.0  ;;  %v4759_v54 = vld [vmem:[#allocation19 + $0x68] sm:$0xff] }
 0xb63   : > { %v14522_v59 = vmul.f32 %v14469_v17, %v4481_v57  ;;  %v4372_v60 = vpop.permute.xlu1 %4371  ;;  %v4620_v57 = vld [vmem:[#allocation19 + $0x30] sm:$0xff] }
 0xb64   : > { %v4376_v61 = vsel %vm3964_vm2, %v4372_v60, 0.0  ;;  %v4460_v0 = vpop.permute.xlu0 %4459  ;;  %v4551_v60 = vld [vmem:[#allocation19 + $0x18] sm:$0xff] }
 0xb65   : > { %v4378_v1 = vadd.f32 %v4376_v61, %v4334_v58  ;;  %4487 = vrot.lane.b32.xlu2 %v14522_v59, %s13292_s14  ;;  %v4464_v62 = vsel %vm4054_vm0, %v4460_v0, 0.0  ;;  %v4760_v58 = vld [vmem:[#allocation19 + $0x70] sm:$0xff]  ;;  %v4621_v61 = vld [vmem:[#allocation19 + $0x38] sm:$0xff] }
 0xb66   : > { %v4761_v0 = vld [vmem:[#allocation19 + $0x78] sm:$0xff] }
 0xb67   : > { %v4422_v2 = vadd.f32 %v4420_v63, %v4378_v1  ;;  %v4691_v63 = vld [vmem:[#allocation19 + $0x58] sm:$0xff]  ;;  %v4828_v1 = vld [vmem:[#allocation19 + $0x80] sm:$0xff] }
 0xb69   : > { %v4466_v52 = vadd.f32 %v4464_v62, %v4422_v2  ;;  %v4878_v62 = vld [vmem:[#allocation19 + $0xa0] sm:$0xff] }
 0xb6a   : > { %v4948_v2 = vld [vmem:[#allocation19 + $0xc0] sm:$0xff] }
 0xb6b   : > { %v4477_v3 = vpop.permute.xlu1 %4476 }
 0xb6c   : > { %v4480_v50 = vadd.f32 %v4477_v3, %v4466_v52  ;;  %v5019_v52 = vld [vmem:[#allocation19 + $0xe0] sm:$0xff]  ;;  %v4829_v3 = vld [vmem:[#allocation19 + $0x88] sm:$0xff] }
 0xb6e   : > { %v4482_v4 = vmax.f32 %v4480_v50, 0.0  ;;  %v4879_v50 = vld [vmem:[#allocation19 + $0xa8] sm:$0xff] }
 0xb70   : > { %v14530_v5 = vmul.f32 %v14469_v17, %v4482_v4  ;;  %v4519_v17 = vld [vmem:[#allocation56 + $0x50] sm:$0xff]  ;;  %v4949_v4 = vld [vmem:[#allocation19 + $0xc8] sm:$0xff] }
 0xb71   : > { %4530 = vmatpush.msrb.mxu1 %v4519_v17  ;;  %v5022_v17 = vld [vmem:[#allocation19 + $0xf8] sm:$0xff] }
 0xb72   : > { %4489 = vrot.lane.b32.xlu0 %v14530_v5, %s13292_s14 }
 0xb73   : > { %4531 = vmatpush.msrb.mxu1 %v4518_v19  ;;  %v5090_v19 = vld [vmem:[#allocation19 + $0x100] sm:$0xff] }
 0xb75   : > { %4532 = vmatpush.msrb.mxu1 %v4517_v20  ;;  %v5091_v20 = vld [vmem:[#allocation19 + $0x108] sm:$0xff] }
 0xb77   : > { %4533 = vmatpush.msrb.mxu1 %v4516_v22  ;;  %v5092_v22 = vld [vmem:[#allocation19 + $0x110] sm:$0xff] }
 0xb79   : > { %4534 = vmatpush.msrb.mxu1 %v4515_v26  ;;  %v5093_v26 = vld [vmem:[#allocation19 + $0x118] sm:$0xff] }
 0xb7b   : > { %4535 = vmatpush.msrb.mxu1 %v4514_v27 }
 0xb7d   : > { %4536 = vmatpush.msrb.mxu1 %v4513_v30 }
 0xb7f   : > { %4537 = vmatpush.msrb.mxu1 %v4512_v34 }
 0xb81   : > { %4538 = vmatpush.msrb.mxu1 %v4511_v32 }
 0xb83   : > { %4539 = vmatpush.msrb.mxu1 %v4510_v36 }
 0xb85   : > { %4540 = vmatpush.msrb.mxu1 %v4509_v29 }
 0xbbf   : > { %v4488_v6 = vpop.permute.xlu2 %4487 }
 0xbc0   : > { %v4493_v7 = vsel %vm2575_vm6, %v4488_v6, 0.0  ;;  %v5020_v6 = vld [vmem:[#allocation19 + $0xe8] sm:$0xff] }
 0xbc1   : > { %v4495_v8 = vmax.f32 %v14522_v59, %v4493_v7  ;;  %v4830_v7 = vld [vmem:[#allocation19 + $0x90] sm:$0xff] }
 0xbc3   : > { %4499 = vrot.lane.b32.xlu1 %v4495_v8, %s13307_s23 }
 0xbe4   : > { %v4490_v28 = vpop.permute.xlu0 %4489 }
 0xbe5   : > { %v4494_v31 = vsel %vm2575_vm6, %v4490_v28, 0.0 }
 0xbe6   : > { %v4496_v33 = vmax.f32 %v14530_v5, %v4494_v31 }
 0xbe8   : > { %4501 = vrot.lane.b32.xlu2 %v4496_v33, %s13307_s23 }
 0xbf0   : > { %5180 = vperm.xlu2 %11977, %v5162_v35  }
 0xc35   : > { %v4500_v37 = vpop.permute.xlu1 %4499 }
 0xc36   : > { %v4505_v38 = vsel %vm4009_vm9, %v4500_v37, 0.0 }
 0xc37   : > { %v4507_v39 = vmax.f32 %v4495_v8, %v4505_v38  ;;  %v4880_v8 = vld [vmem:[#allocation19 + $0xb0] sm:$0xff] }
 0xc39   : > { %4541 = vmatmul.f32.vlgmr.msrb.gmra.mxu1 %v4507_v39 }
 0xc42   : > { %v4502_v40 = vpop.permute.xlu2 %4501 }
 0xc43   : > { %v4506_v41 = vsel %vm4009_vm9, %v4502_v40, 0.0 }
 0xc44   : > { %v4508_v42 = vmax.f32 %v4496_v33, %v4506_v41 }
 0xc46   : > { %4544 = vmatmul.f32.gmra.mxu1 %v4508_v42 }
 0xcb6   : > { %v4542_v43 = vpop.f32.mrf.mxu1 }
 0xcc3   : > { %v4545_v44 = vpop.f32.mrf.mxu1 }
 0xcc4   : > { %4578 = vmatpush.msrb.mxu2 %v4545_v44  ;;  %4648 = vmatpush.msra.mxu3 %v4545_v44 }
 0xcc5   : > { %4718 = vmatpush.msrb.mxu0 %v4545_v44  ;;  %4788 = vmatpush.msra.mxu1 %v4545_v44 }
 0xcc6   : > { %4579 = vmatpush.msrb.mxu2 %v4542_v43  ;;  %4649 = vmatpush.msra.mxu3 %v4542_v43 }
 0xcc7   : > { %4719 = vmatpush.msrb.mxu0 %v4542_v43  ;;  %4789 = vmatpush.msra.mxu1 %v4542_v43 }
 0xcc8   : > { %11288 = vmatmul.msk.f32.vlgmr.msrb.gmra.mxu2 %vm4083_vm15, %v4548_v45  ;;  %11292 = vmatmul.msk.f32.vlgmr.msra.gmra.mxu3 %vm4083_vm15, %v4618_v46 }
 0xcc9   : > { %11296 = vmatmul.msk.f32.vlgmr.msrb.gmra.mxu0 %vm4083_vm15, %v4688_v47  ;;  %4858 = vmatpush.msra.mxu2 %v4545_v44 }
 0xcca   : > { %4908 = vmatpush.msrb.mxu3 %v4545_v44  ;;  %4978 = vmatpush.msra.mxu0 %v4545_v44 }
 0xccb   : > { %5049 = vmatpush.msrb.mxu1 %v4545_v44  ;;  %4859 = vmatpush.msra.mxu2 %v4542_v43 }
 0xccc   : > { %4909 = vmatpush.msrb.mxu3 %v4542_v43  ;;  %4979 = vmatpush.msra.mxu0 %v4542_v43 }
 0xccd   : > { %5050 = vmatpush.msrb.mxu1 %v4542_v43  ;;  %5120 = vmatpush.msrb.mxu2 %v4545_v44 }
 0xcce   : > { %11300 = vmatmul.msk.f32.vlgmr.msra.gmra.mxu1 %vm4083_vm15, %v4758_v48 }
 0xccf   : > { %5121 = vmatpush.msrb.mxu2 %v4542_v43 }
 0xcd0   : > { %11289 = vmatmul.msk.f32.gmra.mxu2 %vm4083_vm15, %v4549_v49  ;;  %11293 = vmatmul.msk.f32.gmra.mxu3 %vm4083_vm15, %v4619_v51 }
 0xcd1   : > { %11297 = vmatmul.msk.f32.gmra.mxu0 %vm4083_vm15, %v4689_v53 }
 0xcd6   : > { %11301 = vmatmul.msk.f32.gmra.mxu1 %vm4083_vm15, %v4759_v54 }
 0xcd8   : > { %11290 = vmatmul.msk.f32.gmra.mxu2 %vm4083_vm15, %v4550_v55  ;;  %11294 = vmatmul.msk.f32.gmra.mxu3 %vm4083_vm15, %v4620_v57 }
 0xcd9   : > { %11298 = vmatmul.msk.f32.gmra.mxu0 %vm4083_vm15, %v4690_v56 }
 0xcde   : > { %11302 = vmatmul.msk.f32.gmra.mxu1 %vm4083_vm15, %v4760_v58 }
 0xce0   : > { %11291 = vmatmul.msk.f32.gmra.mxu2 %vm4083_vm15, %v4551_v60  ;;  %11295 = vmatmul.msk.f32.gmra.mxu3 %vm4083_vm15, %v4621_v61 }
 0xce1   : > { %11299 = vmatmul.msk.f32.gmra.mxu0 %vm4083_vm15, %v4691_v63 }
 0xce6   : > { %11303 = vmatmul.msk.f32.gmra.mxu1 %vm4083_vm15, %v4761_v0 }
 0xce8   : > { %11304 = vmatmul.msk.f32.vlgmr.msra.gmra.mxu2 %vm4083_vm15, %v4828_v1  ;;  %11308 = vmatmul.msk.f32.vlgmr.msrb.gmra.mxu3 %vm4083_vm15, %v4878_v62  ;;  %v5161_v1 = vld [vmem:[#allocation20 + $0x10] sm:$0xff] }
 0xce9   : > { %11312 = vmatmul.msk.f32.vlgmr.msra.gmra.mxu0 %vm4083_vm15, %v4948_v2  ;;  %v5159_v2 = vld [vmem:[#allocation20] sm:$0xff] }
 0xcee   : > { %11316 = vmatmul.msk.f32.vlgmr.msrb.gmra.mxu1 %vm4083_vm15, %v5019_v52 }
 0xcf0   : > { %11305 = vmatmul.msk.f32.gmra.mxu2 %vm4083_vm15, %v4829_v3  ;;  %11309 = vmatmul.msk.f32.gmra.mxu3 %vm4083_vm15, %v4879_v50  ;;  %v5160_v3 = vld [vmem:[#allocation20 + $0x8] sm:$0xff]  ;;  %v5809_v50 = vld [vmem:[#allocation23] sm:$0xff] }
 0xcf1   : > { %11313 = vmatmul.msk.f32.gmra.mxu0 %vm4083_vm15, %v4949_v4  ;;  %v14618_v4 = vpop.permute.xlu2 %5180 }
 0xcf6   : > { %11317 = vmatmul.msk.f32.gmra.mxu1 %vm4083_vm15, %v5020_v6 }
 0xcf8   : > { %11306 = vmatmul.msk.f32.gmra.mxu2 %vm4083_vm15, %v4830_v7  ;;  %11310 = vmatmul.msk.f32.gmra.mxu3 %vm4083_vm15, %v4880_v8 }
 0xcf9   : > { %11314 = vmatmul.msk.f32.gmra.mxu0 %vm4083_vm15, %v4950_v10 }
 0xcfe   : > { %11318 = vmatmul.msk.f32.gmra.mxu1 %vm4083_vm15, %v5021_v11 }
 0xd00   : > { %11307 = vmatmul.msk.f32.gmra.mxu2 %vm4083_vm15, %v4831_v12  ;;  %11311 = vmatmul.msk.f32.gmra.mxu3 %vm4083_vm15, %v4881_v15 }
 0xd01   : > { %11315 = vmatmul.msk.f32.gmra.mxu0 %vm4083_vm15, %v4951_v18 }
 0xd06   : > { %11319 = vmatmul.msk.f32.gmra.mxu1 %vm4083_vm15, %v5022_v17 }
 0xd08   : > { %11320 = vmatmul.msk.f32.vlgmr.msrb.gmra.mxu2 %vm4083_vm15, %v5090_v19 }
 0xd10   : > { %11321 = vmatmul.msk.f32.gmra.mxu2 %vm4083_vm15, %v5091_v20 }
 0xd18   : > { %11322 = vmatmul.msk.f32.gmra.mxu2 %vm4083_vm15, %v5092_v22 }
 0xd20   : > { %11323 = vmatmul.msk.f32.gmra.mxu2 %vm4083_vm15, %v5093_v26 }
 0xd46   : > { %v4721_v27 = vpop.f32.mrf.mxu0 }
 0xd47   : > { %4737 = vrot.lane.b32.xlu1 %v4721_v27, %s13309_s4 }
 0xd4b   : > { %v4581_v28 = vpop.f32.mrf.mxu2  ;;  %v4651_v30 = vpop.f32.mrf.mxu3 }
 0xd4c   : > { %v4791_v31 = vpop.f32.mrf.mxu1  ;;  %4597 = vrot.lane.b32.xlu0 %v4581_v28, %s13303_s7 }
 0xd4e   : > { %v4724_v33 = vpop.f32.mrf.mxu0 }
 0xd4f   : > { %4807 = vrot.lane.b32.xlu1 %v4791_v31, %s13291_s6  ;;  %4739 = vrot.lane.b32.xlu2 %v4724_v33, %s13309_s4 }
 0xd53   : > { %v4584_v34 = vpop.f32.mrf.mxu2  ;;  %v4654_v32 = vpop.f32.mrf.mxu3 }
 0xd54   : > { %v4794_v35 = vpop.f32.mrf.mxu1  ;;  %4669 = vrot.lane.b32.xlu0 %v4654_v32, %s13310_s28 }
 0xd56   : > { %v4727_v36 = vpop.f32.mrf.mxu0 }
 0xd57   : > { %4809 = vrot.lane.b32.xlu2 %v4794_v35, %s13291_s6  ;;  %4667 = vrot.lane.b32.xlu1 %v4651_v30, %s13310_s28 }
 0xd5b   : > { %v4587_v29 = vpop.f32.mrf.mxu2  ;;  %v4657_v39 = vpop.f32.mrf.mxu3 }
 0xd5c   : > { %v4797_v37 = vpop.f32.mrf.mxu1 }
 0xd5d   : > { %4811 = vrot.lane.b32.xlu0 %v4797_v37, %s13291_s6 }
 0xd5e   : > { %v4730_v38 = vpop.f32.mrf.mxu0 }
 0xd5f   : > { %4741 = vrot.lane.b32.xlu1 %v4727_v36, %s13309_s4  ;;  %4599 = vrot.lane.b32.xlu2 %v4584_v34, %s13303_s7 }
 0xd63   : > { %v4590_v40 = vpop.f32.mrf.mxu2  ;;  %v4660_v43 = vpop.f32.mrf.mxu3 }
 0xd64   : > { %v4800_v41 = vpop.f32.mrf.mxu1 }
 0xd65   : > { %4671 = vrot.lane.b32.xlu0 %v4657_v39, %s13310_s28 }
 0xd66   : > { %v4981_v42 = vpop.f32.mrf.mxu0 }
 0xd67   : > { %4743 = vrot.lane.b32.xlu1 %v4730_v38, %s13309_s4  ;;  %4601 = vrot.lane.b32.xlu2 %v4587_v29, %s13303_s7 }
 0xd6b   : > { %v14591_v44 = vpop.f32.mrf.mxu2  ;;  %v4911_v47 = vpop.f32.mrf.mxu3 }
 0xd6c   : > { %v5052_v45 = vpop.f32.mrf.mxu1 }
 0xd6d   : > { %4603 = vrot.lane.b32.xlu0 %v4590_v40, %s13303_s7 }
 0xd6e   : > { %v4984_v46 = vpop.f32.mrf.mxu0 }
 0xd6f   : > { %4673 = vrot.lane.b32.xlu1 %v4660_v43, %s13310_s28  ;;  %4813 = vrot.lane.b32.xlu2 %v4800_v41, %s13291_s6 }
 0xd73   : > { %v14596_v48 = vpop.f32.mrf.mxu2  ;;  %v4914_v55 = vpop.f32.mrf.mxu3 }
 0xd74   : > { %v5055_v49 = vpop.f32.mrf.mxu1 }
 0xd75   : > { %5070 = vrot.lane.b32.xlu0 %v5055_v49, %s13311_s16 }
 0xd76   : > { %v4987_v51 = vpop.f32.mrf.mxu0 }
 0xd77   : > { %4927 = vrot.lane.b32.xlu1 %v4911_v47, %s13292_s14  ;;  %4997 = vrot.lane.b32.xlu2 %v4981_v42, %s13312_s5 }
 0xd7b   : > { %v14601_v53 = vpop.f32.mrf.mxu2  ;;  %v4917_v58 = vpop.f32.mrf.mxu3 }
 0xd7c   : > { %v5058_v54 = vpop.f32.mrf.mxu1 }
 0xd7d   : > { %5072 = vrot.lane.b32.xlu0 %v5058_v54, %s13311_s16 }
 0xd7e   : > { %v4990_v57 = vpop.f32.mrf.mxu0 }
 0xd7f   : > { %4929 = vrot.lane.b32.xlu1 %v4914_v55, %s13292_s14  ;;  %4999 = vrot.lane.b32.xlu2 %v4984_v46, %s13312_s5 }
 0xd83   : > { %v14606_v56 = vpop.f32.mrf.mxu2  ;;  %v4920_v63 = vpop.f32.mrf.mxu3 }
 0xd84   : > { %v5061_v60 = vpop.f32.mrf.mxu1 }
 0xd85   : > { %5003 = vrot.lane.b32.xlu0 %v4990_v57, %s13312_s5 }
 0xd87   : > { %5001 = vrot.lane.b32.xlu2 %v4987_v51, %s13312_s5 }
 0xd8b   : > { %v5123_v61 = vpop.f32.mrf.mxu2 }
 0xd8d   : > { %5074 = vrot.lane.b32.xlu0 %v5061_v60, %s13311_s16 }
 0xd8f   : > { %4931 = vrot.lane.b32.xlu2 %v4917_v58, %s13292_s14 }
 0xd93   : > { %v5126_v0 = vpop.f32.mrf.mxu2 }
 0xd94   : > { %5141 = vrot.lane.b32.xlu1 %v5126_v0, %s13305_s12 }
 0xd95   : > { %4933 = vrot.lane.b32.xlu0 %v4920_v63, %s13292_s14 }
 0xd97   : > { %5175 = vperm.xlu2 %11977, %v5161_v1  }
 0xd9b   : > { %v5129_v62 = vpop.f32.mrf.mxu2 }
 0xd9c   : > { %5143 = vrot.lane.b32.xlu1 %v5129_v62, %s13305_s12 }
 0xd9d   : > { %5068 = vrot.lane.b32.xlu0 %v5052_v45, %s13311_s16 }
 0xd9f   : > { %5165 = vperm.xlu2 %11977, %v5159_v2  }
 0xda3   : > { %v5132_v52 = vpop.f32.mrf.mxu2 }
 0xda4   : > { %5145 = vrot.lane.b32.xlu1 %v5132_v52, %s13305_s12 }
 0xda5   : > { %5139 = vrot.lane.b32.xlu0 %v5123_v61, %s13305_s12 }
 0xda9   : > { %v4740_v6 = vpop.permute.xlu2 %4739 }
 0xdac   : > { %5170 = vperm.xlu1 %11978, %v5160_v3  }
 0xdad   : > { %5815 = vperm.xlu0 %11966, %v5809_v50  }
 0xdb1   : > { %v4810_v10 = vpop.permute.xlu2 %4809 }
 0xdb9   : > { %v4738_v7 = vpop.permute.xlu1 %4737  ;;  %v4600_v15 = vpop.permute.xlu2 %4599 }
 0xdba   : > { %v4610_v58 = vsel %vm3797_vm3, 0.0, %v4600_v15  ;;  %v4749_v0 = vsel %vm2031_vm1, 0.0, %v4738_v7 }
 0xdbe   : > { %v4598_v8 = vpop.permute.xlu0 %4597 }
 0xdbf   : > { %v4609_v49 = vsel %vm3797_vm3, 0.0, %v4598_v8  ;;  %v4750_v8 = vsel %vm2031_vm1, 0.0, %v4740_v6 }
 0xdc1   : > { %v4808_v11 = vpop.permute.xlu1 %4807  ;;  %v4602_v19 = vpop.permute.xlu2 %4601 }
 0xdc2   : > { %v4611_v38 = vsel %vm3797_vm3, 0.0, %v4602_v19  ;;  %v4819_v15 = vsel %vm2399_vm5, 0.0, %v4808_v11 }
 0xdc6   : > { %v4670_v12 = vpop.permute.xlu0 %4669 }
 0xdc7   : > { %v4680_v51 = vsel %vm3041_vm11, 0.0, %v4670_v12 }
 0xdc8   : > { %v4684_v61 = vadd.f32 %v4680_v51, %v4610_v58 }
 0xdc9   : > { %v4668_v18 = vpop.permute.xlu1 %4667  ;;  %v4814_v26 = vpop.permute.xlu2 %4813 }
 0xdca   : > { %v4679_v45 = vsel %vm3041_vm11, 0.0, %v4668_v18  ;;  %v4822_v3 = vsel %vm2399_vm5, 0.0, %v4814_v26  ;;  %v4754_v18 = vadd.f32 %v4750_v8, %v4684_v61 }
 0xdcb   : > { %v4683_v55 = vadd.f32 %v4679_v45, %v4609_v49 }
 0xdcd   : > { %v4753_v52 = vadd.f32 %v4749_v0, %v4683_v55 }
 0xdcf   : > { %v4812_v17 = vpop.permute.xlu0 %4811 }
 0xdd0   : > { %v4821_v63 = vsel %vm2399_vm5, 0.0, %v4812_v17  ;;  %v4823_v17 = vadd.f32 %v4819_v15, %v4753_v52 }
 0xdd1   : > { %v4742_v20 = vpop.permute.xlu1 %4741  ;;  %v14622_v31 = vpop.permute.xlu2 %4997 }
 0xdd2   : > { %v4751_v47 = vsel %vm2031_vm1, 0.0, %v4742_v20  ;;  %v4873_v11 = vadd.f32 %v14591_v44, %v4823_v17  ;;  %v5010_v44 = vsel %vm5009_vm12, %v14622_v31, 0.0 }
 0xdd7   : > { %v4672_v22 = vpop.permute.xlu0 %4671 }
 0xdd8   : > { %v4681_v29 = vsel %vm3041_vm11, 0.0, %v4672_v22  ;;  %v4820_v22 = vsel %vm2399_vm5, 0.0, %v4810_v10 }
 0xdd9   : > { %v4744_v28 = vpop.permute.xlu1 %4743  ;;  %v14624_v32 = vpop.permute.xlu2 %4999  ;;  %v4685_v40 = vadd.f32 %v4681_v29, %v4611_v38 }
 0xdda   : > { %v4752_v57 = vsel %vm2031_vm1, 0.0, %v4744_v28  ;;  %v4824_v28 = vadd.f32 %v4820_v22, %v4754_v18 }
 0xddb   : > { %v4755_v54 = vadd.f32 %v4751_v47, %v4685_v40 }
 0xddc   : > { %v4874_v45 = vadd.f32 %v14596_v48, %v4824_v28  ;;  %v5011_v48 = vsel %vm5009_vm12, %v14624_v32, 0.0  ;;  %v5340_v28 = vld [vmem:[#allocation22 + $0x40] sm:$0xff] }
 0xddd   : > { %v4825_v1 = vadd.f32 %v4821_v63, %v4755_v54 }
 0xddf   : > { %v4604_v27 = vpop.permute.xlu0 %4603  ;;  %v4875_v20 = vadd.f32 %v14601_v53, %v4825_v1 }
 0xde0   : > { %v4612_v42 = vsel %vm3797_vm3, 0.0, %v4604_v27 }
 0xde1   : > { %v4674_v33 = vpop.permute.xlu1 %4673  ;;  %v5002_v37 = vpop.permute.xlu2 %5001 }
 0xde2   : > { %v4682_v39 = vsel %vm3041_vm11, 0.0, %v4674_v33  ;;  %v5012_v38 = vsel %vm5009_vm12, %v5002_v37, 0.0 }
 0xde3   : > { %v4686_v46 = vadd.f32 %v4682_v39, %v4612_v42 }
 0xde5   : > { %v4756_v60 = vadd.f32 %v4752_v57, %v4686_v46 }
 0xde7   : > { %v14620_v30 = vpop.permute.xlu0 %5070  ;;  %v4826_v12 = vadd.f32 %v4822_v3, %v4756_v60 }
 0xde9   : > { %v4928_v35 = vpop.permute.xlu1 %4927  ;;  %v4932_v62 = vpop.permute.xlu2 %4931  ;;  %v4876_v26 = vadd.f32 %v14606_v56, %v4826_v12 }
 0xdea   : > { %v4941_v19 = vsel %vm2575_vm6, %v4932_v62, 0.0  ;;  %v4939_v6 = vsel %vm2575_vm6, %v4928_v35, 0.0  ;;  %v5082_v62 = vsel %vm5080_vm14, %v14620_v30, 0.0 }
 0xdeb   : > { %v4945_v27 = vadd.f32 %v4941_v19, %v4875_v20  ;;  %v4943_v42 = vadd.f32 %v4939_v6, %v4873_v11  ;;  %v5200_v6 = vld [vmem:[#allocation22 + $0x8] sm:$0xff]  ;;  %v5201_v11 = vld [vmem:[#allocation22 + $0x10] sm:$0xff] }
 0xded   : > { %v5016_v40 = vadd.f32 %v5012_v38, %v4945_v27  ;;  %v5199_v27 = vld [vmem:[#allocation22] sm:$0xff] }
 0xdee   : > { %v5410_v38 = vld [vmem:[#allocation22 + $0x60] sm:$0xff] }
 0xdef   : > { %v5073_v34 = vpop.permute.xlu0 %5072 }
 0xdf0   : > { %v5083_v53 = vsel %vm5080_vm14, %v5073_v34, 0.0 }
 0xdf1   : > { %v4930_v41 = vpop.permute.xlu1 %4929  ;;  %v5087_v35 = vadd.f32 %v5083_v53, %v5016_v40  ;;  %v5176_v47 = vpop.permute.xlu2 %5175  ;;  %v5272_v53 = vld [vmem:[#allocation22 + $0x30] sm:$0xff]  ;;  %v5411_v40 = vld [vmem:[#allocation22 + $0x68] sm:$0xff] }
 0xdf2   : > { %v4940_v10 = vsel %vm2575_vm6, %v4930_v41, 0.0  ;;  %v5014_v41 = vadd.f32 %v5010_v44, %v4943_v42  ;;  %v5273_v42 = vld [vmem:[#allocation22 + $0x38] sm:$0xff]  ;;  %v5531_v44 = vld [vmem:[#allocation22 + $0xa8] sm:$0xff] }
 0xdf3   : > { %v4944_v51 = vadd.f32 %v4940_v10, %v4874_v45  ;;  %v5202_v10 = vld [vmem:[#allocation22 + $0x18] sm:$0xff] }
 0xdf4   : > { %v5343_v45 = vld [vmem:[#allocation22 + $0x58] sm:$0xff] }
 0xdf5   : > { %v5015_v57 = vadd.f32 %v5011_v48, %v4944_v51  ;;  %v5481_v51 = vld [vmem:[#allocation22 + $0x88] sm:$0xff] }
 0xdf6   : > { %v5671_v48 = vld [vmem:[#allocation22 + $0xe8] sm:$0xff] }
 0xdf7   : > { %v5004_v36 = vpop.permute.xlu0 %5003  ;;  %v5086_v32 = vadd.f32 %v5082_v62, %v5015_v57  ;;  %v5533_v57 = vld [vmem:[#allocation22 + $0xb8] sm:$0xff] }
 0xdf8   : > { %v5013_v56 = vsel %vm5009_vm12, %v5004_v36, 0.0 }
 0xdf9   : > { %v5166_v3 = vpop.permute.xlu2 %5165 }
 0xdff   : > { %v5075_v43 = vpop.permute.xlu0 %5074 }
 0xe00   : > { %v5084_v54 = vsel %vm5080_vm14, %v5075_v43, 0.0 }
 0xe06   : > { %v5142_v2 = vpop.permute.xlu1 %5141 }
 0xe07   : > { %v4934_v50 = vpop.permute.xlu0 %4933  ;;  %v5152_v43 = vsel %vm3964_vm2, %v5142_v2, 0.0 }
 0xe08   : > { %v4942_v7 = vsel %vm2575_vm6, %v4934_v50, 0.0  ;;  %v14666_v50 = vld [vmem:[#allocation50] ss:$0 sm:$0xff]  ;;  %v5156_v18 = vadd.f32 %v5152_v43, %v5086_v32 }
 0xe09   : > { %v4946_v33 = vadd.f32 %v4942_v7, %v4876_v26  ;;  %v5270_v26 = vld [vmem:[#allocation22 + $0x20] sm:$0xff] }
 0xe0b   : > { %v5017_v49 = vadd.f32 %v5013_v56, %v4946_v33  ;;  %v5271_v33 = vld [vmem:[#allocation22 + $0x28] sm:$0xff]  ;;  %v5412_v56 = vld [vmem:[#allocation22 + $0x70] sm:$0xff] }
 0xe0d   : > { %v5088_v36 = vadd.f32 %v5084_v54, %v5017_v49  ;;  %v5413_v49 = vld [vmem:[#allocation22 + $0x78] sm:$0xff]  ;;  %v5482_v54 = vld [vmem:[#allocation22 + $0x90] sm:$0xff] }
 0xe0e   : > { %v5144_v29 = vpop.permute.xlu1 %5143 }
 0xe0f   : > { %v5069_v39 = vpop.permute.xlu0 %5068  ;;  %v5153_v46 = vsel %vm3964_vm2, %v5144_v29, 0.0  ;;  %v5341_v29 = vld [vmem:[#allocation22 + $0x48] sm:$0xff] }
 0xe10   : > { %v5081_v34 = vsel %vm5080_vm14, %v5069_v39, 0.0  ;;  %v5157_v37 = vadd.f32 %v5153_v46, %v5087_v35  ;;  %v5342_v39 = vld [vmem:[#allocation22 + $0x50] sm:$0xff]  ;;  %v5480_v46 = vld [vmem:[#allocation22 + $0x80] sm:$0xff] }
 0xe11   : > { %v5085_v58 = vadd.f32 %v5081_v34, %v5014_v41  ;;  %v5530_v35 = vld [vmem:[#allocation22 + $0xa0] sm:$0xff]  ;;  %v5601_v34 = vld [vmem:[#allocation22 + $0xc8] sm:$0xff]  ;;  %v5532_v41 = vld [vmem:[#allocation22 + $0xb0] sm:$0xff] }
 0xe12   : > { %v5185_v63 = vadd.f32 %v5176_v47, %v5157_v37  ;;  %v5600_v47 = vld [vmem:[#allocation22 + $0xc0] sm:$0xff] }
 0xe13   : > { %v5670_v37 = vld [vmem:[#allocation22 + $0xe0] sm:$0xff] }
 0xe14   : > { %v5189_v8 = vmax.f32 %v5185_v63, 0.0  ;;  %v5673_v63 = vld [vmem:[#allocation22 + $0xf8] sm:$0xff] }
 0xe16   : > { %v5146_v55 = vpop.permute.xlu1 %5145  ;;  %v5197_v7 = vmul.f32 %v14666_v50, %v5189_v8 }
 0xe17   : > { %v5140_v60 = vpop.permute.xlu0 %5139  ;;  %v5154_v61 = vsel %vm3964_vm2, %v5146_v55, 0.0  ;;  %v5602_v55 = vld [vmem:[#allocation22 + $0xd0] sm:$0xff] }
 0xe18   : > { %v5151_v0 = vsel %vm3964_vm2, %v5140_v60, 0.0  ;;  %v5158_v31 = vadd.f32 %v5154_v61, %v5088_v36  ;;  %v5483_v36 = vld [vmem:[#allocation22 + $0x98] sm:$0xff]  ;;  %v5740_v61 = vld [vmem:[#allocation22 + $0x100] sm:$0xff] }
 0xe19   : > { %v5155_v1 = vadd.f32 %v5151_v0, %v5085_v58  ;;  %v5672_v58 = vld [vmem:[#allocation22 + $0xf0] sm:$0xff]  ;;  %v5603_v60 = vld [vmem:[#allocation22 + $0xd8] sm:$0xff]  ;;  %v5741_v0 = vld [vmem:[#allocation22 + $0x108] sm:$0xff] }
 0xe1a   : > { %v5186_v52 = vadd.f32 %v14618_v4, %v5158_v31  ;;  %v5742_v31 = vld [vmem:[#allocation22 + $0x110] sm:$0xff] }
 0xe1b   : > { %v5183_v19 = vadd.f32 %v5166_v3, %v5155_v1  ;;  %v5743_v1 = vld [vmem:[#allocation22 + $0x118] sm:$0xff] }
 0xe1c   : > { %v5190_v12 = vmax.f32 %v5186_v52, 0.0 }
 0xe1d   : > { %v5187_v30 = vmax.f32 %v5183_v19, 0.0 }
 0xe1e   : > { %v5198_v15 = vmul.f32 %v14666_v50, %v5190_v12  ;;  %v5171_v20 = vpop.permute.xlu1 %5170 }
 0xe1f   : > { %v5184_v17 = vadd.f32 %v5171_v20, %v5156_v18  ;;  %v5195_v22 = vmul.f32 %v14666_v50, %v5187_v30 }
 0xe20   : > { %5228 = vmatpush.msra.mxu3 %v5198_v15  ;;  %5298 = vmatpush.msrb.mxu0 %v5198_v15 }
 0xe21   : > { %v5188_v2 = vmax.f32 %v5184_v17, 0.0  ;;  %5368 = vmatpush.msra.mxu1 %v5198_v15  ;;  %5438 = vmatpush.msra.mxu2 %v5198_v15 }
 0xe22   : > { %5229 = vmatpush.msra.mxu3 %v5197_v7  ;;  %5299 = vmatpush.msrb.mxu0 %v5197_v7 }
 0xe23   : > { %v5196_v4 = vmul.f32 %v14666_v50, %v5188_v2  ;;  %5369 = vmatpush.msra.mxu1 %v5197_v7  ;;  %5439 = vmatpush.msra.mxu2 %v5197_v7 }
 0xe25   : > { %5230 = vmatpush.msra.mxu3 %v5196_v4  ;;  %5300 = vmatpush.msrb.mxu0 %v5196_v4 }
 0xe26   : > { %5370 = vmatpush.msra.mxu1 %v5196_v4  ;;  %5440 = vmatpush.msra.mxu2 %v5196_v4 }
 0xe27   : > { %5231 = vmatpush.msra.mxu3 %v5195_v22  ;;  %5301 = vmatpush.msrb.mxu0 %v5195_v22 }
 0xe28   : > { %5371 = vmatpush.msra.mxu1 %v5195_v22  ;;  %5441 = vmatpush.msra.mxu2 %v5195_v22 }
 0xe29   : > { %11324 = vmatmul.msk.f32.vlgmr.msra.gmra.mxu3 %vm5203_vm13, %v5199_v27  ;;  %11328 = vmatmul.msk.f32.vlgmr.msrb.gmra.mxu0 %vm5203_vm13, %v5270_v26 }
 0xe2a   : > { %11332 = vmatmul.msk.f32.vlgmr.msra.gmra.mxu1 %vm5203_vm13, %v5340_v28  ;;  %5508 = vmatpush.msrb.mxu3 %v5198_v15 }
 0xe2b   : > { %5558 = vmatpush.msra.mxu0 %v5198_v15  ;;  %5628 = vmatpush.msrb.mxu1 %v5198_v15 }
 0xe2c   : > { %5698 = vmatpush.msrb.mxu2 %v5198_v15  ;;  %5509 = vmatpush.msrb.mxu3 %v5197_v7 }
 0xe2d   : > { %5559 = vmatpush.msra.mxu0 %v5197_v7  ;;  %5629 = vmatpush.msrb.mxu1 %v5197_v7 }
 0xe2e   : > { %5699 = vmatpush.msrb.mxu2 %v5197_v7  ;;  %5510 = vmatpush.msrb.mxu3 %v5196_v4 }
 0xe2f   : > { %5560 = vmatpush.msra.mxu0 %v5196_v4  ;;  %5630 = vmatpush.msrb.mxu1 %v5196_v4 }
 0xe30   : > { %5700 = vmatpush.msrb.mxu2 %v5196_v4  ;;  %5511 = vmatpush.msrb.mxu3 %v5195_v22 }
 0xe31   : > { %5561 = vmatpush.msra.mxu0 %v5195_v22  ;;  %5631 = vmatpush.msrb.mxu1 %v5195_v22 }
 0xe32   : > { %5701 = vmatpush.msrb.mxu2 %v5195_v22  ;;  %5768 = vmatpush.msra.mxu3 %v5198_v15 }
 0xe33   : > { %11325 = vmatmul.msk.f32.gmra.mxu3 %vm5203_vm13, %v5200_v6  ;;  %11329 = vmatmul.msk.f32.gmra.mxu0 %vm5203_vm13, %v5271_v33 }
 0xe34   : > { %11333 = vmatmul.msk.f32.gmra.mxu1 %vm5203_vm13, %v5341_v29  ;;  %11336 = vmatmul.msk.f32.vlgmr.msra.gmra.mxu2 %vm5203_vm13, %v5410_v38 }
 0xe35   : > { %5769 = vmatpush.msra.mxu3 %v5197_v7 }
 0xe37   : > { %5770 = vmatpush.msra.mxu3 %v5196_v4 }
 0xe39   : > { %5771 = vmatpush.msra.mxu3 %v5195_v22 }
 0xe3b   : > { %11326 = vmatmul.msk.f32.gmra.mxu3 %vm5203_vm13, %v5201_v11  ;;  %11330 = vmatmul.msk.f32.gmra.mxu0 %vm5203_vm13, %v5272_v53  ;;  %v5810_v53 = vld [vmem:[#allocation23 + $0x8] sm:$0xff] }
 0xe3c   : > { %11334 = vmatmul.msk.f32.gmra.mxu1 %vm5203_vm13, %v5342_v39  ;;  %11337 = vmatmul.msk.f32.gmra.mxu2 %vm5203_vm13, %v5411_v40 }
 0xe43   : > { %11327 = vmatmul.msk.f32.gmra.mxu3 %vm5203_vm13, %v5202_v10  ;;  %11331 = vmatmul.msk.f32.gmra.mxu0 %vm5203_vm13, %v5273_v42 }
 0xe44   : > { %11335 = vmatmul.msk.f32.gmra.mxu1 %vm5203_vm13, %v5343_v45  ;;  %11338 = vmatmul.msk.f32.gmra.mxu2 %vm5203_vm13, %v5412_v56 }
 0xe4b   : > { %11340 = vmatmul.msk.f32.vlgmr.msrb.gmra.mxu3 %vm5203_vm13, %v5480_v46  ;;  %11344 = vmatmul.msk.f32.vlgmr.msra.gmra.mxu0 %vm5203_vm13, %v5530_v35  ;;  %v5811_v35 = vld [vmem:[#allocation23 + $0x10] sm:$0xff] }
 0xe4c   : > { %11348 = vmatmul.msk.f32.vlgmr.msrb.gmra.mxu1 %vm5203_vm13, %v5600_v47  ;;  %11339 = vmatmul.msk.f32.gmra.mxu2 %vm5203_vm13, %v5413_v49 }
 0xe53   : > { %11341 = vmatmul.msk.f32.gmra.mxu3 %vm5203_vm13, %v5481_v51  ;;  %11345 = vmatmul.msk.f32.gmra.mxu0 %vm5203_vm13, %v5531_v44 }
 0xe54   : > { %11349 = vmatmul.msk.f32.gmra.mxu1 %vm5203_vm13, %v5601_v34  ;;  %11352 = vmatmul.msk.f32.vlgmr.msrb.gmra.mxu2 %vm5203_vm13, %v5670_v37  ;;  %v5812_v34 = vld [vmem:[#allocation23 + $0x18] sm:$0xff] }
 0xe5b   : > { %11342 = vmatmul.msk.f32.gmra.mxu3 %vm5203_vm13, %v5482_v54  ;;  %11346 = vmatmul.msk.f32.gmra.mxu0 %vm5203_vm13, %v5532_v41  ;;  %v14748_v54 = vpop.permute.xlu0 %5815 }
 0xe5c   : > { %11353 = vmatmul.msk.f32.gmra.mxu2 %vm5203_vm13, %v5671_v48  ;;  %11350 = vmatmul.msk.f32.gmra.mxu1 %vm5203_vm13, %v5602_v55 }
 0xe63   : > { %11343 = vmatmul.msk.f32.gmra.mxu3 %vm5203_vm13, %v5483_v36  ;;  %11347 = vmatmul.msk.f32.gmra.mxu0 %vm5203_vm13, %v5533_v57 }
 0xe64   : > { %11354 = vmatmul.msk.f32.gmra.mxu2 %vm5203_vm13, %v5672_v58  ;;  %11351 = vmatmul.msk.f32.gmra.mxu1 %vm5203_vm13, %v5603_v60 }
 0xe6b   : > { %11356 = vmatmul.msk.f32.vlgmr.msra.gmra.mxu3 %vm5203_vm13, %v5740_v61 }
 0xe6c   : > { %11355 = vmatmul.msk.f32.gmra.mxu2 %vm5203_vm13, %v5673_v63 }
 0xe73   : > { %11357 = vmatmul.msk.f32.gmra.mxu3 %vm5203_vm13, %v5741_v0 }
 0xe7b   : > { %11358 = vmatmul.msk.f32.gmra.mxu3 %vm5203_vm13, %v5742_v31 }
 0xe83   : > { %11359 = vmatmul.msk.f32.gmra.mxu3 %vm5203_vm13, %v5743_v1 }
 0xea6   : > { %v5303_v62 = vpop.f32.mrf.mxu0 }
 0xea7   : > { %v5373_v43 = vpop.f32.mrf.mxu1  ;;  %5319 = vrot.lane.b32.xlu1 %v5303_v62, %s13310_s28 }
 0xea8   : > { %5389 = vrot.lane.b32.xlu2 %v5373_v43, %s13309_s4 }
 0xeac   : > { %v5233_v52 = vpop.f32.mrf.mxu3 }
 0xead   : > { %5249 = vrot.lane.b32.xlu0 %v5233_v52, %s13303_s7 }
 0xeb0   : > { %v5306_v32 = vpop.f32.mrf.mxu0 }
 0xeb1   : > { %v5376_v3 = vpop.f32.mrf.mxu1  ;;  %5321 = vrot.lane.b32.xlu2 %v5306_v32, %s13310_s28 }
 0xeb2   : > { %5391 = vrot.lane.b32.xlu1 %v5376_v3, %s13309_s4  ;;  %v5908_v3 = vld [vmem:[#allocation58 + $0x78] sm:$0xff] }
 0xeb3   : > { %5909 = vmatpush.msrb.mxu0 %v5908_v3 }
 0xeb6   : > { %v5236_v8 = vpop.f32.mrf.mxu3 }
 0xeb7   : > { %v5443_v12 = vpop.f32.mrf.mxu2 }
 0xeb8   : > { %5459 = vrot.lane.b32.xlu0 %v5443_v12, %s13291_s6  ;;  %v5309_v18 = vpop.f32.mrf.mxu0 }
 0xeb9   : > { %v5379_v19 = vpop.f32.mrf.mxu1 }
 0xeba   : > { %5251 = vrot.lane.b32.xlu1 %v5236_v8, %s13303_s7  ;;  %v6234_v8 = vld [vmem:[#allocation59 + $0x78] sm:$0xff] }
 0xebb   : > { %6235 = vmatpush.msrb.mxu3 %v6234_v8 }
 0xebe   : > { %v5239_v15 = vpop.f32.mrf.mxu3 }
 0xebf   : > { %v5446_v20 = vpop.f32.mrf.mxu2 }
 0xec0   : > { %5461 = vrot.lane.b32.xlu0 %v5446_v20, %s13291_s6  ;;  %v5312_v17 = vpop.f32.mrf.mxu0 }
 0xec1   : > { %v5382_v7 = vpop.f32.mrf.mxu1 }
 0xec2   : > { %5323 = vrot.lane.b32.xlu1 %v5309_v18, %s13310_s28 }
 0xec6   : > { %v5242_v30 = vpop.f32.mrf.mxu3 }
 0xec7   : > { %v5449_v22 = vpop.f32.mrf.mxu2 }
 0xec8   : > { %5253 = vrot.lane.b32.xlu0 %v5239_v15, %s13303_s7  ;;  %v5563_v2 = vpop.f32.mrf.mxu0  ;;  %v6233_v15 = vld [vmem:[#allocation59 + $0x70] sm:$0xff] }
 0xec9   : > { %v5633_v4 = vpop.f32.mrf.mxu1  ;;  %6236 = vmatpush.msrb.mxu3 %v6233_v15  ;;  %v5899_v15 = vld [vmem:[#allocation58 + $0x30] sm:$0xff] }
 0xeca   : > { %5649 = vrot.lane.b32.xlu2 %v5633_v4, %s13312_s5  ;;  %5393 = vrot.lane.b32.xlu1 %v5379_v19, %s13309_s4  ;;  %v5907_v19 = vld [vmem:[#allocation58 + $0x70] sm:$0xff] }
 0xecb   : > { %5910 = vmatpush.msrb.mxu0 %v5907_v19  ;;  %v6226_v19 = vld [vmem:[#allocation59 + $0x38] sm:$0xff] }
 0xece   : > { %v14720_v27 = vpop.f32.mrf.mxu3 }
 0xecf   : > { %v5452_v28 = vpop.f32.mrf.mxu2 }
 0xed0   : > { %5463 = vrot.lane.b32.xlu0 %v5449_v22, %s13291_s6  ;;  %v5566_v26 = vpop.f32.mrf.mxu0 }
 0xed1   : > { %v5636_v33 = vpop.f32.mrf.mxu1 }
 0xed2   : > { %5581 = vrot.lane.b32.xlu2 %v5566_v26, %s13292_s14  ;;  %5325 = vrot.lane.b32.xlu1 %v5312_v17, %s13310_s28 }
 0xed6   : > { %v14725_v6 = vpop.f32.mrf.mxu3 }
 0xed7   : > { %v5703_v29 = vpop.f32.mrf.mxu2 }
 0xed8   : > { %5255 = vrot.lane.b32.xlu0 %v5242_v30, %s13303_s7  ;;  %v5569_v11 = vpop.f32.mrf.mxu0  ;;  %v5906_v30 = vld [vmem:[#allocation58 + $0x68] sm:$0xff] }
 0xed9   : > { %v5639_v10 = vpop.f32.mrf.mxu1  ;;  %5911 = vmatpush.msrb.mxu0 %v5906_v30  ;;  %v6225_v30 = vld [vmem:[#allocation59 + $0x30] sm:$0xff] }
 0xeda   : > { %5651 = vrot.lane.b32.xlu2 %v5636_v33, %s13312_s5  ;;  %5395 = vrot.lane.b32.xlu1 %v5382_v7, %s13309_s4  ;;  %v6231_v33 = vld [vmem:[#allocation59 + $0x60] sm:$0xff] }
 0xede   : > { %v14730_v38 = vpop.f32.mrf.mxu3 }
 0xedf   : > { %v5706_v39 = vpop.f32.mrf.mxu2 }
 0xee0   : > { %5579 = vrot.lane.b32.xlu0 %v5563_v2, %s13292_s14  ;;  %v5572_v56 = vpop.f32.mrf.mxu0  ;;  %v6232_v2 = vld [vmem:[#allocation59 + $0x68] sm:$0xff] }
 0xee1   : > { %v5642_v44 = vpop.f32.mrf.mxu1  ;;  %6237 = vmatpush.msrb.mxu3 %v6232_v2  ;;  %v5898_v2 = vld [vmem:[#allocation58 + $0x28] sm:$0xff] }
 0xee2   : > { %5583 = vrot.lane.b32.xlu2 %v5569_v11, %s13292_s14  ;;  %5719 = vrot.lane.b32.xlu1 %v5703_v29, %s13311_s16 }
 0xee3   : > { %6238 = vmatpush.msrb.mxu3 %v6231_v33 }
 0xee6   : > { %v14735_v40 = vpop.f32.mrf.mxu3 }
 0xee7   : > { %v5709_v45 = vpop.f32.mrf.mxu2 }
 0xee8   : > { %5820 = vperm.xlu0 %11966, %v5810_v53  }
 0xeea   : > { %5653 = vrot.lane.b32.xlu2 %v5639_v10, %s13312_s5  ;;  %5721 = vrot.lane.b32.xlu1 %v5706_v39, %s13311_s16  ;;  %v5904_v10 = vld [vmem:[#allocation58 + $0x58] sm:$0xff] }
 0xeee   : > { %v5773_v42 = vpop.f32.mrf.mxu3 }
 0xeef   : > { %v5712_v47 = vpop.f32.mrf.mxu2 }
 0xef0   : > { %5465 = vrot.lane.b32.xlu0 %v5452_v28, %s13291_s6  ;;  %v5905_v28 = vld [vmem:[#allocation58 + $0x60] sm:$0xff] }
 0xef1   : > { %5912 = vmatpush.msrb.mxu0 %v5905_v28 }
 0xef2   : > { %5723 = vrot.lane.b32.xlu1 %v5709_v45, %s13311_s16  ;;  %5789 = vrot.lane.b32.xlu2 %v5773_v42, %s13305_s12  ;;  %v6230_v42 = vld [vmem:[#allocation59 + $0x58] sm:$0xff] }
 0xef3   : > { %5913 = vmatpush.msrb.mxu0 %v5904_v10  ;;  %6239 = vmatpush.msrb.mxu3 %v6230_v42  ;;  %v5897_v10 = vld [vmem:[#allocation58 + $0x20] sm:$0xff] }
 0xef6   : > { %v5776_v46 = vpop.f32.mrf.mxu3 }
 0xef8   : > { %5585 = vrot.lane.b32.xlu0 %v5572_v56, %s13292_s14 }
 0xefa   : > { %5825 = vperm.xlu1 %11978, %v5811_v35   ;;  %5791 = vrot.lane.b32.xlu2 %v5776_v46, %s13305_s12 }
 0xefe   : > { %v5779_v49 = vpop.f32.mrf.mxu3 }
 0xf00   : > { %5725 = vrot.lane.b32.xlu0 %v5712_v47, %s13311_s16  ;;  %v5903_v47 = vld [vmem:[#allocation58 + $0x50] sm:$0xff] }
 0xf01   : > { %5914 = vmatpush.msrb.mxu0 %v5903_v47  ;;  %v6222_v47 = vld [vmem:[#allocation59 + $0x18] sm:$0xff] }
 0xf02   : > { %5793 = vrot.lane.b32.xlu2 %v5779_v49, %s13305_s12  ;;  %v5390_v37 = vpop.permute.xlu2 %5389  ;;  %v6229_v49 = vld [vmem:[#allocation59 + $0x50] sm:$0xff] }
 0xf03   : > { %v5401_v29 = vsel %vm2031_vm1, 0.0, %v5390_v37  ;;  %6240 = vmatpush.msrb.mxu3 %v6229_v49  ;;  %v5902_v37 = vld [vmem:[#allocation58 + $0x48] sm:$0xff] }
 0xf04   : > { %5915 = vmatpush.msrb.mxu0 %v5902_v37  ;;  %v5895_v37 = vld [vmem:[#allocation58 + $0x10] sm:$0xff] }
 0xf06   : > { %v5782_v51 = vpop.f32.mrf.mxu3 }
 0xf07   : > { %5795 = vrot.lane.b32.xlu1 %v5782_v51, %s13305_s12 }
 0xf0a   : > { %5655 = vrot.lane.b32.xlu2 %v5642_v44, %s13312_s5 }
 0xf0b   : > { %v5322_v48 = vpop.permute.xlu2 %5321 }
 0xf0c   : > { %v5332_v4 = vsel %vm3041_vm11, 0.0, %v5322_v48 }
 0xf12   : > { %5830 = vperm.xlu2 %11977, %v5812_v34  }
 0xf19   : > { %v5320_v41 = vpop.permute.xlu1 %5319 }
 0xf1a   : > { %v5331_v12 = vsel %vm3041_vm11, 0.0, %v5320_v41  ;;  %v6228_v41 = vld [vmem:[#allocation59 + $0x48] sm:$0xff] }
 0xf1b   : > { %6241 = vmatpush.msrb.mxu3 %v6228_v41  ;;  %v6221_v41 = vld [vmem:[#allocation59 + $0x10] sm:$0xff] }
 0xf1f   : > { %v5250_v55 = vpop.permute.xlu0 %5249 }
 0xf20   : > { %v5261_v18 = vsel %vm3797_vm3, 0.0, %v5250_v55 }
 0xf21   : > { %v5335_v17 = vadd.f32 %v5331_v12, %v5261_v18  ;;  %v5900_v18 = vld [vmem:[#allocation58 + $0x38] sm:$0xff] }
 0xf23   : > { %v5405_v53 = vadd.f32 %v5401_v29, %v5335_v17 }
 0xf24   : > { %v5392_v36 = vpop.permute.xlu1 %5391  ;;  %v14750_v57 = vpop.permute.xlu2 %5649 }
 0xf25   : > { %v5402_v45 = vsel %vm2031_vm1, 0.0, %v5392_v36 }
 0xf2a   : > { %v5460_v58 = vpop.permute.xlu0 %5459 }
 0xf2b   : > { %v5471_v11 = vsel %vm2399_vm5, 0.0, %v5460_v58  ;;  %v5901_v58 = vld [vmem:[#allocation58 + $0x40] sm:$0xff] }
 0xf2c   : > { %v14752_v60 = vpop.permute.xlu2 %5581  ;;  %v5252_v61 = vpop.permute.xlu1 %5251  ;;  %v5475_v46 = vadd.f32 %v5471_v11, %v5405_v53  ;;  %5916 = vmatpush.msrb.mxu0 %v5901_v58 }
 0xf2d   : > { %v5262_v20 = vsel %vm3797_vm3, 0.0, %v5252_v61  ;;  %v6227_v61 = vld [vmem:[#allocation59 + $0x40] sm:$0xff] }
 0xf2e   : > { %v5336_v22 = vadd.f32 %v5332_v4, %v5262_v20  ;;  %v5525_v36 = vadd.f32 %v14720_v27, %v5475_v46  ;;  %6242 = vmatpush.msrb.mxu3 %v6227_v61  ;;  %v5661_v20 = vsel %vm5009_vm12, %v14750_v57, 0.0  ;;  %v5592_v27 = vsel %vm2575_vm6, %v14752_v60, 0.0  ;;  %5917 = vmatpush.msrb.mxu0 %v5900_v18  ;;  %v6224_v4 = vld [vmem:[#allocation59 + $0x28] sm:$0xff]  ;;  %v5893_v61 = vld [vmem:[#allocation58] sm:$0xff] }
 0xf30   : > { %v5406_v35 = vadd.f32 %v5402_v45, %v5336_v22  ;;  %6243 = vmatpush.msrb.mxu3 %v6226_v19  ;;  %5918 = vmatpush.msrb.mxu0 %v5899_v15 }
 0xf32   : > { %v5462_v63 = vpop.permute.xlu0 %5461  ;;  %6244 = vmatpush.msrb.mxu3 %v6225_v30  ;;  %5919 = vmatpush.msrb.mxu0 %v5898_v2 }
 0xf33   : > { %v5472_v56 = vsel %vm2399_vm5, 0.0, %v5462_v63 }
 0xf34   : > { %v14754_v0 = vpop.permute.xlu2 %5651  ;;  %v5324_v31 = vpop.permute.xlu1 %5323  ;;  %v5476_v51 = vadd.f32 %v5472_v56, %v5406_v35  ;;  %6245 = vmatpush.msrb.mxu3 %v6224_v4  ;;  %5920 = vmatpush.msrb.mxu0 %v5897_v10  ;;  %v5896_v35 = vld [vmem:[#allocation58 + $0x18] sm:$0xff] }
 0xf35   : > { %v5333_v44 = vsel %vm3041_vm11, 0.0, %v5324_v31  ;;  %v5662_v57 = vsel %vm5009_vm12, %v14754_v0, 0.0 }
 0xf36   : > { %v5526_v8 = vadd.f32 %v14725_v6, %v5476_v51  ;;  %5921 = vmatpush.msrb.mxu0 %v5896_v35 }
 0xf38   : > { %v5596_v28 = vadd.f32 %v5592_v27, %v5526_v8  ;;  %5922 = vmatpush.msrb.mxu0 %v5895_v37 }
 0xf3a   : > { %v5254_v1 = vpop.permute.xlu0 %5253  ;;  %v5666_v42 = vadd.f32 %v5662_v57, %v5596_v28 }
 0xf3b   : > { %v5263_v34 = vsel %vm3797_vm3, 0.0, %v5254_v1 }
 0xf3c   : > { %v5394_v62 = vpop.permute.xlu1 %5393  ;;  %v14756_v43 = vpop.permute.xlu2 %5583  ;;  %v5337_v63 = vadd.f32 %v5333_v44, %v5263_v34 }
 0xf3d   : > { %v5403_v31 = vsel %vm2031_vm1, 0.0, %v5394_v62  ;;  %v5593_v51 = vsel %vm2575_vm6, %v14756_v43, 0.0 }
 0xf3e   : > { %v5407_v22 = vadd.f32 %v5403_v31, %v5337_v63  ;;  %v6219_v63 = vld [vmem:[#allocation59] sm:$0xff] }
 0xf42   : > { %v14758_v52 = vpop.permute.xlu0 %5463 }
 0xf43   : > { %v5473_v6 = vsel %vm2399_vm5, 0.0, %v14758_v52  ;;  %v6223_v52 = vld [vmem:[#allocation59 + $0x20] sm:$0xff] }
 0xf44   : > { %v14760_v32 = vpop.permute.xlu1 %5325  ;;  %v14765_v7 = vpop.permute.xlu2 %5653  ;;  %v5477_v60 = vadd.f32 %v5473_v6, %v5407_v22  ;;  %6246 = vmatpush.msrb.mxu3 %v6223_v52 }
 0xf45   : > { %v5663_v43 = vsel %vm5009_vm12, %v14765_v7, 0.0  ;;  %v5334_v15 = vsel %vm3041_vm11, 0.0, %v14760_v32 }
 0xf46   : > { %v5527_v0 = vadd.f32 %v14730_v38, %v5477_v60  ;;  %6247 = vmatpush.msrb.mxu3 %v6222_v47  ;;  %v5894_v38 = vld [vmem:[#allocation58 + $0x8] sm:$0xff] }
 0xf47   : > { %5923 = vmatpush.msrb.mxu0 %v5894_v38 }
 0xf48   : > { %6248 = vmatpush.msrb.mxu3 %v6221_v41  ;;  %v5597_v58 = vadd.f32 %v5593_v51, %v5527_v0 }
 0xf49   : > { %5924 = vmatpush.msrb.mxu0 %v5893_v61  ;;  %v5954_v61 = vld [vmem:[#allocation26 + $0x38] sm:$0xff] }
 0xf4a   : > { %v14768_v26 = vpop.permute.xlu0 %5255  ;;  %v5667_v18 = vadd.f32 %v5663_v43, %v5597_v58  ;;  %v5950_v58 = vld [vmem:[#allocation26 + $0x18] sm:$0xff]  ;;  %v5951_v43 = vld [vmem:[#allocation26 + $0x20] sm:$0xff] }
 0xf4b   : > { %v5264_v31 = vsel %vm3797_vm3, 0.0, %v14768_v26 }
 0xf4c   : > { %v14772_v39 = vpop.permute.xlu1 %5395  ;;  %v5790_v48 = vpop.permute.xlu2 %5789 }
 0xf4d   : > { %v5801_v29 = vsel %vm3964_vm2, %v5790_v48, 0.0  ;;  %v5404_v30 = vsel %vm2031_vm1, 0.0, %v14772_v39 }
 0xf52   : > { %v5580_v55 = vpop.permute.xlu0 %5579 }
 0xf53   : > { %v5591_v3 = vsel %vm2575_vm6, %v5580_v55, 0.0 }
 0xf54   : > { %v5595_v1 = vadd.f32 %v5591_v3, %v5525_v36  ;;  %v5720_v12 = vpop.permute.xlu1 %5719  ;;  %v5792_v56 = vpop.permute.xlu2 %5791  ;;  %v6220_v36 = vld [vmem:[#allocation59 + $0x8] sm:$0xff] }
 0xf55   : > { %v5731_v17 = vsel %vm5080_vm14, %v5720_v12, 0.0  ;;  %v5802_v48 = vsel %vm3964_vm2, %v5792_v56, 0.0  ;;  %6249 = vmatpush.msrb.mxu3 %v6220_v36 }
 0xf56   : > { %v5665_v62 = vadd.f32 %v5661_v20, %v5595_v1  ;;  %v5338_v20 = vadd.f32 %v5334_v15, %v5264_v31  ;;  %v7494_v15 = vld [vmem:[#allocation34] sm:$0xff] }
 0xf57   : > { %6250 = vmatpush.msrb.mxu3 %v6219_v63  ;;  %v5947_v63 = vld [vmem:[#allocation26] sm:$0xff] }
 0xf58   : > { %v5735_v33 = vadd.f32 %v5731_v17, %v5665_v62  ;;  %v5408_v2 = vadd.f32 %v5404_v30, %v5338_v20  ;;  %v5952_v20 = vld [vmem:[#allocation26 + $0x28] sm:$0xff]  ;;  %v6096_v30 = vld [vmem:[#allocation29 + $0x38] sm:$0xff] }
 0xf5a   : > { %v5805_v11 = vadd.f32 %v5801_v29, %v5735_v33  ;;  %v5821_v53 = vpop.permute.xlu0 %5820 }
 0xf5c   : > { %v5833_v45 = vadd.f32 %v14748_v54, %v5805_v11  ;;  %v5722_v46 = vpop.permute.xlu1 %5721  ;;  %v5794_v27 = vpop.permute.xlu2 %5793 }
 0xf5d   : > { %v5732_v49 = vsel %vm5080_vm14, %v5722_v46, 0.0  ;;  %v5803_v26 = vsel %vm3964_vm2, %v5794_v27, 0.0  ;;  %v6093_v27 = vld [vmem:[#allocation29 + $0x20] sm:$0xff] }
 0xf5e   : > { %v5837_v44 = vmax.f32 %v5833_v45, 0.0  ;;  %v5736_v34 = vadd.f32 %v5732_v49, %v5666_v42 }
 0xf60   : > { %v14799_v54 = vmul.f32 %v14666_v50, %v5837_v44  ;;  %v5806_v55 = vadd.f32 %v5802_v48, %v5736_v34  ;;  %v5953_v48 = vld [vmem:[#allocation26 + $0x30] sm:$0xff] }
 0xf62   : > { %v5834_v3 = vadd.f32 %v5821_v53, %v5806_v55  ;;  %v5466_v8 = vpop.permute.xlu0 %5465  ;;  %5849 = vrot.lane.b32.xlu0 %v14799_v54, %s13292_s14 }
 0xf63   : > { %v5474_v6 = vsel %vm2399_vm5, 0.0, %v5466_v8  ;;  %v5948_v8 = vld [vmem:[#allocation26 + $0x8] sm:$0xff] }
 0xf64   : > { %v5838_v1 = vmax.f32 %v5834_v3, 0.0  ;;  %v5724_v12 = vpop.permute.xlu1 %5723  ;;  %v5478_v22 = vadd.f32 %v5474_v6, %v5408_v2  ;;  %v5656_v29 = vpop.permute.xlu2 %5655  ;;  %v6091_v3 = vld [vmem:[#allocation29 + $0x10] sm:$0xff]  ;;  %v7495_v6 = vld [vmem:[#allocation34 + $0x8] sm:$0xff] }
 0xf65   : > { %v5733_v19 = vsel %vm5080_vm14, %v5724_v12, 0.0  ;;  %v5664_v10 = vsel %vm5009_vm12, %v5656_v29, 0.0  ;;  %v6094_v12 = vld [vmem:[#allocation29 + $0x28] sm:$0xff]  ;;  %v6095_v2 = vld [vmem:[#allocation29 + $0x30] sm:$0xff] }
 0xf66   : > { %v14811_v7 = vmul.f32 %v14666_v50, %v5838_v1  ;;  %v5737_v17 = vadd.f32 %v5733_v19, %v5667_v18  ;;  %v5528_v60 = vadd.f32 %v14735_v40, %v5478_v22  ;;  %v6090_v19 = vld [vmem:[#allocation29 + $0x8] sm:$0xff] }
 0xf68   : > { %5851 = vrot.lane.b32.xlu1 %v14811_v7, %s13292_s14  ;;  %v5807_v4 = vadd.f32 %v5803_v26, %v5737_v17  ;;  %v5949_v17 = vld [vmem:[#allocation26 + $0x10] sm:$0xff]  ;;  %v6089_v26 = vld [vmem:[#allocation29] sm:$0xff] }
 0xf6a   : > { %v5586_v62 = vpop.permute.xlu0 %5585 }
 0xf6b   : > { %v5594_v57 = vsel %vm2575_vm6, %v5586_v62, 0.0  ;;  %v6092_v62 = vld [vmem:[#allocation29 + $0x18] sm:$0xff] }
 0xf6c   : > { %v5826_v32 = vpop.permute.xlu1 %5825  ;;  %v5598_v11 = vadd.f32 %v5594_v57, %v5528_v60  ;;  %v5831_v40 = vpop.permute.xlu2 %5830 }
 0xf6d   : > { %v5835_v28 = vadd.f32 %v5826_v32, %v5807_v4 }
 0xf6e   : > { %v5668_v42 = vadd.f32 %v5664_v10, %v5598_v11 }
 0xf6f   : > { %v5839_v33 = vmax.f32 %v5835_v28, 0.0 }
 0xf71   : > { %v14822_v39 = vmul.f32 %v14666_v50, %v5839_v33 }
 0xf72   : > { %v5726_v53 = vpop.permute.xlu0 %5725 }
 0xf73   : > { %5853 = vrot.lane.b32.xlu2 %v14822_v39, %s13292_s14  ;;  %v5734_v52 = vsel %vm5080_vm14, %v5726_v53, 0.0 }
 0xf74   : > { %v5738_v45 = vadd.f32 %v5734_v52, %v5668_v42  ;;  %v6276_v42 = vld [vmem:[#allocation31] sm:$0xff] }
 0xf79   : > { %v5796_v56 = vpop.permute.xlu1 %5795 }
 0xf7a   : > { %v5804_v46 = vsel %vm3964_vm2, %v5796_v56, 0.0 }
 0xf7b   : > { %v5808_v35 = vadd.f32 %v5804_v46, %v5738_v45 }
 0xf7d   : > { %v5836_v47 = vadd.f32 %v5831_v40, %v5808_v35  ;;  %v5939_v40 = vld [vmem:[#allocation25 + $0x100] sm:$0xff] }
 0xf7f   : > { %v5840_v0 = vmax.f32 %v5836_v47, 0.0  ;;  %v5940_v47 = vld [vmem:[#allocation25 + $0x108] sm:$0xff] }
 0xf81   : > { %v14830_v49 = vmul.f32 %v14666_v50, %v5840_v0  ;;  %v5941_v0 = vld [vmem:[#allocation25 + $0x110] sm:$0xff] }
 0xf83   : > { %5855 = vrot.lane.b32.xlu0 %v14830_v49, %s13292_s14  ;;  %6304 = vmatpush.msra.mxu0 %v14830_v49 }
 0xf84   : > { %6584 = vmatpush.msra.mxu3 %v14830_v49 }
 0xf85   : > { %6305 = vmatpush.msra.mxu0 %v14822_v39 }
 0xf86   : > { %6585 = vmatpush.msra.mxu3 %v14822_v39 }
 0xf87   : > { %6306 = vmatpush.msra.mxu0 %v14811_v7 }
 0xf88   : > { %6586 = vmatpush.msra.mxu3 %v14811_v7 }
 0xf89   : > { %6307 = vmatpush.msra.mxu0 %v14799_v54 }
 0xf8a   : > { %6587 = vmatpush.msra.mxu3 %v14799_v54 }
 0xfcd   : > { %v5854_v50 = vpop.permute.xlu2 %5853 }
 0xfce   : > { %v5863_v51 = vsel %vm2575_vm6, %v5854_v50, 0.0  ;;  %v5942_v50 = vld [vmem:[#allocation25 + $0x118] sm:$0xff] }
 0xfcf   : > { %v14844_v44 = vmax.f32 %v14822_v39, %v5863_v51  ;;  %v5943_v51 = vld [vmem:[#allocation25 + $0x120] sm:$0xff] }
 0xfd1   : > { %5877 = vrot.lane.b32.xlu0 %v14844_v44, %s13311_s16 }
 0xfd4   : > { %v5850_v34 = vpop.permute.xlu0 %5849 }
 0xfd5   : > { %v5861_v37 = vsel %vm2575_vm6, %v5850_v34, 0.0  ;;  %v5945_v34 = vld [vmem:[#allocation25 + $0x130] sm:$0xff] }
 0xfd6   : > { %v5865_v41 = vmax.f32 %v14799_v54, %v5861_v37  ;;  %v5946_v37 = vld [vmem:[#allocation25 + $0x138] sm:$0xff] }
 0xfd8   : > { %5873 = vrot.lane.b32.xlu1 %v5865_v41, %s13311_s16 }
 0xfd9   : > { %5987 = vperm.xlu0 %11966, %v5953_v48  }
 0xfda   : > { %v5852_v55 = vpop.permute.xlu1 %5851 }
 0xfdb   : > { %v5862_v38 = vsel %vm2575_vm6, %v5852_v55, 0.0 }
 0xfdc   : > { %v5866_v36 = vmax.f32 %v14811_v7, %v5862_v38 }
 0xfde   : > { %5875 = vrot.lane.b32.xlu2 %v5866_v36, %s13311_s16 }
 0xfe1   : > { %5972 = vperm.xlu0 %11966, %v5950_v58  }
 0xfe6   : > { %5992 = vperm.xlu2 %11977, %v5954_v61  }
 0xfe9   : > { %5957 = vperm.xlu0 %11966, %v5947_v63  }
 0xfee   : > { %5977 = vperm.xlu2 %11977, %v5951_v43  }
 0xff1   : > { %6109 = vperm.xlu0 %11966, %v6091_v3  }
 0xff5   : > { %v5856_v31 = vpop.permute.xlu0 %5855 }
 0xff6   : > { %5962 = vperm.xlu2 %11977, %v5948_v8   ;;  %v5864_v1 = vsel %vm2575_vm6, %v5856_v31, 0.0 }
 0xff7   : > { %v5868_v18 = vmax.f32 %v14830_v49, %v5864_v1 }
 0xff9   : > { %6124 = vperm.xlu0 %11966, %v6094_v12   ;;  %5879 = vrot.lane.b32.xlu1 %v5868_v18, %s13311_s16 }
 0xffe   : > { %6104 = vperm.xlu2 %11977, %v6090_v19  }
0x1001   : > { %7500 = vperm.xlu0 %11966, %v7494_v15   ;;  %5982 = vperm.xlu1 %11978, %v5952_v20  }
0x1006   : > { %6119 = vperm.xlu2 %11977, %v6093_v27  }
0x1009   : > { %5967 = vperm.xlu1 %11978, %v5949_v17   ;;  %v14887_v17 = vld [vmem:[#allocation52] ss:$0 sm:$0xff] }
0x100e   : > { %6134 = vperm.xlu2 %11977, %v6096_v30  }
0x1011   : > { %6099 = vperm.xlu1 %11978, %v6089_v26  }
0x1016   : > { %7505 = vperm.xlu2 %11977, %v7495_v6  }
0x1019   : > { %6114 = vperm.xlu1 %11978, %v6092_v62  }
0x1021   : > { %6129 = vperm.xlu1 %11978, %v6095_v2  }
0x1038   : > { %v5876_v28 = vpop.permute.xlu2 %5875 }
0x1039   : > { %v5886_v33 = vsel %vm5080_vm14, %v5876_v28, 0.0 }
0x103a   : > { %v5890_v57 = vmax.f32 %v5866_v36, %v5886_v33 }
0x1040   : > { %v5993_v61 = vpop.permute.xlu2 %5992 }
0x1043   : > { %v5878_v60 = vpop.permute.xlu0 %5877 }
0x1044   : > { %v5887_v29 = vsel %vm5080_vm14, %v5878_v60, 0.0 }
0x1045   : > { %v5891_v11 = vmax.f32 %v14844_v44, %v5887_v29  ;;  %v5944_v44 = vld [vmem:[#allocation25 + $0x128] sm:$0xff] }
0x1048   : > { %v5978_v8 = vpop.permute.xlu2 %5977 }
0x104a   : > { %v5874_v4 = vpop.permute.xlu1 %5873 }
0x104b   : > { %v5885_v32 = vsel %vm5080_vm14, %v5874_v4, 0.0  ;;  %v5988_v63 = vpop.permute.xlu0 %5987 }
0x104c   : > { %v5889_v22 = vmax.f32 %v5865_v41, %v5885_v32 }
0x104e   : > { %5925 = vmatmul.f32.vlgmr.msrb.gmra.mxu0 %v5889_v22 }
0x104f   : > { %6374 = vmatpush.msrb.mxu0 %v14830_v49 }
0x1050   : > { %v5963_v22 = vpop.permute.xlu2 %5962 }
0x1051   : > { %6375 = vmatpush.msrb.mxu0 %v14822_v39 }
0x1053   : > { %6376 = vmatpush.msrb.mxu0 %v14811_v7  ;;  %v5973_v1 = vpop.permute.xlu0 %5972 }
0x1055   : > { %6377 = vmatpush.msrb.mxu0 %v14799_v54 }
0x1056   : > { %5928 = vmatmul.f32.gmra.mxu0 %v5890_v57 }
0x105b   : > { %v5958_v60 = vpop.permute.xlu0 %5957 }
0x105e   : > { %5931 = vmatmul.f32.gmra.mxu0 %v5891_v11 }
0x106b   : > { %v5880_v53 = vpop.permute.xlu1 %5879 }
0x106c   : > { %v5888_v10 = vsel %vm5080_vm14, %v5880_v53, 0.0 }
0x106d   : > { %v5892_v52 = vmax.f32 %v5868_v18, %v5888_v10 }
0x106f   : > { %5934 = vmatmul.f32.gmra.mxu0 %v5892_v52 }
0x1073   : > { %v5983_v3 = vpop.permute.xlu1 %5982 }
0x1077   : > { %11376 = vmatmul.msk.f32.vlgmr.msra.gmra.mxu0 %vm5203_vm13, %v6276_v42 }
0x1078   : > { %6634 = vmatpush.msra.mxu0 %v14830_v49 }
0x107a   : > { %6635 = vmatpush.msra.mxu0 %v14822_v39 }
0x107b   : > { %v5968_v62 = vpop.permute.xlu1 %5967 }
0x107c   : > { %6636 = vmatpush.msra.mxu0 %v14811_v7 }
0x107e   : > { %6637 = vmatpush.msra.mxu0 %v14799_v54 }
0x10cb   : > { %v5926_v45 = vpop.f32.mrf.mxu0 }
0x10d3   : > { %v5929_v56 = vpop.f32.mrf.mxu0 }
0x10db   : > { %v5932_v46 = vpop.f32.mrf.mxu0 }
0x10ec   : > { %v5935_v35 = vpop.f32.mrf.mxu0 }
0x10ed   : > { %6031 = vmatpush.msra.mxu1 %v5935_v35  ;;  %v6081_v35 = vld [vmem:[#allocation28 + $0x100] sm:$0xff] }
0x10ef   : > { %6032 = vmatpush.msra.mxu1 %v5932_v46 }
0x10f1   : > { %6033 = vmatpush.msra.mxu1 %v5929_v56 }
0x10f3   : > { %6034 = vmatpush.msra.mxu1 %v5926_v45 }
0x10f4   : > { %11360 = vmatmul.msk.f32.vlgmr.msra.gmra.mxu1 %vm5203_vm13, %v5939_v40  ;;  %v6082_v40 = vld [vmem:[#allocation28 + $0x108] sm:$0xff] }
0x10f5   : > { %6444 = vmatpush.msrb.mxu1 %v14830_v49 }
0x10f7   : > { %6445 = vmatpush.msrb.mxu1 %v14822_v39 }
0x10f9   : > { %6446 = vmatpush.msrb.mxu1 %v14811_v7 }
0x10fb   : > { %6447 = vmatpush.msrb.mxu1 %v14799_v54 }
0x10fc   : > { %11361 = vmatmul.msk.f32.gmra.mxu1 %vm5203_vm13, %v5940_v47  ;;  %v6083_v47 = vld [vmem:[#allocation28 + $0x110] sm:$0xff] }
0x10fd   : > { %6704 = vmatpush.msra.mxu1 %v14830_v49 }
0x10ff   : > { %6705 = vmatpush.msra.mxu1 %v14822_v39 }
0x1101   : > { %6706 = vmatpush.msra.mxu1 %v14811_v7 }
0x1103   : > { %6707 = vmatpush.msra.mxu1 %v14799_v54 }
0x1104   : > { %11362 = vmatmul.msk.f32.gmra.mxu1 %vm5203_vm13, %v5941_v0  ;;  %v6084_v0 = vld [vmem:[#allocation28 + $0x118] sm:$0xff] }
0x110c   : > { %11363 = vmatmul.msk.f32.gmra.mxu1 %vm5203_vm13, %v5942_v50  ;;  %v6277_v50 = vld [vmem:[#allocation31 + $0x8] sm:$0xff] }
0x110d   : > { %11377 = vmatmul.msk.f32.gmra.mxu0 %vm5203_vm13, %v6277_v50 }
0x1114   : > { %11364 = vmatmul.msk.f32.gmra.mxu1 %vm5203_vm13, %v5943_v51  ;;  %v6416_v51 = vld [vmem:[#allocation31 + $0x40] sm:$0xff] }
0x111c   : > { %11365 = vmatmul.msk.f32.gmra.mxu1 %vm5203_vm13, %v5944_v44  ;;  %v6085_v44 = vld [vmem:[#allocation28 + $0x120] sm:$0xff] }
0x1124   : > { %11366 = vmatmul.msk.f32.gmra.mxu1 %vm5203_vm13, %v5945_v34  ;;  %v6278_v34 = vld [vmem:[#allocation31 + $0x10] sm:$0xff] }
0x1125   : > { %11378 = vmatmul.msk.f32.gmra.mxu0 %vm5203_vm13, %v6278_v34 }
0x112c   : > { %11367 = vmatmul.msk.f32.gmra.mxu1 %vm5203_vm13, %v5946_v37  ;;  %v6086_v37 = vld [vmem:[#allocation28 + $0x128] sm:$0xff] }
0x1134   : > { %11384 = vmatmul.msk.f32.vlgmr.msrb.gmra.mxu1 %vm5203_vm13, %v6416_v51  ;;  %v6749_v51 = vld [vmem:[#allocation31 + $0xf8] sm:$0xff] }
0x1171   : > { %v6036_v41 = vpop.f32.mrf.mxu1 }
0x1172   : > { %v6037_v29 = vadd.f32 %v6036_v41, %v5958_v60  ;;  %v6279_v41 = vld [vmem:[#allocation31 + $0x18] sm:$0xff]  ;;  %v6746_v60 = vld [vmem:[#allocation31 + $0xe0] sm:$0xff] }
0x1173   : > { %11379 = vmatmul.msk.f32.gmra.mxu0 %vm5203_vm13, %v6279_v41 }
0x1174   : > { %v6060_v42 = vmax.f32 %v6037_v29, 0.0 }
0x1176   : > { %v6072_v46 = vmul.f32 %v14887_v17, %v6060_v42 }
0x1179   : > { %v6039_v48 = vpop.f32.mrf.mxu1 }
0x117a   : > { %v6040_v28 = vadd.f32 %v6039_v48, %v5963_v22  ;;  %v6087_v48 = vld [vmem:[#allocation28 + $0x130] sm:$0xff] }
0x117c   : > { %v6061_v10 = vmax.f32 %v6040_v28, 0.0  ;;  %v6105_v28 = vpop.permute.xlu2 %6104 }
0x117e   : > { %v6073_v56 = vmul.f32 %v14887_v17, %v6061_v10 }
0x1181   : > { %v6042_v55 = vpop.f32.mrf.mxu1 }
0x1182   : > { %v6043_v2 = vadd.f32 %v6042_v55, %v5968_v62  ;;  %v6346_v55 = vld [vmem:[#allocation31 + $0x20] sm:$0xff] }
0x1183   : > { %11380 = vmatmul.msk.f32.vlgmr.msrb.gmra.mxu0 %vm5203_vm13, %v6346_v55 }
0x1184   : > { %v6062_v11 = vmax.f32 %v6043_v2, 0.0  ;;  %v6679_v2 = vld [vmem:[#allocation31 + $0xd8] sm:$0xff] }
0x1186   : > { %v6074_v45 = vmul.f32 %v14887_v17, %v6062_v11 }
0x1189   : > { %v6045_v38 = vpop.f32.mrf.mxu1 }
0x118a   : > { %v6046_v30 = vadd.f32 %v6045_v38, %v5973_v1  ;;  %v6088_v38 = vld [vmem:[#allocation28 + $0x138] sm:$0xff]  ;;  %v6676_v1 = vld [vmem:[#allocation31 + $0xc0] sm:$0xff] }
0x118c   : > { %v6063_v33 = vmax.f32 %v6046_v30, 0.0  ;;  %v6488_v30 = vld [vmem:[#allocation31 + $0x70] sm:$0xff] }
0x118e   : > { %v6075_v52 = vmul.f32 %v14887_v17, %v6063_v33 }
0x1191   : > { %v6048_v36 = vpop.f32.mrf.mxu1 }
0x1192   : > { %v6049_v15 = vadd.f32 %v6048_v36, %v5978_v8  ;;  %v6347_v36 = vld [vmem:[#allocation31 + $0x28] sm:$0xff]  ;;  %v6606_v8 = vld [vmem:[#allocation31 + $0xa0] sm:$0xff] }
0x1193   : > { %11381 = vmatmul.msk.f32.gmra.mxu0 %vm5203_vm13, %v6347_v36 }
0x1194   : > { %v6064_v4 = vmax.f32 %v6049_v15, 0.0  ;;  %v6487_v15 = vld [vmem:[#allocation31 + $0x68] sm:$0xff] }
0x1196   : > { %v6076_v53 = vmul.f32 %v14887_v17, %v6064_v4 }
0x1199   : > { %v6051_v58 = vpop.f32.mrf.mxu1 }
0x119a   : > { %v6052_v18 = vadd.f32 %v6051_v58, %v5983_v3  ;;  %v6348_v58 = vld [vmem:[#allocation31 + $0x30] sm:$0xff]  ;;  %v6419_v3 = vld [vmem:[#allocation31 + $0x58] sm:$0xff] }
0x119b   : > { %11382 = vmatmul.msk.f32.gmra.mxu0 %vm5203_vm13, %v6348_v58 }
0x119c   : > { %v6065_v26 = vmax.f32 %v6052_v18, 0.0  ;;  %v6608_v18 = vld [vmem:[#allocation31 + $0xb0] sm:$0xff] }
0x119e   : > { %v6077_v57 = vmul.f32 %v14887_v17, %v6065_v26  ;;  %v6100_v26 = vpop.permute.xlu1 %6099 }
0x11a1   : > { %v6054_v43 = vpop.f32.mrf.mxu1 }
0x11a2   : > { %v6055_v31 = vadd.f32 %v6054_v43, %v5988_v63  ;;  %v6349_v63 = vld [vmem:[#allocation31 + $0x38] sm:$0xff]  ;;  %v6418_v43 = vld [vmem:[#allocation31 + $0x50] sm:$0xff] }
0x11a3   : > { %11383 = vmatmul.msk.f32.gmra.mxu0 %vm5203_vm13, %v6349_v63 }
0x11a4   : > { %v6066_v20 = vmax.f32 %v6055_v31, 0.0  ;;  %v6607_v31 = vld [vmem:[#allocation31 + $0xa8] sm:$0xff] }
0x11a6   : > { %v6078_v32 = vmul.f32 %v14887_v17, %v6066_v20  ;;  %v6609_v20 = vld [vmem:[#allocation31 + $0xb8] sm:$0xff] }
0x11a9   : > { %v6057_v12 = vpop.f32.mrf.mxu1 }
0x11aa   : > { %v6058_v19 = vadd.f32 %v6057_v12, %v5993_v61  ;;  %v6417_v61 = vld [vmem:[#allocation31 + $0x48] sm:$0xff]  ;;  %v6486_v12 = vld [vmem:[#allocation31 + $0x60] sm:$0xff] }
0x11ab   : > { %11385 = vmatmul.msk.f32.gmra.mxu1 %vm5203_vm13, %v6417_v61  ;;  %11396 = vmatmul.msk.f32.vlgmr.msra.gmra.mxu0 %vm5203_vm13, %v6606_v8 }
0x11ac   : > { %v6067_v27 = vmax.f32 %v6058_v19, 0.0  ;;  %v6677_v19 = vld [vmem:[#allocation31 + $0xc8] sm:$0xff] }
0x11ae   : > { %v6079_v6 = vmul.f32 %v14887_v17, %v6067_v27  ;;  %v6678_v27 = vld [vmem:[#allocation31 + $0xd0] sm:$0xff] }
0x11b0   : > { %6170 = vmatpush.msra.mxu2 %v6079_v6 }
0x11b2   : > { %6171 = vmatpush.msra.mxu2 %v6078_v32  ;;  %v6489_v32 = vld [vmem:[#allocation31 + $0x78] sm:$0xff] }
0x11b3   : > { %11386 = vmatmul.msk.f32.gmra.mxu1 %vm5203_vm13, %v6418_v43  ;;  %11397 = vmatmul.msk.f32.gmra.mxu0 %vm5203_vm13, %v6607_v31 }
0x11b4   : > { %6172 = vmatpush.msra.mxu2 %v6077_v57 }
0x11b6   : > { %6173 = vmatpush.msra.mxu2 %v6076_v53  ;;  %v6110_v53 = vpop.permute.xlu0 %6109 }
0x11b8   : > { %6174 = vmatpush.msra.mxu2 %v6075_v52 }
0x11ba   : > { %6175 = vmatpush.msra.mxu2 %v6074_v45  ;;  %v6115_v45 = vpop.permute.xlu1 %6114 }
0x11bb   : > { %11387 = vmatmul.msk.f32.gmra.mxu1 %vm5203_vm13, %v6419_v3  ;;  %11398 = vmatmul.msk.f32.gmra.mxu0 %vm5203_vm13, %v6608_v18 }
0x11bc   : > { %6176 = vmatpush.msra.mxu2 %v6073_v56 }
0x11be   : > { %6177 = vmatpush.msra.mxu2 %v6072_v46  ;;  %v6748_v46 = vld [vmem:[#allocation31 + $0xf0] sm:$0xff]  ;;  %v6125_v41 = vpop.permute.xlu0 %6124 }
0x11bf   : > { %11368 = vmatmul.msk.f32.vlgmr.msra.gmra.mxu2 %vm6137_vm10, %v6081_v35 }
0x11c0   : > { %6514 = vmatpush.msrb.mxu2 %v14830_v49 }
0x11c2   : > { %6515 = vmatpush.msrb.mxu2 %v14822_v39  ;;  %v6130_v61 = vpop.permute.xlu1 %6129 }
0x11c3   : > { %11400 = vmatmul.msk.f32.vlgmr.msra.gmra.mxu1 %vm5203_vm13, %v6676_v1  ;;  %11399 = vmatmul.msk.f32.gmra.mxu0 %vm5203_vm13, %v6609_v20 }
0x11c4   : > { %6516 = vmatpush.msrb.mxu2 %v14811_v7 }
0x11c6   : > { %6517 = vmatpush.msrb.mxu2 %v14799_v54 }
0x11c7   : > { %11369 = vmatmul.msk.f32.gmra.mxu2 %vm6137_vm10, %v6082_v40  ;;  %v6309_v40 = vpop.f32.mrf.mxu0 }
0x11c8   : > { %6774 = vmatpush.msra.mxu2 %v14830_v49  ;;  %6325 = vrot.lane.b32.xlu0 %v6309_v40, %s13303_s7 }
0x11ca   : > { %6775 = vmatpush.msra.mxu2 %v14822_v39 }
0x11cb   : > { %11401 = vmatmul.msk.f32.gmra.mxu1 %vm5203_vm13, %v6677_v19 }
0x11cc   : > { %6776 = vmatpush.msra.mxu2 %v14811_v7 }
0x11ce   : > { %6777 = vmatpush.msra.mxu2 %v14799_v54 }
0x11cf   : > { %11370 = vmatmul.msk.f32.gmra.mxu2 %vm6137_vm10, %v6083_v47  ;;  %v6120_v47 = vpop.permute.xlu2 %6119 }
0x11d3   : > { %11402 = vmatmul.msk.f32.gmra.mxu1 %vm5203_vm13, %v6678_v27  ;;  %v6556_v27 = vld [vmem:[#allocation31 + $0x80] sm:$0xff] }
0x11d7   : > { %11371 = vmatmul.msk.f32.gmra.mxu2 %vm6137_vm10, %v6084_v0  ;;  %v6135_v1 = vpop.permute.xlu2 %6134 }
0x11db   : > { %11403 = vmatmul.msk.f32.gmra.mxu1 %vm5203_vm13, %v6679_v2 }
0x11df   : > { %11372 = vmatmul.msk.f32.gmra.mxu2 %vm6137_vm10, %v6085_v44 }
0x11e7   : > { %11373 = vmatmul.msk.f32.gmra.mxu2 %vm6137_vm10, %v6086_v37  ;;  %v6312_v37 = vpop.f32.mrf.mxu0 }
0x11e8   : > { %6327 = vrot.lane.b32.xlu1 %v6312_v37, %s13303_s7 }
0x11ef   : > { %11374 = vmatmul.msk.f32.gmra.mxu2 %vm6137_vm10, %v6087_v48  ;;  %v6315_v58 = vpop.f32.mrf.mxu0 }
0x11f0   : > { %6329 = vrot.lane.b32.xlu0 %v6315_v58, %s13303_s7  ;;  %v7025_v58 = vld [vmem:[#allocation32 + $0x40] sm:$0xff] }
0x11f7   : > { %11375 = vmatmul.msk.f32.gmra.mxu2 %vm6137_vm10, %v6088_v38  ;;  %v6318_v31 = vpop.f32.mrf.mxu0 }
0x11f8   : > { %6331 = vrot.lane.b32.xlu0 %v6318_v31, %s13303_s7  ;;  %v7026_v31 = vld [vmem:[#allocation32 + $0x48] sm:$0xff] }
0x11ff   : > { %11388 = vmatmul.msk.f32.vlgmr.msrb.gmra.mxu2 %vm5203_vm13, %v6486_v12 }
0x1200   : > { %v6379_v20 = vpop.f32.mrf.mxu0 }
0x1201   : > { %6395 = vrot.lane.b32.xlu1 %v6379_v20, %s13310_s28  ;;  %v7097_v20 = vld [vmem:[#allocation32 + $0x70] sm:$0xff] }
0x1207   : > { %11389 = vmatmul.msk.f32.gmra.mxu2 %vm5203_vm13, %v6487_v15 }
0x120f   : > { %11390 = vmatmul.msk.f32.gmra.mxu2 %vm5203_vm13, %v6488_v30 }
0x1210   : > { %v6382_v30 = vpop.f32.mrf.mxu0 }
0x1211   : > { %6397 = vrot.lane.b32.xlu2 %v6382_v30, %s13310_s28  ;;  %v7543_v30 = vld [vmem:[#allocation61 + $0x68] sm:$0xff] }
0x1217   : > { %11391 = vmatmul.msk.f32.gmra.mxu2 %vm5203_vm13, %v6489_v32 }
0x121f   : > { %11404 = vmatmul.msk.f32.vlgmr.msra.gmra.mxu2 %vm5203_vm13, %v6746_v60 }
0x1242   : > { %v6179_v6 = vpop.f32.mrf.mxu2 }
0x1243   : > { %v6180_v62 = vadd.f32 %v6179_v6, %v6100_v26  ;;  %v6449_v26 = vpop.f32.mrf.mxu1  ;;  %v6557_v6 = vld [vmem:[#allocation31 + $0x88] sm:$0xff] }
0x1245   : > { %v6203_v4 = vmax.f32 %v6180_v62, 0.0  ;;  %v6385_v62 = vpop.f32.mrf.mxu0 }
0x1246   : > { %6399 = vrot.lane.b32.xlu1 %v6385_v62, %s13310_s28  ;;  %v7542_v62 = vld [vmem:[#allocation61 + $0x60] sm:$0xff] }
0x1247   : > { %v6211_v22 = vmul.f32 %v14887_v17, %v6203_v4  ;;  %v6558_v4 = vld [vmem:[#allocation31 + $0x90] sm:$0xff] }
0x1249   : > { %6251 = vmatmul.f32.vlgmr.msrb.gmra.mxu3 %v6211_v22  ;;  %v6559_v22 = vld [vmem:[#allocation31 + $0x98] sm:$0xff] }
0x124a   : > { %6844 = vmatpush.msrb.mxu3 %v14830_v49  ;;  %v6182_v33 = vpop.f32.mrf.mxu2  ;;  %v6747_v49 = vld [vmem:[#allocation31 + $0xe8] sm:$0xff] }
0x124b   : > { %v6183_v57 = vadd.f32 %v6182_v33, %v6105_v28  ;;  %11405 = vmatmul.msk.f32.gmra.mxu2 %vm5203_vm13, %v6747_v49  ;;  %v6452_v2 = vpop.f32.mrf.mxu1  ;;  %v6818_v49 = vld [vmem:[#allocation31 + $0x110] sm:$0xff] }
0x124c   : > { %6845 = vmatpush.msrb.mxu3 %v14822_v39 }
0x124d   : > { %v6204_v29 = vmax.f32 %v6183_v57, 0.0  ;;  %v6816_v57 = vld [vmem:[#allocation31 + $0x100] sm:$0xff] }
0x124e   : > { %6846 = vmatpush.msrb.mxu3 %v14811_v7 }
0x124f   : > { %v6212_v11 = vmul.f32 %v14887_v17, %v6204_v29 }
0x1250   : > { %6847 = vmatpush.msrb.mxu3 %v14799_v54 }
0x1251   : > { %6254 = vmatmul.f32.gmra.mxu3 %v6212_v11  ;;  %v6817_v11 = vld [vmem:[#allocation31 + $0x108] sm:$0xff] }
0x1252   : > { %v6185_v10 = vpop.f32.mrf.mxu2 }
0x1253   : > { %v6186_v52 = vadd.f32 %v6185_v10, %v6110_v53  ;;  %11406 = vmatmul.msk.f32.gmra.mxu2 %vm5203_vm13, %v6748_v46  ;;  %v6455_v32 = vpop.f32.mrf.mxu1 }
0x1255   : > { %v6205_v42 = vmax.f32 %v6186_v52, 0.0 }
0x1257   : > { %v6213_v39 = vmul.f32 %v14887_v17, %v6205_v42 }
0x1259   : > { %6257 = vmatmul.f32.gmra.mxu3 %v6213_v39 }
0x125a   : > { %v6188_v56 = vpop.f32.mrf.mxu2 }
0x125b   : > { %v6189_v7 = vadd.f32 %v6188_v56, %v6115_v45  ;;  %11407 = vmatmul.msk.f32.gmra.mxu2 %vm5203_vm13, %v6749_v51  ;;  %v6458_v28 = vpop.f32.mrf.mxu1  ;;  %v6819_v56 = vld [vmem:[#allocation31 + $0x118] sm:$0xff] }
0x125d   : > { %v6206_v35 = vmax.f32 %v6189_v7, 0.0 }
0x125f   : > { %v6214_v54 = vmul.f32 %v14887_v17, %v6206_v35 }
0x1261   : > { %6260 = vmatmul.f32.gmra.mxu3 %v6214_v54 }
0x1262   : > { %v6191_v0 = vpop.f32.mrf.mxu2 }
0x1263   : > { %v6192_v50 = vadd.f32 %v6191_v0, %v6120_v47  ;;  %v6709_v29 = vpop.f32.mrf.mxu1 }
0x1265   : > { %v6207_v44 = vmax.f32 %v6192_v50, 0.0 }
0x1267   : > { %v6215_v34 = vmul.f32 %v14887_v17, %v6207_v44 }
0x1269   : > { %6263 = vmatmul.f32.gmra.mxu3 %v6215_v34 }
0x126a   : > { %v6194_v48 = vpop.f32.mrf.mxu2 }
0x126b   : > { %v6195_v55 = vadd.f32 %v6194_v48, %v6125_v41  ;;  %v6712_v52 = vpop.f32.mrf.mxu1 }
0x126d   : > { %v6208_v38 = vmax.f32 %v6195_v55, 0.0 }
0x126f   : > { %v6216_v36 = vmul.f32 %v14887_v17, %v6208_v38 }
0x1271   : > { %6266 = vmatmul.f32.gmra.mxu3 %v6216_v36  ;;  %v6885_v36 = vld [vmem:[#allocation32] sm:$0xff] }
0x1272   : > { %v6197_v63 = vpop.f32.mrf.mxu2 }
0x1273   : > { %v6198_v43 = vadd.f32 %v6197_v63, %v6130_v61  ;;  %v6715_v45 = vpop.f32.mrf.mxu1  ;;  %v7095_v61 = vld [vmem:[#allocation32 + $0x60] sm:$0xff] }
0x1275   : > { %v6209_v3 = vmax.f32 %v6198_v43, 0.0  ;;  %v6886_v43 = vld [vmem:[#allocation32 + $0x8] sm:$0xff] }
0x1277   : > { %v6217_v8 = vmul.f32 %v14887_v17, %v6209_v3 }
0x1279   : > { %6269 = vmatmul.f32.gmra.mxu3 %v6217_v8  ;;  %v6955_v8 = vld [vmem:[#allocation32 + $0x20] sm:$0xff] }
0x127a   : > { %v6200_v12 = vpop.f32.mrf.mxu2 }
0x127b   : > { %v6201_v18 = vadd.f32 %v6200_v12, %v6135_v1  ;;  %v6718_v46 = vpop.f32.mrf.mxu1  ;;  %v7096_v1 = vld [vmem:[#allocation32 + $0x68] sm:$0xff] }
0x127d   : > { %v6210_v19 = vmax.f32 %v6201_v18, 0.0  ;;  %v7545_v18 = vld [vmem:[#allocation61 + $0x78] sm:$0xff] }
0x127f   : > { %v6218_v15 = vmul.f32 %v14887_v17, %v6210_v19  ;;  %v6388_v17 = vpop.f32.mrf.mxu0  ;;  %v6887_v19 = vld [vmem:[#allocation32 + $0x10] sm:$0xff] }
0x1280   : > { %6401 = vrot.lane.b32.xlu1 %v6388_v17, %s13310_s28  ;;  %v7028_v17 = vld [vmem:[#allocation32 + $0x58] sm:$0xff] }
0x1281   : > { %6272 = vmatmul.f32.gmra.mxu3 %v6218_v15  ;;  %v7027_v15 = vld [vmem:[#allocation32 + $0x50] sm:$0xff] }
0x1282   : > { %v6519_v53 = vpop.f32.mrf.mxu2 }
0x1287   : > { %v6639_v33 = vpop.f32.mrf.mxu0 }
0x1288   : > { %6467 = vrot.lane.b32.xlu1 %v6452_v2, %s13309_s4  ;;  %6655 = vrot.lane.b32.xlu0 %v6639_v33, %s13292_s14  ;;  %v7541_v2 = vld [vmem:[#allocation61 + $0x58] sm:$0xff] }
0x1289   : > { %11392 = vmatmul.msk.f32.vlgmr.msra.gmra.mxu3 %vm5203_vm13, %v6556_v27  ;;  %v7544_v27 = vld [vmem:[#allocation61 + $0x70] sm:$0xff] }
0x128a   : > { %v6522_v42 = vpop.f32.mrf.mxu2 }
0x128f   : > { %v6642_v60 = vpop.f32.mrf.mxu0 }
0x1290   : > { %6469 = vrot.lane.b32.xlu1 %v6455_v32, %s13309_s4  ;;  %6657 = vrot.lane.b32.xlu2 %v6642_v60, %s13292_s14  ;;  %v7098_v32 = vld [vmem:[#allocation32 + $0x78] sm:$0xff]  ;;  %v7538_v60 = vld [vmem:[#allocation61 + $0x40] sm:$0xff] }
0x1291   : > { %11393 = vmatmul.msk.f32.gmra.mxu3 %vm5203_vm13, %v6557_v6 }
0x1292   : > { %v6525_v7 = vpop.f32.mrf.mxu2 }
0x1297   : > { %v6645_v10 = vpop.f32.mrf.mxu0 }
0x1298   : > { %6471 = vrot.lane.b32.xlu1 %v6458_v28, %s13309_s4  ;;  %6659 = vrot.lane.b32.xlu2 %v6645_v10, %s13292_s14  ;;  %v7539_v28 = vld [vmem:[#allocation61 + $0x48] sm:$0xff]  ;;  %v7355_v10 = vld [vmem:[#allocation32 + $0xe0] sm:$0xff] }
0x1299   : > { %11394 = vmatmul.msk.f32.gmra.mxu3 %vm5203_vm13, %v6558_v4  ;;  %v6888_v4 = vld [vmem:[#allocation32 + $0x18] sm:$0xff] }
0x129a   : > { %v6528_v35 = vpop.f32.mrf.mxu2 }
0x129f   : > { %v6648_v39 = vpop.f32.mrf.mxu0 }
0x12a0   : > { %6661 = vrot.lane.b32.xlu0 %v6648_v39, %s13292_s14  ;;  %6465 = vrot.lane.b32.xlu2 %v6449_v26, %s13309_s4  ;;  %v6956_v26 = vld [vmem:[#allocation32 + $0x28] sm:$0xff]  ;;  %v6958_v39 = vld [vmem:[#allocation32 + $0x38] sm:$0xff] }
0x12a1   : > { %11395 = vmatmul.msk.f32.gmra.mxu3 %vm5203_vm13, %v6559_v22  ;;  %6539 = vrot.lane.b32.xlu1 %v6525_v7, %s13291_s6  ;;  %v7540_v22 = vld [vmem:[#allocation61 + $0x50] sm:$0xff]  ;;  %v7533_v7 = vld [vmem:[#allocation61 + $0x18] sm:$0xff] }
0x12a2   : > { %v6779_v40 = vpop.f32.mrf.mxu2 }
0x12a8   : > { %6731 = vrot.lane.b32.xlu0 %v6718_v46, %s13312_s5  ;;  %6725 = vrot.lane.b32.xlu2 %v6709_v29, %s13312_s5  ;;  %v7537_v29 = vld [vmem:[#allocation61 + $0x38] sm:$0xff] }
0x12a9   : > { %11408 = vmatmul.msk.f32.vlgmr.msrb.gmra.mxu3 %vm5203_vm13, %v6816_v57  ;;  %6795 = vrot.lane.b32.xlu1 %v6779_v40, %s13311_s16  ;;  %v6957_v57 = vld [vmem:[#allocation32 + $0x30] sm:$0xff]  ;;  %v7286_v46 = vld [vmem:[#allocation32 + $0xc8] sm:$0xff] }
0x12b0   : > { %6535 = vrot.lane.b32.xlu0 %v6519_v53, %s13291_s6  ;;  %6727 = vrot.lane.b32.xlu2 %v6712_v52, %s13312_s5  ;;  %v7285_v53 = vld [vmem:[#allocation32 + $0xc0] sm:$0xff] }
0x12b1   : > { %11409 = vmatmul.msk.f32.gmra.mxu3 %vm5203_vm13, %v6817_v11  ;;  %v7165_v11 = vld [vmem:[#allocation32 + $0x80] sm:$0xff] }
0x12b2   : > { %v7536_v52 = vld [vmem:[#allocation61 + $0x30] sm:$0xff] }
0x12b8   : > { %6537 = vrot.lane.b32.xlu0 %v6522_v42, %s13291_s6  ;;  %6729 = vrot.lane.b32.xlu2 %v6715_v45, %s13312_s5  ;;  %v7535_v42 = vld [vmem:[#allocation61 + $0x28] sm:$0xff]  ;;  %v7534_v45 = vld [vmem:[#allocation61 + $0x20] sm:$0xff] }
0x12b9   : > { %11410 = vmatmul.msk.f32.gmra.mxu3 %vm5203_vm13, %v6818_v49 }
0x12c0   : > { %6541 = vrot.lane.b32.xlu2 %v6528_v35, %s13291_s6  ;;  %v7356_v35 = vld [vmem:[#allocation32 + $0xe8] sm:$0xff] }
0x12c1   : > { %11411 = vmatmul.msk.f32.gmra.mxu3 %vm5203_vm13, %v6819_v56  ;;  %v7166_v56 = vld [vmem:[#allocation32 + $0x88] sm:$0xff] }
0x12cc   : > { %v14981_v54 = vpop.f32.mrf.mxu3 }
0x12ce   : > { %v6782_v0 = vpop.f32.mrf.mxu2 }
0x12cf   : > { %6797 = vrot.lane.b32.xlu2 %v6782_v0, %s13311_s16  ;;  %v7215_v0 = vld [vmem:[#allocation32 + $0xa0] sm:$0xff] }
0x12d4   : > { %v14986_v47 = vpop.f32.mrf.mxu3 }
0x12d6   : > { %v6785_v51 = vpop.f32.mrf.mxu2 }
0x12d7   : > { %6799 = vrot.lane.b32.xlu0 %v6785_v51, %s13311_s16  ;;  %v7167_v51 = vld [vmem:[#allocation32 + $0x90] sm:$0xff] }
0x12dc   : > { %v14989_v50 = vpop.f32.mrf.mxu3 }
0x12de   : > { %v6788_v37 = vpop.f32.mrf.mxu2 }
0x12df   : > { %6801 = vrot.lane.b32.xlu1 %v6788_v37, %s13311_s16  ;;  %v7216_v37 = vld [vmem:[#allocation32 + $0xa8] sm:$0xff] }
0x12e4   : > { %v14993_v44 = vpop.f32.mrf.mxu3 }
0x12ec   : > { %v14995_v34 = vpop.f32.mrf.mxu3 }
0x12f4   : > { %v14998_v41 = vpop.f32.mrf.mxu3 }
0x12fc   : > { %v15000_v48 = vpop.f32.mrf.mxu3 }
0x1304   : > { %v15002_v55 = vpop.f32.mrf.mxu3 }
0x1305   : > { %6909 = vmatpush.msrb.mxu0 %v15002_v55  ;;  %6979 = vmatpush.msrb.mxu1 %v15002_v55 }
0x1306   : > { %7049 = vmatpush.msrb.mxu2 %v15002_v55  ;;  %7119 = vmatpush.msra.mxu3 %v15002_v55 }
0x1307   : > { %6910 = vmatpush.msrb.mxu0 %v15000_v48  ;;  %6980 = vmatpush.msrb.mxu1 %v15000_v48 }
0x1308   : > { %7050 = vmatpush.msrb.mxu2 %v15000_v48  ;;  %7120 = vmatpush.msra.mxu3 %v15000_v48 }
0x1309   : > { %6911 = vmatpush.msrb.mxu0 %v14998_v41  ;;  %6981 = vmatpush.msrb.mxu1 %v14998_v41 }
0x130a   : > { %7051 = vmatpush.msrb.mxu2 %v14998_v41  ;;  %7121 = vmatpush.msra.mxu3 %v14998_v41 }
0x130b   : > { %6912 = vmatpush.msrb.mxu0 %v14995_v34  ;;  %6982 = vmatpush.msrb.mxu1 %v14995_v34 }
0x130c   : > { %7052 = vmatpush.msrb.mxu2 %v14995_v34  ;;  %7122 = vmatpush.msra.mxu3 %v14995_v34  ;;  %v15020_v38 = vpop.f32.mrf.mxu3 }
0x130d   : > { %6913 = vmatpush.msrb.mxu0 %v14993_v44  ;;  %6983 = vmatpush.msrb.mxu1 %v14993_v44 }
0x130e   : > { %7053 = vmatpush.msrb.mxu2 %v14993_v44  ;;  %7123 = vmatpush.msra.mxu3 %v14993_v44 }
0x130f   : > { %6914 = vmatpush.msrb.mxu0 %v14989_v50  ;;  %6984 = vmatpush.msrb.mxu1 %v14989_v50 }
0x1310   : > { %7054 = vmatpush.msrb.mxu2 %v14989_v50  ;;  %7124 = vmatpush.msra.mxu3 %v14989_v50 }
0x1311   : > { %6915 = vmatpush.msrb.mxu0 %v14986_v47  ;;  %6985 = vmatpush.msrb.mxu1 %v14986_v47 }
0x1312   : > { %7055 = vmatpush.msrb.mxu2 %v14986_v47  ;;  %7125 = vmatpush.msra.mxu3 %v14986_v47 }
0x1313   : > { %6916 = vmatpush.msrb.mxu0 %v14981_v54  ;;  %6986 = vmatpush.msrb.mxu1 %v14981_v54 }
0x1314   : > { %7056 = vmatpush.msrb.mxu2 %v14981_v54  ;;  %7126 = vmatpush.msra.mxu3 %v14981_v54  ;;  %v15038_v63 = vpop.f32.mrf.mxu3 }
0x1315   : > { %11412 = vmatmul.msk.f32.vlgmr.msrb.gmra.mxu0 %vm6137_vm10, %v6885_v36  ;;  %11420 = vmatmul.msk.f32.vlgmr.msrb.gmra.mxu2 %vm6137_vm10, %v7025_v58  ;;  %v15129_v36 = vpop.permute.xlu0 %7500  ;;  %v7217_v58 = vld [vmem:[#allocation32 + $0xb0] sm:$0xff] }
0x1316   : > { %11424 = vmatmul.msk.f32.vlgmr.msra.gmra.mxu3 %vm6137_vm10, %v7095_v61  ;;  %7189 = vmatpush.msra.mxu0 %v15002_v55  ;;  %v7425_v61 = vld [vmem:[#allocation32 + $0x100] sm:$0xff] }
0x1317   : > { %7239 = vmatpush.msra.mxu1 %v15002_v55  ;;  %7309 = vmatpush.msra.mxu2 %v15002_v55 }
0x1318   : > { %7379 = vmatpush.msrb.mxu3 %v15002_v55  ;;  %7190 = vmatpush.msra.mxu0 %v15000_v48 }
0x1319   : > { %7240 = vmatpush.msra.mxu1 %v15000_v48  ;;  %7310 = vmatpush.msra.mxu2 %v15000_v48 }
0x131a   : > { %7380 = vmatpush.msrb.mxu3 %v15000_v48  ;;  %7191 = vmatpush.msra.mxu0 %v14998_v41 }
0x131b   : > { %7241 = vmatpush.msra.mxu1 %v14998_v41  ;;  %7311 = vmatpush.msra.mxu2 %v14998_v41 }
0x131c   : > { %7381 = vmatpush.msrb.mxu3 %v14998_v41  ;;  %7192 = vmatpush.msra.mxu0 %v14995_v34  ;;  %v15056_v3 = vpop.f32.mrf.mxu3 }
0x131d   : > { %7242 = vmatpush.msra.mxu1 %v14995_v34  ;;  %7312 = vmatpush.msra.mxu2 %v14995_v34 }
0x131e   : > { %7382 = vmatpush.msrb.mxu3 %v14995_v34  ;;  %11413 = vmatmul.msk.f32.gmra.mxu0 %vm6137_vm10, %v6886_v43  ;;  %v15132_v43 = vpop.permute.xlu1 %6327 }
0x131f   : > { %11416 = vmatmul.msk.f32.vlgmr.msrb.gmra.mxu1 %vm6137_vm10, %v6955_v8  ;;  %11421 = vmatmul.msk.f32.gmra.mxu2 %vm6137_vm10, %v7026_v31  ;;  %v7575_v8 = vld [vmem:[#allocation35] sm:$0xff]  ;;  %v7619_v31 = vld [vmem:[#allocation35 + $0x10] sm:$0xff] }
0x1320   : > { %11425 = vmatmul.msk.f32.gmra.mxu3 %vm6137_vm10, %v7096_v1  ;;  %7193 = vmatpush.msra.mxu0 %v14993_v44  ;;  %v15138_v1 = vpop.permute.xlu0 %6325 }
0x1321   : > { %7243 = vmatpush.msra.mxu1 %v14993_v44  ;;  %7313 = vmatpush.msra.mxu2 %v14993_v44 }
0x1322   : > { %7383 = vmatpush.msrb.mxu3 %v14993_v44  ;;  %7194 = vmatpush.msra.mxu0 %v14989_v50 }
0x1323   : > { %7244 = vmatpush.msra.mxu1 %v14989_v50  ;;  %7314 = vmatpush.msra.mxu2 %v14989_v50 }
0x1324   : > { %7384 = vmatpush.msrb.mxu3 %v14989_v50  ;;  %7195 = vmatpush.msra.mxu0 %v14986_v47  ;;  %v15074_v12 = vpop.f32.mrf.mxu3 }
0x1325   : > { %7245 = vmatpush.msra.mxu1 %v14986_v47  ;;  %7315 = vmatpush.msra.mxu2 %v14986_v47 }
0x1326   : > { %7385 = vmatpush.msrb.mxu3 %v14986_v47  ;;  %7196 = vmatpush.msra.mxu0 %v14981_v54 }
0x1327   : > { %7246 = vmatpush.msra.mxu1 %v14981_v54  ;;  %7316 = vmatpush.msra.mxu2 %v14981_v54 }
0x1328   : > { %7386 = vmatpush.msrb.mxu3 %v14981_v54  ;;  %7449 = vmatpush.msrb.mxu0 %v15002_v55  ;;  %v7358_v55 = vld [vmem:[#allocation32 + $0xf8] sm:$0xff] }
0x1329   : > { %7546 = vmatpush.msrb.mxu1 %v7545_v18  ;;  %7597 = vmatpush.msrb.mxu2 %v14530_v5  ;;  %v7218_v18 = vld [vmem:[#allocation32 + $0xb8] sm:$0xff] }
0x132a   : > { %7641 = vmatpush.msra.mxu3 %v14530_v5  ;;  %11414 = vmatmul.msk.f32.gmra.mxu0 %vm6137_vm10, %v6887_v19  ;;  %v7426_v19 = vld [vmem:[#allocation32 + $0x108] sm:$0xff] }
0x132b   : > { %11422 = vmatmul.msk.f32.gmra.mxu2 %vm6137_vm10, %v7027_v15  ;;  %11426 = vmatmul.msk.f32.gmra.mxu3 %vm6137_vm10, %v7097_v20  ;;  %v15147_v15 = vpop.permute.xlu1 %6395  ;;  %v15150_v20 = vpop.permute.xlu2 %7505 }
0x132c   : > { %7450 = vmatpush.msrb.mxu0 %v15000_v48  ;;  %7547 = vmatpush.msrb.mxu1 %v7544_v27  ;;  %v6849_v6 = vpop.f32.mrf.mxu3  ;;  %v7288_v48 = vld [vmem:[#allocation32 + $0xd8] sm:$0xff]  ;;  %v6330_v27 = vpop.permute.xlu0 %6329 }
0x132d   : > { %7598 = vmatpush.msrb.mxu2 %v14522_v59  ;;  %7642 = vmatpush.msra.mxu3 %v14522_v59 }
0x132e   : > { %7451 = vmatpush.msrb.mxu0 %v14998_v41  ;;  %7548 = vmatpush.msrb.mxu1 %v7543_v30  ;;  %v7168_v41 = vld [vmem:[#allocation32 + $0x98] sm:$0xff]  ;;  %v7427_v30 = vld [vmem:[#allocation32 + $0x110] sm:$0xff] }
0x132f   : > { %11417 = vmatmul.msk.f32.gmra.mxu1 %vm6137_vm10, %v6956_v26  ;;  %6865 = vrot.lane.b32.xlu2 %v6849_v6, %s13305_s12  ;;  %v7428_v6 = vld [vmem:[#allocation32 + $0x118] sm:$0xff] }
0x1330   : > { %7452 = vmatpush.msrb.mxu0 %v14995_v34  ;;  %7549 = vmatpush.msrb.mxu1 %v7542_v62  ;;  %v7357_v34 = vld [vmem:[#allocation32 + $0xf0] sm:$0xff] }
0x1332   : > { %7453 = vmatpush.msrb.mxu0 %v14993_v44  ;;  %7550 = vmatpush.msrb.mxu1 %v7541_v2  ;;  %v7287_v44 = vld [vmem:[#allocation32 + $0xd0] sm:$0xff] }
0x1333   : > { %11415 = vmatmul.msk.f32.gmra.mxu0 %vm6137_vm10, %v6888_v4  ;;  %11423 = vmatmul.msk.f32.gmra.mxu2 %vm6137_vm10, %v7028_v17  ;;  %v15153_v26 = vpop.permute.xlu2 %6397 }
0x1334   : > { %11427 = vmatmul.msk.f32.gmra.mxu3 %vm6137_vm10, %v7098_v32  ;;  %7454 = vmatpush.msrb.mxu0 %v14989_v50  ;;  %v6852_v33 = vpop.f32.mrf.mxu3  ;;  %v7530_v50 = vld [vmem:[#allocation61] sm:$0xff]  ;;  %v15155_v62 = vpop.permute.xlu0 %6331 }
0x1335   : > { %7551 = vmatpush.msrb.mxu1 %v7540_v22  ;;  %6867 = vrot.lane.b32.xlu1 %v6852_v33, %s13305_s12 }
0x1336   : > { %7455 = vmatpush.msrb.mxu0 %v14986_v47  ;;  %v7531_v47 = vld [vmem:[#allocation61 + $0x8] sm:$0xff] }
0x1337   : > { %7552 = vmatpush.msrb.mxu1 %v7539_v28 }
0x1338   : > { %7456 = vmatpush.msrb.mxu0 %v14981_v54  ;;  %11418 = vmatmul.msk.f32.gmra.mxu1 %vm6137_vm10, %v6957_v57  ;;  %v7532_v54 = vld [vmem:[#allocation61 + $0x10] sm:$0xff] }
0x1339   : > { %7553 = vmatpush.msrb.mxu1 %v7538_v60 }
0x133b   : > { %7554 = vmatpush.msrb.mxu1 %v7537_v29  ;;  %11428 = vmatmul.msk.f32.vlgmr.msra.gmra.mxu0 %vm6137_vm10, %v7165_v11  ;;  %v15160_v2 = vpop.permute.xlu2 %6657 }
0x133c   : > { %11436 = vmatmul.msk.f32.vlgmr.msra.gmra.mxu2 %vm6137_vm10, %v7285_v53  ;;  %11440 = vmatmul.msk.f32.vlgmr.msrb.gmra.mxu3 %vm6137_vm10, %v7355_v10  ;;  %v6855_v49 = vpop.f32.mrf.mxu3  ;;  %v15162_v4 = vpop.permute.xlu0 %6655  ;;  %v6339_v53 = vsel %vm3797_vm3, 0.0, %v6330_v27 }
0x133d   : > { %7685 = vmatpush.msra.mxu0 %v14530_v5  ;;  %7729 = vmatpush.msra.mxu2 %v14530_v5 }
0x133e   : > { %7773 = vmatpush.msrb.mxu3 %v14530_v5  ;;  %7555 = vmatpush.msrb.mxu1 %v7536_v52 }
0x133f   : > { %7686 = vmatpush.msra.mxu0 %v14522_v59  ;;  %7730 = vmatpush.msra.mxu2 %v14522_v59 }
0x1340   : > { %7774 = vmatpush.msrb.mxu3 %v14522_v59  ;;  %7556 = vmatpush.msrb.mxu1 %v7535_v42 }
0x1341   : > { %11419 = vmatmul.msk.f32.gmra.mxu1 %vm6137_vm10, %v6958_v39  ;;  %6869 = vrot.lane.b32.xlu0 %v6855_v49, %s13305_s12 }
0x1342   : > { %7557 = vmatpush.msrb.mxu1 %v7534_v45 }
0x1343   : > { %11429 = vmatmul.msk.f32.gmra.mxu0 %vm6137_vm10, %v7166_v56  ;;  %v6660_v32 = vpop.permute.xlu2 %6659 }
0x1344   : > { %7558 = vmatpush.msrb.mxu1 %v7533_v7  ;;  %11437 = vmatmul.msk.f32.gmra.mxu2 %vm6137_vm10, %v7286_v46  ;;  %v6858_v40 = vpop.f32.mrf.mxu3  ;;  %v15166_v22 = vpop.permute.xlu0 %6661 }
0x1345   : > { %11441 = vmatmul.msk.f32.gmra.mxu3 %vm6137_vm10, %v7356_v35  ;;  %6871 = vrot.lane.b32.xlu1 %v6858_v40, %s13305_s12 }
0x1346   : > { %7559 = vmatpush.msrb.mxu1 %v7532_v54 }
0x1348   : > { %7560 = vmatpush.msrb.mxu1 %v7531_v47 }
0x1349   : > { %11432 = vmatmul.msk.f32.vlgmr.msra.gmra.mxu1 %vm6137_vm10, %v7215_v0 }
0x134a   : > { %7561 = vmatpush.msrb.mxu1 %v7530_v50 }
0x134b   : > { %11430 = vmatmul.msk.f32.gmra.mxu0 %vm6137_vm10, %v7167_v51  ;;  %v15168_v33 = vpop.permute.xlu2 %6465 }
0x134c   : > { %7851 = vmatpush.msra.mxu1 %v14530_v5  ;;  %11438 = vmatmul.msk.f32.gmra.mxu2 %vm6137_vm10, %v7287_v44  ;;  %v15170_v57 = vpop.permute.xlu0 %6731 }
0x134d   : > { %11442 = vmatmul.msk.f32.gmra.mxu3 %vm6137_vm10, %v7357_v34  ;;  %v6669_v34 = vsel %vm2575_vm6, %v6660_v32, 0.0 }
0x134e   : > { %7852 = vmatpush.msra.mxu1 %v14522_v59 }
0x1351   : > { %11433 = vmatmul.msk.f32.gmra.mxu1 %vm6137_vm10, %v7216_v37 }
0x1353   : > { %11431 = vmatmul.msk.f32.gmra.mxu0 %vm6137_vm10, %v7168_v41  ;;  %v15175_v11 = vpop.permute.xlu2 %6725 }
0x1354   : > { %11439 = vmatmul.msk.f32.gmra.mxu2 %vm6137_vm10, %v7288_v48  ;;  %v15179_v49 = vpop.permute.xlu0 %6535 }
0x1355   : > { %11443 = vmatmul.msk.f32.gmra.mxu3 %vm6137_vm10, %v7358_v55 }
0x1359   : > { %11434 = vmatmul.msk.f32.gmra.mxu1 %vm6137_vm10, %v7217_v58 }
0x135b   : > { %11444 = vmatmul.msk.f32.vlgmr.msrb.gmra.mxu0 %vm6137_vm10, %v7425_v61  ;;  %v15185_v40 = vpop.permute.xlu2 %6727 }
0x135c   : > { %11448 = vmatmul.msk.f32.vlgmr.msrb.gmra.mxu2 %vm4083_vm15, %v7575_v8  ;;  %7807 = vmatpush.msrb.mxu0 %v14530_v5  ;;  %v15187_v50 = vpop.permute.xlu0 %6537 }
0x135d   : > { %11450 = vmatmul.msk.f32.vlgmr.msra.gmra.mxu3 %vm4083_vm15, %v7619_v31  ;;  %7895 = vmatpush.msrb.mxu2 %v14530_v5 }
0x135e   : > { %7939 = vmatpush.msra.mxu3 %v14530_v5  ;;  %7808 = vmatpush.msrb.mxu0 %v14522_v59  ;;  %v6400_v5 = vpop.permute.xlu1 %6399 }
0x135f   : > { %7896 = vmatpush.msrb.mxu2 %v14522_v59  ;;  %v6409_v10 = vsel %vm3041_vm11, 0.0, %v6400_v5 }
0x1360   : > { %7940 = vmatpush.msra.mxu3 %v14522_v59  ;;  %v6413_v39 = vadd.f32 %v6409_v10, %v6339_v53 }
0x1361   : > { %11435 = vmatmul.msk.f32.gmra.mxu1 %vm6137_vm10, %v7218_v18 }
0x1363   : > { %11445 = vmatmul.msk.f32.gmra.mxu0 %vm6137_vm10, %v7426_v19  ;;  %v6730_v48 = vpop.permute.xlu2 %6729 }
0x1364   : > { %v6800_v55 = vpop.permute.xlu0 %6799  ;;  %v6739_v58 = vsel %vm5009_vm12, %v6730_v48, 0.0 }
0x1366   : > { %v15158_v59 = vpop.permute.xlu1 %6401 }
0x136b   : > { %11446 = vmatmul.msk.f32.gmra.mxu0 %vm6137_vm10, %v7427_v30 }
0x136e   : > { %v15164_v17 = vpop.permute.xlu1 %6467 }
0x1373   : > { %11447 = vmatmul.msk.f32.gmra.mxu0 %vm6137_vm10, %v7428_v6 }
0x1376   : > { %v6470_v28 = vpop.permute.xlu1 %6469 }
0x1377   : > { %v6479_v45 = vsel %vm2031_vm1, 0.0, %v6470_v28 }
0x1378   : > { %v6483_v46 = vadd.f32 %v6479_v45, %v6413_v39 }
0x137e   : > { %v15173_v29 = vpop.permute.xlu1 %6471 }
0x1386   : > { %v6540_v35 = vpop.permute.xlu1 %6539 }
0x1387   : > { %v6549_v54 = vsel %vm2399_vm5, 0.0, %v6540_v35 }
0x1388   : > { %v6553_v0 = vadd.f32 %v6549_v54, %v6483_v46 }
0x138a   : > { %v6603_v51 = vadd.f32 %v15056_v3, %v6553_v0  ;;  %v6809_v3 = vsel %vm5080_vm14, %v6800_v55, 0.0 }
0x138c   : > { %v6673_v41 = vadd.f32 %v6669_v34, %v6603_v51 }
0x138e   : > { %v6743_v31 = vadd.f32 %v6739_v58, %v6673_v41  ;;  %v7496_v41 = vld [vmem:[#allocation34 + $0x10] sm:$0xff] }
0x1390   : > { %v6813_v27 = vadd.f32 %v6809_v3, %v6743_v31  ;;  %v6796_v3 = vpop.permute.xlu1 %6795 }
0x1392   : > { %v6918_v60 = vpop.f32.mrf.mxu0 }
0x1393   : > { %6934 = vrot.lane.b32.xlu0 %v6918_v60, %s13303_s7 }
0x1398   : > { %v7058_v52 = vpop.f32.mrf.mxu2 }
0x1399   : > { %v7128_v42 = vpop.f32.mrf.mxu3 }
0x139a   : > { %7144 = vrot.lane.b32.xlu2 %v7128_v42, %s13291_s6 }
0x139b   : > { %v6921_v7 = vpop.f32.mrf.mxu0 }
0x139c   : > { %v6988_v56 = vpop.f32.mrf.mxu1 }
0x139d   : > { %7004 = vrot.lane.b32.xlu0 %v6988_v56, %s13310_s28 }
0x13a2   : > { %v7061_v47 = vpop.f32.mrf.mxu2 }
0x13a3   : > { %7076 = vrot.lane.b32.xlu1 %v7061_v47, %s13309_s4  ;;  %v7131_v37 = vpop.f32.mrf.mxu3 }
0x13a5   : > { %7074 = vrot.lane.b32.xlu0 %v7058_v52, %s13309_s4 }
0x13a7   : > { %v6924_v44 = vpop.f32.mrf.mxu0 }
0x13ab   : > { %7146 = vrot.lane.b32.xlu1 %v7131_v37, %s13291_s6  ;;  %v15227_v37 = vpop.permute.xlu2 %6541 }
0x13ac   : > { %v6991_v61 = vpop.f32.mrf.mxu1 }
0x13ad   : > { %6936 = vrot.lane.b32.xlu0 %v6921_v7, %s13303_s7 }
0x13ae   : > { %v7064_v8 = vpop.f32.mrf.mxu2  ;;  %v7134_v19 = vpop.f32.mrf.mxu3 }
0x13af   : > { %7078 = vrot.lane.b32.xlu2 %v7064_v8, %s13309_s4 }
0x13b0   : > { %v6927_v18 = vpop.f32.mrf.mxu0 }
0x13b3   : > { %v6870_v30 = vpop.permute.xlu0 %6869  ;;  %6938 = vrot.lane.b32.xlu1 %v6924_v44, %s13303_s7 }
0x13b4   : > { %v6879_v5 = vsel %vm3964_vm2, %v6870_v30, 0.0 }
0x13b5   : > { %v6994_v6 = vpop.f32.mrf.mxu1  ;;  %v15200_v32 = vadd.f32 %v6879_v5, %v6813_v27  ;;  %7006 = vrot.lane.b32.xlu0 %v6991_v61, %s13310_s28  ;;  %v6798_v61 = vpop.permute.xlu2 %6797 }
0x13b6   : > { %v7067_v60 = vpop.f32.mrf.mxu2  ;;  %v15235_v27 = vpop.permute.xlu1 %6801 }
0x13b7   : > { %7148 = vrot.lane.b32.xlu2 %v7134_v19, %s13291_s6  ;;  %v7137_v53 = vpop.f32.mrf.mxu3 }
0x13b8   : > { %v15204_v28 = vpop.f32.mrf.mxu0 }
0x13bb   : > { %7008 = vrot.lane.b32.xlu1 %v6994_v6, %s13310_s28 }
0x13bd   : > { %v6866_v19 = vpop.permute.xlu2 %6865 }
0x13be   : > { %v6997_v10 = vpop.f32.mrf.mxu1  ;;  %v6868_v5 = vpop.permute.xlu1 %6867 }
0x13bf   : > { %7150 = vrot.lane.b32.xlu2 %v7137_v53, %s13291_s6  ;;  %7010 = vrot.lane.b32.xlu0 %v6997_v10, %s13310_s28  ;;  %v7318_v42 = vpop.f32.mrf.mxu2  ;;  %v7388_v56 = vpop.f32.mrf.mxu3  ;;  %s16148_s28 = smov 19  }
0x13c0   : > { %v15209_v52 = vpop.f32.mrf.mxu0 }
0x13c3   : > { %6940 = vrot.lane.b32.xlu1 %v6927_v18, %s13303_s7  ;;  %v7497_v18 = vld [vmem:[#allocation34 + $0x18] sm:$0xff] }
0x13c6   : > { %v7248_v39 = vpop.f32.mrf.mxu1  ;;  %v15241_v53 = vpop.permute.xlu1 %6871 }
0x13c7   : > { %7334 = vrot.lane.b32.xlu2 %v7318_v42, %s13312_s5  ;;  %7080 = vrot.lane.b32.xlu0 %v7067_v60, %s13309_s4  ;;  %v7321_v7 = vpop.f32.mrf.mxu2  ;;  %s16111_s4 = smov 118  }
0x13c8   : > { %v15214_v45 = vpop.f32.mrf.mxu0  ;;  %v7391_v54 = vpop.f32.mrf.mxu3 }
0x13cb   : > { %7264 = vrot.lane.b32.xlu1 %v7248_v39, %s13292_s14  ;;  %v6337_v39 = vsel %vm3797_vm3, 0.0, %v15138_v1 }
0x13ce   : > { %v7251_v46 = vpop.f32.mrf.mxu1 }
0x13cf   : > { %7404 = vrot.lane.b32.xlu2 %v7388_v56, %s13311_s16  ;;  %7336 = vrot.lane.b32.xlu0 %v7321_v7, %s13312_s5  ;;  %v7324_v51 = vpop.f32.mrf.mxu2  ;;  %v6407_v56 = vsel %vm3041_vm11, 0.0, %v15147_v15  ;;  %v6547_v15 = vsel %vm2399_vm5, 0.0, %v15179_v49 }
0x13d0   : > { %v15219_v35 = vpop.f32.mrf.mxu0  ;;  %v7394_v44 = vpop.f32.mrf.mxu3  ;;  %v6411_v7 = vadd.f32 %v6407_v56, %v6337_v39  ;;  %v6737_v56 = vsel %vm5009_vm12, %v15175_v11, 0.0 }
0x13d6   : > { %v7254_v47 = vpop.f32.mrf.mxu1 }
0x13d7   : > { %7266 = vrot.lane.b32.xlu2 %v7251_v46, %s13292_s14  ;;  %7268 = vrot.lane.b32.xlu1 %v7254_v47, %s13292_s14  ;;  %v7327_v58 = vpop.f32.mrf.mxu2  ;;  %v6338_v47 = vsel %vm3797_vm3, 0.0, %v15132_v43  ;;  %v6548_v43 = vsel %vm2399_vm5, 0.0, %v15187_v50 }
0x13d8   : > { %v7458_v0 = vpop.f32.mrf.mxu0  ;;  %7406 = vrot.lane.b32.xlu0 %v7391_v54, %s13311_s16  ;;  %v7397_v31 = vpop.f32.mrf.mxu3  ;;  %v6477_v54 = vsel %vm2031_vm1, 0.0, %v15168_v33 }
0x13de   : > { %v7257_v55 = vpop.f32.mrf.mxu1 }
0x13df   : > { %7338 = vrot.lane.b32.xlu1 %v7324_v51, %s13312_s5  ;;  %7474 = vrot.lane.b32.xlu2 %v7458_v0, %s13305_s12  ;;  %v6408_v0 = vsel %vm3041_vm11, 0.0, %v15153_v26 }
0x13e0   : > { %v7461_v34 = vpop.f32.mrf.mxu0  ;;  %7408 = vrot.lane.b32.xlu0 %v7394_v44, %s13311_s16  ;;  %v6481_v44 = vadd.f32 %v6477_v54, %v6411_v7  ;;  %v6412_v1 = vadd.f32 %v6408_v0, %v6338_v47  ;;  %v7707_v47 = vld [vmem:[#allocation35 + $0x30] sm:$0xff] }
0x13e7   : > { %7476 = vrot.lane.b32.xlu2 %v7461_v34, %s13305_s12 }
0x13e8   : > { %v7464_v48 = vpop.f32.mrf.mxu0  ;;  %7510 = vperm.xlu0 %11966, %v7496_v41   ;;  %v6478_v41 = vsel %vm2031_vm1, 0.0, %v15164_v17 }
0x13e9   : > { %7478 = vrot.lane.b32.xlu1 %v7464_v48, %s13305_s12  ;;  %v6551_v48 = vadd.f32 %v6547_v15, %v6481_v44  ;;  %v6482_v33 = vadd.f32 %v6478_v41, %v6412_v1  ;;  %v6738_v44 = vsel %vm5009_vm12, %v15185_v40, 0.0  ;;  %v6877_v1 = vsel %vm3964_vm2, %v6866_v19, 0.0  ;;  %v7708_v19 = vld [vmem:[#allocation35 + $0x38] sm:$0xff] }
0x13eb   : > { %v6601_v26 = vadd.f32 %v15020_v38, %v6551_v48  ;;  %v6668_v38 = vsel %vm2575_vm6, %v15160_v2, 0.0  ;;  %v6808_v2 = vsel %vm5080_vm14, %v6798_v61, 0.0 }
0x13ef   : > { %7270 = vrot.lane.b32.xlu2 %v7257_v55, %s13292_s14 }
0x13f0   : > { %v7467_v8 = vpop.f32.mrf.mxu0 }
0x13f1   : > { %7340 = vrot.lane.b32.xlu1 %v7327_v58, %s13312_s5  ;;  %7480 = vrot.lane.b32.xlu0 %v7467_v8, %s13305_s12  ;;  %v7576_v8 = vld [vmem:[#allocation35 + $0x8] sm:$0xff]  ;;  %s16114_s5 = smov 119  }
0x13f2   : > { %11449 = vmatmul.msk.f32.gmra.mxu2 %vm4083_vm15, %v7576_v8 }
0x13f4   : > { %v15237_v30 = vpop.permute.xlu2 %7144 }
0x13f7   : > { %7410 = vrot.lane.b32.xlu2 %v7397_v31, %s13311_s16  ;;  %v6667_v31 = vsel %vm2575_vm6, %v15162_v4, 0.0  ;;  %v6807_v4 = vsel %vm5080_vm14, %v6796_v3, 0.0  ;;  %s16125_s16 = sld [smem:[#allocation107_spill]] }
0x13f8   : > { %v6671_v17 = vadd.f32 %v6667_v31, %v6601_v26  ;;  %v6878_v26 = vsel %vm3964_vm2, %v6868_v5, 0.0  ;;  %v6340_v31 = vsel %vm3797_vm3, 0.0, %v15155_v62  ;;  %v6480_v62 = vsel %vm2031_vm1, 0.0, %v15173_v29 }
0x13f9   : > { %7515 = vperm.xlu1 %11978, %v7497_v18   ;;  %v6552_v18 = vadd.f32 %v6548_v43, %v6482_v33  ;;  %v7620_v43 = vld [vmem:[#allocation35 + $0x18] sm:$0xff] }
0x13fa   : > { %v6741_v54 = vadd.f32 %v6737_v56, %v6671_v17  ;;  %11454 = vmatmul.msk.f32.vlgmr.msra.gmra.mxu2 %vm4083_vm15, %v7707_v47  ;;  %11451 = vmatmul.msk.f32.gmra.mxu3 %vm4083_vm15, %v7620_v43 }
0x13fb   : > { %v6602_v50 = vadd.f32 %v15038_v63, %v6552_v18 }
0x13fc   : > { %v6811_v11 = vadd.f32 %v6807_v4, %v6741_v54  ;;  %v7751_v4 = vld [vmem:[#allocation35 + $0x40] sm:$0xff] }
0x13fd   : > { %v6672_v0 = vadd.f32 %v6668_v38, %v6602_v50 }
0x13fe   : > { %v6881_v33 = vadd.f32 %v6877_v1, %v6811_v11  ;;  %v7873_v11 = vld [vmem:[#allocation35 + $0x70] sm:$0xff] }
0x13ff   : > { %v6742_v63 = vadd.f32 %v6738_v44, %v6672_v0 }
0x1401   : > { %v6812_v18 = vadd.f32 %v6808_v2, %v6742_v63 }
0x1402   : > { %11455 = vmatmul.msk.f32.gmra.mxu2 %vm4083_vm15, %v7708_v19  ;;  %11456 = vmatmul.msk.f32.vlgmr.msrb.gmra.mxu3 %vm4083_vm15, %v7751_v4 }
0x1403   : > { %v6882_v56 = vadd.f32 %v6878_v26, %v6812_v18  ;;  %v7752_v26 = vld [vmem:[#allocation35 + $0x48] sm:$0xff]  ;;  %v6670_v18 = vsel %vm2575_vm6, %v15166_v22, 0.0 }
0x1405   : > { %v6935_v6 = vpop.permute.xlu0 %6934 }
0x1406   : > { %v6946_v48 = vsel %vm3797_vm3, 0.0, %v6935_v6  ;;  %v6410_v6 = vsel %vm3041_vm11, 0.0, %v15158_v59 }
0x1407   : > { %v6950_v8 = vadd.f32 %v6946_v48, %v6881_v33  ;;  %v6414_v5 = vadd.f32 %v6410_v6, %v6340_v31 }
0x1409   : > { %v15239_v60 = vpop.permute.xlu2 %7078 }
0x140a   : > { %11462 = vmatmul.msk.f32.vlgmr.msrb.gmra.mxu2 %vm4083_vm15, %v7873_v11  ;;  %11457 = vmatmul.msk.f32.gmra.mxu3 %vm4083_vm15, %v7752_v26  ;;  %v7918_v26 = vld [vmem:[#allocation35 + $0x88] sm:$0xff] }
0x140f   : > { %v7005_v10 = vpop.permute.xlu0 %7004 }
0x1410   : > { %v7016_v3 = vsel %vm3041_vm11, 0.0, %v7005_v10 }
0x1411   : > { %v15243_v42 = vpop.permute.xlu2 %7148  ;;  %v7020_v10 = vadd.f32 %v7016_v3, %v6950_v8  ;;  %v7663_v8 = vld [vmem:[#allocation35 + $0x20] sm:$0xff] }
0x1412   : > { %11452 = vmatmul.msk.f32.vlgmr.msra.gmra.mxu0 %vm4083_vm15, %v7663_v8 }
0x1415   : > { %v15249_v46 = vpop.permute.xlu1 %7076 }
0x1416   : > { %v7087_v29 = vsel %vm2031_vm1, 0.0, %v15249_v46 }
0x1417   : > { %v7075_v51 = vpop.permute.xlu0 %7074 }
0x1418   : > { %v7086_v61 = vsel %vm2031_vm1, 0.0, %v7075_v51  ;;  %v7156_v51 = vsel %vm2399_vm5, 0.0, %v15237_v30 }
0x1419   : > { %v15257_v34 = vpop.permute.xlu2 %7150  ;;  %v7090_v50 = vadd.f32 %v7086_v61, %v7020_v10 }
0x141b   : > { %v7160_v44 = vadd.f32 %v7156_v51, %v7090_v50 }
0x141d   : > { %v15263_v55 = vpop.permute.xlu1 %7146  ;;  %v7210_v30 = vadd.f32 %v15204_v28, %v7160_v44 }
0x141e   : > { %v7157_v43 = vsel %vm2399_vm5, 0.0, %v15263_v55 }
0x141f   : > { %v6937_v58 = vpop.permute.xlu0 %6936 }
0x1420   : > { %v6947_v17 = vsel %vm3797_vm3, 0.0, %v6937_v58  ;;  %v6484_v58 = vadd.f32 %v6480_v62, %v6414_v5 }
0x1421   : > { %v15270_v39 = vpop.permute.xlu2 %7334  ;;  %v6951_v47 = vadd.f32 %v6947_v17, %v6882_v56 }
0x1425   : > { %v15273_v49 = vpop.permute.xlu1 %6938 }
0x1426   : > { %v6948_v61 = vsel %vm3797_vm3, 0.0, %v15273_v49 }
0x1427   : > { %v7007_v7 = vpop.permute.xlu0 %7006 }
0x1428   : > { %v7017_v38 = vsel %vm3041_vm11, 0.0, %v7007_v7  ;;  %v6550_v7 = vsel %vm2399_vm5, 0.0, %v15227_v37  ;;  %v7346_v37 = vsel %vm5009_vm12, %v15270_v39, 0.0 }
0x1429   : > { %v7405_v15 = vpop.permute.xlu2 %7404  ;;  %v7021_v0 = vadd.f32 %v7017_v38, %v6951_v47  ;;  %v6554_v48 = vadd.f32 %v6550_v7, %v6484_v58  ;;  %v6740_v38 = vsel %vm5009_vm12, %v15170_v57, 0.0  ;;  %v7917_v47 = vld [vmem:[#allocation35 + $0x80] sm:$0xff]  ;;  %v6810_v57 = vsel %vm5080_vm14, %v15235_v27, 0.0  ;;  %v15344_v7 = vld [vmem:[#allocation50] ss:$0 sm:$0xff] }
0x142a   : > { %v7416_v55 = vsel %vm5080_vm14, %v7405_v15, 0.0  ;;  %11464 = vmatmul.msk.f32.vlgmr.msra.gmra.mxu3 %vm4083_vm15, %v7917_v47 }
0x142b   : > { %v7091_v63 = vadd.f32 %v7087_v29, %v7021_v0  ;;  %v6604_v46 = vadd.f32 %v15074_v12, %v6554_v48  ;;  %v6952_v12 = vadd.f32 %v6948_v61, %v15200_v32 }
0x142d   : > { %v7009_v41 = vpop.permute.xlu1 %7008  ;;  %v7161_v19 = vadd.f32 %v7157_v43, %v7091_v63  ;;  %v6674_v5 = vadd.f32 %v6670_v18, %v6604_v46  ;;  %v6880_v63 = vsel %vm3964_vm2, %v15241_v53, 0.0 }
0x142e   : > { %v7018_v17 = vsel %vm3041_vm11, 0.0, %v7009_v41 }
0x142f   : > { %v7211_v39 = vadd.f32 %v15209_v52, %v7161_v19  ;;  %v7022_v15 = vadd.f32 %v7018_v17, %v6952_v12  ;;  %v7664_v52 = vld [vmem:[#allocation35 + $0x28] sm:$0xff]  ;;  %v6744_v41 = vadd.f32 %v6740_v38, %v6674_v5 }
0x1430   : > { %11453 = vmatmul.msk.f32.gmra.mxu0 %vm4083_vm15, %v7664_v52 }
0x1431   : > { %v15290_v40 = vpop.permute.xlu0 %7010  ;;  %v7267_v59 = vpop.permute.xlu2 %7266 }
0x1432   : > { %v7277_v22 = vsel %vm2575_vm6, %v7267_v59, 0.0  ;;  %v7088_v59 = vsel %vm2031_vm1, 0.0, %v15239_v60  ;;  %v7158_v60 = vsel %vm2399_vm5, 0.0, %v15243_v42  ;;  %11465 = vmatmul.msk.f32.gmra.mxu3 %vm4083_vm15, %v7918_v26  ;;  %v7019_v42 = vsel %vm3041_vm11, 0.0, %v15290_v40 }
0x1433   : > { %v7281_v4 = vadd.f32 %v7277_v22, %v7211_v39  ;;  %v7092_v44 = vadd.f32 %v7088_v59, %v7022_v15  ;;  %v7159_v40 = vsel %vm2399_vm5, 0.0, %v15257_v34  ;;  %v7785_v15 = vld [vmem:[#allocation35 + $0x50] sm:$0xff] }
0x1435   : > { %v15300_v54 = vpop.permute.xlu1 %6940 }
0x1438   : > { %11458 = vmatmul.msk.f32.vlgmr.msrb.gmra.mxu0 %vm4083_vm15, %v7785_v15  ;;  %v8137_v15 = vld [vmem:[#allocation37 + $0x48] sm:$0xff] }
0x1439   : > { %v15307_v1 = vpop.permute.xlu0 %7080  ;;  %v7475_v31 = vpop.permute.xlu2 %7474 }
0x143a   : > { %v7486_v56 = vsel %vm3964_vm2, %v7475_v31, 0.0  ;;  %v7089_v61 = vsel %vm2031_vm1, 0.0, %v15307_v1  ;;  %vm16113_vm1 = vcmask 1043456  }
0x143b   : > { %vm16120_vm10 = vmmov %vm16113_vm1 }
0x143d   : > { %v7265_v2 = vpop.permute.xlu1 %7264 }
0x143e   : > { %v7276_v33 = vsel %vm2575_vm6, %v7265_v2, 0.0  ;;  %v6814_v2 = vadd.f32 %v6810_v57, %v6744_v41  ;;  %v7786_v57 = vld [vmem:[#allocation35 + $0x58] sm:$0xff] }
0x143f   : > { %v7280_v3 = vadd.f32 %v7276_v33, %v7210_v30  ;;  %v6949_v30 = vsel %vm3797_vm3, 0.0, %v15300_v54 }
0x1440   : > { %v6884_v43 = vadd.f32 %v6880_v63, %v6814_v2  ;;  %11459 = vmatmul.msk.f32.gmra.mxu0 %vm4083_vm15, %v7786_v57  ;;  %v7829_v2 = vld [vmem:[#allocation35 + $0x60] sm:$0xff] }
0x1441   : > { %v7350_v28 = vadd.f32 %v7346_v37, %v7280_v3  ;;  %v7337_v6 = vpop.permute.xlu0 %7336  ;;  %v7477_v0 = vpop.permute.xlu2 %7476  ;;  %v7162_v3 = vadd.f32 %v7158_v60, %v7092_v44 }
0x1442   : > { %v7347_v49 = vsel %vm5009_vm12, %v7337_v6, 0.0  ;;  %v7487_v27 = vsel %vm3964_vm2, %v7477_v0, 0.0  ;;  %v6953_v53 = vadd.f32 %v6949_v30, %v6884_v43  ;;  %v7644_v30 = vpop.f32.mrf.mxu3 }
0x1443   : > { %v7420_v10 = vadd.f32 %v7416_v55, %v7350_v28  ;;  %v7212_v28 = vadd.f32 %v15214_v45, %v7162_v3  ;;  %7652 = vrot.lane.b32.xlu0 %v7644_v30, %s13304_s11 }
0x1444   : > { %v7023_v18 = vadd.f32 %v7019_v42, %v6953_v53 }
0x1445   : > { %v7490_v50 = vadd.f32 %v7486_v56, %v7420_v10  ;;  %v7874_v56 = vld [vmem:[#allocation35 + $0x78] sm:$0xff] }
0x1446   : > { %v7093_v39 = vadd.f32 %v7089_v61, %v7023_v18  ;;  %11463 = vmatmul.msk.f32.gmra.mxu2 %vm4083_vm15, %v7874_v56  ;;  %v8048_v61 = vld [vmem:[#allocation37 + $0x20] sm:$0xff]  ;;  %v8004_v56 = vld [vmem:[#allocation37 + $0x10] sm:$0xff] }
0x1447   : > { %v7518_v62 = vadd.f32 %v15129_v36, %v7490_v50  ;;  %v7351_v36 = vadd.f32 %v7347_v49, %v7281_v4  ;;  %v7600_v4 = vpop.f32.mrf.mxu2 }
0x1448   : > { %v7163_v38 = vadd.f32 %v7159_v40, %v7093_v39  ;;  %7608 = vrot.lane.b32.xlu2 %v7600_v4, %s13306_s8  ;;  %v8136_v40 = vld [vmem:[#allocation37 + $0x40] sm:$0xff] }
0x1449   : > { %v7522_v32 = vmax.f32 %v7518_v62, 0.0  ;;  %v7269_v51 = vpop.permute.xlu1 %7268  ;;  %v7271_v17 = vpop.permute.xlu2 %7270  ;;  %v8402_v4 = vld [vmem:[#allocation40] sm:$0xff] }
0x144a   : > { %v7407_v58 = vpop.permute.xlu0 %7406  ;;  %v7278_v19 = vsel %vm2575_vm6, %v7269_v51, 0.0  ;;  %v7279_v62 = vsel %vm2575_vm6, %v7271_v17, 0.0  ;;  %v7213_v49 = vadd.f32 %v15219_v35, %v7163_v38  ;;  %v7961_v17 = vld [vmem:[#allocation37 + $0x8] sm:$0xff]  ;;  %v8214_v38 = vld [vmem:[#allocation37 + $0x60] sm:$0xff] }
0x144b   : > { %v7417_v11 = vsel %vm5080_vm14, %v7407_v58, 0.0  ;;  %v7526_v29 = vmul.f32 %v15344_v7, %v7522_v32  ;;  %v7282_v55 = vadd.f32 %v7278_v19, %v7212_v28 }
0x144c   : > { %v7421_v48 = vadd.f32 %v7417_v11, %v7351_v36  ;;  %v7283_v41 = vadd.f32 %v7279_v62, %v7213_v49  ;;  %v8215_v62 = vld [vmem:[#allocation37 + $0x68] sm:$0xff]  ;;  %v8259_v49 = vld [vmem:[#allocation37 + $0x78] sm:$0xff] }
0x144d   : > { %7562 = vmatmul.f32.vlgmr.msrb.gmra.mxu1 %v7526_v29 }
0x144e   : > { %v7491_v33 = vadd.f32 %v7487_v27, %v7421_v48  ;;  %v7830_v27 = vld [vmem:[#allocation35 + $0x68] sm:$0xff] }
0x1450   : > { %v7519_v8 = vadd.f32 %v15150_v20, %v7491_v33 }
0x1451   : > { %v7339_v37 = vpop.permute.xlu1 %7338  ;;  %v7411_v52 = vpop.permute.xlu2 %7410 }
0x1452   : > { %v7409_v31 = vpop.permute.xlu0 %7408  ;;  %v7523_v46 = vmax.f32 %v7519_v8, 0.0  ;;  %v7348_v54 = vsel %vm5009_vm12, %v7339_v37, 0.0  ;;  %v7419_v0 = vsel %vm5080_vm14, %v7411_v52, 0.0  ;;  %v8171_v52 = vld [vmem:[#allocation37 + $0x58] sm:$0xff] }
0x1453   : > { %v7352_v20 = vadd.f32 %v7348_v54, %v7282_v55  ;;  %v7418_v10 = vsel %vm5080_vm14, %v7409_v31, 0.0  ;;  %vm16123_vm14 = vmmov %vm16113_vm1 }
0x1454   : > { %v7527_v6 = vmul.f32 %v15344_v7, %v7523_v46 }
0x1455   : > { %v7422_v45 = vadd.f32 %v7418_v10, %v7352_v20  ;;  %v7960_v20 = vld [vmem:[#allocation37] sm:$0xff]  ;;  %v8092_v10 = vld [vmem:[#allocation37 + $0x30] sm:$0xff] }
0x1456   : > { %7565 = vmatmul.f32.gmra.mxu1 %v7527_v6 }
0x145a   : > { %v7511_v5 = vpop.permute.xlu0 %7510 }
0x145b   : > { %v7479_v12 = vpop.permute.xlu1 %7478 }
0x145c   : > { %v7488_v50 = vsel %vm3964_vm2, %v7479_v12, 0.0 }
0x145d   : > { %v7492_v22 = vadd.f32 %v7488_v50, %v7422_v45  ;;  %v8049_v45 = vld [vmem:[#allocation37 + $0x28] sm:$0xff]  ;;  %v8005_v50 = vld [vmem:[#allocation37 + $0x18] sm:$0xff] }
0x145f   : > { %v7520_v1 = vadd.f32 %v7511_v5, %v7492_v22  ;;  %v8093_v5 = vld [vmem:[#allocation37 + $0x38] sm:$0xff]  ;;  %v8258_v22 = vld [vmem:[#allocation37 + $0x70] sm:$0xff] }
0x1461   : > { %v7524_v47 = vmax.f32 %v7520_v1, 0.0  ;;  %v8170_v1 = vld [vmem:[#allocation37 + $0x50] sm:$0xff] }
0x1463   : > { %v7341_v32 = vpop.permute.xlu1 %7340  ;;  %v7528_v51 = vmul.f32 %v15344_v7, %v7524_v47  ;;  %v7481_v34 = vpop.permute.xlu0 %7480  ;;  %v8302_v47 = vld [vmem:[#allocation37 + $0x80] sm:$0xff] }
0x1464   : > { %v7349_v59 = vsel %vm5009_vm12, %v7341_v32, 0.0  ;;  %v7489_v58 = vsel %vm3964_vm2, %v7481_v34, 0.0  ;;  %v8303_v32 = vld [vmem:[#allocation37 + $0x88] sm:$0xff]  ;;  %vm16121_vm12 = vmmov %vm16113_vm1 }
0x1465   : > { %v7353_v36 = vadd.f32 %v7349_v59, %v7283_v41  ;;  %7568 = vmatmul.f32.gmra.mxu1 %v7528_v51  ;;  %v8433_v41 = vld [vmem:[#allocation40 + $0x8] sm:$0xff]  ;;  %v8464_v51 = vld [vmem:[#allocation40 + $0x10] sm:$0xff] }
0x1467   : > { %v7423_v35 = vadd.f32 %v7419_v0, %v7353_v36 }
0x1469   : > { %v7493_v44 = vadd.f32 %v7489_v58, %v7423_v35 }
0x146b   : > { %v7516_v11 = vpop.permute.xlu1 %7515 }
0x146c   : > { %v7521_v29 = vadd.f32 %v7516_v11, %v7493_v44 }
0x146e   : > { %v7525_v63 = vmax.f32 %v7521_v29, 0.0 }
0x1470   : > { %v7529_v48 = vmul.f32 %v15344_v7, %v7525_v63 }
0x1472   : > { %7571 = vmatmul.f32.gmra.mxu1 %v7529_v48 }
0x1475   : > { %v7603_v60 = vpop.f32.mrf.mxu2 }
0x1476   : > { %7610 = vrot.lane.b32.xlu0 %v7603_v60, %s13306_s8  ;;  %v8345_v60 = vld [vmem:[#allocation38] sm:$0xff] }
0x147a   : > { %11460 = vmatmul.msk.f32.vlgmr.msra.gmra.mxu1 %vm4083_vm15, %v7829_v2 }
0x147d   : > { %v7732_v33 = vpop.f32.mrf.mxu2  ;;  %v7647_v43 = vpop.f32.mrf.mxu3 }
0x147e   : > { %7740 = vrot.lane.b32.xlu2 %v7732_v33, %s13291_s6  ;;  %7654 = vrot.lane.b32.xlu1 %v7647_v43, %s13304_s11 }
0x1482   : > { %11461 = vmatmul.msk.f32.gmra.mxu1 %vm4083_vm15, %v7830_v27 }
0x1485   : > { %v7735_v7 = vpop.f32.mrf.mxu2  ;;  %v15386_v3 = vpop.f32.mrf.mxu3 }
0x1486   : > { %7742 = vrot.lane.b32.xlu2 %v7735_v7, %s13291_s6  ;;  %v8346_v7 = vld [vmem:[#allocation38 + $0x8] sm:$0xff] }
0x148d   : > { %v7898_v8 = vpop.f32.mrf.mxu2  ;;  %v15390_v53 = vpop.f32.mrf.mxu3 }
0x148e   : > { %7906 = vrot.lane.b32.xlu0 %v7898_v8, %s13307_s23 }
0x148f   : > { %v7688_v26 = vpop.f32.mrf.mxu0 }
0x1490   : > { %7696 = vrot.lane.b32.xlu1 %v7688_v26, %s13303_s7 }
0x14a2   : > { %v7609_v26 = vpop.permute.xlu2 %7608 }
0x14ad   : > { %v7691_v37 = vpop.f32.mrf.mxu0  ;;  %v7942_v19 = vpop.f32.mrf.mxu3 }
0x14ae   : > { %7698 = vrot.lane.b32.xlu0 %v7691_v37, %s13303_s7  ;;  %7950 = vrot.lane.b32.xlu1 %v7942_v19, %s13308_s9 }
0x14b5   : > { %v7945_v46 = vpop.f32.mrf.mxu3  ;;  %v7810_v42 = vpop.f32.mrf.mxu0 }
0x14b6   : > { %7952 = vrot.lane.b32.xlu2 %v7945_v46, %s13308_s9  ;;  %v7653_v37 = vpop.permute.xlu0 %7652 }
0x14bd   : > { %v7813_v18 = vpop.f32.mrf.mxu0 }
0x14be   : > { %7818 = vrot.lane.b32.xlu2 %v7810_v42, %s13292_s14 }
0x14c6   : > { %7820 = vrot.lane.b32.xlu2 %v7813_v18, %s13292_s14 }
0x14c9   : > { %v7901_v54 = vpop.f32.mrf.mxu2 }
0x14ca   : > { %v15394_v31 = vpop.f32.mrf.mxu1  ;;  %7908 = vrot.lane.b32.xlu0 %v7901_v54, %s13307_s23 }
0x14d3   : > { %v7566_v28 = vpop.f32.mrf.mxu1 }
0x14d8   : > { %v7741_v8 = vpop.permute.xlu2 %7740 }
0x14e2   : > { %v7569_v6 = vpop.f32.mrf.mxu1 }
0x14e8   : > { %v7611_v46 = vpop.permute.xlu0 %7610 }
0x14ef   : > { %v7572_v55 = vpop.f32.mrf.mxu1 }
0x14f0   : > { %7980 = vmatpush.msra.mxu0 %v7572_v55  ;;  %8024 = vmatpush.msrb.mxu1 %v7572_v55  ;;  %v7655_v19 = vpop.permute.xlu1 %7654 }
0x14f1   : > { %8068 = vmatpush.msra.mxu2 %v7572_v55  ;;  %8112 = vmatpush.msrb.mxu3 %v7572_v55 }
0x14f2   : > { %7981 = vmatpush.msra.mxu0 %v7569_v6  ;;  %8025 = vmatpush.msrb.mxu1 %v7569_v6 }
0x14f3   : > { %8069 = vmatpush.msra.mxu2 %v7569_v6  ;;  %8113 = vmatpush.msrb.mxu3 %v7569_v6 }
0x14f4   : > { %7982 = vmatpush.msra.mxu0 %v7566_v28  ;;  %8026 = vmatpush.msrb.mxu1 %v7566_v28 }
0x14f5   : > { %8070 = vmatpush.msra.mxu2 %v7566_v28  ;;  %8114 = vmatpush.msrb.mxu3 %v7566_v28 }
0x14f6   : > { %7983 = vmatpush.msra.mxu0 %v15394_v31  ;;  %8027 = vmatpush.msrb.mxu1 %v15394_v31 }
0x14f7   : > { %8071 = vmatpush.msra.mxu2 %v15394_v31  ;;  %8115 = vmatpush.msrb.mxu3 %v15394_v31  ;;  %v7854_v39 = vpop.f32.mrf.mxu1 }
0x14f8   : > { %11466 = vmatmul.msk.f32.vlgmr.msra.gmra.mxu0 %vm5203_vm13, %v7960_v20  ;;  %11470 = vmatmul.msk.f32.vlgmr.msra.gmra.mxu2 %vm5203_vm13, %v8048_v61  ;;  %v7614_v20 = vsel %vm3707_vm7, 0.0, %v7609_v26  ;;  %v7658_v61 = vsel %vm3752_vm4, 0.0, %v7653_v37 }
0x14f9   : > { %11472 = vmatmul.msk.f32.vlgmr.msrb.gmra.mxu3 %vm5203_vm13, %v8092_v10  ;;  %8156 = vmatpush.msrb.mxu0 %v7572_v55 }
0x14fa   : > { %8190 = vmatpush.msra.mxu1 %v7572_v55  ;;  %8234 = vmatpush.msrb.mxu2 %v7572_v55 }
0x14fb   : > { %8278 = vmatpush.msra.mxu3 %v7572_v55  ;;  %7862 = vrot.lane.b32.xlu1 %v7854_v39, %s13305_s12  ;;  %v8377_v39 = vld [vmem:[#allocation62 + $0x70] sm:$0xff] }
0x14fc   : > { %8157 = vmatpush.msrb.mxu0 %v7569_v6  ;;  %8191 = vmatpush.msra.mxu1 %v7569_v6 }
0x14fd   : > { %8235 = vmatpush.msrb.mxu2 %v7569_v6  ;;  %8279 = vmatpush.msra.mxu3 %v7569_v6 }
0x14fe   : > { %8158 = vmatpush.msrb.mxu0 %v7566_v28  ;;  %8192 = vmatpush.msra.mxu1 %v7566_v28 }
0x14ff   : > { %8236 = vmatpush.msrb.mxu2 %v7566_v28  ;;  %8280 = vmatpush.msra.mxu3 %v7566_v28  ;;  %v7857_v12 = vpop.f32.mrf.mxu1 }
0x1500   : > { %8159 = vmatpush.msrb.mxu0 %v15394_v31  ;;  %8193 = vmatpush.msra.mxu1 %v15394_v31  ;;  %v7907_v54 = vpop.permute.xlu0 %7906 }
0x1501   : > { %8237 = vmatpush.msrb.mxu2 %v15394_v31  ;;  %8281 = vmatpush.msra.mxu3 %v15394_v31 }
0x1502   : > { %8322 = vmatpush.msra.mxu0 %v7572_v55  ;;  %11468 = vmatmul.msk.f32.vlgmr.msrb.gmra.mxu1 %vm5203_vm13, %v8004_v56  ;;  %v8378_v55 = vld [vmem:[#allocation62 + $0x78] sm:$0xff] }
0x1503   : > { %8421 = vmatpush.msra.mxu2 %v14412_v21  ;;  %8452 = vmatpush.msrb.mxu3 %v14412_v21 }
0x1504   : > { %11467 = vmatmul.msk.f32.gmra.mxu0 %vm5203_vm13, %v7961_v17  ;;  %11471 = vmatmul.msk.f32.gmra.mxu2 %vm5203_vm13, %v8049_v45  ;;  %v7660_v17 = vadd.f32 %v7658_v61, %v7614_v20  ;;  %v8364_v61 = vld [vmem:[#allocation62 + $0x8] sm:$0xff] }
0x1505   : > { %11473 = vmatmul.msk.f32.gmra.mxu3 %vm5203_vm13, %v8093_v5  ;;  %8323 = vmatpush.msra.mxu0 %v7569_v6  ;;  %v8376_v5 = vld [vmem:[#allocation62 + $0x68] sm:$0xff] }
0x1506   : > { %7864 = vrot.lane.b32.xlu1 %v7857_v12, %s13305_s12  ;;  %8379 = vmatpush.msrb.mxu1 %v8378_v55  ;;  %v8375_v12 = vld [vmem:[#allocation62 + $0x60] sm:$0xff] }
0x1507   : > { %8324 = vmatpush.msra.mxu0 %v7566_v28  ;;  %v7697_v28 = vpop.permute.xlu1 %7696 }
0x1508   : > { %8380 = vmatpush.msrb.mxu1 %v8377_v39  ;;  %v7702_v56 = vsel %vm3797_vm3, 0.0, %v7697_v28  ;;  %v8365_v28 = vld [vmem:[#allocation62 + $0x10] sm:$0xff] }
0x1509   : > { %8325 = vmatpush.msra.mxu0 %v15394_v31  ;;  %v7743_v31 = vpop.permute.xlu2 %7742 }
0x150a   : > { %11469 = vmatmul.msk.f32.gmra.mxu1 %vm5203_vm13, %v8005_v50  ;;  %v7746_v50 = vsel %vm2399_vm5, 0.0, %v7741_v8 }
0x150b   : > { %8381 = vmatpush.msrb.mxu1 %v8376_v5 }
0x150c   : > { %11474 = vmatmul.msk.f32.vlgmr.msrb.gmra.mxu0 %vm5203_vm13, %v8136_v40  ;;  %11478 = vmatmul.msk.f32.vlgmr.msrb.gmra.mxu2 %vm5203_vm13, %v8214_v38  ;;  %v7704_v40 = vadd.f32 %v7702_v56, %v7660_v17 }
0x150d   : > { %11480 = vmatmul.msk.f32.vlgmr.msra.gmra.mxu3 %vm5203_vm13, %v8258_v22  ;;  %8483 = vmatpush.msrb.mxu0 %v14412_v21  ;;  %v8374_v22 = vld [vmem:[#allocation62 + $0x58] sm:$0xff] }
0x150e   : > { %8514 = vmatpush.msrb.mxu2 %v14412_v21  ;;  %8545 = vmatpush.msra.mxu3 %v14412_v21 }
0x150f   : > { %8382 = vmatpush.msrb.mxu1 %v8375_v12 }
0x1511   : > { %v15461_v42 = vpop.permute.xlu2 %7952  ;;  %8383 = vmatpush.msrb.mxu1 %v8374_v22 }
0x1512   : > { %11476 = vmatmul.msk.f32.vlgmr.msra.gmra.mxu1 %vm5203_vm13, %v8170_v1  ;;  %v7659_v1 = vsel %vm3752_vm4, 0.0, %v7655_v19  ;;  %v7957_v5 = vsel %vm4054_vm0, %v15461_v42, 0.0 }
0x1514   : > { %11475 = vmatmul.msk.f32.gmra.mxu0 %vm5203_vm13, %v8137_v15  ;;  %11479 = vmatmul.msk.f32.gmra.mxu2 %vm5203_vm13, %v8215_v62  ;;  %v7615_v62 = vsel %vm3707_vm7, 0.0, %v7611_v46 }
0x1515   : > { %11481 = vmatmul.msk.f32.gmra.mxu3 %vm5203_vm13, %v8259_v49  ;;  %v7748_v49 = vadd.f32 %v7746_v50, %v7704_v40 }
0x1519   : > { %v7819_v18 = vpop.permute.xlu2 %7818 }
0x151a   : > { %11477 = vmatmul.msk.f32.gmra.mxu1 %vm5203_vm13, %v8171_v52  ;;  %v7661_v52 = vadd.f32 %v7659_v1, %v7615_v62 }
0x151c   : > { %11482 = vmatmul.msk.f32.vlgmr.msra.gmra.mxu0 %vm5203_vm13, %v8302_v47  ;;  %11484 = vmatmul.msk.f32.vlgmr.msra.gmra.mxu2 %vm3338_vm8, %v8402_v4  ;;  %v8373_v47 = vld [vmem:[#allocation62 + $0x50] sm:$0xff] }
0x151d   : > { %11485 = vmatmul.msk.f32.vlgmr.msrb.gmra.mxu3 %vm3338_vm8, %v8433_v41  ;;  %8571 = vmatpush.msra.mxu0 %v14412_v21  ;;  %v7782_v41 = vadd.f32 %v15386_v3, %v7748_v49 }
0x151e   : > { %8602 = vmatpush.msra.mxu2 %v14412_v21  ;;  %8633 = vmatpush.msrb.mxu3 %v14412_v21 }
0x151f   : > { %8384 = vmatpush.msrb.mxu1 %v8373_v47  ;;  %v8495_v47 = vld [vmem:[#allocation40 + $0x18] sm:$0xff] }
0x1520   : > { %v7951_v6 = vpop.permute.xlu1 %7950  ;;  %v7699_v10 = vpop.permute.xlu0 %7698 }
0x1521   : > { %v7821_v38 = vpop.permute.xlu2 %7820  ;;  %v7703_v4 = vsel %vm3797_vm3, 0.0, %v7699_v10  ;;  %v7956_v26 = vsel %vm4054_vm0, %v7951_v6, 0.0  ;;  %v8363_v10 = vld [vmem:[#allocation62] sm:$0xff] }
0x1522   : > { %v7825_v8 = vsel %vm2575_vm6, %v7821_v38, 0.0 }
0x1524   : > { %11483 = vmatmul.msk.f32.gmra.mxu0 %vm5203_vm13, %v8303_v32  ;;  %11487 = vmatmul.msk.f32.vlgmr.msrb.gmra.mxu2 %vm3338_vm8, %v8495_v47  ;;  %vm16122_vm13 = vmmov %vm16113_vm1 }
0x152c   : > { %11486 = vmatmul.msk.f32.vlgmr.msrb.gmra.mxu0 %vm3338_vm8, %v8464_v51  ;;  %v8372_v51 = vld [vmem:[#allocation62 + $0x48] sm:$0xff] }
0x152d   : > { %8664 = vmatpush.msrb.mxu0 %v14412_v21  ;;  %8385 = vmatpush.msrb.mxu1 %v8372_v51 }
0x153c   : > { %v7909_v15 = vpop.permute.xlu0 %7908 }
0x153d   : > { %v7913_v6 = vsel %vm4009_vm9, %v7909_v15, 0.0 }
0x156d   : > { %v7863_v45 = vpop.permute.xlu1 %7862 }
0x1575   : > { %v7985_v34 = vpop.f32.mrf.mxu0 }
0x1576   : > { %7993 = vrot.lane.b32.xlu0 %v7985_v34, %s13306_s8  ;;  %v8371_v34 = vld [vmem:[#allocation62 + $0x40] sm:$0xff] }
0x1577   : > { %8386 = vmatpush.msrb.mxu1 %v8371_v34 }
0x1578   : > { %v7865_v32 = vpop.permute.xlu1 %7864 }
0x157b   : > { %v8073_v57 = vpop.f32.mrf.mxu2 }
0x157c   : > { %8081 = vrot.lane.b32.xlu1 %v8073_v57, %s13303_s7  ;;  %v8117_v59 = vpop.f32.mrf.mxu3  ;;  %v7824_v57 = vsel %vm2575_vm6, %v7819_v18, 0.0 }
0x157e   : > { %8125 = vrot.lane.b32.xlu0 %v8117_v59, %s13291_s6 }
0x157f   : > { %v8029_v36 = vpop.f32.mrf.mxu1 }
0x1580   : > { %8037 = vrot.lane.b32.xlu2 %v8029_v36, %s13304_s11 }
0x1581   : > { %v7988_v0 = vpop.f32.mrf.mxu0 }
0x1584   : > { %7995 = vrot.lane.b32.xlu1 %v7988_v0, %s13306_s8  ;;  %v7705_v0 = vadd.f32 %v7703_v4, %v7661_v52  ;;  %v8526_v52 = vld [vmem:[#allocation40 + $0x20] sm:$0xff]  ;;  %v8552_v4 = vld [vmem:[#allocation40 + $0x28] sm:$0xff]  ;;  %s16107_s8 = smov 11  }
0x1585   : > { %11488 = vmatmul.msk.f32.vlgmr.msra.gmra.mxu3 %vm3338_vm8, %v8526_v52  ;;  %11489 = vmatmul.msk.f32.vlgmr.msra.gmra.mxu0 %vm3338_vm8, %v8552_v4 }
0x1587   : > { %v8076_v58 = vpop.f32.mrf.mxu2  ;;  %v8032_v21 = vpop.f32.mrf.mxu1 }
0x1588   : > { %v8120_v35 = vpop.f32.mrf.mxu3  ;;  %8039 = vrot.lane.b32.xlu2 %v8032_v21, %s13304_s11  ;;  %v7868_v21 = vsel %vm3964_vm2, %v7863_v45, 0.0  ;;  %s16109_s11 = smov 9  }
0x1589   : > { %v15446_v44 = vpop.f32.mrf.mxu0  ;;  %8127 = vrot.lane.b32.xlu0 %v8120_v35, %s13291_s6  ;;  %v7747_v35 = vsel %vm2399_vm5, 0.0, %v7743_v31  ;;  %v7869_v31 = vsel %vm3964_vm2, %v7865_v32, 0.0 }
0x158c   : > { %8083 = vrot.lane.b32.xlu1 %v8076_v58, %s13303_s7  ;;  %v8370_v58 = vld [vmem:[#allocation62 + $0x38] sm:$0xff]  ;;  %s16110_s7 = sld [smem:[#allocation106_spill]] }
0x158d   : > { %8387 = vmatpush.msrb.mxu1 %v8370_v58 }
0x158f   : > { %v8239_v11 = vpop.f32.mrf.mxu2  ;;  %v8195_v63 = vpop.f32.mrf.mxu1 }
0x1590   : > { %v8283_v48 = vpop.f32.mrf.mxu3  ;;  %8247 = vrot.lane.b32.xlu2 %v8239_v11, %s13305_s12  ;;  %v7826_v11 = vadd.f32 %v7824_v57, %v7782_v41 }
0x1591   : > { %v15451_v29 = vpop.f32.mrf.mxu0  ;;  %8203 = vrot.lane.b32.xlu0 %v8195_v63, %s13292_s14  ;;  %v8369_v63 = vld [vmem:[#allocation62 + $0x30] sm:$0xff] }
0x1592   : > { %v7870_v3 = vadd.f32 %v7868_v21, %v7826_v11  ;;  %8388 = vmatpush.msrb.mxu1 %v8369_v63  ;;  %v8614_v21 = vld [vmem:[#allocation40 + $0x38] sm:$0xff]  ;;  %v8583_v11 = vld [vmem:[#allocation40 + $0x30] sm:$0xff]  ;;  %v11494_v47 = vld [vmem:[%s16110_s7 + $0x8] sm:$0xff] }
0x1593   : > { %11491 = vmatmul.msk.f32.vlgmr.msrb.gmra.mxu3 %vm3338_vm8, %v8614_v21  ;;  %11490 = vmatmul.msk.f32.vlgmr.msra.gmra.mxu2 %vm3338_vm8, %v8583_v11  ;;  %v11496_v52 = vld [vmem:[%s16110_s7 + $0x10] sm:$0xff]  ;;  %v11498_v4 = vld [vmem:[%s16110_s7 + $0x18] sm:$0xff]  ;;  %v8993_v11 = vld [vmem:[%s13544_s10 + $0x120] sm:$0xff] }
0x1594   : > { %8291 = vrot.lane.b32.xlu1 %v8283_v48, %s13307_s23  ;;  %v7749_v48 = vadd.f32 %v7747_v35, %v7705_v0  ;;  %v11504_v21 = vld [vmem:[%s16110_s7 + $0x30] sm:$0xff] }
0x1597   : > { %v8198_v27 = vpop.f32.mrf.mxu1  ;;  %v8242_v30 = vpop.f32.mrf.mxu2 }
0x1598   : > { %v8286_v33 = vpop.f32.mrf.mxu3 }
0x1599   : > { %v8327_v2 = vpop.f32.mrf.mxu0  ;;  %8205 = vrot.lane.b32.xlu0 %v8198_v27, %s13292_s14 }
0x159a   : > { %8335 = vrot.lane.b32.xlu2 %v8327_v2, %s13308_s9  ;;  %v7912_v2 = vsel %vm4009_vm9, %v7907_v54, 0.0 }
0x159c   : > { %8349 = vperm.xlu1 %11978, %v8345_v60   ;;  %v8368_v60 = vld [vmem:[#allocation62 + $0x28] sm:$0xff] }
0x159d   : > { %8389 = vmatpush.msrb.mxu1 %v8368_v60 }
0x15a1   : > { %v8330_v43 = vpop.f32.mrf.mxu0  ;;  %8293 = vrot.lane.b32.xlu0 %v8286_v33, %s13307_s23  ;;  %v7914_v33 = vadd.f32 %v7912_v2, %v7870_v3  ;;  %s16112_s23 = smov 117  }
0x15a2   : > { %8249 = vrot.lane.b32.xlu2 %v8242_v30, %s13305_s12  ;;  %v8367_v30 = vld [vmem:[#allocation62 + $0x20] sm:$0xff]  ;;  %s16108_s12 = smov 10  }
0x15a3   : > { %8390 = vmatpush.msrb.mxu1 %v8367_v30  ;;  %v7958_v18 = vadd.f32 %v7956_v26, %v7914_v33 }
0x15a4   : > { %8337 = vrot.lane.b32.xlu1 %v8330_v43, %s13308_s9  ;;  %v7783_v43 = vadd.f32 %v15390_v53, %v7749_v48  ;;  %v8645_v48 = vld [vmem:[#allocation40 + $0x40] sm:$0xff]  ;;  %s16155_s9 = smov 18  }
0x15a5   : > { %11492 = vmatmul.msk.f32.vlgmr.msrb.gmra.mxu0 %vm3338_vm8, %v8645_v48  ;;  %v8995_v48 = vld [vmem:[%s13544_s10 + $0x130] sm:$0xff] }
0x15a6   : > { %v7827_v54 = vadd.f32 %v7825_v8, %v7783_v43 }
0x15a8   : > { %v7871_v55 = vadd.f32 %v7869_v31, %v7827_v54 }
0x15aa   : > { %8354 = vperm.xlu2 %11977, %v8346_v7   ;;  %v8366_v7 = vld [vmem:[#allocation62 + $0x18] sm:$0xff]  ;;  %v7915_v56 = vadd.f32 %v7913_v6, %v7871_v55 }
0x15ab   : > { %8391 = vmatpush.msrb.mxu1 %v8366_v7 }
0x15ac   : > { %v7959_v1 = vadd.f32 %v7957_v5, %v7915_v56  ;;  %v8454_v5 = vpop.f32.mrf.mxu3 }
0x15ad   : > { %8392 = vmatpush.msrb.mxu1 %v8365_v28  ;;  %v11984_v28 = vld [vmem:[#allocation49] ss:$0 sm:$0xff]  ;;  %8458 = vrot.lane.b32.xlu1 %v8454_v5, %s16108_s12  ;;  %v8967_v5 = vld [vmem:[%s13544_s10 + $0x50] sm:$0xff] }
0x15af   : > { %8393 = vmatpush.msrb.mxu1 %v8364_v61 }
0x15b1   : > { %8394 = vmatpush.msrb.mxu1 %v8363_v10 }
0x15da   : > { %v8038_v59 = vpop.permute.xlu2 %8037 }
0x15db   : > { %v8043_v39 = vsel %vm3752_vm4, 0.0, %v8038_v59 }
0x15e2   : > { %v8040_v37 = vpop.permute.xlu2 %8039 }
0x15e3   : > { %v8044_v42 = vsel %vm3752_vm4, 0.0, %v8040_v37  ;;  %vm16117_vm4 = vmmov %vm16113_vm1 }
0x15e8   : > { %v7994_v36 = vpop.permute.xlu0 %7993 }
0x15e9   : > { %v7999_v46 = vsel %vm3707_vm7, 0.0, %v7994_v36 }
0x15ea   : > { %v8001_v20 = vadd.f32 %v7999_v46, %v7958_v18  ;;  %v8248_v12 = vpop.permute.xlu2 %8247 }
0x15eb   : > { %v8253_v57 = vsel %vm3964_vm2, %v8248_v12, 0.0  ;;  %v8485_v12 = vpop.f32.mrf.mxu0 }
0x15ec   : > { %v8045_v45 = vadd.f32 %v8043_v39, %v8001_v20  ;;  %8489 = vrot.lane.b32.xlu2 %v8485_v12, %s16109_s11  ;;  %v8968_v12 = vld [vmem:[%s13544_s10 + $0x58] sm:$0xff] }
0x15ee   : > { %v8082_v27 = vpop.permute.xlu1 %8081 }
0x15ef   : > { %v8087_v17 = vsel %vm3797_vm3, 0.0, %v8082_v27 }
0x15f0   : > { %v8126_v19 = vpop.permute.xlu0 %8125  ;;  %v8089_v50 = vadd.f32 %v8087_v17, %v8045_v45  ;;  %v8423_v45 = vpop.f32.mrf.mxu2 }
0x15f1   : > { %v8131_v38 = vsel %vm2399_vm5, 0.0, %v8126_v19  ;;  %8427 = vrot.lane.b32.xlu0 %v8423_v45, %s16107_s8  ;;  %v8966_v45 = vld [vmem:[%s13544_s10 + $0x48] sm:$0xff] }
0x15f2   : > { %v8133_v62 = vadd.f32 %v8131_v38, %v8089_v50 }
0x15f4   : > { %v8167_v51 = vadd.f32 %v15446_v44, %v8133_v62  ;;  %v8336_v59 = vpop.permute.xlu2 %8335 }
0x15f5   : > { %v8341_v60 = vsel %vm4054_vm0, %v8336_v59, 0.0  ;;  %v8996_v59 = vld [vmem:[%s13544_s10 + $0x138] sm:$0xff] }
0x15f6   : > { %v7996_v53 = vpop.permute.xlu1 %7995 }
0x15f7   : > { %v8000_v22 = vsel %vm3707_vm7, 0.0, %v7996_v53  ;;  %vm16118_vm7 = vmmov %vm16113_vm1 }
0x15f8   : > { %v8002_v49 = vadd.f32 %v8000_v22, %v7959_v1 }
0x15fa   : > { %v8046_v32 = vadd.f32 %v8044_v42, %v8002_v49  ;;  %v8675_v49 = vld [vmem:[%s16110_s7] sm:$0xff]  ;;  %v9002_v42 = vld [vmem:[%s13544_s10 + $0x168] sm:$0xff] }
0x15fb   : > { %v8128_v40 = vpop.permute.xlu0 %8127 }
0x15fc   : > { %v8132_v2 = vsel %vm2399_vm5, 0.0, %v8128_v40  ;;  %v8250_v8 = vpop.permute.xlu2 %8249  ;;  %v8516_v40 = vpop.f32.mrf.mxu2 }
0x15fd   : > { %v8254_v31 = vsel %vm3964_vm2, %v8250_v8, 0.0  ;;  %8520 = vrot.lane.b32.xlu0 %v8516_v40, %s13291_s6  ;;  %v8985_v8 = vld [vmem:[%s13544_s10 + $0xe0] sm:$0xff]  ;;  %vm16115_vm2 = vmmov %vm16113_vm1  ;;  %v8963_v40 = vld [vmem:[%s13544_s10 + $0x30] sm:$0xff] }
0x15fe   : > { %v8084_v15 = vpop.permute.xlu1 %8083 }
0x15ff   : > { %v8088_v41 = vsel %vm3797_vm3, 0.0, %v8084_v15  ;;  %vm16116_vm3 = vmmov %vm16113_vm1 }
0x1600   : > { %v8090_v36 = vadd.f32 %v8088_v41, %v8046_v32  ;;  %v9003_v41 = vld [vmem:[%s13544_s10 + $0x170] sm:$0xff]  ;;  %v9004_v32 = vld [vmem:[%s13544_s10 + $0x178] sm:$0xff] }
0x1602   : > { %v8134_v44 = vadd.f32 %v8132_v2, %v8090_v36  ;;  %v8573_v38 = vpop.f32.mrf.mxu0  ;;  %v8997_v36 = vld [vmem:[%s13544_s10 + $0x140] sm:$0xff]  ;;  %v11506_v2 = vld [vmem:[%s16110_s7 + $0x38] sm:$0xff] }
0x1603   : > { %v8204_v34 = vpop.permute.xlu0 %8203  ;;  %8577 = vrot.lane.b32.xlu1 %v8573_v38, %s13292_s14  ;;  %v8964_v38 = vld [vmem:[%s13544_s10 + $0x38] sm:$0xff] }
0x1604   : > { %v8209_v0 = vsel %vm2575_vm6, %v8204_v34, 0.0  ;;  %v8168_v7 = vadd.f32 %v15451_v29, %v8134_v44  ;;  %v8355_v29 = vpop.permute.xlu2 %8354  ;;  %v9000_v34 = vld [vmem:[%s13544_s10 + $0x158] sm:$0xff]  ;;  %v8991_v44 = vld [vmem:[%s13544_s10 + $0x110] sm:$0xff] }
0x1605   : > { %v8211_v58 = vadd.f32 %v8209_v0, %v8167_v51  ;;  %v8999_v51 = vld [vmem:[%s13544_s10 + $0x150] sm:$0xff]  ;;  %v11500_v0 = vld [vmem:[%s16110_s7 + $0x20] sm:$0xff] }
0x1606   : > { %v8292_v35 = vpop.permute.xlu1 %8291 }
0x1607   : > { %v8297_v63 = vsel %vm4009_vm9, %v8292_v35, 0.0  ;;  %v8255_v3 = vadd.f32 %v8253_v57, %v8211_v58  ;;  %v9001_v57 = vld [vmem:[%s13544_s10 + $0x160] sm:$0xff]  ;;  %v8998_v58 = vld [vmem:[%s13544_s10 + $0x148] sm:$0xff] }
0x1608   : > { %v15509_v50 = vpop.f32.mrf.mxu3  ;;  %v11502_v35 = vld [vmem:[%s16110_s7 + $0x28] sm:$0xff] }
0x1609   : > { %v8299_v27 = vadd.f32 %v8297_v63, %v8255_v3  ;;  %v8994_v63 = vld [vmem:[%s13544_s10 + $0x128] sm:$0xff] }
0x160a   : > { %v8990_v3 = vld [vmem:[%s13544_s10 + $0x108] sm:$0xff] }
0x160b   : > { %v8206_v30 = vpop.permute.xlu0 %8205  ;;  %v8343_v43 = vadd.f32 %v8341_v60, %v8299_v27  ;;  %v8992_v27 = vld [vmem:[%s13544_s10 + $0x118] sm:$0xff]  ;;  %v8987_v60 = vld [vmem:[%s13544_s10 + $0xf0] sm:$0xff] }
0x160c   : > { %v8210_v33 = vsel %vm2575_vm6, %v8206_v30, 0.0 }
0x160d   : > { %v8212_v19 = vadd.f32 %v8210_v33, %v8168_v7  ;;  %v8988_v33 = vld [vmem:[%s13544_s10 + $0xf8] sm:$0xff] }
0x160e   : > { %v8350_v26 = vpop.permute.xlu1 %8349  ;;  %v8984_v7 = vld [vmem:[%s13544_s10 + $0xd8] sm:$0xff] }
0x160f   : > { %v8357_v37 = vadd.f32 %v8350_v26, %v8343_v43  ;;  %v8256_v18 = vadd.f32 %v8254_v31, %v8212_v19  ;;  %v8989_v43 = vld [vmem:[%s13544_s10 + $0x100] sm:$0xff]  ;;  %v8982_v31 = vld [vmem:[%s13544_s10 + $0xc8] sm:$0xff] }
0x1610   : > { %v11508_v26 = vld [vmem:[%s16110_s7 + $0x40] sm:$0xff] }
0x1611   : > { %v8359_v46 = vmax.f32 %v8357_v37, 0.0  ;;  %v8986_v37 = vld [vmem:[%s13544_s10 + $0xe8] sm:$0xff]  ;;  %v8981_v19 = vld [vmem:[%s13544_s10 + $0xc0] sm:$0xff] }
0x1613   : > { %v8361_v54 = vmul.f32 %v11984_v28, %v8359_v46  ;;  %v8294_v55 = vpop.permute.xlu0 %8293  ;;  %v8983_v46 = vld [vmem:[%s13544_s10 + $0xd0] sm:$0xff] }
0x1614   : > { %v8298_v20 = vsel %vm4009_vm9, %v8294_v55, 0.0  ;;  %v8975_v55 = vld [vmem:[%s13544_s10 + $0x90] sm:$0xff]  ;;  %vm16119_vm9 = vmmov %vm16113_vm1 }
0x1615   : > { %8395 = vmatmul.f32.vlgmr.msrb.gmra.mxu1 %v8361_v54  ;;  %v8300_v53 = vadd.f32 %v8298_v20, %v8256_v18  ;;  %v8979_v54 = vld [vmem:[%s13544_s10 + $0xb0] sm:$0xff]  ;;  %v8980_v18 = vld [vmem:[%s13544_s10 + $0xb8] sm:$0xff] }
0x1616   : > { %v8338_v61 = vpop.permute.xlu1 %8337  ;;  %v8635_v22 = vpop.f32.mrf.mxu3  ;;  %v8976_v20 = vld [vmem:[%s13544_s10 + $0x98] sm:$0xff] }
0x1617   : > { %v8342_v10 = vsel %vm4054_vm0, %v8338_v61, 0.0  ;;  %8639 = vrot.lane.b32.xlu0 %v8635_v22, %s16111_s4  ;;  %v8604_v30 = vpop.f32.mrf.mxu2  ;;  %v8972_v61 = vld [vmem:[%s13544_s10 + $0x78] sm:$0xff]  ;;  %v8965_v22 = vld [vmem:[%s13544_s10 + $0x40] sm:$0xff]  ;;  %vm16126_vm0 = vmmov %vm16113_vm1 }
0x1618   : > { %v8344_v6 = vadd.f32 %v8342_v10, %v8300_v53  ;;  %8608 = vrot.lane.b32.xlu2 %v8604_v30, %s16114_s5  ;;  %v8977_v53 = vld [vmem:[%s13544_s10 + $0xa0] sm:$0xff]  ;;  %v9065_v10 = vld [vmem:[#allocation41] sm:$0xf] }
0x161a   : > { %v8358_v39 = vadd.f32 %v8355_v29, %v8344_v6  ;;  %v8973_v6 = vld [vmem:[%s13544_s10 + $0x80] sm:$0xff]  ;;  %v8974_v29 = vld [vmem:[%s13544_s10 + $0x88] sm:$0xff] }
0x161c   : > { %v8360_v17 = vmax.f32 %v8358_v39, 0.0  ;;  %v8969_v39 = vld [vmem:[%s13544_s10 + $0x60] sm:$0xff] }
0x161e   : > { %v8362_v56 = vmul.f32 %v11984_v28, %v8360_v17  ;;  %v8978_v28 = vld [vmem:[%s13544_s10 + $0xa8] sm:$0xff] }
0x161f   : > { %v8970_v17 = vld [vmem:[%s13544_s10 + $0x68] sm:$0xff] }
0x1620   : > { %8398 = vmatmul.f32.gmra.mxu1 %v8362_v56  ;;  %v8971_v56 = vld [vmem:[%s13544_s10 + $0x70] sm:$0xff] }
0x1622   : > { %v8666_v1 = vpop.f32.mrf.mxu0 }
0x1623   : > { %8670 = vrot.lane.b32.xlu1 %v8666_v1, %s16112_s23  ;;  %v8960_v1 = vld [vmem:[%s13544_s10 + $0x18] sm:$0xff] }
0x1692   : > { %v8396_v15 = vpop.f32.mrf.mxu1 }
0x169d   : > { %v8399_v62 = vpop.f32.mrf.mxu1 }
0x169e   : > { %8693 = vmatpush.msrb.mxu2 %v8399_v62  ;;  %8724 = vmatpush.msra.mxu3 %v8399_v62 }
0x169f   : > { %8755 = vmatpush.msra.mxu0 %v8399_v62  ;;  %8786 = vmatpush.msra.mxu1 %v8399_v62 }
0x16a0   : > { %8694 = vmatpush.msrb.mxu2 %v8396_v15  ;;  %8725 = vmatpush.msra.mxu3 %v8396_v15 }
0x16a1   : > { %8756 = vmatpush.msra.mxu0 %v8396_v15  ;;  %8787 = vmatpush.msra.mxu1 %v8396_v15 }
0x16a2   : > { %11493 = vmatmul.msk.f32.vlgmr.msrb.gmra.mxu2 %vm4083_vm15, %v8675_v49  ;;  %11495 = vmatmul.msk.f32.vlgmr.msra.gmra.mxu3 %vm4083_vm15, %v11494_v47  ;;  %v8957_v49 = vld [vmem:[%s13544_s10] sm:$0xff]  ;;  %v8958_v47 = vld [vmem:[%s13544_s10 + $0x8] sm:$0xff] }
0x16a3   : > { %11497 = vmatmul.msk.f32.vlgmr.msra.gmra.mxu0 %vm4083_vm15, %v11496_v52  ;;  %8817 = vmatpush.msra.mxu2 %v8399_v62  ;;  %v8959_v52 = vld [vmem:[%s13544_s10 + $0x10] sm:$0xff] }
0x16a4   : > { %8843 = vmatpush.msrb.mxu3 %v8399_v62  ;;  %8874 = vmatpush.msrb.mxu0 %v8399_v62 }
0x16a5   : > { %8905 = vmatpush.msrb.mxu1 %v8399_v62  ;;  %8818 = vmatpush.msra.mxu2 %v8396_v15 }
0x16a6   : > { %8844 = vmatpush.msrb.mxu3 %v8396_v15  ;;  %8875 = vmatpush.msrb.mxu0 %v8396_v15 }
0x16a7   : > { %8906 = vmatpush.msrb.mxu1 %v8396_v15  ;;  %8936 = vmatpush.msrb.mxu2 %v8399_v62  ;;  %v8962_v62 = vld [vmem:[%s13544_s10 + $0x28] sm:$0xff] }
0x16a8   : > { %11499 = vmatmul.msk.f32.vlgmr.msra.gmra.mxu1 %vm4083_vm15, %v11498_v4  ;;  %9005 = vmatpush.msra.mxu3 %v9002_v42  ;;  %v15601_v4 = vld [vmem:[#allocation41 + $0x4] sm:$0xf]  ;;  %v15607_v42 = vld [vmem:[#allocation41 + $0x8] sm:$0xf] }
0x16a9   : > { %9025 = vmatpush.msra.mxu0 %v9003_v41  ;;  %9045 = vmatpush.msra.mxu1 %v9004_v32  ;;  %v15613_v41 = vld [vmem:[#allocation41 + $0xc] sm:$0xf]  ;;  %v15619_v32 = vld [vmem:[#allocation41 + $0x14] sm:$0xf] }
0x16aa   : > { %8937 = vmatpush.msrb.mxu2 %v8396_v15  ;;  %9006 = vmatpush.msra.mxu3 %v8999_v51  ;;  %v8961_v15 = vld [vmem:[%s13544_s10 + $0x20] sm:$0xff] }
0x16ab   : > { %9026 = vmatpush.msra.mxu0 %v9000_v34  ;;  %9046 = vmatpush.msra.mxu1 %v9001_v57 }
0x16ac   : > { %9007 = vmatpush.msra.mxu3 %v8996_v59  ;;  %11501 = vmatmul.msk.f32.vlgmr.msra.gmra.mxu2 %vm4083_vm15, %v11500_v0 }
0x16ad   : > { %9027 = vmatpush.msra.mxu0 %v8997_v36  ;;  %9047 = vmatpush.msra.mxu1 %v8998_v58 }
0x16ae   : > { %11503 = vmatmul.msk.f32.vlgmr.msrb.gmra.mxu3 %vm4083_vm15, %v11502_v35  ;;  %11505 = vmatmul.msk.f32.vlgmr.msrb.gmra.mxu0 %vm4083_vm15, %v11504_v21  ;;  %v8948_v35 = vld [vmem:[%s16125_s16] sm:$0xff] }
0x16af   : > { %11510 = vmatpush.msk.msra.mxu2 %vm16113_vm1, %v14311_v23  ;;  %9008 = vmatpush.msra.mxu3 %v8993_v11 }
0x16b0   : > { %9028 = vmatpush.msra.mxu0 %v8994_v63  ;;  %9048 = vmatpush.msra.mxu1 %v8995_v48  ;;  %v8428_v63 = vpop.permute.xlu0 %8427  ;;  %v8459_v48 = vpop.permute.xlu1 %8458 }
0x16b1   : > { %9009 = vmatpush.msra.mxu3 %v8990_v3  ;;  %11507 = vmatmul.msk.f32.vlgmr.msrb.gmra.mxu1 %vm4083_vm15, %v11506_v2 }
0x16b2   : > { %9029 = vmatpush.msra.mxu0 %v8991_v44  ;;  %9049 = vmatpush.msra.mxu1 %v8992_v27  ;;  %v8490_v44 = vpop.permute.xlu2 %8489 }
0x16b3   : > { %9010 = vmatpush.msra.mxu3 %v8987_v60 }
0x16b4   : > { %9030 = vmatpush.msra.mxu0 %v8988_v33  ;;  %9050 = vmatpush.msra.mxu1 %v8989_v43 }
0x16b5   : > { %9011 = vmatpush.msra.mxu3 %v8984_v7  ;;  %11509 = vmatmul.msk.f32.vlgmr.msrb.gmra.mxu2 %vm4083_vm15, %v11508_v26  ;;  %vm16124_vm15 = vmmov %vm16113_vm1  ;;  %vm16127_vm1 = vcmask 89088  }
0x16b6   : > { %9031 = vmatpush.msra.mxu0 %v8985_v8  ;;  %9051 = vmatpush.msra.mxu1 %v8986_v37  ;;  %v8430_v3 = vsel %vm16127_vm1, 0.0, %v8428_v63 }
0x16b7   : > { %11512 = vmatpush.msk.msrb.mxu2 %vm16115_vm2, %v14315_v24  ;;  %9012 = vmatpush.msra.mxu3 %v8981_v19  ;;  %vm16128_vm2 = vcmask 80896  }
0x16b8   : > { %9032 = vmatpush.msra.mxu0 %v8982_v31  ;;  %9052 = vmatpush.msra.mxu1 %v8983_v46  ;;  %v8461_v2 = vsel %vm16128_vm2, 0.0, %v8459_v48  ;;  %v8521_v30 = vpop.permute.xlu0 %8520  ;;  %v8578_v26 = vpop.permute.xlu1 %8577 }
0x16b9   : > { %9013 = vmatpush.msra.mxu3 %v8978_v28  ;;  %v8462_v27 = vadd.f32 %v8461_v2, %v8430_v3  ;;  %v8523_v43 = vsel %vm2399_vm5, 0.0, %v8521_v30  ;;  %v8580_v37 = vsel %vm2575_vm6, %v8578_v26, 0.0  ;;  %v9403_v2 = vld [vmem:[#allocation41 + $0x10] sm:$0xf] }
0x16ba   : > { %9033 = vmatpush.msra.mxu0 %v8979_v54  ;;  %9053 = vmatpush.msra.mxu1 %v8980_v18  ;;  %v8609_v19 = vpop.permute.xlu2 %8608 }
0x16bb   : > { %9014 = vmatpush.msra.mxu3 %v8975_v55 }
0x16bc   : > { %9034 = vmatpush.msra.mxu0 %v8976_v20  ;;  %9054 = vmatpush.msra.mxu1 %v8977_v53  ;;  %v15642_v20 = vld [vmem:[#allocation41 + $0x18] sm:$0xf] }
0x16bd   : > { %9015 = vmatpush.msra.mxu3 %v8972_v61  ;;  %11511 = vmatmul.msk.f32.vlgmr.msra.gmra.mxu2 %vm3041_vm11, %v9065_v10 }
0x16be   : > { %9035 = vmatpush.msra.mxu0 %v8973_v6  ;;  %9055 = vmatpush.msra.mxu1 %v8974_v29 }
0x16bf   : > { %11514 = vmatpush.msk.msra.mxu2 %vm16116_vm3, %v14319_v25  ;;  %9016 = vmatpush.msra.mxu3 %v8969_v39  ;;  %vm16129_vm3 = vcmask 72704   ;;  %v15648_v39 = vld [vmem:[#allocation41 + $0x1c] sm:$0xf] }
0x16c0   : > { %9036 = vmatpush.msra.mxu0 %v8970_v17  ;;  %9056 = vmatpush.msra.mxu1 %v8971_v56  ;;  %v8492_v60 = vsel %vm16129_vm3, 0.0, %v8490_v44  ;;  %v8640_v28 = vpop.permute.xlu0 %8639  ;;  %v8671_v53 = vpop.permute.xlu1 %8670 }
0x16c1   : > { %9017 = vmatpush.msra.mxu3 %v8966_v45  ;;  %v8493_v33 = vadd.f32 %v8492_v60, %v8462_v27 }
0x16c2   : > { %9037 = vmatpush.msra.mxu0 %v8967_v5  ;;  %9057 = vmatpush.msra.mxu1 %v8968_v12 }
0x16c3   : > { %9018 = vmatpush.msra.mxu3 %v8963_v40  ;;  %v8524_v7 = vadd.f32 %v8523_v43, %v8493_v33 }
0x16c4   : > { %9038 = vmatpush.msra.mxu0 %v8964_v38  ;;  %9058 = vmatpush.msra.mxu1 %v8965_v22 }
0x16c5   : > { %9019 = vmatpush.msra.mxu3 %v8960_v1  ;;  %11513 = vmatmul.msk.f32.vlgmr.msrb.gmra.mxu2 %vm3041_vm11, %v9065_v10  ;;  %v8550_v8 = vadd.f32 %v15509_v50, %v8524_v7 }
0x16c6   : > { %9039 = vmatpush.msra.mxu0 %v8961_v15  ;;  %9059 = vmatpush.msra.mxu1 %v8962_v62 }
0x16c7   : > { %11516 = vmatpush.msk.msrb.mxu2 %vm16117_vm4, %v14311_v23  ;;  %9020 = vmatpush.msra.mxu3 %v8957_v49  ;;  %v8581_v31 = vadd.f32 %v8580_v37, %v8550_v8  ;;  %vm16130_vm4 = vcmask 973824  }
0x16c8   : > { %9040 = vmatpush.msra.mxu0 %v8958_v47  ;;  %9060 = vmatpush.msra.mxu1 %v8959_v52  ;;  %v8611_v46 = vsel %vm16130_vm4, %v8609_v19, 0.0 }
0x16c9   : > { %11518 = vmatpush.msk.msrb.mxu3 %vm16118_vm7, %v14315_v24  ;;  %v8612_v54 = vadd.f32 %v8611_v46, %v8581_v31  ;;  %vm16131_vm7 = vcmask 965632  }
0x16ca   : > { %11520 = vmatpush.msk.msrb.mxu0 %vm16119_vm9, %v14319_v25  ;;  %11522 = vmatpush.msk.msrb.mxu1 %vm16120_vm10, %v14311_v23  ;;  %v8642_v18 = vsel %vm16131_vm7, %v8640_v28, 0.0  ;;  %vm16132_vm9 = vcmask 957440   ;;  %vm16133_vm10 = vmmov %vm16127_vm1  ;;  %vm16139_vm1 = vcmask 1043456  }
0x16cb   : > { %v8643_v61 = vadd.f32 %v8642_v18, %v8612_v54  ;;  %v8673_v50 = vsel %vm16132_vm9, %v8671_v53, 0.0 }
0x16cd   : > { %11515 = vmatmul.msk.f32.vlgmr.msra.gmra.mxu2 %vm3041_vm11, %v9065_v10  ;;  %v8674_v6 = vadd.f32 %v8673_v50, %v8643_v61 }
0x16ce   : > { %11524 = vmatpush.msk.msra.mxu2 %vm16121_vm12, %v14315_v24  ;;  %vm16134_vm12 = vmmov %vm16129_vm3 }
0x16cf   : > { %vm16141_vm3 = vmmov %vm16139_vm1 }
0x16d5   : > { %11517 = vmatmul.msk.f32.vlgmr.msrb.gmra.mxu2 %vm3041_vm11, %v15601_v4 }
0x16d6   : > { %11532 = vmatpush.msk.msrb.mxu2 %vm16122_vm13, %v14319_v25  ;;  %vm16135_vm13 = vmmov %vm16128_vm2 }
0x16d7   : > { %vm16140_vm2 = vmmov %vm16139_vm1 }
0x16dd   : > { %11525 = vmatmul.msk.f32.vlgmr.msra.gmra.mxu2 %vm3041_vm11, %v15607_v42 }
0x16de   : > { %11540 = vmatpush.msk.msra.mxu2 %vm16123_vm14, %v14311_v23  ;;  %vm16136_vm14 = vmmov %vm16130_vm4 }
0x16df   : > { %vm16142_vm4 = vmmov %vm16139_vm1 }
0x16e5   : > { %11533 = vmatmul.msk.f32.vlgmr.msrb.gmra.mxu2 %vm3041_vm11, %v15613_v41 }
0x16e6   : > { %11548 = vmatpush.msk.msrb.mxu2 %vm16124_vm15, %v14315_v24  ;;  %vm16137_vm15 = vmmov %vm16131_vm7 }
0x16e7   : > { %vm16143_vm7 = vmmov %vm16139_vm1 }
0x16ed   : > { %11541 = vmatmul.msk.f32.vlgmr.msra.gmra.mxu2 %vm3041_vm11, %v15619_v32 }
0x16ee   : > { %11556 = vmatpush.msk.msra.mxu2 %vm16126_vm0, %v14319_v25  ;;  %vm16138_vm0 = vmmov %vm16132_vm9 }
0x16ef   : > { %vm16144_vm9 = vmmov %vm16139_vm1 }
0x16f5   : > { %11549 = vmatmul.msk.f32.vlgmr.msrb.gmra.mxu2 %vm3041_vm11, %v15642_v20 }
0x16fd   : > { %11557 = vmatmul.msk.f32.vlgmr.msra.gmra.mxu2 %vm3041_vm11, %v15648_v39 }
0x1720   : > { %v8758_v51 = vpop.f32.mrf.mxu0 }
0x1721   : > { %8762 = vrot.lane.b32.xlu1 %v8758_v51, %s16109_s11  ;;  %s16158_s11 = smov 111  }
0x1725   : > { %v8696_v34 = vpop.f32.mrf.mxu2  ;;  %v8727_v57 = vpop.f32.mrf.mxu3 }
0x1726   : > { %8731 = vrot.lane.b32.xlu0 %v8727_v57, %s16108_s12  ;;  %8700 = vrot.lane.b32.xlu2 %v8696_v34, %s16107_s8  ;;  %v8789_v59 = vpop.f32.mrf.mxu1  ;;  %s16156_s8 = sld [smem:[#allocation108_spill]]  ;;  %s16157_s12 = smov 17  }
0x172b   : > { %v8877_v0 = vpop.f32.mrf.mxu0 }
0x172c   : > { %8881 = vrot.lane.b32.xlu1 %v8877_v0, %s16114_s5  ;;  %v9802_v30 = vld [vmem:[%s16156_s8] sm:$0xf]  ;;  %v11567_v26 = vld [vmem:[%s16156_s8 + $0x4] sm:$0xf]  ;;  %v11571_v19 = vld [vmem:[%s16156_s8 + $0x8] sm:$0xf] }
0x172d   : > { %v11575_v28 = vld [vmem:[%s16156_s8 + $0xc] sm:$0xf] }
0x172e   : > { %8793 = vrot.lane.b32.xlu2 %v8789_v59, %s13291_s6  ;;  %v8908_v21 = vpop.f32.mrf.mxu1 }
0x172f   : > { %v8820_v36 = vpop.f32.mrf.mxu2 }
0x1731   : > { %v8846_v58 = vpop.f32.mrf.mxu3 }
0x1732   : > { %8850 = vrot.lane.b32.xlu0 %v8846_v58, %s13292_s14 }
0x1734   : > { %8951 = vperm.xlu1 %11978, %v8948_v35  }
0x1736   : > { %8912 = vrot.lane.b32.xlu2 %v8908_v21, %s16111_s4  ;;  %s16159_s4 = smov 110  }
0x1738   : > { %v8939_v11 = vpop.f32.mrf.mxu2 }
0x173a   : > { %8943 = vrot.lane.b32.xlu0 %v8939_v11, %s16112_s23  ;;  %s16162_s23 = smov 109  }
0x1780   : > { %v8701_v55 = vpop.permute.xlu2 %8700 }
0x1781   : > { %v8703_v10 = vsel %vm16133_vm10, 0.0, %v8701_v55  ;;  %vm16145_vm10 = vmmov %vm16139_vm1 }
0x1782   : > { %v8704_v17 = vadd.f32 %v8703_v10, %v8674_v6 }
0x1788   : > { %v8794_v29 = vpop.permute.xlu2 %8793 }
0x1789   : > { %v8796_v38 = vsel %vm2399_vm5, 0.0, %v8794_v29 }
0x1790   : > { %v8913_v34 = vpop.permute.xlu2 %8912 }
0x1791   : > { %v8915_v59 = vsel %vm16137_vm15, %v8913_v34, 0.0  ;;  %vm16150_vm15 = vmmov %vm16139_vm1 }
0x1793   : > { %v8763_v56 = vpop.permute.xlu1 %8762 }
0x1794   : > { %v8765_v5 = vsel %vm16134_vm12, 0.0, %v8763_v56  ;;  %vm16146_vm12 = vmmov %vm16139_vm1 }
0x1798   : > { %v8732_v45 = vpop.permute.xlu0 %8731 }
0x1799   : > { %v8734_v12 = vsel %vm16135_vm13, 0.0, %v8732_v45  ;;  %vm16147_vm13 = vmmov %vm16139_vm1 }
0x179a   : > { %v8735_v40 = vadd.f32 %v8734_v12, %v8704_v17  ;;  %v11583_v17 = vld [vmem:[%s16156_s8 + $0x14] sm:$0xf] }
0x179c   : > { %v8766_v22 = vadd.f32 %v8765_v5, %v8735_v40  ;;  %v11587_v5 = vld [vmem:[%s16156_s8 + $0x18] sm:$0xf] }
0x179e   : > { %v8797_v1 = vadd.f32 %v8796_v38, %v8766_v22  ;;  %v8882_v62 = vpop.permute.xlu1 %8881  ;;  %v11591_v22 = vld [vmem:[%s16156_s8 + $0x1c] sm:$0xf] }
0x179f   : > { %v8884_v47 = vsel %vm16136_vm14, %v8882_v62, 0.0  ;;  %vm16149_vm14 = vmmov %vm16139_vm1 }
0x17a0   : > { %v8823_v15 = vadd.f32 %v8820_v36, %v8797_v1  ;;  %v11985_v36 = vld [vmem:[#allocation47] ss:$0 sm:$0xff] }
0x17a4   : > { %v8851_v49 = vpop.permute.xlu0 %8850 }
0x17a5   : > { %v8853_v52 = vsel %vm2575_vm6, %v8851_v49, 0.0 }
0x17a6   : > { %v8854_v51 = vadd.f32 %v8853_v52, %v8823_v15  ;;  %v8952_v11 = vpop.permute.xlu1 %8951  ;;  %v11595_v15 = vld [vmem:[%s16156_s8 + $0x20] sm:$0xf] }
0x17a8   : > { %v8885_v57 = vadd.f32 %v8884_v47, %v8854_v51 }
0x17aa   : > { %v8916_v0 = vadd.f32 %v8915_v59, %v8885_v57 }
0x17ac   : > { %v8944_v58 = vpop.permute.xlu0 %8943 }
0x17ad   : > { %v8946_v35 = vsel %vm16138_vm0, %v8944_v58, 0.0  ;;  %vm16151_vm0 = vmmov %vm16139_vm1 }
0x17ae   : > { %v8947_v21 = vadd.f32 %v8946_v35, %v8916_v0 }
0x17b0   : > { %v8954_v63 = vadd.f32 %v8952_v11, %v8947_v21 }
0x17b2   : > { %v8955_v48 = vmax.f32 %v8954_v63, 0.0 }
0x17b4   : > { %v8956_v3 = vmul.f32 %v11985_v36, %v8955_v48 }
0x17b6   : > { %9021 = vmatmul.f32.vlgmr.msra.gmra.mxu3 %v8956_v3  ;;  %9041 = vmatmul.f32.vlgmr.msra.gmra.mxu0 %v8956_v3 }
0x17b7   : > { %9061 = vmatmul.f32.vlgmr.msra.gmra.mxu1 %v8956_v3  ;;  %11526 = vmatpush.msk.msra.mxu3 %vm16139_vm1, %v14319_v25  ;;  %vm16152_vm1 = vmmov %vm16151_vm0 }
0x17b8   : > { %11528 = vmatpush.msk.msra.mxu0 %vm16140_vm2, %v14311_v23  ;;  %11530 = vmatpush.msk.msra.mxu1 %vm16141_vm3, %v14315_v24  ;;  %vm16153_vm2 = vmmov %vm16151_vm0 }
0x17b9   : > { %vm16154_vm3 = vmmov %vm16151_vm0 }
0x17be   : > { %11519 = vmatmul.msk.f32.vlgmr.msrb.gmra.mxu3 %vm3041_vm11, %v15601_v4  ;;  %11521 = vmatmul.msk.f32.vlgmr.msrb.gmra.mxu0 %vm3041_vm11, %v15601_v4  ;;  %v9092_v4 = vpop.f32.mrf.mxu2 }
0x17bf   : > { %11523 = vmatmul.msk.f32.vlgmr.msrb.gmra.mxu1 %vm3041_vm11, %v15607_v42  ;;  %11534 = vmatpush.msk.msrb.mxu3 %vm16142_vm4, %v14311_v23 }
0x17c0   : > { %11536 = vmatpush.msk.msrb.mxu0 %vm16143_vm7, %v14315_v24  ;;  %11538 = vmatpush.msk.msrb.mxu1 %vm16144_vm9, %v14319_v25  ;;  %vm16164_vm9 = vcmask 146432  }
0x17c1   : > { %9138 = vrot.lane.b32.xlu2 %v9092_v4, %s16148_s28 }
0x17c6   : > { %11527 = vmatmul.msk.f32.vlgmr.msra.gmra.mxu3 %vm3041_vm11, %v15607_v42  ;;  %11529 = vmatmul.msk.f32.vlgmr.msra.gmra.mxu0 %vm3041_vm11, %v15613_v41  ;;  %v9112_v42 = vpop.f32.mrf.mxu2 }
0x17c7   : > { %11531 = vmatmul.msk.f32.vlgmr.msra.gmra.mxu1 %vm3041_vm11, %v15613_v41  ;;  %11542 = vmatpush.msk.msra.mxu3 %vm16145_vm10, %v14315_v24  ;;  %vm16165_vm10 = vcmask 138240  }
0x17c8   : > { %11544 = vmatpush.msk.msra.mxu0 %vm16146_vm12, %v14319_v25  ;;  %11546 = vmatpush.msk.msra.mxu1 %vm16147_vm13, %v14311_v23  ;;  %vm16166_vm12 = vmmov %vm16165_vm10 }
0x17c9   : > { %9140 = vrot.lane.b32.xlu0 %v9112_v42, %s16148_s28  ;;  %vm16168_vm13 = vmmov %vm16164_vm9 }
0x17ce   : > { %11535 = vmatmul.msk.f32.vlgmr.msrb.gmra.mxu3 %vm3041_vm11, %v9403_v2  ;;  %11537 = vmatmul.msk.f32.vlgmr.msrb.gmra.mxu0 %vm3041_vm11, %v9403_v2  ;;  %v9132_v41 = vpop.f32.mrf.mxu2 }
0x17cf   : > { %11539 = vmatmul.msk.f32.vlgmr.msrb.gmra.mxu1 %vm3041_vm11, %v9403_v2  ;;  %11550 = vmatpush.msk.msrb.mxu3 %vm16149_vm14, %v14319_v25  ;;  %vm16169_vm14 = vmmov %vm16164_vm9 }
0x17d0   : > { %11552 = vmatpush.msk.msrb.mxu0 %vm16150_vm15, %v14311_v23  ;;  %11554 = vmatpush.msk.msrb.mxu1 %vm16151_vm0, %v14315_v24  ;;  %vm16170_vm15 = vmmov %vm16165_vm10 }
0x17d1   : > { %9142 = vrot.lane.b32.xlu1 %v9132_v41, %s16148_s28 }
0x17d6   : > { %11543 = vmatmul.msk.f32.vlgmr.msra.gmra.mxu3 %vm3041_vm11, %v15619_v32  ;;  %11545 = vmatmul.msk.f32.vlgmr.msra.gmra.mxu0 %vm3041_vm11, %v15619_v32  ;;  %v9175_v32 = vpop.f32.mrf.mxu2 }
0x17d7   : > { %11547 = vmatmul.msk.f32.vlgmr.msra.gmra.mxu1 %vm3041_vm11, %v15642_v20  ;;  %11558 = vmatpush.msk.msra.mxu3 %vm16152_vm1, %v14311_v23  ;;  %v9720_v23 = vld [vmem:[#allocation41 + $0x20] sm:$0xf] }
0x17d8   : > { %11560 = vmatpush.msk.msra.mxu0 %vm16153_vm2, %v14315_v24  ;;  %11562 = vmatpush.msk.msra.mxu1 %vm16154_vm3, %v14319_v25  ;;  %vm16173_vm2 = vcmask 900096  }
0x17d9   : > { %9221 = vrot.lane.b32.xlu2 %v9175_v32, %s16155_s9  ;;  %vm16174_vm3 = vmmov %vm16173_vm2 }
0x17de   : > { %11551 = vmatmul.msk.f32.vlgmr.msrb.gmra.mxu3 %vm3041_vm11, %v15642_v20  ;;  %11553 = vmatmul.msk.f32.vlgmr.msrb.gmra.mxu0 %vm3041_vm11, %v15648_v39  ;;  %v9278_v24 = vpop.f32.mrf.mxu2  ;;  %v11579_v20 = vld [vmem:[%s16156_s8 + $0x10] sm:$0xf] }
0x17df   : > { %11555 = vmatmul.msk.f32.vlgmr.msrb.gmra.mxu1 %vm3041_vm11, %v15648_v39  ;;  %9306 = vrot.lane.b32.xlu0 %v9278_v24, %s16157_s12 }
0x17e6   : > { %11561 = vmatmul.msk.f32.vlgmr.msra.gmra.mxu0 %vm3041_vm11, %v9720_v23  ;;  %11559 = vmatmul.msk.f32.vlgmr.msra.gmra.mxu3 %vm3041_vm11, %v9720_v23  ;;  %v9381_v25 = vpop.f32.mrf.mxu2 }
0x17e7   : > { %11563 = vmatmul.msk.f32.vlgmr.msra.gmra.mxu1 %vm3041_vm11, %v9720_v23  ;;  %9391 = vrot.lane.b32.xlu1 %v9381_v25, %s13291_s6  ;;  %vm16160_vm11 = vcmask 154624  }
0x17e8   : > { %vm16161_vm4 = vmmov %vm16160_vm11 }
0x17e9   : > { %vm16163_vm7 = vmmov %vm16161_vm4 }
0x17ee   : > { %v9492_v44 = vpop.f32.mrf.mxu2 }
0x17ef   : > { %9538 = vrot.lane.b32.xlu2 %v9492_v44, %s13292_s14 }
0x17f6   : > { %v9595_v27 = vpop.f32.mrf.mxu2 }
0x17f7   : > { %9623 = vrot.lane.b32.xlu0 %v9595_v27, %s16158_s11 }
0x17fe   : > { %v9698_v60 = vpop.f32.mrf.mxu2 }
0x17ff   : > { %9708 = vrot.lane.b32.xlu1 %v9698_v60, %s16159_s4 }
0x181b   : > { %v9139_v61 = vpop.permute.xlu2 %9138 }
0x181c   : > { %v9149_v34 = vsel %vm16163_vm7, 0.0, %v9139_v61  ;;  %vm16177_vm7 = vmmov %vm16173_vm2 }
0x1833   : > { %v15729_v33 = vpop.f32.mrf.mxu0  ;;  %v9222_v52 = vpop.permute.xlu2 %9221 }
0x1834   : > { %v15731_v43 = vpop.f32.mrf.mxu1  ;;  %9841 = vmatpush.msrb.mxu3 %v15729_v33  ;;  %v9232_v57 = vsel %vm16164_vm9, 0.0, %v9222_v52  ;;  %vm16178_vm9 = vcmask 154624  }
0x1835   : > { %9861 = vmatpush.msrb.mxu0 %v15731_v43  ;;  %11565 = vmatmul.msk.f32.vlgmr.msrb.gmra.mxu3 %vm3338_vm8, %v9802_v30  ;;  %v9233_v59 = vadd.f32 %v9232_v57, %v9149_v34 }
0x1836   : > { %11566 = vmatmul.msk.f32.vlgmr.msrb.gmra.mxu0 %vm3338_vm8, %v9802_v30  ;;  %9944 = vmatpush.msra.mxu3 %v15731_v43 }
0x1839   : > { %v15738_v7 = vpop.f32.mrf.mxu3 }
0x183a   : > { %9821 = vmatpush.msrb.mxu2 %v15738_v7  ;;  %9904 = vmatpush.msrb.mxu1 %v15738_v7 }
0x183b   : > { %9987 = vmatpush.msra.mxu0 %v15738_v7  ;;  %10070 = vmatpush.msrb.mxu3 %v15738_v7  ;;  %v9215_v8 = vpop.f32.mrf.mxu0  ;;  %v9141_v50 = vpop.permute.xlu0 %9140 }
0x183c   : > { %11564 = vmatmul.msk.f32.vlgmr.msrb.gmra.mxu2 %vm3338_vm8, %v9802_v30  ;;  %11568 = vmatmul.msk.f32.vlgmr.msrb.gmra.mxu1 %vm3338_vm8, %v11567_v26  ;;  %v9258_v37 = vpop.f32.mrf.mxu1  ;;  %v15782_v6 = vsel %vm16160_vm11, %v9139_v61, %v9141_v50  ;;  %vm16175_vm11 = vcmask 891904  }
0x183d   : > { %9924 = vmatpush.msra.mxu2 %v15729_v33  ;;  %10007 = vmatpush.msra.mxu1 %v15729_v33 }
0x183e   : > { %10090 = vmatpush.msrb.mxu0 %v15729_v33  ;;  %11570 = vmatmul.msk.f32.vlgmr.msra.gmra.mxu3 %vm3338_vm8, %v11567_v26 }
0x183f   : > { %10027 = vmatpush.msrb.mxu2 %v15731_v43  ;;  %10110 = vmatpush.msrb.mxu1 %v15731_v43 }
0x1840   : > { %11572 = vmatmul.msk.f32.vlgmr.msra.gmra.mxu0 %vm3338_vm8, %v11571_v19  ;;  %10173 = vmatpush.msra.mxu3 %v15729_v33 }
0x1841   : > { %10193 = vmatpush.msra.mxu0 %v15731_v43  ;;  %v9195_v31 = vpop.f32.mrf.mxu3  ;;  %9225 = vrot.lane.b32.xlu1 %v9215_v8, %s16155_s9 }
0x1842   : > { %9223 = vrot.lane.b32.xlu0 %v9195_v31, %s16155_s9  ;;  %9304 = vrot.lane.b32.xlu2 %v9258_v37, %s16157_s12 }
0x1843   : > { %v9341_v46 = vpop.f32.mrf.mxu0  ;;  %v9143_v10 = vpop.permute.xlu1 %9142 }
0x1844   : > { %11569 = vmatmul.msk.f32.vlgmr.msra.gmra.mxu2 %vm3338_vm8, %v11567_v26  ;;  %11573 = vmatmul.msk.f32.vlgmr.msra.gmra.mxu1 %vm3338_vm8, %v11571_v19  ;;  %v9361_v54 = vpop.f32.mrf.mxu1  ;;  %v15785_v29 = vsel %vm16161_vm4, %v9141_v50, %v9143_v10  ;;  %vm16176_vm4 = vmmov %vm16175_vm11 }
0x1845   : > { %10153 = vmatpush.msra.mxu2 %v15738_v7  ;;  %10221 = vmatpush.msra.mxu1 %v15738_v7 }
0x1846   : > { %11576 = vmatmul.msk.f32.vlgmr.msrb.gmra.mxu3 %vm3338_vm8, %v11575_v28 }
0x1847   : > { %10261 = vmatpush.msrb.mxu3 %v15731_v43 }
0x1848   : > { %11577 = vmatmul.msk.f32.vlgmr.msrb.gmra.mxu0 %vm3338_vm8, %v11575_v28 }
0x1849   : > { %10304 = vmatpush.msrb.mxu0 %v15738_v7  ;;  %v9298_v18 = vpop.f32.mrf.mxu3  ;;  %v9539_v51 = vpop.permute.xlu2 %9538 }
0x184a   : > { %9389 = vrot.lane.b32.xlu0 %v9361_v54, %s13291_s6  ;;  %9308 = vrot.lane.b32.xlu1 %v9298_v18, %s16157_s12 }
0x184b   : > { %v15771_v55 = vpop.f32.mrf.mxu0  ;;  %9387 = vrot.lane.b32.xlu2 %v9341_v46, %s13291_s6 }
0x184c   : > { %11574 = vmatmul.msk.f32.vlgmr.msrb.gmra.mxu2 %vm3338_vm8, %v11571_v19  ;;  %11578 = vmatmul.msk.f32.vlgmr.msrb.gmra.mxu1 %vm3338_vm8, %v11575_v28  ;;  %v15777_v53 = vpop.f32.mrf.mxu1 }
0x184d   : > { %10241 = vmatpush.msrb.mxu2 %v15729_v33  ;;  %10324 = vmatpush.msrb.mxu1 %v15729_v33 }
0x184e   : > { %11581 = vmatmul.msk.f32.vlgmr.msra.gmra.mxu3 %vm3338_vm8, %v11579_v20 }
0x184f   : > { %10387 = vmatpush.msra.mxu3 %v15738_v7 }
0x1850   : > { %11582 = vmatmul.msk.f32.vlgmr.msra.gmra.mxu0 %vm3338_vm8, %v11579_v20 }
0x1851   : > { %10407 = vmatpush.msra.mxu0 %v15729_v33  ;;  %v15791_v39 = vpop.f32.mrf.mxu3  ;;  %v9307_v0 = vpop.permute.xlu0 %9306 }
0x1853   : > { %v9532_v56 = vpop.f32.mrf.mxu0 }
0x1854   : > { %11580 = vmatmul.msk.f32.vlgmr.msra.gmra.mxu2 %vm3338_vm8, %v11579_v20  ;;  %11584 = vmatmul.msk.f32.vlgmr.msra.gmra.mxu1 %vm3338_vm8, %v11583_v17  ;;  %v9575_v45 = vpop.f32.mrf.mxu1 }
0x1855   : > { %10344 = vmatpush.msra.mxu2 %v15731_v43  ;;  %10427 = vmatpush.msra.mxu1 %v15731_v43 }
0x1856   : > { %9542 = vrot.lane.b32.xlu1 %v9532_v56, %s13292_s14  ;;  %9621 = vrot.lane.b32.xlu2 %v9575_v45, %s16158_s11 }
0x1857   : > { %11586 = vmatmul.msk.f32.vlgmr.msrb.gmra.mxu3 %vm3338_vm8, %v11583_v17 }
0x1858   : > { %11588 = vmatmul.msk.f32.vlgmr.msrb.gmra.mxu0 %vm3338_vm8, %v11587_v5  ;;  %10490 = vmatpush.msrb.mxu3 %v15729_v33 }
0x1859   : > { %10510 = vmatpush.msrb.mxu0 %v15731_v43  ;;  %v9512_v12 = vpop.f32.mrf.mxu3  ;;  %v9392_v63 = vpop.permute.xlu1 %9391 }
0x185a   : > { %9540 = vrot.lane.b32.xlu0 %v9512_v12, %s13292_s14 }
0x185b   : > { %v9658_v40 = vpop.f32.mrf.mxu0 }
0x185c   : > { %11585 = vmatmul.msk.f32.vlgmr.msrb.gmra.mxu2 %vm3338_vm8, %v11583_v17  ;;  %11589 = vmatmul.msk.f32.vlgmr.msrb.gmra.mxu1 %vm3338_vm8, %v11587_v5  ;;  %v9678_v38 = vpop.f32.mrf.mxu1 }
0x185d   : > { %10470 = vmatpush.msrb.mxu2 %v15738_v7 }
0x185e   : > { %9704 = vrot.lane.b32.xlu2 %v9658_v40, %s16159_s4 }
0x185f   : > { %11592 = vmatmul.msk.f32.vlgmr.msra.gmra.mxu3 %vm3338_vm8, %v11591_v22 }
0x1860   : > { %11593 = vmatmul.msk.f32.vlgmr.msra.gmra.mxu0 %vm3338_vm8, %v11591_v22 }
0x1861   : > { %v9615_v1 = vpop.f32.mrf.mxu3 }
0x1862   : > { %9706 = vrot.lane.b32.xlu0 %v9678_v38, %s16159_s4  ;;  %9625 = vrot.lane.b32.xlu1 %v9615_v1, %s16158_s11 }
0x1863   : > { %v9761_v62 = vpop.f32.mrf.mxu0 }
0x1864   : > { %11594 = vmatmul.msk.f32.vlgmr.msra.gmra.mxu1 %vm3338_vm8, %v11591_v22  ;;  %11590 = vmatmul.msk.f32.vlgmr.msra.gmra.mxu2 %vm3338_vm8, %v11587_v5  ;;  %v9781_v49 = vpop.f32.mrf.mxu1 }
0x1867   : > { %11597 = vmatmul.msk.f32.vlgmr.msrb.gmra.mxu3 %vm3338_vm8, %v11595_v15 }
0x1868   : > { %11598 = vmatmul.msk.f32.vlgmr.msrb.gmra.mxu0 %vm3338_vm8, %v11595_v15 }
0x1869   : > { %v9741_v47 = vpop.f32.mrf.mxu3  ;;  %v9624_v2 = vpop.permute.xlu0 %9623 }
0x186a   : > { %9789 = vrot.lane.b32.xlu0 %v9761_v62, %s16162_s23  ;;  %9791 = vrot.lane.b32.xlu1 %v9781_v49, %s16162_s23 }
0x186b   : > { %9787 = vrot.lane.b32.xlu2 %v9741_v47, %s16162_s23 }
0x186c   : > { %11596 = vmatmul.msk.f32.vlgmr.msrb.gmra.mxu2 %vm3338_vm8, %v11595_v15  ;;  %vm16167_vm8 = vcmask 908288  }
0x186d   : > { %vm16171_vm0 = vmmov %vm16167_vm8 }
0x186e   : > { %vm16172_vm1 = vmmov %vm16171_vm0 }
0x1871   : > { %v15829_v4 = vpop.permute.xlu1 %9708 }
0x189c   : > { %v9305_v58 = vpop.permute.xlu2 %9304 }
0x189d   : > { %v9310_v35 = vsel %vm16165_vm10, %v9305_v58, %v9307_v0  ;;  %v9315_v21 = vsel %vm16166_vm12, 0.0, %v9305_v58  ;;  %vm16179_vm10 = vmmov %vm16178_vm9 }
0x189e   : > { %v9316_v11 = vadd.f32 %v9315_v21, %v9233_v59  ;;  %vm16180_vm12 = vmmov %vm16176_vm4 }
0x18a5   : > { %v9388_v48 = vpop.permute.xlu2 %9387 }
0x18a6   : > { %v9398_v36 = vsel %vm2399_vm5, 0.0, %v9388_v48 }
0x18a7   : > { %v9399_v3 = vadd.f32 %v9398_v36, %v9316_v11 }
0x18a9   : > { %v9467_v45 = vadd.f32 %v15791_v39, %v9399_v3  ;;  %v10533_v3 = vld [vmem:[#allocation43] sm:$0xf] }
0x18b0   : > { %v9622_v42 = vpop.permute.xlu2 %9621 }
0x18b1   : > { %v9627_v41 = vsel %vm16167_vm8, %v9622_v42, %v9624_v2  ;;  %v10578_v42 = vld [vmem:[#allocation2] sm:$0x1]  ;;  %vm16181_vm8 = vmmov %vm16168_vm13 }
0x18b3   : > { %v9226_v32 = vpop.permute.xlu1 %9225  ;;  %v9863_v23 = vpop.f32.mrf.mxu0 }
0x18b4   : > { %v9224_v24 = vpop.permute.xlu0 %9223  ;;  %9873 = vrot.lane.b32.xlu1 %v9863_v23, %s16148_s28 }
0x18b5   : > { %v9227_v25 = vsel %vm16168_vm13, %v9222_v52, %v9224_v24  ;;  %v9228_v44 = vsel %vm16169_vm14, %v9224_v24, %v9226_v32  ;;  %vm16182_vm13 = vmmov %vm16181_vm8 }
0x18b6   : > { %v9234_v27 = vadd.f32 %v9227_v25, %v15782_v6  ;;  %v9235_v60 = vadd.f32 %v9228_v44, %v15785_v29  ;;  %vm16183_vm14 = vmmov %vm16178_vm9 }
0x18b8   : > { %v9843_v30 = vpop.f32.mrf.mxu3  ;;  %v9317_v33 = vadd.f32 %v9310_v35, %v9234_v27 }
0x18b9   : > { %v9906_v43 = vpop.f32.mrf.mxu1  ;;  %9871 = vrot.lane.b32.xlu0 %v9843_v30, %s16148_s28 }
0x18ba   : > { %9952 = vrot.lane.b32.xlu2 %v9906_v43, %s16155_s9 }
0x18bc   : > { %v9390_v7 = vpop.permute.xlu0 %9389  ;;  %v9309_v26 = vpop.permute.xlu1 %9308 }
0x18bd   : > { %v9393_v8 = vsel %vm2399_vm5, %v9388_v48, %v9390_v7  ;;  %v9394_v37 = vsel %vm2399_vm5, %v9390_v7, %v9392_v63  ;;  %v9311_v19 = vsel %vm16170_vm15, %v9307_v0, %v9309_v26  ;;  %v9989_v31 = vpop.f32.mrf.mxu0 }
0x18be   : > { %v9400_v46 = vadd.f32 %v9393_v8, %v9317_v33  ;;  %v9318_v28 = vadd.f32 %v9311_v19, %v9235_v60 }
0x18bf   : > { %v9823_v54 = vpop.f32.mrf.mxu2 }
0x18c0   : > { %v15842_v18 = vadd.f32 %v9394_v37, %v9318_v28  ;;  %v9468_v62 = vadd.f32 %v15771_v55, %v9400_v46 }
0x18c1   : > { %v10009_v20 = vpop.f32.mrf.mxu1  ;;  %v9946_v61 = vpop.f32.mrf.mxu3 }
0x18c2   : > { %10035 = vrot.lane.b32.xlu2 %v9989_v31, %s16157_s12  ;;  %10037 = vrot.lane.b32.xlu0 %v10009_v20, %s16157_s12  ;;  %v9469_v46 = vadd.f32 %v15777_v53, %v15842_v18 }
0x18c3   : > { %9956 = vrot.lane.b32.xlu1 %v9946_v61, %s16155_s9 }
0x18c5   : > { %v10092_v50 = vpop.f32.mrf.mxu0 }
0x18c7   : > { %v9926_v10 = vpop.f32.mrf.mxu2 }
0x18c8   : > { %v15850_v17 = vpop.permute.xlu1 %9542 }
0x18c9   : > { %v10112_v6 = vpop.f32.mrf.mxu1  ;;  %v10072_v29 = vpop.f32.mrf.mxu3  ;;  %v9549_v19 = vsel %vm2575_vm6, %v15850_v17, 0.0 }
0x18ca   : > { %9869 = vrot.lane.b32.xlu2 %v9823_v54, %s16148_s28  ;;  %10120 = vrot.lane.b32.xlu0 %v10092_v50, %s13291_s6  ;;  %v9552_v54 = vadd.f32 %v9549_v19, %v9469_v46 }
0x18cb   : > { %10122 = vrot.lane.b32.xlu1 %v10112_v6, %s13291_s6 }
0x18cc   : > { %v9541_v56 = vpop.permute.xlu0 %9540 }
0x18cd   : > { %v9544_v5 = vsel %vm2575_vm6, %v9539_v51, %v9541_v56  ;;  %v15854_v12 = vpop.f32.mrf.mxu0  ;;  %v9545_v1 = vsel %vm2575_vm6, %v9541_v56, %v15850_v17 }
0x18ce   : > { %v9550_v40 = vadd.f32 %v9544_v5, %v9467_v45  ;;  %v9551_v39 = vadd.f32 %v9545_v1, %v9468_v62 }
0x18cf   : > { %v10029_v38 = vpop.f32.mrf.mxu2 }
0x18d0   : > { %v15856_v22 = vadd.f32 %v9627_v41, %v9550_v40  ;;  %v9705_v41 = vpop.permute.xlu2 %9704 }
0x18d1   : > { %v10223_v15 = vpop.f32.mrf.mxu1  ;;  %v15861_v49 = vpop.f32.mrf.mxu3 }
0x18d2   : > { %9954 = vrot.lane.b32.xlu0 %v9926_v10, %s16155_s9  ;;  %10118 = vrot.lane.b32.xlu2 %v10072_v29, %s13291_s6  ;;  %v9715_v10 = vsel %vm16173_vm2, %v15829_v4, 0.0  ;;  %s11602_s6 = smul.u32 3, %s16200_s22 }
0x18d3   : > { %10039 = vrot.lane.b32.xlu1 %v10029_v38, %s16157_s12 }
0x18d4   : > { %v9626_v47 = vpop.permute.xlu1 %9625  ;;  %v9707_v24 = vpop.permute.xlu0 %9706 }
0x18d5   : > { %v9628_v52 = vsel %vm16171_vm0, %v9624_v2, %v9626_v47  ;;  %v10306_v51 = vpop.f32.mrf.mxu0  ;;  %v10548_v2 = vld [vmem:[#allocation44] sm:$0xf]  ;;  %v9632_v28 = vsel %vm16172_vm1, %v9626_v47, 0.0  ;;  %v9711_v6 = vsel %vm16174_vm3, %v9707_v24, %v15829_v4  ;;  %v9710_v53 = vsel %vm16177_vm7, %v9705_v41, %v9707_v24  ;;  %vm16184_vm0 = vmmov %vm16170_vm15 }
0x18d6   : > { %v9634_v34 = vadd.f32 %v9628_v52, %v9551_v39  ;;  %v9635_v61 = vadd.f32 %v9632_v28, %v9552_v54  ;;  %v9716_v39 = vadd.f32 %v9710_v53, %v15856_v22  ;;  %vm16185_vm1 = vmmov %vm16181_vm8  ;;  %vm16187_vm3 = vcmask 908288  }
0x18d7   : > { %v15867_v57 = vpop.f32.mrf.mxu2  ;;  %vm16186_vm2 = vmmov %vm16184_vm0 }
0x18d8   : > { %v9788_v32 = vpop.permute.xlu2 %9787  ;;  %v9717_v56 = vadd.f32 %v9711_v6, %v9634_v34  ;;  %v9718_v45 = vadd.f32 %v9715_v10, %v9635_v61 }
0x18d9   : > { %v10326_v59 = vpop.f32.mrf.mxu1 }
0x18da   : > { %v10263_v0 = vpop.f32.mrf.mxu3  ;;  %10354 = vrot.lane.b32.xlu2 %v10326_v59, %s16158_s11 }
0x18db   : > { %10269 = vrot.lane.b32.xlu1 %v10223_v15, %s13292_s14  ;;  %10273 = vrot.lane.b32.xlu0 %v10263_v0, %s13292_s14 }
0x18dc   : > { %v9790_v44 = vpop.permute.xlu0 %9789  ;;  %v9792_v27 = vpop.permute.xlu1 %9791 }
0x18dd   : > { %v10409_v58 = vpop.f32.mrf.mxu0  ;;  %v9794_v29 = vsel %vm16175_vm11, %v9790_v44, %v9792_v27  ;;  %v9798_v17 = vsel %vm16176_vm4, %v9792_v27, 0.0  ;;  %v9793_v15 = vsel %vm16180_vm12, %v9788_v32, %v9790_v44  ;;  %vm16188_vm11 = vmmov %vm16187_vm3 }
0x18de   : > { %v9800_v38 = vadd.f32 %v9794_v29, %v9717_v56  ;;  %v9801_v1 = vadd.f32 %v9798_v17, %v9718_v45  ;;  %v9799_v0 = vadd.f32 %v9793_v15, %v9716_v39  ;;  %vm16190_vm4 = vmmov %vm16177_vm7 }
0x18df   : > { %v10243_v55 = vpop.f32.mrf.mxu2  ;;  %vm16192_vm7 = vmmov %vm16190_vm4 }
0x18e1   : > { %v10429_v35 = vpop.f32.mrf.mxu1 }
0x18e2   : > { %10437 = vrot.lane.b32.xlu2 %v10409_v58, %s16159_s4  ;;  %v10389_v21 = vpop.f32.mrf.mxu3 }
0x18e3   : > { %10352 = vrot.lane.b32.xlu1 %v10306_v51, %s16158_s11  ;;  %10439 = vrot.lane.b32.xlu0 %v10429_v35, %s16159_s4 }
0x18e5   : > { %v10512_v36 = vpop.f32.mrf.mxu0 }
0x18e7   : > { %v10346_v11 = vpop.f32.mrf.mxu2 }
0x18ea   : > { %10271 = vrot.lane.b32.xlu2 %v10243_v55, %s13292_s14  ;;  %v10492_v63 = vpop.f32.mrf.mxu3  ;;  %s2019_s14 = scalar_lea.vmem %s13549_s15, %s11602_s6 }
0x18eb   : > { %10356 = vrot.lane.b32.xlu0 %v10346_v11, %s16158_s11  ;;  %10435 = vrot.lane.b32.xlu1 %v10389_v21, %s16159_s4 }
0x18ef   : > { %v10472_v48 = vpop.f32.mrf.mxu2 }
0x18f2   : > { %10520 = vrot.lane.b32.xlu2 %v10492_v63, %s16162_s23 }
0x18f3   : > { %10522 = vrot.lane.b32.xlu0 %v10512_v36, %s16162_s23  ;;  %10518 = vrot.lane.b32.xlu1 %v10472_v48, %s16162_s23 }
0x18fa   : > { %10536 = vperm.xlu2 %11977, %v10533_v3  }
0x18fb   : > { %10551 = vperm.xlu0 %11966, %v10548_v2   ;;  %10581 = vperm.xlu1 %11978, %v10578_v42  }
0x1914   : > { %v9953_v23 = vpop.permute.xlu2 %9952 }
0x1915   : > { %v9963_v36 = vsel %vm16185_vm1, 0.0, %v9953_v23 }
0x191c   : > { %v10036_v25 = vpop.permute.xlu2 %10035 }
0x191d   : > { %v10046_v27 = vsel %vm16186_vm2, 0.0, %v10036_v25 }
0x1924   : > { %v9870_v33 = vpop.permute.xlu2 %9869 }
0x1925   : > { %v9880_v59 = vsel %vm16183_vm14, 0.0, %v9870_v33 }
0x1926   : > { %v9874_v60 = vpop.permute.xlu1 %9873  ;;  %v9881_v35 = vadd.f32 %v9880_v59, %v9799_v0 }
0x1928   : > { %v9964_v22 = vadd.f32 %v9963_v36, %v9881_v35 }
0x192b   : > { %v9872_v30 = vpop.permute.xlu0 %9871 }
0x192c   : > { %v10119_v26 = vpop.permute.xlu2 %10118  ;;  %v9875_v18 = vsel %vm16178_vm9, %v9870_v33, %v9872_v30  ;;  %v9876_v5 = vsel %vm16179_vm10, %v9872_v30, %v9874_v60  ;;  %v10047_v30 = vadd.f32 %v10046_v27, %v9964_v22  ;;  %vm16193_vm9 = vmmov %vm16180_vm12 }
0x192d   : > { %v9882_v47 = vadd.f32 %v9875_v18, %v9800_v38  ;;  %v9883_v52 = vadd.f32 %v9876_v5, %v9801_v1  ;;  %v10129_v60 = vsel %vm2399_vm5, 0.0, %v10119_v26  ;;  %vm16194_vm10 = vmmov %vm16193_vm9 }
0x192e   : > { %v10130_v33 = vadd.f32 %v10129_v60, %v10047_v30  ;;  %vm16195_vm12 = vmmov %vm16193_vm9 }
0x1930   : > { %v10198_v54 = vadd.f32 %v15867_v57, %v10130_v33 }
0x1934   : > { %v10038_v43 = vpop.permute.xlu0 %10037  ;;  %v15883_v31 = vpop.permute.xlu2 %10354 }
0x1935   : > { %v9957_v7 = vpop.permute.xlu1 %9956  ;;  %v10041_v21 = vsel %vm16170_vm15, %v10036_v25, %v10038_v43  ;;  %vm10593_vm15 = vcmask 1040384  }
0x193c   : > { %v10121_v8 = vpop.permute.xlu0 %10120  ;;  %v10438_v40 = vpop.permute.xlu2 %10437 }
0x193d   : > { %v10123_v37 = vpop.permute.xlu1 %10122  ;;  %v10124_v41 = vsel %vm2399_vm5, %v10119_v26, %v10121_v8 }
0x193e   : > { %v10125_v32 = vsel %vm2399_vm5, %v10121_v8, %v10123_v37  ;;  %vm16189_vm5 = vmmov %vm16187_vm3 }
0x1944   : > { %v9955_v20 = vpop.permute.xlu0 %9954  ;;  %v10272_v3 = vpop.permute.xlu2 %10271 }
0x1945   : > { %v10040_v50 = vpop.permute.xlu1 %10039  ;;  %v9958_v62 = vsel %vm16181_vm8, %v9953_v23, %v9955_v20  ;;  %v9959_v4 = vsel %vm16182_vm13, %v9955_v20, %v9957_v7  ;;  %vm16196_vm8 = vcmask 1043456  }
0x1946   : > { %v9965_v55 = vadd.f32 %v9958_v62, %v9882_v47  ;;  %v9966_v58 = vadd.f32 %v9959_v4, %v9883_v52  ;;  %v10042_v11 = vsel %vm16184_vm0, %v10038_v43, %v10040_v50  ;;  %vm16197_vm13 = vmmov %vm16196_vm8  ;;  %vm10595_vm0 = vcmask 1041408  }
0x1947   : > { %vm16198_vm14 = vmmov %vm16196_vm8 }
0x1948   : > { %v10048_v63 = vadd.f32 %v10041_v21, %v9965_v55  ;;  %v10049_v48 = vadd.f32 %v10042_v11, %v9966_v58 }
0x194a   : > { %v10132_v24 = vadd.f32 %v10125_v32, %v10049_v48  ;;  %v10131_v44 = vadd.f32 %v10124_v41, %v10048_v63 }
0x194c   : > { %v10200_v43 = vadd.f32 %v15854_v12, %v10132_v24  ;;  %v10199_v23 = vadd.f32 %v15861_v49, %v10131_v44  ;;  %v10521_v37 = vpop.permute.xlu2 %10520 }
0x194d   : > { %v10270_v51 = vpop.permute.xlu1 %10269  ;;  %v10274_v34 = vpop.permute.xlu0 %10273 }
0x194e   : > { %v10276_v7 = vsel %vm2575_vm6, %v10272_v3, %v10274_v34  ;;  %v10280_v19 = vsel %vm2575_vm6, %v10274_v34, 0.0  ;;  %v10275_v8 = vsel %vm2575_vm6, %v10270_v51, %v10272_v3  ;;  %vm16191_vm6 = vmmov %vm16190_vm4 }
0x194f   : > { %v10282_v20 = vadd.f32 %v10276_v7, %v10199_v23  ;;  %v10283_v12 = vadd.f32 %v10280_v19, %v10200_v43  ;;  %v10281_v61 = vadd.f32 %v10275_v8, %v10198_v54 }
0x1954   : > { %v10537_v39 = vpop.permute.xlu2 %10536 }
0x1955   : > { %v10353_v2 = vpop.permute.xlu1 %10352  ;;  %v10440_v42 = vpop.permute.xlu0 %10439 }
0x1956   : > { %v10358_v49 = vsel %vm16189_vm5, %v10353_v2, %v15883_v31  ;;  %v10442_v17 = vsel %vm16191_vm6, %v10438_v40, %v10440_v42  ;;  %v10446_v56 = vsel %vm16192_vm7, %v10440_v42, 0.0 }
0x1957   : > { %v10364_v29 = vadd.f32 %v10358_v49, %v10281_v61 }
0x195d   : > { %v10357_v46 = vpop.permute.xlu0 %10356  ;;  %v10436_v28 = vpop.permute.xlu1 %10435 }
0x195e   : > { %v10359_v25 = vsel %vm16187_vm3, %v15883_v31, %v10357_v46  ;;  %v10363_v26 = vsel %vm16188_vm11, %v10357_v46, 0.0  ;;  %v10441_v6 = vsel %vm16190_vm4, %v10436_v28, %v10438_v40  ;;  %v10598_v28 = vlaneseq }
0x195f   : > { %v10365_v50 = vadd.f32 %v10359_v25, %v10282_v20  ;;  %v10366_v10 = vadd.f32 %v10363_v26, %v10283_v12  ;;  %v10447_v45 = vadd.f32 %v10441_v6, %v10364_v29 }
0x1960   : > { %vm10600_vm1 = vcmp.lt.s32.totalorder %v10598_v28, 384 }
0x1961   : > { %v10449_v53 = vadd.f32 %v10446_v56, %v10366_v10  ;;  %v10448_v5 = vadd.f32 %v10442_v17, %v10365_v50 }
0x1965   : > { %v10523_v18 = vpop.permute.xlu0 %10522  ;;  %v10519_v57 = vpop.permute.xlu1 %10518 }
0x1966   : > { %v10525_v38 = vsel %vm16193_vm9, %v10521_v37, %v10523_v18  ;;  %v10529_v1 = vsel %vm16194_vm10, %v10523_v18, 0.0  ;;  %v10524_v31 = vsel %vm16195_vm12, %v10519_v57, %v10521_v37 }
0x1967   : > { %v10531_v15 = vadd.f32 %v10525_v38, %v10448_v5  ;;  %v10532_v62 = vadd.f32 %v10529_v1, %v10449_v53  ;;  %v10530_v4 = vadd.f32 %v10524_v31, %v10447_v45 }
0x1969   : > { %v10540_v47 = vadd.f32 %v10537_v39, %v10531_v15  ;;  %v10541_v52 = vadd.f32 %v10537_v39, %v10532_v62  ;;  %v10539_v40 = vadd.f32 %v10537_v39, %v10530_v4 }
0x196b   : > { %v10543_v51 = vmax.f32 %v10540_v47, 0.0  ;;  %v10544_v34 = vmax.f32 %v10541_v52, 0.0  ;;  %v10542_v59 = vmax.f32 %v10539_v40, 0.0 }
0x196d   : > { %v10552_v0 = vpop.permute.xlu0 %10551  ;;  %v10545_v55 = vmul.f32 %v10542_v59, %v2887_v13  ;;  %v10546_v58 = vmul.f32 %v10543_v51, %v2888_v14  ;;  %v10547_v35 = vmul.f32 %v10544_v34, %v2889_v16  ;;  %v10582_v60 = vpop.permute.xlu1 %10581 }
0x196e   : > { %v10584_v46 = vperm.slane %v10582_v60, 0 }
0x196f   : > { %v10554_v21 = vmul.f32 %v10552_v0, %v10545_v55  ;;  %v10555_v11 = vmul.f32 %v10552_v0, %v10546_v58  ;;  %v10556_v63 = vmul.f32 %v10552_v0, %v10547_v35 }
0x1971   : > { %v10557_v48 = vsel %vm16196_vm8, %v10554_v21, 0.0  ;;  %v10564_v36 = vsel %vm16197_vm13, %v10555_v11, 0.0  ;;  %v10571_v3 = vsel %vm16198_vm14, %v10556_v63, 0.0 }
0x1972   : > { %v10558_v22 = vrot.slane %v10557_v48, 4  ;;  %v10565_v2 = vrot.slane %v10564_v36, 4  ;;  %v10572_v42 = vrot.slane %v10571_v3, 4 }
0x1974   : > { %v10559_v41 = vadd.f32 %v10558_v22, %v10557_v48  ;;  %v10566_v13 = vadd.f32 %v10565_v2, %v10564_v36  ;;  %v10573_v32 = vadd.f32 %v10572_v42, %v10571_v3 }
0x1976   : > { %v10560_v14 = vrot.slane %v10559_v41, 2  ;;  %v10567_v24 = vrot.slane %v10566_v13, 2  ;;  %v10574_v9 = vrot.slane %v10573_v32, 2 }
0x1978   : > { %v10561_v16 = vadd.f32 %v10560_v14, %v10559_v41  ;;  %v10568_v44 = vadd.f32 %v10567_v24, %v10566_v13  ;;  %v10575_v27 = vadd.f32 %v10574_v9, %v10573_v32 }
0x197a   : > { %v10562_v30 = vrot.slane %v10561_v16, 1  ;;  %v10569_v33 = vrot.slane %v10568_v44, 1  ;;  %v10576_v43 = vrot.slane %v10575_v27, 1 }
0x197c   : > { %v10563_v23 = vadd.f32 %v10562_v30, %v10561_v16  ;;  %v10570_v7 = vadd.f32 %v10569_v33, %v10568_v44  ;;  %v10577_v19 = vadd.f32 %v10576_v43, %v10575_v27 }
0x197e   : > { %v10586_v8 = vadd.f32 %v10584_v46, %v10570_v7  ;;  %v10587_v37 = vadd.f32 %v10584_v46, %v10577_v19  ;;  %v10585_v25 = vadd.f32 %v10584_v46, %v10563_v23 }
0x1980   : > { %v10591_v26 = vrot.slane %v10586_v8, 7  ;;  %v10592_v54 = vrot.slane %v10587_v37, 6 }
0x1982   : > { %v10594_v20 = vsel %vm10593_vm15, %v10585_v25, %v10591_v26 }
0x1983   : > { %v10596_v12 = vsel %vm10595_vm0, %v10594_v20, %v10592_v54 }
0x1984   : > { %10602 = vst.msk [vmem:[%s2019_s14] sm:$0x7] %vm10600_vm1, %v10596_v12 }
0x1985 PF: > { %s126_s0 = sadd.s32 1, %s13196_s0  }
0x1986   : > { %p123_p3 = scmp.ge.s32.totalorder %s126_s0, 4  }
0x1988   :  { %125 = sbr.rel (!%p123_p3) target bundleno = 104 (0x68), region = 572 }
0x198d   :  { %10622 = vsyncpa [#allocation4], 1 }
0x198e   :  { %10624 = vsyncpa [#allocation4 + $0x1], 1 }
0x198f   :  { %10625 = vsyncpa [#allocation6], 1 }
0x1990   :  { %10626 = vsyncpa [#allocation9], 1 }
0x1991   :  { %10627 = vsyncpa [#allocation12], 1 }
0x1992   :  { %10628 = vsyncpa [#allocation15], 1 }
0x1993   :  { %10629 = vsyncpa [#allocation18], 1 }
0x1994   :  { %10630 = vsyncpa [#allocation21], 1 }
0x1995   :  { %10631 = vsyncpa [#allocation24], 1 }
0x1996   :  { %10632 = vsyncpa [#allocation27], 1 }
0x1997   :  { %10633 = vsyncpa [#allocation30], 1 }
0x1998   :  { %10634 = vsyncpa [#allocation33], 1 }
0x1999   :  { %10635 = vsyncpa [#allocation36], 1 }
0x199a   :  { %10636 = vsyncpa [#allocation39], 1 }
0x199b   :  { %10637 = vsyncpa [#allocation42], 1 }
0x199c   :  { %10638 = vsyncpa [#allocation45], 1 }
0x199d   :  { %10639 = vsyncpa [#allocation48], 1 }
0x199e   :  { %10640 = vsyncpa [#allocation51], 1 }
0x199f   :  { %10641 = vsyncpa [#allocation54], 1 }
0x19a0   :  { %10642 = vsyncpa [#allocation57], 1 }
0x19a1   :  { %10643 = vsyncpa [#allocation60], 1 }
0x19a2   :  { %10644 = vsyncpa [#allocation63], 1 }

</bundles_post_ra>
